<compile_context>
chip_gen: v7x
topology: tpu7x:2x2x1
jax: 0.10.0
libtpu: 0.0.40
codegen_flags: <defaults>
</compile_context>

<pallas_src>
import re

import jax
import jax.numpy as jnp
from jax.experimental import pallas as pl
from jax.experimental.pallas import tpu as pltpu

# ---------------------------------------------------------------------------
# Host-side glue: tokenizer + vocab (mirrors word_tokenize2 / get_tokenizer).
# TODO(synk): string tokenization & vocab lookup have no Pallas equivalent;
#             they stay on the host and only integer indices enter the kernel.
# ---------------------------------------------------------------------------
TOKENIZER2 = re.compile(
    "[A-Z]{2,}(?![a-z])|[A-Z][a-z]+(?=[A-Z])|[\\'\\w]+",
    re.UNICODE | re.MULTILINE | re.DOTALL,
)


def word_tokenize2(text):
    return [s.lower() for s in TOKENIZER2.findall(text)]


PAD, EOS, UNK = "<pad>", "<eos>", "<unk>"


def build_vocab(utterances):
    vocab = {PAD: 0, EOS: 1, UNK: 2}
    for utt in utterances:
        for tok in utt:
            if tok not in vocab:
                vocab[tok] = len(vocab)
    return vocab


def to_indices(utterances, vocab, max_words):
    """Truncate to max_words, append EOS, pad to T = max_words + 1."""
    T = max_words + 1
    ids, mask = [], []
    for utt in utterances:
        toks = utt[:max_words] + [EOS]
        row = [vocab.get(t, vocab[UNK]) for t in toks]
        m = [1.0] * len(row)
        row += [vocab[PAD]] * (T - len(row))
        m += [0.0] * (T - len(m))
        ids.append(row)
        mask.append(m)
    return (
        jnp.asarray(ids, dtype=jnp.int32),
        jnp.asarray(mask, dtype=jnp.float32),
    )


# ---------------------------------------------------------------------------
# Pallas kernel: per batch tile, DMA-gather the tb*T embedding rows addressed
# by SMEM-resident token ids, then compute the mask-weighted mean on the VPU.
# ---------------------------------------------------------------------------
def _gather_avg_kernel(ids_ref, mask_ref, emb_hbm, out_ref, rows_ref, sem_ref):
    """One grid step handles one tb-row batch tile.

    ids_ref : SMEM (B_pad, T) int32   -- scalar-prefetched token ids
    mask_ref: VMEM (tb, T)   float32  -- validity mask for this tile
    emb_hbm : ANY/HBM (V, D)          -- embedding table, never tiled into VMEM
    out_ref : VMEM (tb, D)   float32
    rows_ref: VMEM (T, tb, D) scratch -- gathered embedding rows
    sem_ref : DMA semaphores (T, tb)
    """
    i = pl.program_id(0)
    T, tb, D = rows_ref.shape

    # Issue every row-gather DMA for this tile before any wait, so the tb*T
    # small (D,) copies are all in flight together.  All SMEM scalar reads
    # happen before the first .wait().
    # TODO(synk): for large T, replace the trace-time unroll with
    #             lax.fori_loop and double-buffer rows across grid steps.
    for t in range(T):
        for r in range(tb):
            row = ids_ref[i * tb + r, t]
            pltpu.make_async_copy(
                emb_hbm.at[row], rows_ref.at[t, r], sem_ref.at[t, r]
            ).start()

    for t in range(T):
        for r in range(tb):
            pltpu.make_async_copy(
                emb_hbm.at[0], rows_ref.at[t, r], sem_ref.at[t, r]
            ).wait()

    mask = mask_ref[...]                                   # (tb, T) f32
    # Running (tb, D) f32 accumulator: one vreg tile per 128 lanes, no spills.
    acc = jnp.zeros((tb, D), jnp.float32)
    for t in range(T):
        acc = acc + rows_ref[t].astype(jnp.float32) * mask[:, t:t + 1]

    # SequenceBatch.reduce_mean: divide by the number of valid tokens.
    denom = jnp.maximum(jnp.sum(mask, axis=1, keepdims=True), 1.0)  # (tb, 1)
    # Exact reciprocal (approx=False) keeps the 1e-5 tolerance vs f32 reference.
    out_ref[...] = (acc * pl.reciprocal(denom)).astype(out_ref.dtype)


def _round_up(x, m):
    return -(-x // m) * m


def average_utterance_embed(token_ids, mask, embedding, *, tb=8):
    """token_ids (B,T) int32, mask (B,T) f32, embedding (V,D) -> (B,D) f32.

    Scalar-prefetch row gather: the embedding table stays in HBM and only the
    B*T referenced rows are DMA'd into VMEM scratch, so HBM traffic is
    ~B*T*D*itemsize instead of (B/tb)*V*D*itemsize.  A bf16 table halves the
    gather bytes again; accumulation stays f32 in-kernel.

    NOTE: token ids must satisfy 0 <= id < V (guaranteed by the host vocab
    lookup); out-of-range ids would DMA out of bounds.
    NOTE: if B*T ever approaches/exceeds V (huge batches, tiny vocab), a
    streamed-table matmul formulation becomes competitive again.
    """
    token_ids = token_ids.astype(jnp.int32)
    mask = mask.astype(jnp.float32)

    B, T = token_ids.shape
    V, D = embedding.shape

    tb = max(8, _round_up(tb, 8))          # sublane-aligned batch tile

    # Pad batch so the grid divides evenly.  Padded rows have an all-zero
    # mask (output row is 0 and sliced away); their ids point at row 0 (PAD),
    # which is always a valid table row.
    B_pad = _round_up(B, tb)
    if B_pad != B:
        token_ids = jnp.pad(token_ids, ((0, B_pad - B), (0, 0)))
        mask = jnp.pad(mask, ((0, B_pad - B), (0, 0)))

    grid = (B_pad // tb,)

    itemsize = jnp.dtype(embedding.dtype).itemsize
    cost = pl.CostEstimate(
        flops=2 * B_pad * T * D,
        transcendentals=0,
        bytes_accessed=B_pad * T * (D * itemsize + 8) + B_pad * D * 4,
    )

    out = pl.pallas_call(
        _gather_avg_kernel,
        out_shape=jax.ShapeDtypeStruct((B_pad, D), jnp.float32),
        grid_spec=pltpu.PrefetchScalarGridSpec(
            num_scalar_prefetch=1,                       # token ids -> SMEM
            grid=grid,
            in_specs=[
                pl.BlockSpec((tb, T), lambda i, ids: (i, 0)),   # mask tile
                pl.BlockSpec(memory_space=pl.ANY),              # table in HBM
            ],
            out_specs=pl.BlockSpec((tb, D), lambda i, ids: (i, 0)),
            scratch_shapes=[
                pltpu.VMEM((T, tb, D), embedding.dtype),        # gathered rows
                pltpu.SemaphoreType.DMA((T, tb)),               # per-row sems
            ],
        ),
        compiler_params=pltpu.CompilerParams(
            dimension_semantics=("parallel",),
        ),
        cost_estimate=cost,
    )(token_ids, mask, embedding)

    return out[:B]


# ---------------------------------------------------------------------------
# Pure-JAX reference (same math) for a sanity check.
# ---------------------------------------------------------------------------
def reference_embed(token_ids, mask, embedding):
    embeds = embedding[token_ids]                                # (B, T, D)
    summed = jnp.sum(embeds * mask[:, :, None], axis=1)          # (B, D)
    denom = jnp.maximum(jnp.sum(mask, axis=1, keepdims=True), 1.0)
    return summed / denom


if __name__ == "__main__":
    # Small deterministic example consistent with the module's forward():
    # batch of 2 utterances, max_words=7 -> T=8 tokens, embed_dim=128
    # (lane-dense output), 256-row embedding table.
    max_words = 7
    embed_dim = 128
    vocab_rows = 256

    raw_utterances = [
        "Jeff's dog is un-American SomeTimes! BUT NOTAlways",
        "Click the submit button now",
    ]
    tokenized = [word_tokenize2(u) for u in raw_utterances]
    vocab = build_vocab(tokenized)
    assert len(vocab) <= vocab_rows

    token_ids, mask = to_indices(tokenized, vocab, max_words)    # (2, 8) each

    # Deterministic synthetic embedding table (token_embedder weights).
    key = jax.random.PRNGKey(0)
    embedding = jax.random.normal(key, (vocab_rows, embed_dim), dtype=jnp.float32)

    out = average_utterance_embed(token_ids, mask, embedding, tb=8)
    out = jax.block_until_ready(out)

    ref = reference_embed(token_ids, mask, embedding)
    assert out.shape == (2, embed_dim)
    assert jnp.allclose(out, ref, atol=1e-5, rtol=1e-5)

    print("KERNEL_OK")
</pallas_src>

<mosaic_0001>
module attributes {stable_mosaic.version = 11 : i64} {
  func.func @_gather_avg_kernel(%arg0: i32, %arg1: memref<8x8xi32, #tpu.memory_space<smem>>, %arg2: memref<8x8xf32, #tpu.memory_space<vmem>>, %arg3: memref<256x128xf32, #tpu.memory_space<any>>, %arg4: memref<8x128xf32, #tpu.memory_space<vmem>>, %arg5: memref<8x8x128xf32, #tpu.memory_space<vmem>>, %arg6: memref<8x8x!tpu.dma_semaphore, #tpu.memory_space<semaphore_mem>>) attributes {dimension_semantics = [#tpu.dimension_semantics<parallel>], iteration_bounds = array<i64: 1>, scalar_prefetch = 1 : i64, scratch_operands = 2 : i64, tpu.core_type = #tpu.core_type<tc>, window_params = [{transform_indices = @transform_0, window_bounds = array<i64: 8, 8>}, {}, {transform_indices = @transform_2, window_bounds = array<i64: 8, 128>}]} {
    %c8_i32 = arith.constant 8 : i32
    %0 = arith.muli %arg0, %c8_i32 : i32
    %c0_i32 = arith.constant 0 : i32
    %1 = arith.addi %0, %c0_i32 : i32
    %2 = arith.index_cast %1 : i32 to index
    %c0 = arith.constant 0 : index
    %3 = memref.load %arg1[%2, %c0] : memref<8x8xi32, #tpu.memory_space<smem>>
    %c0_i32_0 = arith.constant 0 : i32
    %c0_i32_1 = arith.constant 0 : i32
    %c0_i32_2 = arith.constant 0 : i32
    %c0_i32_3 = arith.constant 0 : i32
    %c0_i32_4 = arith.constant 0 : i32
    %4 = tpu.memref_slice %arg3[%3, %c0_i32_4] : memref<256x128xf32, #tpu.memory_space<any>> -> memref<1x128xf32, #tpu.memory_space<any>>
    %5 = tpu.memref_squeeze %4 : memref<1x128xf32, #tpu.memory_space<any>> -> memref<128xf32, #tpu.memory_space<any>>
    %c0_i32_5 = arith.constant 0 : i32
    %6 = tpu.memref_slice %arg5[%c0_i32_0, %c0_i32_1, %c0_i32_5] : memref<8x8x128xf32, #tpu.memory_space<vmem>> -> memref<1x1x128xf32, #tpu.memory_space<vmem>>
    %7 = tpu.memref_squeeze %6 : memref<1x1x128xf32, #tpu.memory_space<vmem>> -> memref<128xf32, #tpu.memory_space<vmem>>
    %8 = tpu.memref_slice %arg6[%c0_i32_2, %c0_i32_3] : memref<8x8x!tpu.dma_semaphore, #tpu.memory_space<semaphore_mem>> -> memref<1x1x!tpu.dma_semaphore, #tpu.memory_space<semaphore_mem>>
    %9 = tpu.memref_squeeze %8 : memref<1x1x!tpu.dma_semaphore, #tpu.memory_space<semaphore_mem>> -> memref<!tpu.dma_semaphore, #tpu.memory_space<semaphore_mem>>
    tpu.enqueue_dma source(%5 : memref<128xf32, #tpu.memory_space<any>>) target(%7 : memref<128xf32, #tpu.memory_space<vmem>>) target_semaphore(%9 : memref<!tpu.dma_semaphore, #tpu.memory_space<semaphore_mem>>)
    %c8_i32_6 = arith.constant 8 : i32
    %10 = arith.muli %arg0, %c8_i32_6 : i32
    %c1_i32 = arith.constant 1 : i32
    %11 = arith.addi %10, %c1_i32 : i32
    %12 = arith.index_cast %11 : i32 to index
    %c0_7 = arith.constant 0 : index
    %13 = memref.load %arg1[%12, %c0_7] : memref<8x8xi32, #tpu.memory_space<smem>>
    %c0_i32_8 = arith.constant 0 : i32
    %c1_i32_9 = arith.constant 1 : i32
    %c0_i32_10 = arith.constant 0 : i32
    %c1_i32_11 = arith.constant 1 : i32
    %c0_i32_12 = arith.constant 0 : i32
    %14 = tpu.memref_slice %arg3[%13, %c0_i32_12] : memref<256x128xf32, #tpu.memory_space<any>> -> memref<1x128xf32, #tpu.memory_space<any>>
    %15 = tpu.memref_squeeze %14 : memref<1x128xf32, #tpu.memory_space<any>> -> memref<128xf32, #tpu.memory_space<any>>
    %c0_i32_13 = arith.constant 0 : i32
    %16 = tpu.memref_slice %arg5[%c0_i32_8, %c1_i32_9, %c0_i32_13] : memref<8x8x128xf32, #tpu.memory_space<vmem>> -> memref<1x1x128xf32, #tpu.memory_space<vmem>>
    %17 = tpu.memref_squeeze %16 : memref<1x1x128xf32, #tpu.memory_space<vmem>> -> memref<128xf32, #tpu.memory_space<vmem>>
    %18 = tpu.memref_slice %arg6[%c0_i32_10, %c1_i32_11] : memref<8x8x!tpu.dma_semaphore, #tpu.memory_space<semaphore_mem>> -> memref<1x1x!tpu.dma_semaphore, #tpu.memory_space<semaphore_mem>>
    %19 = tpu.memref_squeeze %18 : memref<1x1x!tpu.dma_semaphore, #tpu.memory_space<semaphore_mem>> -> memref<!tpu.dma_semaphore, #tpu.memory_space<semaphore_mem>>
    tpu.enqueue_dma source(%15 : memref<128xf32, #tpu.memory_space<any>>) target(%17 : memref<128xf32, #tpu.memory_space<vmem>>) target_semaphore(%19 : memref<!tpu.dma_semaphore, #tpu.memory_space<semaphore_mem>>)
    %c8_i32_14 = arith.constant 8 : i32
    %20 = arith.muli %arg0, %c8_i32_14 : i32
    %c2_i32 = arith.constant 2 : i32
    %21 = arith.addi %20, %c2_i32 : i32
    %22 = arith.index_cast %21 : i32 to index
    %c0_15 = arith.constant 0 : index
    %23 = memref.load %arg1[%22, %c0_15] : memref<8x8xi32, #tpu.memory_space<smem>>
    %c0_i32_16 = arith.constant 0 : i32
    %c2_i32_17 = arith.constant 2 : i32
    %c0_i32_18 = arith.constant 0 : i32
    %c2_i32_19 = arith.constant 2 : i32
    %c0_i32_20 = arith.constant 0 : i32
    %24 = tpu.memref_slice %arg3[%23, %c0_i32_20] : memref<256x128xf32, #tpu.memory_space<any>> -> memref<1x128xf32, #tpu.memory_space<any>>
    %25 = tpu.memref_squeeze %24 : memref<1x128xf32, #tpu.memory_space<any>> -> memref<128xf32, #tpu.memory_space<any>>
    %c0_i32_21 = arith.constant 0 : i32
    %26 = tpu.memref_slice %arg5[%c0_i32_16, %c2_i32_17, %c0_i32_21] : memref<8x8x128xf32, #tpu.memory_space<vmem>> -> memref<1x1x128xf32, #tpu.memory_space<vmem>>
    %27 = tpu.memref_squeeze %26 : memref<1x1x128xf32, #tpu.memory_space<vmem>> -> memref<128xf32, #tpu.memory_space<vmem>>
    %28 = tpu.memref_slice %arg6[%c0_i32_18, %c2_i32_19] : memref<8x8x!tpu.dma_semaphore, #tpu.memory_space<semaphore_mem>> -> memref<1x1x!tpu.dma_semaphore, #tpu.memory_space<semaphore_mem>>
    %29 = tpu.memref_squeeze %28 : memref<1x1x!tpu.dma_semaphore, #tpu.memory_space<semaphore_mem>> -> memref<!tpu.dma_semaphore, #tpu.memory_space<semaphore_mem>>
    tpu.enqueue_dma source(%25 : memref<128xf32, #tpu.memory_space<any>>) target(%27 : memref<128xf32, #tpu.memory_space<vmem>>) target_semaphore(%29 : memref<!tpu.dma_semaphore, #tpu.memory_space<semaphore_mem>>)
    %c8_i32_22 = arith.constant 8 : i32
    %30 = arith.muli %arg0, %c8_i32_22 : i32
    %c3_i32 = arith.constant 3 : i32
    %31 = arith.addi %30, %c3_i32 : i32
    %32 = arith.index_cast %31 : i32 to index
    %c0_23 = arith.constant 0 : index
    %33 = memref.load %arg1[%32, %c0_23] : memref<8x8xi32, #tpu.memory_space<smem>>
    %c0_i32_24 = arith.constant 0 : i32
    %c3_i32_25 = arith.constant 3 : i32
    %c0_i32_26 = arith.constant 0 : i32
    %c3_i32_27 = arith.constant 3 : i32
    %c0_i32_28 = arith.constant 0 : i32
    %34 = tpu.memref_slice %arg3[%33, %c0_i32_28] : memref<256x128xf32, #tpu.memory_space<any>> -> memref<1x128xf32, #tpu.memory_space<any>>
    %35 = tpu.memref_squeeze %34 : memref<1x128xf32, #tpu.memory_space<any>> -> memref<128xf32, #tpu.memory_space<any>>
    %c0_i32_29 = arith.constant 0 : i32
    %36 = tpu.memref_slice %arg5[%c0_i32_24, %c3_i32_25, %c0_i32_29] : memref<8x8x128xf32, #tpu.memory_space<vmem>> -> memref<1x1x128xf32, #tpu.memory_space<vmem>>
    %37 = tpu.memref_squeeze %36 : memref<1x1x128xf32, #tpu.memory_space<vmem>> -> memref<128xf32, #tpu.memory_space<vmem>>
    %38 = tpu.memref_slice %arg6[%c0_i32_26, %c3_i32_27] : memref<8x8x!tpu.dma_semaphore, #tpu.memory_space<semaphore_mem>> -> memref<1x1x!tpu.dma_semaphore, #tpu.memory_space<semaphore_mem>>
    %39 = tpu.memref_squeeze %38 : memref<1x1x!tpu.dma_semaphore, #tpu.memory_space<semaphore_mem>> -> memref<!tpu.dma_semaphore, #tpu.memory_space<semaphore_mem>>
    tpu.enqueue_dma source(%35 : memref<128xf32, #tpu.memory_space<any>>) target(%37 : memref<128xf32, #tpu.memory_space<vmem>>) target_semaphore(%39 : memref<!tpu.dma_semaphore, #tpu.memory_space<semaphore_mem>>)
    %c8_i32_30 = arith.constant 8 : i32
    %40 = arith.muli %arg0, %c8_i32_30 : i32
    %c4_i32 = arith.constant 4 : i32
    %41 = arith.addi %40, %c4_i32 : i32
    %42 = arith.index_cast %41 : i32 to index
    %c0_31 = arith.constant 0 : index
    %43 = memref.load %arg1[%42, %c0_31] : memref<8x8xi32, #tpu.memory_space<smem>>
    %c0_i32_32 = arith.constant 0 : i32
    %c4_i32_33 = arith.constant 4 : i32
    %c0_i32_34 = arith.constant 0 : i32
    %c4_i32_35 = arith.constant 4 : i32
    %c0_i32_36 = arith.constant 0 : i32
    %44 = tpu.memref_slice %arg3[%43, %c0_i32_36] : memref<256x128xf32, #tpu.memory_space<any>> -> memref<1x128xf32, #tpu.memory_space<any>>
    %45 = tpu.memref_squeeze %44 : memref<1x128xf32, #tpu.memory_space<any>> -> memref<128xf32, #tpu.memory_space<any>>
    %c0_i32_37 = arith.constant 0 : i32
    %46 = tpu.memref_slice %arg5[%c0_i32_32, %c4_i32_33, %c0_i32_37] : memref<8x8x128xf32, #tpu.memory_space<vmem>> -> memref<1x1x128xf32, #tpu.memory_space<vmem>>
    %47 = tpu.memref_squeeze %46 : memref<1x1x128xf32, #tpu.memory_space<vmem>> -> memref<128xf32, #tpu.memory_space<vmem>>
    %48 = tpu.memref_slice %arg6[%c0_i32_34, %c4_i32_35] : memref<8x8x!tpu.dma_semaphore, #tpu.memory_space<semaphore_mem>> -> memref<1x1x!tpu.dma_semaphore, #tpu.memory_space<semaphore_mem>>
    %49 = tpu.memref_squeeze %48 : memref<1x1x!tpu.dma_semaphore, #tpu.memory_space<semaphore_mem>> -> memref<!tpu.dma_semaphore, #tpu.memory_space<semaphore_mem>>
    tpu.enqueue_dma source(%45 : memref<128xf32, #tpu.memory_space<any>>) target(%47 : memref<128xf32, #tpu.memory_space<vmem>>) target_semaphore(%49 : memref<!tpu.dma_semaphore, #tpu.memory_space<semaphore_mem>>)
    %c8_i32_38 = arith.constant 8 : i32
    %50 = arith.muli %arg0, %c8_i32_38 : i32
    %c5_i32 = arith.constant 5 : i32
    %51 = arith.addi %50, %c5_i32 : i32
    %52 = arith.index_cast %51 : i32 to index
    %c0_39 = arith.constant 0 : index
    %53 = memref.load %arg1[%52, %c0_39] : memref<8x8xi32, #tpu.memory_space<smem>>
    %c0_i32_40 = arith.constant 0 : i32
    %c5_i32_41 = arith.constant 5 : i32
    %c0_i32_42 = arith.constant 0 : i32
    %c5_i32_43 = arith.constant 5 : i32
    %c0_i32_44 = arith.constant 0 : i32
    %54 = tpu.memref_slice %arg3[%53, %c0_i32_44] : memref<256x128xf32, #tpu.memory_space<any>> -> memref<1x128xf32, #tpu.memory_space<any>>
    %55 = tpu.memref_squeeze %54 : memref<1x128xf32, #tpu.memory_space<any>> -> memref<128xf32, #tpu.memory_space<any>>
    %c0_i32_45 = arith.constant 0 : i32
    %56 = tpu.memref_slice %arg5[%c0_i32_40, %c5_i32_41, %c0_i32_45] : memref<8x8x128xf32, #tpu.memory_space<vmem>> -> memref<1x1x128xf32, #tpu.memory_space<vmem>>
    %57 = tpu.memref_squeeze %56 : memref<1x1x128xf32, #tpu.memory_space<vmem>> -> memref<128xf32, #tpu.memory_space<vmem>>
    %58 = tpu.memref_slice %arg6[%c0_i32_42, %c5_i32_43] : memref<8x8x!tpu.dma_semaphore, #tpu.memory_space<semaphore_mem>> -> memref<1x1x!tpu.dma_semaphore, #tpu.memory_space<semaphore_mem>>
    %59 = tpu.memref_squeeze %58 : memref<1x1x!tpu.dma_semaphore, #tpu.memory_space<semaphore_mem>> -> memref<!tpu.dma_semaphore, #tpu.memory_space<semaphore_mem>>
    tpu.enqueue_dma source(%55 : memref<128xf32, #tpu.memory_space<any>>) target(%57 : memref<128xf32, #tpu.memory_space<vmem>>) target_semaphore(%59 : memref<!tpu.dma_semaphore, #tpu.memory_space<semaphore_mem>>)
    %c8_i32_46 = arith.constant 8 : i32
    %60 = arith.muli %arg0, %c8_i32_46 : i32
    %c6_i32 = arith.constant 6 : i32
    %61 = arith.addi %60, %c6_i32 : i32
    %62 = arith.index_cast %61 : i32 to index
    %c0_47 = arith.constant 0 : index
    %63 = memref.load %arg1[%62, %c0_47] : memref<8x8xi32, #tpu.memory_space<smem>>
    %c0_i32_48 = arith.constant 0 : i32
    %c6_i32_49 = arith.constant 6 : i32
    %c0_i32_50 = arith.constant 0 : i32
    %c6_i32_51 = arith.constant 6 : i32
    %c0_i32_52 = arith.constant 0 : i32
    %64 = tpu.memref_slice %arg3[%63, %c0_i32_52] : memref<256x128xf32, #tpu.memory_space<any>> -> memref<1x128xf32, #tpu.memory_space<any>>
    %65 = tpu.memref_squeeze %64 : memref<1x128xf32, #tpu.memory_space<any>> -> memref<128xf32, #tpu.memory_space<any>>
    %c0_i32_53 = arith.constant 0 : i32
    %66 = tpu.memref_slice %arg5[%c0_i32_48, %c6_i32_49, %c0_i32_53] : memref<8x8x128xf32, #tpu.memory_space<vmem>> -> memref<1x1x128xf32, #tpu.memory_space<vmem>>
    %67 = tpu.memref_squeeze %66 : memref<1x1x128xf32, #tpu.memory_space<vmem>> -> memref<128xf32, #tpu.memory_space<vmem>>
    %68 = tpu.memref_slice %arg6[%c0_i32_50, %c6_i32_51] : memref<8x8x!tpu.dma_semaphore, #tpu.memory_space<semaphore_mem>> -> memref<1x1x!tpu.dma_semaphore, #tpu.memory_space<semaphore_mem>>
    %69 = tpu.memref_squeeze %68 : memref<1x1x!tpu.dma_semaphore, #tpu.memory_space<semaphore_mem>> -> memref<!tpu.dma_semaphore, #tpu.memory_space<semaphore_mem>>
    tpu.enqueue_dma source(%65 : memref<128xf32, #tpu.memory_space<any>>) target(%67 : memref<128xf32, #tpu.memory_space<vmem>>) target_semaphore(%69 : memref<!tpu.dma_semaphore, #tpu.memory_space<semaphore_mem>>)
    %c8_i32_54 = arith.constant 8 : i32
    %70 = arith.muli %arg0, %c8_i32_54 : i32
    %c7_i32 = arith.constant 7 : i32
    %71 = arith.addi %70, %c7_i32 : i32
    %72 = arith.index_cast %71 : i32 to index
    %c0_55 = arith.constant 0 : index
    %73 = memref.load %arg1[%72, %c0_55] : memref<8x8xi32, #tpu.memory_space<smem>>
    %c0_i32_56 = arith.constant 0 : i32
    %c7_i32_57 = arith.constant 7 : i32
    %c0_i32_58 = arith.constant 0 : i32
    %c7_i32_59 = arith.constant 7 : i32
    %c0_i32_60 = arith.constant 0 : i32
    %74 = tpu.memref_slice %arg3[%73, %c0_i32_60] : memref<256x128xf32, #tpu.memory_space<any>> -> memref<1x128xf32, #tpu.memory_space<any>>
    %75 = tpu.memref_squeeze %74 : memref<1x128xf32, #tpu.memory_space<any>> -> memref<128xf32, #tpu.memory_space<any>>
    %c0_i32_61 = arith.constant 0 : i32
    %76 = tpu.memref_slice %arg5[%c0_i32_56, %c7_i32_57, %c0_i32_61] : memref<8x8x128xf32, #tpu.memory_space<vmem>> -> memref<1x1x128xf32, #tpu.memory_space<vmem>>
    %77 = tpu.memref_squeeze %76 : memref<1x1x128xf32, #tpu.memory_space<vmem>> -> memref<128xf32, #tpu.memory_space<vmem>>
    %78 = tpu.memref_slice %arg6[%c0_i32_58, %c7_i32_59] : memref<8x8x!tpu.dma_semaphore, #tpu.memory_space<semaphore_mem>> -> memref<1x1x!tpu.dma_semaphore, #tpu.memory_space<semaphore_mem>>
    %79 = tpu.memref_squeeze %78 : memref<1x1x!tpu.dma_semaphore, #tpu.memory_space<semaphore_mem>> -> memref<!tpu.dma_semaphore, #tpu.memory_space<semaphore_mem>>
    tpu.enqueue_dma source(%75 : memref<128xf32, #tpu.memory_space<any>>) target(%77 : memref<128xf32, #tpu.memory_space<vmem>>) target_semaphore(%79 : memref<!tpu.dma_semaphore, #tpu.memory_space<semaphore_mem>>)
    %c8_i32_62 = arith.constant 8 : i32
    %80 = arith.muli %arg0, %c8_i32_62 : i32
    %c0_i32_63 = arith.constant 0 : i32
    %81 = arith.addi %80, %c0_i32_63 : i32
    %82 = arith.index_cast %81 : i32 to index
    %c1 = arith.constant 1 : index
    %83 = memref.load %arg1[%82, %c1] : memref<8x8xi32, #tpu.memory_space<smem>>
    %c1_i32_64 = arith.constant 1 : i32
    %c0_i32_65 = arith.constant 0 : i32
    %c1_i32_66 = arith.constant 1 : i32
    %c0_i32_67 = arith.constant 0 : i32
    %c0_i32_68 = arith.constant 0 : i32
    %84 = tpu.memref_slice %arg3[%83, %c0_i32_68] : memref<256x128xf32, #tpu.memory_space<any>> -> memref<1x128xf32, #tpu.memory_space<any>>
    %85 = tpu.memref_squeeze %84 : memref<1x128xf32, #tpu.memory_space<any>> -> memref<128xf32, #tpu.memory_space<any>>
    %c0_i32_69 = arith.constant 0 : i32
    %86 = tpu.memref_slice %arg5[%c1_i32_64, %c0_i32_65, %c0_i32_69] : memref<8x8x128xf32, #tpu.memory_space<vmem>> -> memref<1x1x128xf32, #tpu.memory_space<vmem>>
    %87 = tpu.memref_squeeze %86 : memref<1x1x128xf32, #tpu.memory_space<vmem>> -> memref<128xf32, #tpu.memory_space<vmem>>
    %88 = tpu.memref_slice %arg6[%c1_i32_66, %c0_i32_67] : memref<8x8x!tpu.dma_semaphore, #tpu.memory_space<semaphore_mem>> -> memref<1x1x!tpu.dma_semaphore, #tpu.memory_space<semaphore_mem>>
    %89 = tpu.memref_squeeze %88 : memref<1x1x!tpu.dma_semaphore, #tpu.memory_space<semaphore_mem>> -> memref<!tpu.dma_semaphore, #tpu.memory_space<semaphore_mem>>
    tpu.enqueue_dma source(%85 : memref<128xf32, #tpu.memory_space<any>>) target(%87 : memref<128xf32, #tpu.memory_space<vmem>>) target_semaphore(%89 : memref<!tpu.dma_semaphore, #tpu.memory_space<semaphore_mem>>)
    %c8_i32_70 = arith.constant 8 : i32
    %90 = arith.muli %arg0, %c8_i32_70 : i32
    %c1_i32_71 = arith.constant 1 : i32
    %91 = arith.addi %90, %c1_i32_71 : i32
    %92 = arith.index_cast %91 : i32 to index
    %c1_72 = arith.constant 1 : index
    %93 = memref.load %arg1[%92, %c1_72] : memref<8x8xi32, #tpu.memory_space<smem>>
    %c1_i32_73 = arith.constant 1 : i32
    %c1_i32_74 = arith.constant 1 : i32
    %c1_i32_75 = arith.constant 1 : i32
    %c1_i32_76 = arith.constant 1 : i32
    %c0_i32_77 = arith.constant 0 : i32
    %94 = tpu.memref_slice %arg3[%93, %c0_i32_77] : memref<256x128xf32, #tpu.memory_space<any>> -> memref<1x128xf32, #tpu.memory_space<any>>
    %95 = tpu.memref_squeeze %94 : memref<1x128xf32, #tpu.memory_space<any>> -> memref<128xf32, #tpu.memory_space<any>>
    %c0_i32_78 = arith.constant 0 : i32
    %96 = tpu.memref_slice %arg5[%c1_i32_73, %c1_i32_74, %c0_i32_78] : memref<8x8x128xf32, #tpu.memory_space<vmem>> -> memref<1x1x128xf32, #tpu.memory_space<vmem>>
    %97 = tpu.memref_squeeze %96 : memref<1x1x128xf32, #tpu.memory_space<vmem>> -> memref<128xf32, #tpu.memory_space<vmem>>
    %98 = tpu.memref_slice %arg6[%c1_i32_75, %c1_i32_76] : memref<8x8x!tpu.dma_semaphore, #tpu.memory_space<semaphore_mem>> -> memref<1x1x!tpu.dma_semaphore, #tpu.memory_space<semaphore_mem>>
    %99 = tpu.memref_squeeze %98 : memref<1x1x!tpu.dma_semaphore, #tpu.memory_space<semaphore_mem>> -> memref<!tpu.dma_semaphore, #tpu.memory_space<semaphore_mem>>
    tpu.enqueue_dma source(%95 : memref<128xf32, #tpu.memory_space<any>>) target(%97 : memref<128xf32, #tpu.memory_space<vmem>>) target_semaphore(%99 : memref<!tpu.dma_semaphore, #tpu.memory_space<semaphore_mem>>)
    %c8_i32_79 = arith.constant 8 : i32
    %100 = arith.muli %arg0, %c8_i32_79 : i32
    %c2_i32_80 = arith.constant 2 : i32
    %101 = arith.addi %100, %c2_i32_80 : i32
    %102 = arith.index_cast %101 : i32 to index
    %c1_81 = arith.constant 1 : index
    %103 = memref.load %arg1[%102, %c1_81] : memref<8x8xi32, #tpu.memory_space<smem>>
    %c1_i32_82 = arith.constant 1 : i32
    %c2_i32_83 = arith.constant 2 : i32
    %c1_i32_84 = arith.constant 1 : i32
    %c2_i32_85 = arith.constant 2 : i32
    %c0_i32_86 = arith.constant 0 : i32
    %104 = tpu.memref_slice %arg3[%103, %c0_i32_86] : memref<256x128xf32, #tpu.memory_space<any>> -> memref<1x128xf32, #tpu.memory_space<any>>
    %105 = tpu.memref_squeeze %104 : memref<1x128xf32, #tpu.memory_space<any>> -> memref<128xf32, #tpu.memory_space<any>>
    %c0_i32_87 = arith.constant 0 : i32
    %106 = tpu.memref_slice %arg5[%c1_i32_82, %c2_i32_83, %c0_i32_87] : memref<8x8x128xf32, #tpu.memory_space<vmem>> -> memref<1x1x128xf32, #tpu.memory_space<vmem>>
    %107 = tpu.memref_squeeze %106 : memref<1x1x128xf32, #tpu.memory_space<vmem>> -> memref<128xf32, #tpu.memory_space<vmem>>
    %108 = tpu.memref_slice %arg6[%c1_i32_84, %c2_i32_85] : memref<8x8x!tpu.dma_semaphore, #tpu.memory_space<semaphore_mem>> -> memref<1x1x!tpu.dma_semaphore, #tpu.memory_space<semaphore_mem>>
    %109 = tpu.memref_squeeze %108 : memref<1x1x!tpu.dma_semaphore, #tpu.memory_space<semaphore_mem>> -> memref<!tpu.dma_semaphore, #tpu.memory_space<semaphore_mem>>
    tpu.enqueue_dma source(%105 : memref<128xf32, #tpu.memory_space<any>>) target(%107 : memref<128xf32, #tpu.memory_space<vmem>>) target_semaphore(%109 : memref<!tpu.dma_semaphore, #tpu.memory_space<semaphore_mem>>)
    %c8_i32_88 = arith.constant 8 : i32
    %110 = arith.muli %arg0, %c8_i32_88 : i32
    %c3_i32_89 = arith.constant 3 : i32
    %111 = arith.addi %110, %c3_i32_89 : i32
    %112 = arith.index_cast %111 : i32 to index
    %c1_90 = arith.constant 1 : index
    %113 = memref.load %arg1[%112, %c1_90] : memref<8x8xi32, #tpu.memory_space<smem>>
    %c1_i32_91 = arith.constant 1 : i32
    %c3_i32_92 = arith.constant 3 : i32
    %c1_i32_93 = arith.constant 1 : i32
    %c3_i32_94 = arith.constant 3 : i32
    %c0_i32_95 = arith.constant 0 : i32
    %114 = tpu.memref_slice %arg3[%113, %c0_i32_95] : memref<256x128xf32, #tpu.memory_space<any>> -> memref<1x128xf32, #tpu.memory_space<any>>
    %115 = tpu.memref_squeeze %114 : memref<1x128xf32, #tpu.memory_space<any>> -> memref<128xf32, #tpu.memory_space<any>>
    %c0_i32_96 = arith.constant 0 : i32
    %116 = tpu.memref_slice %arg5[%c1_i32_91, %c3_i32_92, %c0_i32_96] : memref<8x8x128xf32, #tpu.memory_space<vmem>> -> memref<1x1x128xf32, #tpu.memory_space<vmem>>
    %117 = tpu.memref_squeeze %116 : memref<1x1x128xf32, #tpu.memory_space<vmem>> -> memref<128xf32, #tpu.memory_space<vmem>>
    %118 = tpu.memref_slice %arg6[%c1_i32_93, %c3_i32_94] : memref<8x8x!tpu.dma_semaphore, #tpu.memory_space<semaphore_mem>> -> memref<1x1x!tpu.dma_semaphore, #tpu.memory_space<semaphore_mem>>
    %119 = tpu.memref_squeeze %118 : memref<1x1x!tpu.dma_semaphore, #tpu.memory_space<semaphore_mem>> -> memref<!tpu.dma_semaphore, #tpu.memory_space<semaphore_mem>>
    tpu.enqueue_dma source(%115 : memref<128xf32, #tpu.memory_space<any>>) target(%117 : memref<128xf32, #tpu.memory_space<vmem>>) target_semaphore(%119 : memref<!tpu.dma_semaphore, #tpu.memory_space<semaphore_mem>>)
    %c8_i32_97 = arith.constant 8 : i32
    %120 = arith.muli %arg0, %c8_i32_97 : i32
    %c4_i32_98 = arith.constant 4 : i32
    %121 = arith.addi %120, %c4_i32_98 : i32
    %122 = arith.index_cast %121 : i32 to index
    %c1_99 = arith.constant 1 : index
    %123 = memref.load %arg1[%122, %c1_99] : memref<8x8xi32, #tpu.memory_space<smem>>
    %c1_i32_100 = arith.constant 1 : i32
    %c4_i32_101 = arith.constant 4 : i32
    %c1_i32_102 = arith.constant 1 : i32
    %c4_i32_103 = arith.constant 4 : i32
    %c0_i32_104 = arith.constant 0 : i32
    %124 = tpu.memref_slice %arg3[%123, %c0_i32_104] : memref<256x128xf32, #tpu.memory_space<any>> -> memref<1x128xf32, #tpu.memory_space<any>>
    %125 = tpu.memref_squeeze %124 : memref<1x128xf32, #tpu.memory_space<any>> -> memref<128xf32, #tpu.memory_space<any>>
    %c0_i32_105 = arith.constant 0 : i32
    %126 = tpu.memref_slice %arg5[%c1_i32_100, %c4_i32_101, %c0_i32_105] : memref<8x8x128xf32, #tpu.memory_space<vmem>> -> memref<1x1x128xf32, #tpu.memory_space<vmem>>
    %127 = tpu.memref_squeeze %126 : memref<1x1x128xf32, #tpu.memory_space<vmem>> -> memref<128xf32, #tpu.memory_space<vmem>>
    %128 = tpu.memref_slice %arg6[%c1_i32_102, %c4_i32_103] : memref<8x8x!tpu.dma_semaphore, #tpu.memory_space<semaphore_mem>> -> memref<1x1x!tpu.dma_semaphore, #tpu.memory_space<semaphore_mem>>
    %129 = tpu.memref_squeeze %128 : memref<1x1x!tpu.dma_semaphore, #tpu.memory_space<semaphore_mem>> -> memref<!tpu.dma_semaphore, #tpu.memory_space<semaphore_mem>>
    tpu.enqueue_dma source(%125 : memref<128xf32, #tpu.memory_space<any>>) target(%127 : memref<128xf32, #tpu.memory_space<vmem>>) target_semaphore(%129 : memref<!tpu.dma_semaphore, #tpu.memory_space<semaphore_mem>>)
    %c8_i32_106 = arith.constant 8 : i32
    %130 = arith.muli %arg0, %c8_i32_106 : i32
    %c5_i32_107 = arith.constant 5 : i32
    %131 = arith.addi %130, %c5_i32_107 : i32
    %132 = arith.index_cast %131 : i32 to index
    %c1_108 = arith.constant 1 : index
    %133 = memref.load %arg1[%132, %c1_108] : memref<8x8xi32, #tpu.memory_space<smem>>
    %c1_i32_109 = arith.constant 1 : i32
    %c5_i32_110 = arith.constant 5 : i32
    %c1_i32_111 = arith.constant 1 : i32
    %c5_i32_112 = arith.constant 5 : i32
    %c0_i32_113 = arith.constant 0 : i32
    %134 = tpu.memref_slice %arg3[%133, %c0_i32_113] : memref<256x128xf32, #tpu.memory_space<any>> -> memref<1x128xf32, #tpu.memory_space<any>>
    %135 = tpu.memref_squeeze %134 : memref<1x128xf32, #tpu.memory_space<any>> -> memref<128xf32, #tpu.memory_space<any>>
    %c0_i32_114 = arith.constant 0 : i32
    %136 = tpu.memref_slice %arg5[%c1_i32_109, %c5_i32_110, %c0_i32_114] : memref<8x8x128xf32, #tpu.memory_space<vmem>> -> memref<1x1x128xf32, #tpu.memory_space<vmem>>
    %137 = tpu.memref_squeeze %136 : memref<1x1x128xf32, #tpu.memory_space<vmem>> -> memref<128xf32, #tpu.memory_space<vmem>>
    %138 = tpu.memref_slice %arg6[%c1_i32_111, %c5_i32_112] : memref<8x8x!tpu.dma_semaphore, #tpu.memory_space<semaphore_mem>> -> memref<1x1x!tpu.dma_semaphore, #tpu.memory_space<semaphore_mem>>
    %139 = tpu.memref_squeeze %138 : memref<1x1x!tpu.dma_semaphore, #tpu.memory_space<semaphore_mem>> -> memref<!tpu.dma_semaphore, #tpu.memory_space<semaphore_mem>>
    tpu.enqueue_dma source(%135 : memref<128xf32, #tpu.memory_space<any>>) target(%137 : memref<128xf32, #tpu.memory_space<vmem>>) target_semaphore(%139 : memref<!tpu.dma_semaphore, #tpu.memory_space<semaphore_mem>>)
    %c8_i32_115 = arith.constant 8 : i32
    %140 = arith.muli %arg0, %c8_i32_115 : i32
    %c6_i32_116 = arith.constant 6 : i32
    %141 = arith.addi %140, %c6_i32_116 : i32
    %142 = arith.index_cast %141 : i32 to index
    %c1_117 = arith.constant 1 : index
    %143 = memref.load %arg1[%142, %c1_117] : memref<8x8xi32, #tpu.memory_space<smem>>
    %c1_i32_118 = arith.constant 1 : i32
    %c6_i32_119 = arith.constant 6 : i32
    %c1_i32_120 = arith.constant 1 : i32
    %c6_i32_121 = arith.constant 6 : i32
    %c0_i32_122 = arith.constant 0 : i32
    %144 = tpu.memref_slice %arg3[%143, %c0_i32_122] : memref<256x128xf32, #tpu.memory_space<any>> -> memref<1x128xf32, #tpu.memory_space<any>>
    %145 = tpu.memref_squeeze %144 : memref<1x128xf32, #tpu.memory_space<any>> -> memref<128xf32, #tpu.memory_space<any>>
    %c0_i32_123 = arith.constant 0 : i32
    %146 = tpu.memref_slice %arg5[%c1_i32_118, %c6_i32_119, %c0_i32_123] : memref<8x8x128xf32, #tpu.memory_space<vmem>> -> memref<1x1x128xf32, #tpu.memory_space<vmem>>
    %147 = tpu.memref_squeeze %146 : memref<1x1x128xf32, #tpu.memory_space<vmem>> -> memref<128xf32, #tpu.memory_space<vmem>>
    %148 = tpu.memref_slice %arg6[%c1_i32_120, %c6_i32_121] : memref<8x8x!tpu.dma_semaphore, #tpu.memory_space<semaphore_mem>> -> memref<1x1x!tpu.dma_semaphore, #tpu.memory_space<semaphore_mem>>
    %149 = tpu.memref_squeeze %148 : memref<1x1x!tpu.dma_semaphore, #tpu.memory_space<semaphore_mem>> -> memref<!tpu.dma_semaphore, #tpu.memory_space<semaphore_mem>>
    tpu.enqueue_dma source(%145 : memref<128xf32, #tpu.memory_space<any>>) target(%147 : memref<128xf32, #tpu.memory_space<vmem>>) target_semaphore(%149 : memref<!tpu.dma_semaphore, #tpu.memory_space<semaphore_mem>>)
    %c8_i32_124 = arith.constant 8 : i32
    %150 = arith.muli %arg0, %c8_i32_124 : i32
    %c7_i32_125 = arith.constant 7 : i32
    %151 = arith.addi %150, %c7_i32_125 : i32
    %152 = arith.index_cast %151 : i32 to index
    %c1_126 = arith.constant 1 : index
    %153 = memref.load %arg1[%152, %c1_126] : memref<8x8xi32, #tpu.memory_space<smem>>
    %c1_i32_127 = arith.constant 1 : i32
    %c7_i32_128 = arith.constant 7 : i32
    %c1_i32_129 = arith.constant 1 : i32
    %c7_i32_130 = arith.constant 7 : i32
    %c0_i32_131 = arith.constant 0 : i32
    %154 = tpu.memref_slice %arg3[%153, %c0_i32_131] : memref<256x128xf32, #tpu.memory_space<any>> -> memref<1x128xf32, #tpu.memory_space<any>>
    %155 = tpu.memref_squeeze %154 : memref<1x128xf32, #tpu.memory_space<any>> -> memref<128xf32, #tpu.memory_space<any>>
    %c0_i32_132 = arith.constant 0 : i32
    %156 = tpu.memref_slice %arg5[%c1_i32_127, %c7_i32_128, %c0_i32_132] : memref<8x8x128xf32, #tpu.memory_space<vmem>> -> memref<1x1x128xf32, #tpu.memory_space<vmem>>
    %157 = tpu.memref_squeeze %156 : memref<1x1x128xf32, #tpu.memory_space<vmem>> -> memref<128xf32, #tpu.memory_space<vmem>>
    %158 = tpu.memref_slice %arg6[%c1_i32_129, %c7_i32_130] : memref<8x8x!tpu.dma_semaphore, #tpu.memory_space<semaphore_mem>> -> memref<1x1x!tpu.dma_semaphore, #tpu.memory_space<semaphore_mem>>
    %159 = tpu.memref_squeeze %158 : memref<1x1x!tpu.dma_semaphore, #tpu.memory_space<semaphore_mem>> -> memref<!tpu.dma_semaphore, #tpu.memory_space<semaphore_mem>>
    tpu.enqueue_dma source(%155 : memref<128xf32, #tpu.memory_space<any>>) target(%157 : memref<128xf32, #tpu.memory_space<vmem>>) target_semaphore(%159 : memref<!tpu.dma_semaphore, #tpu.memory_space<semaphore_mem>>)
    %c8_i32_133 = arith.constant 8 : i32
    %160 = arith.muli %arg0, %c8_i32_133 : i32
    %c0_i32_134 = arith.constant 0 : i32
    %161 = arith.addi %160, %c0_i32_134 : i32
    %162 = arith.index_cast %161 : i32 to index
    %c2 = arith.constant 2 : index
    %163 = memref.load %arg1[%162, %c2] : memref<8x8xi32, #tpu.memory_space<smem>>
    %c2_i32_135 = arith.constant 2 : i32
    %c0_i32_136 = arith.constant 0 : i32
    %c2_i32_137 = arith.constant 2 : i32
    %c0_i32_138 = arith.constant 0 : i32
    %c0_i32_139 = arith.constant 0 : i32
    %164 = tpu.memref_slice %arg3[%163, %c0_i32_139] : memref<256x128xf32, #tpu.memory_space<any>> -> memref<1x128xf32, #tpu.memory_space<any>>
    %165 = tpu.memref_squeeze %164 : memref<1x128xf32, #tpu.memory_space<any>> -> memref<128xf32, #tpu.memory_space<any>>
    %c0_i32_140 = arith.constant 0 : i32
    %166 = tpu.memref_slice %arg5[%c2_i32_135, %c0_i32_136, %c0_i32_140] : memref<8x8x128xf32, #tpu.memory_space<vmem>> -> memref<1x1x128xf32, #tpu.memory_space<vmem>>
    %167 = tpu.memref_squeeze %166 : memref<1x1x128xf32, #tpu.memory_space<vmem>> -> memref<128xf32, #tpu.memory_space<vmem>>
    %168 = tpu.memref_slice %arg6[%c2_i32_137, %c0_i32_138] : memref<8x8x!tpu.dma_semaphore, #tpu.memory_space<semaphore_mem>> -> memref<1x1x!tpu.dma_semaphore, #tpu.memory_space<semaphore_mem>>
    %169 = tpu.memref_squeeze %168 : memref<1x1x!tpu.dma_semaphore, #tpu.memory_space<semaphore_mem>> -> memref<!tpu.dma_semaphore, #tpu.memory_space<semaphore_mem>>
    tpu.enqueue_dma source(%165 : memref<128xf32, #tpu.memory_space<any>>) target(%167 : memref<128xf32, #tpu.memory_space<vmem>>) target_semaphore(%169 : memref<!tpu.dma_semaphore, #tpu.memory_space<semaphore_mem>>)
    %c8_i32_141 = arith.constant 8 : i32
    %170 = arith.muli %arg0, %c8_i32_141 : i32
    %c1_i32_142 = arith.constant 1 : i32
    %171 = arith.addi %170, %c1_i32_142 : i32
    %172 = arith.index_cast %171 : i32 to index
    %c2_143 = arith.constant 2 : index
    %173 = memref.load %arg1[%172, %c2_143] : memref<8x8xi32, #tpu.memory_space<smem>>
    %c2_i32_144 = arith.constant 2 : i32
    %c1_i32_145 = arith.constant 1 : i32
    %c2_i32_146 = arith.constant 2 : i32
    %c1_i32_147 = arith.constant 1 : i32
    %c0_i32_148 = arith.constant 0 : i32
    %174 = tpu.memref_slice %arg3[%173, %c0_i32_148] : memref<256x128xf32, #tpu.memory_space<any>> -> memref<1x128xf32, #tpu.memory_space<any>>
    %175 = tpu.memref_squeeze %174 : memref<1x128xf32, #tpu.memory_space<any>> -> memref<128xf32, #tpu.memory_space<any>>
    %c0_i32_149 = arith.constant 0 : i32
    %176 = tpu.memref_slice %arg5[%c2_i32_144, %c1_i32_145, %c0_i32_149] : memref<8x8x128xf32, #tpu.memory_space<vmem>> -> memref<1x1x128xf32, #tpu.memory_space<vmem>>
    %177 = tpu.memref_squeeze %176 : memref<1x1x128xf32, #tpu.memory_space<vmem>> -> memref<128xf32, #tpu.memory_space<vmem>>
    %178 = tpu.memref_slice %arg6[%c2_i32_146, %c1_i32_147] : memref<8x8x!tpu.dma_semaphore, #tpu.memory_space<semaphore_mem>> -> memref<1x1x!tpu.dma_semaphore, #tpu.memory_space<semaphore_mem>>
    %179 = tpu.memref_squeeze %178 : memref<1x1x!tpu.dma_semaphore, #tpu.memory_space<semaphore_mem>> -> memref<!tpu.dma_semaphore, #tpu.memory_space<semaphore_mem>>
    tpu.enqueue_dma source(%175 : memref<128xf32, #tpu.memory_space<any>>) target(%177 : memref<128xf32, #tpu.memory_space<vmem>>) target_semaphore(%179 : memref<!tpu.dma_semaphore, #tpu.memory_space<semaphore_mem>>)
    %c8_i32_150 = arith.constant 8 : i32
    %180 = arith.muli %arg0, %c8_i32_150 : i32
    %c2_i32_151 = arith.constant 2 : i32
    %181 = arith.addi %180, %c2_i32_151 : i32
    %182 = arith.index_cast %181 : i32 to index
    %c2_152 = arith.constant 2 : index
    %183 = memref.load %arg1[%182, %c2_152] : memref<8x8xi32, #tpu.memory_space<smem>>
    %c2_i32_153 = arith.constant 2 : i32
    %c2_i32_154 = arith.constant 2 : i32
    %c2_i32_155 = arith.constant 2 : i32
    %c2_i32_156 = arith.constant 2 : i32
    %c0_i32_157 = arith.constant 0 : i32
    %184 = tpu.memref_slice %arg3[%183, %c0_i32_157] : memref<256x128xf32, #tpu.memory_space<any>> -> memref<1x128xf32, #tpu.memory_space<any>>
    %185 = tpu.memref_squeeze %184 : memref<1x128xf32, #tpu.memory_space<any>> -> memref<128xf32, #tpu.memory_space<any>>
    %c0_i32_158 = arith.constant 0 : i32
    %186 = tpu.memref_slice %arg5[%c2_i32_153, %c2_i32_154, %c0_i32_158] : memref<8x8x128xf32, #tpu.memory_space<vmem>> -> memref<1x1x128xf32, #tpu.memory_space<vmem>>
    %187 = tpu.memref_squeeze %186 : memref<1x1x128xf32, #tpu.memory_space<vmem>> -> memref<128xf32, #tpu.memory_space<vmem>>
    %188 = tpu.memref_slice %arg6[%c2_i32_155, %c2_i32_156] : memref<8x8x!tpu.dma_semaphore, #tpu.memory_space<semaphore_mem>> -> memref<1x1x!tpu.dma_semaphore, #tpu.memory_space<semaphore_mem>>
    %189 = tpu.memref_squeeze %188 : memref<1x1x!tpu.dma_semaphore, #tpu.memory_space<semaphore_mem>> -> memref<!tpu.dma_semaphore, #tpu.memory_space<semaphore_mem>>
    tpu.enqueue_dma source(%185 : memref<128xf32, #tpu.memory_space<any>>) target(%187 : memref<128xf32, #tpu.memory_space<vmem>>) target_semaphore(%189 : memref<!tpu.dma_semaphore, #tpu.memory_space<semaphore_mem>>)
    %c8_i32_159 = arith.constant 8 : i32
    %190 = arith.muli %arg0, %c8_i32_159 : i32
    %c3_i32_160 = arith.constant 3 : i32
    %191 = arith.addi %190, %c3_i32_160 : i32
    %192 = arith.index_cast %191 : i32 to index
    %c2_161 = arith.constant 2 : index
    %193 = memref.load %arg1[%192, %c2_161] : memref<8x8xi32, #tpu.memory_space<smem>>
    %c2_i32_162 = arith.constant 2 : i32
    %c3_i32_163 = arith.constant 3 : i32
    %c2_i32_164 = arith.constant 2 : i32
    %c3_i32_165 = arith.constant 3 : i32
    %c0_i32_166 = arith.constant 0 : i32
    %194 = tpu.memref_slice %arg3[%193, %c0_i32_166] : memref<256x128xf32, #tpu.memory_space<any>> -> memref<1x128xf32, #tpu.memory_space<any>>
    %195 = tpu.memref_squeeze %194 : memref<1x128xf32, #tpu.memory_space<any>> -> memref<128xf32, #tpu.memory_space<any>>
    %c0_i32_167 = arith.constant 0 : i32
    %196 = tpu.memref_slice %arg5[%c2_i32_162, %c3_i32_163, %c0_i32_167] : memref<8x8x128xf32, #tpu.memory_space<vmem>> -> memref<1x1x128xf32, #tpu.memory_space<vmem>>
    %197 = tpu.memref_squeeze %196 : memref<1x1x128xf32, #tpu.memory_space<vmem>> -> memref<128xf32, #tpu.memory_space<vmem>>
    %198 = tpu.memref_slice %arg6[%c2_i32_164, %c3_i32_165] : memref<8x8x!tpu.dma_semaphore, #tpu.memory_space<semaphore_mem>> -> memref<1x1x!tpu.dma_semaphore, #tpu.memory_space<semaphore_mem>>
    %199 = tpu.memref_squeeze %198 : memref<1x1x!tpu.dma_semaphore, #tpu.memory_space<semaphore_mem>> -> memref<!tpu.dma_semaphore, #tpu.memory_space<semaphore_mem>>
    tpu.enqueue_dma source(%195 : memref<128xf32, #tpu.memory_space<any>>) target(%197 : memref<128xf32, #tpu.memory_space<vmem>>) target_semaphore(%199 : memref<!tpu.dma_semaphore, #tpu.memory_space<semaphore_mem>>)
    %c8_i32_168 = arith.constant 8 : i32
    %200 = arith.muli %arg0, %c8_i32_168 : i32
    %c4_i32_169 = arith.constant 4 : i32
    %201 = arith.addi %200, %c4_i32_169 : i32
    %202 = arith.index_cast %201 : i32 to index
    %c2_170 = arith.constant 2 : index
    %203 = memref.load %arg1[%202, %c2_170] : memref<8x8xi32, #tpu.memory_space<smem>>
    %c2_i32_171 = arith.constant 2 : i32
    %c4_i32_172 = arith.constant 4 : i32
    %c2_i32_173 = arith.constant 2 : i32
    %c4_i32_174 = arith.constant 4 : i32
    %c0_i32_175 = arith.constant 0 : i32
    %204 = tpu.memref_slice %arg3[%203, %c0_i32_175] : memref<256x128xf32, #tpu.memory_space<any>> -> memref<1x128xf32, #tpu.memory_space<any>>
    %205 = tpu.memref_squeeze %204 : memref<1x128xf32, #tpu.memory_space<any>> -> memref<128xf32, #tpu.memory_space<any>>
    %c0_i32_176 = arith.constant 0 : i32
    %206 = tpu.memref_slice %arg5[%c2_i32_171, %c4_i32_172, %c0_i32_176] : memref<8x8x128xf32, #tpu.memory_space<vmem>> -> memref<1x1x128xf32, #tpu.memory_space<vmem>>
    %207 = tpu.memref_squeeze %206 : memref<1x1x128xf32, #tpu.memory_space<vmem>> -> memref<128xf32, #tpu.memory_space<vmem>>
    %208 = tpu.memref_slice %arg6[%c2_i32_173, %c4_i32_174] : memref<8x8x!tpu.dma_semaphore, #tpu.memory_space<semaphore_mem>> -> memref<1x1x!tpu.dma_semaphore, #tpu.memory_space<semaphore_mem>>
    %209 = tpu.memref_squeeze %208 : memref<1x1x!tpu.dma_semaphore, #tpu.memory_space<semaphore_mem>> -> memref<!tpu.dma_semaphore, #tpu.memory_space<semaphore_mem>>
    tpu.enqueue_dma source(%205 : memref<128xf32, #tpu.memory_space<any>>) target(%207 : memref<128xf32, #tpu.memory_space<vmem>>) target_semaphore(%209 : memref<!tpu.dma_semaphore, #tpu.memory_space<semaphore_mem>>)
    %c8_i32_177 = arith.constant 8 : i32
    %210 = arith.muli %arg0, %c8_i32_177 : i32
    %c5_i32_178 = arith.constant 5 : i32
    %211 = arith.addi %210, %c5_i32_178 : i32
    %212 = arith.index_cast %211 : i32 to index
    %c2_179 = arith.constant 2 : index
    %213 = memref.load %arg1[%212, %c2_179] : memref<8x8xi32, #tpu.memory_space<smem>>
    %c2_i32_180 = arith.constant 2 : i32
    %c5_i32_181 = arith.constant 5 : i32
    %c2_i32_182 = arith.constant 2 : i32
    %c5_i32_183 = arith.constant 5 : i32
    %c0_i32_184 = arith.constant 0 : i32
    %214 = tpu.memref_slice %arg3[%213, %c0_i32_184] : memref<256x128xf32, #tpu.memory_space<any>> -> memref<1x128xf32, #tpu.memory_space<any>>
    %215 = tpu.memref_squeeze %214 : memref<1x128xf32, #tpu.memory_space<any>> -> memref<128xf32, #tpu.memory_space<any>>
    %c0_i32_185 = arith.constant 0 : i32
    %216 = tpu.memref_slice %arg5[%c2_i32_180, %c5_i32_181, %c0_i32_185] : memref<8x8x128xf32, #tpu.memory_space<vmem>> -> memref<1x1x128xf32, #tpu.memory_space<vmem>>
    %217 = tpu.memref_squeeze %216 : memref<1x1x128xf32, #tpu.memory_space<vmem>> -> memref<128xf32, #tpu.memory_space<vmem>>
    %218 = tpu.memref_slice %arg6[%c2_i32_182, %c5_i32_183] : memref<8x8x!tpu.dma_semaphore, #tpu.memory_space<semaphore_mem>> -> memref<1x1x!tpu.dma_semaphore, #tpu.memory_space<semaphore_mem>>
    %219 = tpu.memref_squeeze %218 : memref<1x1x!tpu.dma_semaphore, #tpu.memory_space<semaphore_mem>> -> memref<!tpu.dma_semaphore, #tpu.memory_space<semaphore_mem>>
    tpu.enqueue_dma source(%215 : memref<128xf32, #tpu.memory_space<any>>) target(%217 : memref<128xf32, #tpu.memory_space<vmem>>) target_semaphore(%219 : memref<!tpu.dma_semaphore, #tpu.memory_space<semaphore_mem>>)
    %c8_i32_186 = arith.constant 8 : i32
    %220 = arith.muli %arg0, %c8_i32_186 : i32
    %c6_i32_187 = arith.constant 6 : i32
    %221 = arith.addi %220, %c6_i32_187 : i32
    %222 = arith.index_cast %221 : i32 to index
    %c2_188 = arith.constant 2 : index
    %223 = memref.load %arg1[%222, %c2_188] : memref<8x8xi32, #tpu.memory_space<smem>>
    %c2_i32_189 = arith.constant 2 : i32
    %c6_i32_190 = arith.constant 6 : i32
    %c2_i32_191 = arith.constant 2 : i32
    %c6_i32_192 = arith.constant 6 : i32
    %c0_i32_193 = arith.constant 0 : i32
    %224 = tpu.memref_slice %arg3[%223, %c0_i32_193] : memref<256x128xf32, #tpu.memory_space<any>> -> memref<1x128xf32, #tpu.memory_space<any>>
    %225 = tpu.memref_squeeze %224 : memref<1x128xf32, #tpu.memory_space<any>> -> memref<128xf32, #tpu.memory_space<any>>
    %c0_i32_194 = arith.constant 0 : i32
    %226 = tpu.memref_slice %arg5[%c2_i32_189, %c6_i32_190, %c0_i32_194] : memref<8x8x128xf32, #tpu.memory_space<vmem>> -> memref<1x1x128xf32, #tpu.memory_space<vmem>>
    %227 = tpu.memref_squeeze %226 : memref<1x1x128xf32, #tpu.memory_space<vmem>> -> memref<128xf32, #tpu.memory_space<vmem>>
    %228 = tpu.memref_slice %arg6[%c2_i32_191, %c6_i32_192] : memref<8x8x!tpu.dma_semaphore, #tpu.memory_space<semaphore_mem>> -> memref<1x1x!tpu.dma_semaphore, #tpu.memory_space<semaphore_mem>>
    %229 = tpu.memref_squeeze %228 : memref<1x1x!tpu.dma_semaphore, #tpu.memory_space<semaphore_mem>> -> memref<!tpu.dma_semaphore, #tpu.memory_space<semaphore_mem>>
    tpu.enqueue_dma source(%225 : memref<128xf32, #tpu.memory_space<any>>) target(%227 : memref<128xf32, #tpu.memory_space<vmem>>) target_semaphore(%229 : memref<!tpu.dma_semaphore, #tpu.memory_space<semaphore_mem>>)
    %c8_i32_195 = arith.constant 8 : i32
    %230 = arith.muli %arg0, %c8_i32_195 : i32
    %c7_i32_196 = arith.constant 7 : i32
    %231 = arith.addi %230, %c7_i32_196 : i32
    %232 = arith.index_cast %231 : i32 to index
    %c2_197 = arith.constant 2 : index
    %233 = memref.load %arg1[%232, %c2_197] : memref<8x8xi32, #tpu.memory_space<smem>>
    %c2_i32_198 = arith.constant 2 : i32
    %c7_i32_199 = arith.constant 7 : i32
    %c2_i32_200 = arith.constant 2 : i32
    %c7_i32_201 = arith.constant 7 : i32
    %c0_i32_202 = arith.constant 0 : i32
    %234 = tpu.memref_slice %arg3[%233, %c0_i32_202] : memref<256x128xf32, #tpu.memory_space<any>> -> memref<1x128xf32, #tpu.memory_space<any>>
    %235 = tpu.memref_squeeze %234 : memref<1x128xf32, #tpu.memory_space<any>> -> memref<128xf32, #tpu.memory_space<any>>
    %c0_i32_203 = arith.constant 0 : i32
    %236 = tpu.memref_slice %arg5[%c2_i32_198, %c7_i32_199, %c0_i32_203] : memref<8x8x128xf32, #tpu.memory_space<vmem>> -> memref<1x1x128xf32, #tpu.memory_space<vmem>>
    %237 = tpu.memref_squeeze %236 : memref<1x1x128xf32, #tpu.memory_space<vmem>> -> memref<128xf32, #tpu.memory_space<vmem>>
    %238 = tpu.memref_slice %arg6[%c2_i32_200, %c7_i32_201] : memref<8x8x!tpu.dma_semaphore, #tpu.memory_space<semaphore_mem>> -> memref<1x1x!tpu.dma_semaphore, #tpu.memory_space<semaphore_mem>>
    %239 = tpu.memref_squeeze %238 : memref<1x1x!tpu.dma_semaphore, #tpu.memory_space<semaphore_mem>> -> memref<!tpu.dma_semaphore, #tpu.memory_space<semaphore_mem>>
    tpu.enqueue_dma source(%235 : memref<128xf32, #tpu.memory_space<any>>) target(%237 : memref<128xf32, #tpu.memory_space<vmem>>) target_semaphore(%239 : memref<!tpu.dma_semaphore, #tpu.memory_space<semaphore_mem>>)
    %c8_i32_204 = arith.constant 8 : i32
    %240 = arith.muli %arg0, %c8_i32_204 : i32
    %c0_i32_205 = arith.constant 0 : i32
    %241 = arith.addi %240, %c0_i32_205 : i32
    %242 = arith.index_cast %241 : i32 to index
    %c3 = arith.constant 3 : index
    %243 = memref.load %arg1[%242, %c3] : memref<8x8xi32, #tpu.memory_space<smem>>
    %c3_i32_206 = arith.constant 3 : i32
    %c0_i32_207 = arith.constant 0 : i32
    %c3_i32_208 = arith.constant 3 : i32
    %c0_i32_209 = arith.constant 0 : i32
    %c0_i32_210 = arith.constant 0 : i32
    %244 = tpu.memref_slice %arg3[%243, %c0_i32_210] : memref<256x128xf32, #tpu.memory_space<any>> -> memref<1x128xf32, #tpu.memory_space<any>>
    %245 = tpu.memref_squeeze %244 : memref<1x128xf32, #tpu.memory_space<any>> -> memref<128xf32, #tpu.memory_space<any>>
    %c0_i32_211 = arith.constant 0 : i32
    %246 = tpu.memref_slice %arg5[%c3_i32_206, %c0_i32_207, %c0_i32_211] : memref<8x8x128xf32, #tpu.memory_space<vmem>> -> memref<1x1x128xf32, #tpu.memory_space<vmem>>
    %247 = tpu.memref_squeeze %246 : memref<1x1x128xf32, #tpu.memory_space<vmem>> -> memref<128xf32, #tpu.memory_space<vmem>>
    %248 = tpu.memref_slice %arg6[%c3_i32_208, %c0_i32_209] : memref<8x8x!tpu.dma_semaphore, #tpu.memory_space<semaphore_mem>> -> memref<1x1x!tpu.dma_semaphore, #tpu.memory_space<semaphore_mem>>
    %249 = tpu.memref_squeeze %248 : memref<1x1x!tpu.dma_semaphore, #tpu.memory_space<semaphore_mem>> -> memref<!tpu.dma_semaphore, #tpu.memory_space<semaphore_mem>>
    tpu.enqueue_dma source(%245 : memref<128xf32, #tpu.memory_space<any>>) target(%247 : memref<128xf32, #tpu.memory_space<vmem>>) target_semaphore(%249 : memref<!tpu.dma_semaphore, #tpu.memory_space<semaphore_mem>>)
    %c8_i32_212 = arith.constant 8 : i32
    %250 = arith.muli %arg0, %c8_i32_212 : i32
    %c1_i32_213 = arith.constant 1 : i32
    %251 = arith.addi %250, %c1_i32_213 : i32
    %252 = arith.index_cast %251 : i32 to index
    %c3_214 = arith.constant 3 : index
    %253 = memref.load %arg1[%252, %c3_214] : memref<8x8xi32, #tpu.memory_space<smem>>
    %c3_i32_215 = arith.constant 3 : i32
    %c1_i32_216 = arith.constant 1 : i32
    %c3_i32_217 = arith.constant 3 : i32
    %c1_i32_218 = arith.constant 1 : i32
    %c0_i32_219 = arith.constant 0 : i32
    %254 = tpu.memref_slice %arg3[%253, %c0_i32_219] : memref<256x128xf32, #tpu.memory_space<any>> -> memref<1x128xf32, #tpu.memory_space<any>>
    %255 = tpu.memref_squeeze %254 : memref<1x128xf32, #tpu.memory_space<any>> -> memref<128xf32, #tpu.memory_space<any>>
    %c0_i32_220 = arith.constant 0 : i32
    %256 = tpu.memref_slice %arg5[%c3_i32_215, %c1_i32_216, %c0_i32_220] : memref<8x8x128xf32, #tpu.memory_space<vmem>> -> memref<1x1x128xf32, #tpu.memory_space<vmem>>
    %257 = tpu.memref_squeeze %256 : memref<1x1x128xf32, #tpu.memory_space<vmem>> -> memref<128xf32, #tpu.memory_space<vmem>>
    %258 = tpu.memref_slice %arg6[%c3_i32_217, %c1_i32_218] : memref<8x8x!tpu.dma_semaphore, #tpu.memory_space<semaphore_mem>> -> memref<1x1x!tpu.dma_semaphore, #tpu.memory_space<semaphore_mem>>
    %259 = tpu.memref_squeeze %258 : memref<1x1x!tpu.dma_semaphore, #tpu.memory_space<semaphore_mem>> -> memref<!tpu.dma_semaphore, #tpu.memory_space<semaphore_mem>>
    tpu.enqueue_dma source(%255 : memref<128xf32, #tpu.memory_space<any>>) target(%257 : memref<128xf32, #tpu.memory_space<vmem>>) target_semaphore(%259 : memref<!tpu.dma_semaphore, #tpu.memory_space<semaphore_mem>>)
    %c8_i32_221 = arith.constant 8 : i32
    %260 = arith.muli %arg0, %c8_i32_221 : i32
    %c2_i32_222 = arith.constant 2 : i32
    %261 = arith.addi %260, %c2_i32_222 : i32
    %262 = arith.index_cast %261 : i32 to index
    %c3_223 = arith.constant 3 : index
    %263 = memref.load %arg1[%262, %c3_223] : memref<8x8xi32, #tpu.memory_space<smem>>
    %c3_i32_224 = arith.constant 3 : i32
    %c2_i32_225 = arith.constant 2 : i32
    %c3_i32_226 = arith.constant 3 : i32
    %c2_i32_227 = arith.constant 2 : i32
    %c0_i32_228 = arith.constant 0 : i32
    %264 = tpu.memref_slice %arg3[%263, %c0_i32_228] : memref<256x128xf32, #tpu.memory_space<any>> -> memref<1x128xf32, #tpu.memory_space<any>>
    %265 = tpu.memref_squeeze %264 : memref<1x128xf32, #tpu.memory_space<any>> -> memref<128xf32, #tpu.memory_space<any>>
    %c0_i32_229 = arith.constant 0 : i32
    %266 = tpu.memref_slice %arg5[%c3_i32_224, %c2_i32_225, %c0_i32_229] : memref<8x8x128xf32, #tpu.memory_space<vmem>> -> memref<1x1x128xf32, #tpu.memory_space<vmem>>
    %267 = tpu.memref_squeeze %266 : memref<1x1x128xf32, #tpu.memory_space<vmem>> -> memref<128xf32, #tpu.memory_space<vmem>>
    %268 = tpu.memref_slice %arg6[%c3_i32_226, %c2_i32_227] : memref<8x8x!tpu.dma_semaphore, #tpu.memory_space<semaphore_mem>> -> memref<1x1x!tpu.dma_semaphore, #tpu.memory_space<semaphore_mem>>
    %269 = tpu.memref_squeeze %268 : memref<1x1x!tpu.dma_semaphore, #tpu.memory_space<semaphore_mem>> -> memref<!tpu.dma_semaphore, #tpu.memory_space<semaphore_mem>>
    tpu.enqueue_dma source(%265 : memref<128xf32, #tpu.memory_space<any>>) target(%267 : memref<128xf32, #tpu.memory_space<vmem>>) target_semaphore(%269 : memref<!tpu.dma_semaphore, #tpu.memory_space<semaphore_mem>>)
    %c8_i32_230 = arith.constant 8 : i32
    %270 = arith.muli %arg0, %c8_i32_230 : i32
    %c3_i32_231 = arith.constant 3 : i32
    %271 = arith.addi %270, %c3_i32_231 : i32
    %272 = arith.index_cast %271 : i32 to index
    %c3_232 = arith.constant 3 : index
    %273 = memref.load %arg1[%272, %c3_232] : memref<8x8xi32, #tpu.memory_space<smem>>
    %c3_i32_233 = arith.constant 3 : i32
    %c3_i32_234 = arith.constant 3 : i32
    %c3_i32_235 = arith.constant 3 : i32
    %c3_i32_236 = arith.constant 3 : i32
    %c0_i32_237 = arith.constant 0 : i32
    %274 = tpu.memref_slice %arg3[%273, %c0_i32_237] : memref<256x128xf32, #tpu.memory_space<any>> -> memref<1x128xf32, #tpu.memory_space<any>>
    %275 = tpu.memref_squeeze %274 : memref<1x128xf32, #tpu.memory_space<any>> -> memref<128xf32, #tpu.memory_space<any>>
    %c0_i32_238 = arith.constant 0 : i32
    %276 = tpu.memref_slice %arg5[%c3_i32_233, %c3_i32_234, %c0_i32_238] : memref<8x8x128xf32, #tpu.memory_space<vmem>> -> memref<1x1x128xf32, #tpu.memory_space<vmem>>
    %277 = tpu.memref_squeeze %276 : memref<1x1x128xf32, #tpu.memory_space<vmem>> -> memref<128xf32, #tpu.memory_space<vmem>>
    %278 = tpu.memref_slice %arg6[%c3_i32_235, %c3_i32_236] : memref<8x8x!tpu.dma_semaphore, #tpu.memory_space<semaphore_mem>> -> memref<1x1x!tpu.dma_semaphore, #tpu.memory_space<semaphore_mem>>
    %279 = tpu.memref_squeeze %278 : memref<1x1x!tpu.dma_semaphore, #tpu.memory_space<semaphore_mem>> -> memref<!tpu.dma_semaphore, #tpu.memory_space<semaphore_mem>>
    tpu.enqueue_dma source(%275 : memref<128xf32, #tpu.memory_space<any>>) target(%277 : memref<128xf32, #tpu.memory_space<vmem>>) target_semaphore(%279 : memref<!tpu.dma_semaphore, #tpu.memory_space<semaphore_mem>>)
    %c8_i32_239 = arith.constant 8 : i32
    %280 = arith.muli %arg0, %c8_i32_239 : i32
    %c4_i32_240 = arith.constant 4 : i32
    %281 = arith.addi %280, %c4_i32_240 : i32
    %282 = arith.index_cast %281 : i32 to index
    %c3_241 = arith.constant 3 : index
    %283 = memref.load %arg1[%282, %c3_241] : memref<8x8xi32, #tpu.memory_space<smem>>
    %c3_i32_242 = arith.constant 3 : i32
    %c4_i32_243 = arith.constant 4 : i32
    %c3_i32_244 = arith.constant 3 : i32
    %c4_i32_245 = arith.constant 4 : i32
    %c0_i32_246 = arith.constant 0 : i32
    %284 = tpu.memref_slice %arg3[%283, %c0_i32_246] : memref<256x128xf32, #tpu.memory_space<any>> -> memref<1x128xf32, #tpu.memory_space<any>>
    %285 = tpu.memref_squeeze %284 : memref<1x128xf32, #tpu.memory_space<any>> -> memref<128xf32, #tpu.memory_space<any>>
    %c0_i32_247 = arith.constant 0 : i32
    %286 = tpu.memref_slice %arg5[%c3_i32_242, %c4_i32_243, %c0_i32_247] : memref<8x8x128xf32, #tpu.memory_space<vmem>> -> memref<1x1x128xf32, #tpu.memory_space<vmem>>
    %287 = tpu.memref_squeeze %286 : memref<1x1x128xf32, #tpu.memory_space<vmem>> -> memref<128xf32, #tpu.memory_space<vmem>>
    %288 = tpu.memref_slice %arg6[%c3_i32_244, %c4_i32_245] : memref<8x8x!tpu.dma_semaphore, #tpu.memory_space<semaphore_mem>> -> memref<1x1x!tpu.dma_semaphore, #tpu.memory_space<semaphore_mem>>
    %289 = tpu.memref_squeeze %288 : memref<1x1x!tpu.dma_semaphore, #tpu.memory_space<semaphore_mem>> -> memref<!tpu.dma_semaphore, #tpu.memory_space<semaphore_mem>>
    tpu.enqueue_dma source(%285 : memref<128xf32, #tpu.memory_space<any>>) target(%287 : memref<128xf32, #tpu.memory_space<vmem>>) target_semaphore(%289 : memref<!tpu.dma_semaphore, #tpu.memory_space<semaphore_mem>>)
    %c8_i32_248 = arith.constant 8 : i32
    %290 = arith.muli %arg0, %c8_i32_248 : i32
    %c5_i32_249 = arith.constant 5 : i32
    %291 = arith.addi %290, %c5_i32_249 : i32
    %292 = arith.index_cast %291 : i32 to index
    %c3_250 = arith.constant 3 : index
    %293 = memref.load %arg1[%292, %c3_250] : memref<8x8xi32, #tpu.memory_space<smem>>
    %c3_i32_251 = arith.constant 3 : i32
    %c5_i32_252 = arith.constant 5 : i32
    %c3_i32_253 = arith.constant 3 : i32
    %c5_i32_254 = arith.constant 5 : i32
    %c0_i32_255 = arith.constant 0 : i32
    %294 = tpu.memref_slice %arg3[%293, %c0_i32_255] : memref<256x128xf32, #tpu.memory_space<any>> -> memref<1x128xf32, #tpu.memory_space<any>>
    %295 = tpu.memref_squeeze %294 : memref<1x128xf32, #tpu.memory_space<any>> -> memref<128xf32, #tpu.memory_space<any>>
    %c0_i32_256 = arith.constant 0 : i32
    %296 = tpu.memref_slice %arg5[%c3_i32_251, %c5_i32_252, %c0_i32_256] : memref<8x8x128xf32, #tpu.memory_space<vmem>> -> memref<1x1x128xf32, #tpu.memory_space<vmem>>
    %297 = tpu.memref_squeeze %296 : memref<1x1x128xf32, #tpu.memory_space<vmem>> -> memref<128xf32, #tpu.memory_space<vmem>>
    %298 = tpu.memref_slice %arg6[%c3_i32_253, %c5_i32_254] : memref<8x8x!tpu.dma_semaphore, #tpu.memory_space<semaphore_mem>> -> memref<1x1x!tpu.dma_semaphore, #tpu.memory_space<semaphore_mem>>
    %299 = tpu.memref_squeeze %298 : memref<1x1x!tpu.dma_semaphore, #tpu.memory_space<semaphore_mem>> -> memref<!tpu.dma_semaphore, #tpu.memory_space<semaphore_mem>>
    tpu.enqueue_dma source(%295 : memref<128xf32, #tpu.memory_space<any>>) target(%297 : memref<128xf32, #tpu.memory_space<vmem>>) target_semaphore(%299 : memref<!tpu.dma_semaphore, #tpu.memory_space<semaphore_mem>>)
    %c8_i32_257 = arith.constant 8 : i32
    %300 = arith.muli %arg0, %c8_i32_257 : i32
    %c6_i32_258 = arith.constant 6 : i32
    %301 = arith.addi %300, %c6_i32_258 : i32
    %302 = arith.index_cast %301 : i32 to index
    %c3_259 = arith.constant 3 : index
    %303 = memref.load %arg1[%302, %c3_259] : memref<8x8xi32, #tpu.memory_space<smem>>
    %c3_i32_260 = arith.constant 3 : i32
    %c6_i32_261 = arith.constant 6 : i32
    %c3_i32_262 = arith.constant 3 : i32
    %c6_i32_263 = arith.constant 6 : i32
    %c0_i32_264 = arith.constant 0 : i32
    %304 = tpu.memref_slice %arg3[%303, %c0_i32_264] : memref<256x128xf32, #tpu.memory_space<any>> -> memref<1x128xf32, #tpu.memory_space<any>>
    %305 = tpu.memref_squeeze %304 : memref<1x128xf32, #tpu.memory_space<any>> -> memref<128xf32, #tpu.memory_space<any>>
    %c0_i32_265 = arith.constant 0 : i32
    %306 = tpu.memref_slice %arg5[%c3_i32_260, %c6_i32_261, %c0_i32_265] : memref<8x8x128xf32, #tpu.memory_space<vmem>> -> memref<1x1x128xf32, #tpu.memory_space<vmem>>
    %307 = tpu.memref_squeeze %306 : memref<1x1x128xf32, #tpu.memory_space<vmem>> -> memref<128xf32, #tpu.memory_space<vmem>>
    %308 = tpu.memref_slice %arg6[%c3_i32_262, %c6_i32_263] : memref<8x8x!tpu.dma_semaphore, #tpu.memory_space<semaphore_mem>> -> memref<1x1x!tpu.dma_semaphore, #tpu.memory_space<semaphore_mem>>
    %309 = tpu.memref_squeeze %308 : memref<1x1x!tpu.dma_semaphore, #tpu.memory_space<semaphore_mem>> -> memref<!tpu.dma_semaphore, #tpu.memory_space<semaphore_mem>>
    tpu.enqueue_dma source(%305 : memref<128xf32, #tpu.memory_space<any>>) target(%307 : memref<128xf32, #tpu.memory_space<vmem>>) target_semaphore(%309 : memref<!tpu.dma_semaphore, #tpu.memory_space<semaphore_mem>>)
    %c8_i32_266 = arith.constant 8 : i32
    %310 = arith.muli %arg0, %c8_i32_266 : i32
    %c7_i32_267 = arith.constant 7 : i32
    %311 = arith.addi %310, %c7_i32_267 : i32
    %312 = arith.index_cast %311 : i32 to index
    %c3_268 = arith.constant 3 : index
    %313 = memref.load %arg1[%312, %c3_268] : memref<8x8xi32, #tpu.memory_space<smem>>
    %c3_i32_269 = arith.constant 3 : i32
    %c7_i32_270 = arith.constant 7 : i32
    %c3_i32_271 = arith.constant 3 : i32
    %c7_i32_272 = arith.constant 7 : i32
    %c0_i32_273 = arith.constant 0 : i32
    %314 = tpu.memref_slice %arg3[%313, %c0_i32_273] : memref<256x128xf32, #tpu.memory_space<any>> -> memref<1x128xf32, #tpu.memory_space<any>>
    %315 = tpu.memref_squeeze %314 : memref<1x128xf32, #tpu.memory_space<any>> -> memref<128xf32, #tpu.memory_space<any>>
    %c0_i32_274 = arith.constant 0 : i32
    %316 = tpu.memref_slice %arg5[%c3_i32_269, %c7_i32_270, %c0_i32_274] : memref<8x8x128xf32, #tpu.memory_space<vmem>> -> memref<1x1x128xf32, #tpu.memory_space<vmem>>
    %317 = tpu.memref_squeeze %316 : memref<1x1x128xf32, #tpu.memory_space<vmem>> -> memref<128xf32, #tpu.memory_space<vmem>>
    %318 = tpu.memref_slice %arg6[%c3_i32_271, %c7_i32_272] : memref<8x8x!tpu.dma_semaphore, #tpu.memory_space<semaphore_mem>> -> memref<1x1x!tpu.dma_semaphore, #tpu.memory_space<semaphore_mem>>
    %319 = tpu.memref_squeeze %318 : memref<1x1x!tpu.dma_semaphore, #tpu.memory_space<semaphore_mem>> -> memref<!tpu.dma_semaphore, #tpu.memory_space<semaphore_mem>>
    tpu.enqueue_dma source(%315 : memref<128xf32, #tpu.memory_space<any>>) target(%317 : memref<128xf32, #tpu.memory_space<vmem>>) target_semaphore(%319 : memref<!tpu.dma_semaphore, #tpu.memory_space<semaphore_mem>>)
    %c8_i32_275 = arith.constant 8 : i32
    %320 = arith.muli %arg0, %c8_i32_275 : i32
    %c0_i32_276 = arith.constant 0 : i32
    %321 = arith.addi %320, %c0_i32_276 : i32
    %322 = arith.index_cast %321 : i32 to index
    %c4 = arith.constant 4 : index
    %323 = memref.load %arg1[%322, %c4] : memref<8x8xi32, #tpu.memory_space<smem>>
    %c4_i32_277 = arith.constant 4 : i32
    %c0_i32_278 = arith.constant 0 : i32
    %c4_i32_279 = arith.constant 4 : i32
    %c0_i32_280 = arith.constant 0 : i32
    %c0_i32_281 = arith.constant 0 : i32
    %324 = tpu.memref_slice %arg3[%323, %c0_i32_281] : memref<256x128xf32, #tpu.memory_space<any>> -> memref<1x128xf32, #tpu.memory_space<any>>
    %325 = tpu.memref_squeeze %324 : memref<1x128xf32, #tpu.memory_space<any>> -> memref<128xf32, #tpu.memory_space<any>>
    %c0_i32_282 = arith.constant 0 : i32
    %326 = tpu.memref_slice %arg5[%c4_i32_277, %c0_i32_278, %c0_i32_282] : memref<8x8x128xf32, #tpu.memory_space<vmem>> -> memref<1x1x128xf32, #tpu.memory_space<vmem>>
    %327 = tpu.memref_squeeze %326 : memref<1x1x128xf32, #tpu.memory_space<vmem>> -> memref<128xf32, #tpu.memory_space<vmem>>
    %328 = tpu.memref_slice %arg6[%c4_i32_279, %c0_i32_280] : memref<8x8x!tpu.dma_semaphore, #tpu.memory_space<semaphore_mem>> -> memref<1x1x!tpu.dma_semaphore, #tpu.memory_space<semaphore_mem>>
    %329 = tpu.memref_squeeze %328 : memref<1x1x!tpu.dma_semaphore, #tpu.memory_space<semaphore_mem>> -> memref<!tpu.dma_semaphore, #tpu.memory_space<semaphore_mem>>
    tpu.enqueue_dma source(%325 : memref<128xf32, #tpu.memory_space<any>>) target(%327 : memref<128xf32, #tpu.memory_space<vmem>>) target_semaphore(%329 : memref<!tpu.dma_semaphore, #tpu.memory_space<semaphore_mem>>)
    %c8_i32_283 = arith.constant 8 : i32
    %330 = arith.muli %arg0, %c8_i32_283 : i32
    %c1_i32_284 = arith.constant 1 : i32
    %331 = arith.addi %330, %c1_i32_284 : i32
    %332 = arith.index_cast %331 : i32 to index
    %c4_285 = arith.constant 4 : index
    %333 = memref.load %arg1[%332, %c4_285] : memref<8x8xi32, #tpu.memory_space<smem>>
    %c4_i32_286 = arith.constant 4 : i32
    %c1_i32_287 = arith.constant 1 : i32
    %c4_i32_288 = arith.constant 4 : i32
    %c1_i32_289 = arith.constant 1 : i32
    %c0_i32_290 = arith.constant 0 : i32
    %334 = tpu.memref_slice %arg3[%333, %c0_i32_290] : memref<256x128xf32, #tpu.memory_space<any>> -> memref<1x128xf32, #tpu.memory_space<any>>
    %335 = tpu.memref_squeeze %334 : memref<1x128xf32, #tpu.memory_space<any>> -> memref<128xf32, #tpu.memory_space<any>>
    %c0_i32_291 = arith.constant 0 : i32
    %336 = tpu.memref_slice %arg5[%c4_i32_286, %c1_i32_287, %c0_i32_291] : memref<8x8x128xf32, #tpu.memory_space<vmem>> -> memref<1x1x128xf32, #tpu.memory_space<vmem>>
    %337 = tpu.memref_squeeze %336 : memref<1x1x128xf32, #tpu.memory_space<vmem>> -> memref<128xf32, #tpu.memory_space<vmem>>
    %338 = tpu.memref_slice %arg6[%c4_i32_288, %c1_i32_289] : memref<8x8x!tpu.dma_semaphore, #tpu.memory_space<semaphore_mem>> -> memref<1x1x!tpu.dma_semaphore, #tpu.memory_space<semaphore_mem>>
    %339 = tpu.memref_squeeze %338 : memref<1x1x!tpu.dma_semaphore, #tpu.memory_space<semaphore_mem>> -> memref<!tpu.dma_semaphore, #tpu.memory_space<semaphore_mem>>
    tpu.enqueue_dma source(%335 : memref<128xf32, #tpu.memory_space<any>>) target(%337 : memref<128xf32, #tpu.memory_space<vmem>>) target_semaphore(%339 : memref<!tpu.dma_semaphore, #tpu.memory_space<semaphore_mem>>)
    %c8_i32_292 = arith.constant 8 : i32
    %340 = arith.muli %arg0, %c8_i32_292 : i32
    %c2_i32_293 = arith.constant 2 : i32
    %341 = arith.addi %340, %c2_i32_293 : i32
    %342 = arith.index_cast %341 : i32 to index
    %c4_294 = arith.constant 4 : index
    %343 = memref.load %arg1[%342, %c4_294] : memref<8x8xi32, #tpu.memory_space<smem>>
    %c4_i32_295 = arith.constant 4 : i32
    %c2_i32_296 = arith.constant 2 : i32
    %c4_i32_297 = arith.constant 4 : i32
    %c2_i32_298 = arith.constant 2 : i32
    %c0_i32_299 = arith.constant 0 : i32
    %344 = tpu.memref_slice %arg3[%343, %c0_i32_299] : memref<256x128xf32, #tpu.memory_space<any>> -> memref<1x128xf32, #tpu.memory_space<any>>
    %345 = tpu.memref_squeeze %344 : memref<1x128xf32, #tpu.memory_space<any>> -> memref<128xf32, #tpu.memory_space<any>>
    %c0_i32_300 = arith.constant 0 : i32
    %346 = tpu.memref_slice %arg5[%c4_i32_295, %c2_i32_296, %c0_i32_300] : memref<8x8x128xf32, #tpu.memory_space<vmem>> -> memref<1x1x128xf32, #tpu.memory_space<vmem>>
    %347 = tpu.memref_squeeze %346 : memref<1x1x128xf32, #tpu.memory_space<vmem>> -> memref<128xf32, #tpu.memory_space<vmem>>
    %348 = tpu.memref_slice %arg6[%c4_i32_297, %c2_i32_298] : memref<8x8x!tpu.dma_semaphore, #tpu.memory_space<semaphore_mem>> -> memref<1x1x!tpu.dma_semaphore, #tpu.memory_space<semaphore_mem>>
    %349 = tpu.memref_squeeze %348 : memref<1x1x!tpu.dma_semaphore, #tpu.memory_space<semaphore_mem>> -> memref<!tpu.dma_semaphore, #tpu.memory_space<semaphore_mem>>
    tpu.enqueue_dma source(%345 : memref<128xf32, #tpu.memory_space<any>>) target(%347 : memref<128xf32, #tpu.memory_space<vmem>>) target_semaphore(%349 : memref<!tpu.dma_semaphore, #tpu.memory_space<semaphore_mem>>)
    %c8_i32_301 = arith.constant 8 : i32
    %350 = arith.muli %arg0, %c8_i32_301 : i32
    %c3_i32_302 = arith.constant 3 : i32
    %351 = arith.addi %350, %c3_i32_302 : i32
    %352 = arith.index_cast %351 : i32 to index
    %c4_303 = arith.constant 4 : index
    %353 = memref.load %arg1[%352, %c4_303] : memref<8x8xi32, #tpu.memory_space<smem>>
    %c4_i32_304 = arith.constant 4 : i32
    %c3_i32_305 = arith.constant 3 : i32
    %c4_i32_306 = arith.constant 4 : i32
    %c3_i32_307 = arith.constant 3 : i32
    %c0_i32_308 = arith.constant 0 : i32
    %354 = tpu.memref_slice %arg3[%353, %c0_i32_308] : memref<256x128xf32, #tpu.memory_space<any>> -> memref<1x128xf32, #tpu.memory_space<any>>
    %355 = tpu.memref_squeeze %354 : memref<1x128xf32, #tpu.memory_space<any>> -> memref<128xf32, #tpu.memory_space<any>>
    %c0_i32_309 = arith.constant 0 : i32
    %356 = tpu.memref_slice %arg5[%c4_i32_304, %c3_i32_305, %c0_i32_309] : memref<8x8x128xf32, #tpu.memory_space<vmem>> -> memref<1x1x128xf32, #tpu.memory_space<vmem>>
    %357 = tpu.memref_squeeze %356 : memref<1x1x128xf32, #tpu.memory_space<vmem>> -> memref<128xf32, #tpu.memory_space<vmem>>
    %358 = tpu.memref_slice %arg6[%c4_i32_306, %c3_i32_307] : memref<8x8x!tpu.dma_semaphore, #tpu.memory_space<semaphore_mem>> -> memref<1x1x!tpu.dma_semaphore, #tpu.memory_space<semaphore_mem>>
    %359 = tpu.memref_squeeze %358 : memref<1x1x!tpu.dma_semaphore, #tpu.memory_space<semaphore_mem>> -> memref<!tpu.dma_semaphore, #tpu.memory_space<semaphore_mem>>
    tpu.enqueue_dma source(%355 : memref<128xf32, #tpu.memory_space<any>>) target(%357 : memref<128xf32, #tpu.memory_space<vmem>>) target_semaphore(%359 : memref<!tpu.dma_semaphore, #tpu.memory_space<semaphore_mem>>)
    %c8_i32_310 = arith.constant 8 : i32
    %360 = arith.muli %arg0, %c8_i32_310 : i32
    %c4_i32_311 = arith.constant 4 : i32
    %361 = arith.addi %360, %c4_i32_311 : i32
    %362 = arith.index_cast %361 : i32 to index
    %c4_312 = arith.constant 4 : index
    %363 = memref.load %arg1[%362, %c4_312] : memref<8x8xi32, #tpu.memory_space<smem>>
    %c4_i32_313 = arith.constant 4 : i32
    %c4_i32_314 = arith.constant 4 : i32
    %c4_i32_315 = arith.constant 4 : i32
    %c4_i32_316 = arith.constant 4 : i32
    %c0_i32_317 = arith.constant 0 : i32
    %364 = tpu.memref_slice %arg3[%363, %c0_i32_317] : memref<256x128xf32, #tpu.memory_space<any>> -> memref<1x128xf32, #tpu.memory_space<any>>
    %365 = tpu.memref_squeeze %364 : memref<1x128xf32, #tpu.memory_space<any>> -> memref<128xf32, #tpu.memory_space<any>>
    %c0_i32_318 = arith.constant 0 : i32
    %366 = tpu.memref_slice %arg5[%c4_i32_313, %c4_i32_314, %c0_i32_318] : memref<8x8x128xf32, #tpu.memory_space<vmem>> -> memref<1x1x128xf32, #tpu.memory_space<vmem>>
    %367 = tpu.memref_squeeze %366 : memref<1x1x128xf32, #tpu.memory_space<vmem>> -> memref<128xf32, #tpu.memory_space<vmem>>
    %368 = tpu.memref_slice %arg6[%c4_i32_315, %c4_i32_316] : memref<8x8x!tpu.dma_semaphore, #tpu.memory_space<semaphore_mem>> -> memref<1x1x!tpu.dma_semaphore, #tpu.memory_space<semaphore_mem>>
    %369 = tpu.memref_squeeze %368 : memref<1x1x!tpu.dma_semaphore, #tpu.memory_space<semaphore_mem>> -> memref<!tpu.dma_semaphore, #tpu.memory_space<semaphore_mem>>
    tpu.enqueue_dma source(%365 : memref<128xf32, #tpu.memory_space<any>>) target(%367 : memref<128xf32, #tpu.memory_space<vmem>>) target_semaphore(%369 : memref<!tpu.dma_semaphore, #tpu.memory_space<semaphore_mem>>)
    %c8_i32_319 = arith.constant 8 : i32
    %370 = arith.muli %arg0, %c8_i32_319 : i32
    %c5_i32_320 = arith.constant 5 : i32
    %371 = arith.addi %370, %c5_i32_320 : i32
    %372 = arith.index_cast %371 : i32 to index
    %c4_321 = arith.constant 4 : index
    %373 = memref.load %arg1[%372, %c4_321] : memref<8x8xi32, #tpu.memory_space<smem>>
    %c4_i32_322 = arith.constant 4 : i32
    %c5_i32_323 = arith.constant 5 : i32
    %c4_i32_324 = arith.constant 4 : i32
    %c5_i32_325 = arith.constant 5 : i32
    %c0_i32_326 = arith.constant 0 : i32
    %374 = tpu.memref_slice %arg3[%373, %c0_i32_326] : memref<256x128xf32, #tpu.memory_space<any>> -> memref<1x128xf32, #tpu.memory_space<any>>
    %375 = tpu.memref_squeeze %374 : memref<1x128xf32, #tpu.memory_space<any>> -> memref<128xf32, #tpu.memory_space<any>>
    %c0_i32_327 = arith.constant 0 : i32
    %376 = tpu.memref_slice %arg5[%c4_i32_322, %c5_i32_323, %c0_i32_327] : memref<8x8x128xf32, #tpu.memory_space<vmem>> -> memref<1x1x128xf32, #tpu.memory_space<vmem>>
    %377 = tpu.memref_squeeze %376 : memref<1x1x128xf32, #tpu.memory_space<vmem>> -> memref<128xf32, #tpu.memory_space<vmem>>
    %378 = tpu.memref_slice %arg6[%c4_i32_324, %c5_i32_325] : memref<8x8x!tpu.dma_semaphore, #tpu.memory_space<semaphore_mem>> -> memref<1x1x!tpu.dma_semaphore, #tpu.memory_space<semaphore_mem>>
    %379 = tpu.memref_squeeze %378 : memref<1x1x!tpu.dma_semaphore, #tpu.memory_space<semaphore_mem>> -> memref<!tpu.dma_semaphore, #tpu.memory_space<semaphore_mem>>
    tpu.enqueue_dma source(%375 : memref<128xf32, #tpu.memory_space<any>>) target(%377 : memref<128xf32, #tpu.memory_space<vmem>>) target_semaphore(%379 : memref<!tpu.dma_semaphore, #tpu.memory_space<semaphore_mem>>)
    %c8_i32_328 = arith.constant 8 : i32
    %380 = arith.muli %arg0, %c8_i32_328 : i32
    %c6_i32_329 = arith.constant 6 : i32
    %381 = arith.addi %380, %c6_i32_329 : i32
    %382 = arith.index_cast %381 : i32 to index
    %c4_330 = arith.constant 4 : index
    %383 = memref.load %arg1[%382, %c4_330] : memref<8x8xi32, #tpu.memory_space<smem>>
    %c4_i32_331 = arith.constant 4 : i32
    %c6_i32_332 = arith.constant 6 : i32
    %c4_i32_333 = arith.constant 4 : i32
    %c6_i32_334 = arith.constant 6 : i32
    %c0_i32_335 = arith.constant 0 : i32
    %384 = tpu.memref_slice %arg3[%383, %c0_i32_335] : memref<256x128xf32, #tpu.memory_space<any>> -> memref<1x128xf32, #tpu.memory_space<any>>
    %385 = tpu.memref_squeeze %384 : memref<1x128xf32, #tpu.memory_space<any>> -> memref<128xf32, #tpu.memory_space<any>>
    %c0_i32_336 = arith.constant 0 : i32
    %386 = tpu.memref_slice %arg5[%c4_i32_331, %c6_i32_332, %c0_i32_336] : memref<8x8x128xf32, #tpu.memory_space<vmem>> -> memref<1x1x128xf32, #tpu.memory_space<vmem>>
    %387 = tpu.memref_squeeze %386 : memref<1x1x128xf32, #tpu.memory_space<vmem>> -> memref<128xf32, #tpu.memory_space<vmem>>
    %388 = tpu.memref_slice %arg6[%c4_i32_333, %c6_i32_334] : memref<8x8x!tpu.dma_semaphore, #tpu.memory_space<semaphore_mem>> -> memref<1x1x!tpu.dma_semaphore, #tpu.memory_space<semaphore_mem>>
    %389 = tpu.memref_squeeze %388 : memref<1x1x!tpu.dma_semaphore, #tpu.memory_space<semaphore_mem>> -> memref<!tpu.dma_semaphore, #tpu.memory_space<semaphore_mem>>
    tpu.enqueue_dma source(%385 : memref<128xf32, #tpu.memory_space<any>>) target(%387 : memref<128xf32, #tpu.memory_space<vmem>>) target_semaphore(%389 : memref<!tpu.dma_semaphore, #tpu.memory_space<semaphore_mem>>)
    %c8_i32_337 = arith.constant 8 : i32
    %390 = arith.muli %arg0, %c8_i32_337 : i32
    %c7_i32_338 = arith.constant 7 : i32
    %391 = arith.addi %390, %c7_i32_338 : i32
    %392 = arith.index_cast %391 : i32 to index
    %c4_339 = arith.constant 4 : index
    %393 = memref.load %arg1[%392, %c4_339] : memref<8x8xi32, #tpu.memory_space<smem>>
    %c4_i32_340 = arith.constant 4 : i32
    %c7_i32_341 = arith.constant 7 : i32
    %c4_i32_342 = arith.constant 4 : i32
    %c7_i32_343 = arith.constant 7 : i32
    %c0_i32_344 = arith.constant 0 : i32
    %394 = tpu.memref_slice %arg3[%393, %c0_i32_344] : memref<256x128xf32, #tpu.memory_space<any>> -> memref<1x128xf32, #tpu.memory_space<any>>
    %395 = tpu.memref_squeeze %394 : memref<1x128xf32, #tpu.memory_space<any>> -> memref<128xf32, #tpu.memory_space<any>>
    %c0_i32_345 = arith.constant 0 : i32
    %396 = tpu.memref_slice %arg5[%c4_i32_340, %c7_i32_341, %c0_i32_345] : memref<8x8x128xf32, #tpu.memory_space<vmem>> -> memref<1x1x128xf32, #tpu.memory_space<vmem>>
    %397 = tpu.memref_squeeze %396 : memref<1x1x128xf32, #tpu.memory_space<vmem>> -> memref<128xf32, #tpu.memory_space<vmem>>
    %398 = tpu.memref_slice %arg6[%c4_i32_342, %c7_i32_343] : memref<8x8x!tpu.dma_semaphore, #tpu.memory_space<semaphore_mem>> -> memref<1x1x!tpu.dma_semaphore, #tpu.memory_space<semaphore_mem>>
    %399 = tpu.memref_squeeze %398 : memref<1x1x!tpu.dma_semaphore, #tpu.memory_space<semaphore_mem>> -> memref<!tpu.dma_semaphore, #tpu.memory_space<semaphore_mem>>
    tpu.enqueue_dma source(%395 : memref<128xf32, #tpu.memory_space<any>>) target(%397 : memref<128xf32, #tpu.memory_space<vmem>>) target_semaphore(%399 : memref<!tpu.dma_semaphore, #tpu.memory_space<semaphore_mem>>)
    %c8_i32_346 = arith.constant 8 : i32
    %400 = arith.muli %arg0, %c8_i32_346 : i32
    %c0_i32_347 = arith.constant 0 : i32
    %401 = arith.addi %400, %c0_i32_347 : i32
    %402 = arith.index_cast %401 : i32 to index
    %c5 = arith.constant 5 : index
    %403 = memref.load %arg1[%402, %c5] : memref<8x8xi32, #tpu.memory_space<smem>>
    %c5_i32_348 = arith.constant 5 : i32
    %c0_i32_349 = arith.constant 0 : i32
    %c5_i32_350 = arith.constant 5 : i32
    %c0_i32_351 = arith.constant 0 : i32
    %c0_i32_352 = arith.constant 0 : i32
    %404 = tpu.memref_slice %arg3[%403, %c0_i32_352] : memref<256x128xf32, #tpu.memory_space<any>> -> memref<1x128xf32, #tpu.memory_space<any>>
    %405 = tpu.memref_squeeze %404 : memref<1x128xf32, #tpu.memory_space<any>> -> memref<128xf32, #tpu.memory_space<any>>
    %c0_i32_353 = arith.constant 0 : i32
    %406 = tpu.memref_slice %arg5[%c5_i32_348, %c0_i32_349, %c0_i32_353] : memref<8x8x128xf32, #tpu.memory_space<vmem>> -> memref<1x1x128xf32, #tpu.memory_space<vmem>>
    %407 = tpu.memref_squeeze %406 : memref<1x1x128xf32, #tpu.memory_space<vmem>> -> memref<128xf32, #tpu.memory_space<vmem>>
    %408 = tpu.memref_slice %arg6[%c5_i32_350, %c0_i32_351] : memref<8x8x!tpu.dma_semaphore, #tpu.memory_space<semaphore_mem>> -> memref<1x1x!tpu.dma_semaphore, #tpu.memory_space<semaphore_mem>>
    %409 = tpu.memref_squeeze %408 : memref<1x1x!tpu.dma_semaphore, #tpu.memory_space<semaphore_mem>> -> memref<!tpu.dma_semaphore, #tpu.memory_space<semaphore_mem>>
    tpu.enqueue_dma source(%405 : memref<128xf32, #tpu.memory_space<any>>) target(%407 : memref<128xf32, #tpu.memory_space<vmem>>) target_semaphore(%409 : memref<!tpu.dma_semaphore, #tpu.memory_space<semaphore_mem>>)
    %c8_i32_354 = arith.constant 8 : i32
    %410 = arith.muli %arg0, %c8_i32_354 : i32
    %c1_i32_355 = arith.constant 1 : i32
    %411 = arith.addi %410, %c1_i32_355 : i32
    %412 = arith.index_cast %411 : i32 to index
    %c5_356 = arith.constant 5 : index
    %413 = memref.load %arg1[%412, %c5_356] : memref<8x8xi32, #tpu.memory_space<smem>>
    %c5_i32_357 = arith.constant 5 : i32
    %c1_i32_358 = arith.constant 1 : i32
    %c5_i32_359 = arith.constant 5 : i32
    %c1_i32_360 = arith.constant 1 : i32
    %c0_i32_361 = arith.constant 0 : i32
    %414 = tpu.memref_slice %arg3[%413, %c0_i32_361] : memref<256x128xf32, #tpu.memory_space<any>> -> memref<1x128xf32, #tpu.memory_space<any>>
    %415 = tpu.memref_squeeze %414 : memref<1x128xf32, #tpu.memory_space<any>> -> memref<128xf32, #tpu.memory_space<any>>
    %c0_i32_362 = arith.constant 0 : i32
    %416 = tpu.memref_slice %arg5[%c5_i32_357, %c1_i32_358, %c0_i32_362] : memref<8x8x128xf32, #tpu.memory_space<vmem>> -> memref<1x1x128xf32, #tpu.memory_space<vmem>>
    %417 = tpu.memref_squeeze %416 : memref<1x1x128xf32, #tpu.memory_space<vmem>> -> memref<128xf32, #tpu.memory_space<vmem>>
    %418 = tpu.memref_slice %arg6[%c5_i32_359, %c1_i32_360] : memref<8x8x!tpu.dma_semaphore, #tpu.memory_space<semaphore_mem>> -> memref<1x1x!tpu.dma_semaphore, #tpu.memory_space<semaphore_mem>>
    %419 = tpu.memref_squeeze %418 : memref<1x1x!tpu.dma_semaphore, #tpu.memory_space<semaphore_mem>> -> memref<!tpu.dma_semaphore, #tpu.memory_space<semaphore_mem>>
    tpu.enqueue_dma source(%415 : memref<128xf32, #tpu.memory_space<any>>) target(%417 : memref<128xf32, #tpu.memory_space<vmem>>) target_semaphore(%419 : memref<!tpu.dma_semaphore, #tpu.memory_space<semaphore_mem>>)
    %c8_i32_363 = arith.constant 8 : i32
    %420 = arith.muli %arg0, %c8_i32_363 : i32
    %c2_i32_364 = arith.constant 2 : i32
    %421 = arith.addi %420, %c2_i32_364 : i32
    %422 = arith.index_cast %421 : i32 to index
    %c5_365 = arith.constant 5 : index
    %423 = memref.load %arg1[%422, %c5_365] : memref<8x8xi32, #tpu.memory_space<smem>>
    %c5_i32_366 = arith.constant 5 : i32
    %c2_i32_367 = arith.constant 2 : i32
    %c5_i32_368 = arith.constant 5 : i32
    %c2_i32_369 = arith.constant 2 : i32
    %c0_i32_370 = arith.constant 0 : i32
    %424 = tpu.memref_slice %arg3[%423, %c0_i32_370] : memref<256x128xf32, #tpu.memory_space<any>> -> memref<1x128xf32, #tpu.memory_space<any>>
    %425 = tpu.memref_squeeze %424 : memref<1x128xf32, #tpu.memory_space<any>> -> memref<128xf32, #tpu.memory_space<any>>
    %c0_i32_371 = arith.constant 0 : i32
    %426 = tpu.memref_slice %arg5[%c5_i32_366, %c2_i32_367, %c0_i32_371] : memref<8x8x128xf32, #tpu.memory_space<vmem>> -> memref<1x1x128xf32, #tpu.memory_space<vmem>>
    %427 = tpu.memref_squeeze %426 : memref<1x1x128xf32, #tpu.memory_space<vmem>> -> memref<128xf32, #tpu.memory_space<vmem>>
    %428 = tpu.memref_slice %arg6[%c5_i32_368, %c2_i32_369] : memref<8x8x!tpu.dma_semaphore, #tpu.memory_space<semaphore_mem>> -> memref<1x1x!tpu.dma_semaphore, #tpu.memory_space<semaphore_mem>>
    %429 = tpu.memref_squeeze %428 : memref<1x1x!tpu.dma_semaphore, #tpu.memory_space<semaphore_mem>> -> memref<!tpu.dma_semaphore, #tpu.memory_space<semaphore_mem>>
    tpu.enqueue_dma source(%425 : memref<128xf32, #tpu.memory_space<any>>) target(%427 : memref<128xf32, #tpu.memory_space<vmem>>) target_semaphore(%429 : memref<!tpu.dma_semaphore, #tpu.memory_space<semaphore_mem>>)
    %c8_i32_372 = arith.constant 8 : i32
    %430 = arith.muli %arg0, %c8_i32_372 : i32
    %c3_i32_373 = arith.constant 3 : i32
    %431 = arith.addi %430, %c3_i32_373 : i32
    %432 = arith.index_cast %431 : i32 to index
    %c5_374 = arith.constant 5 : index
    %433 = memref.load %arg1[%432, %c5_374] : memref<8x8xi32, #tpu.memory_space<smem>>
    %c5_i32_375 = arith.constant 5 : i32
    %c3_i32_376 = arith.constant 3 : i32
    %c5_i32_377 = arith.constant 5 : i32
    %c3_i32_378 = arith.constant 3 : i32
    %c0_i32_379 = arith.constant 0 : i32
    %434 = tpu.memref_slice %arg3[%433, %c0_i32_379] : memref<256x128xf32, #tpu.memory_space<any>> -> memref<1x128xf32, #tpu.memory_space<any>>
    %435 = tpu.memref_squeeze %434 : memref<1x128xf32, #tpu.memory_space<any>> -> memref<128xf32, #tpu.memory_space<any>>
    %c0_i32_380 = arith.constant 0 : i32
    %436 = tpu.memref_slice %arg5[%c5_i32_375, %c3_i32_376, %c0_i32_380] : memref<8x8x128xf32, #tpu.memory_space<vmem>> -> memref<1x1x128xf32, #tpu.memory_space<vmem>>
    %437 = tpu.memref_squeeze %436 : memref<1x1x128xf32, #tpu.memory_space<vmem>> -> memref<128xf32, #tpu.memory_space<vmem>>
    %438 = tpu.memref_slice %arg6[%c5_i32_377, %c3_i32_378] : memref<8x8x!tpu.dma_semaphore, #tpu.memory_space<semaphore_mem>> -> memref<1x1x!tpu.dma_semaphore, #tpu.memory_space<semaphore_mem>>
    %439 = tpu.memref_squeeze %438 : memref<1x1x!tpu.dma_semaphore, #tpu.memory_space<semaphore_mem>> -> memref<!tpu.dma_semaphore, #tpu.memory_space<semaphore_mem>>
    tpu.enqueue_dma source(%435 : memref<128xf32, #tpu.memory_space<any>>) target(%437 : memref<128xf32, #tpu.memory_space<vmem>>) target_semaphore(%439 : memref<!tpu.dma_semaphore, #tpu.memory_space<semaphore_mem>>)
    %c8_i32_381 = arith.constant 8 : i32
    %440 = arith.muli %arg0, %c8_i32_381 : i32
    %c4_i32_382 = arith.constant 4 : i32
    %441 = arith.addi %440, %c4_i32_382 : i32
    %442 = arith.index_cast %441 : i32 to index
    %c5_383 = arith.constant 5 : index
    %443 = memref.load %arg1[%442, %c5_383] : memref<8x8xi32, #tpu.memory_space<smem>>
    %c5_i32_384 = arith.constant 5 : i32
    %c4_i32_385 = arith.constant 4 : i32
    %c5_i32_386 = arith.constant 5 : i32
    %c4_i32_387 = arith.constant 4 : i32
    %c0_i32_388 = arith.constant 0 : i32
    %444 = tpu.memref_slice %arg3[%443, %c0_i32_388] : memref<256x128xf32, #tpu.memory_space<any>> -> memref<1x128xf32, #tpu.memory_space<any>>
    %445 = tpu.memref_squeeze %444 : memref<1x128xf32, #tpu.memory_space<any>> -> memref<128xf32, #tpu.memory_space<any>>
    %c0_i32_389 = arith.constant 0 : i32
    %446 = tpu.memref_slice %arg5[%c5_i32_384, %c4_i32_385, %c0_i32_389] : memref<8x8x128xf32, #tpu.memory_space<vmem>> -> memref<1x1x128xf32, #tpu.memory_space<vmem>>
    %447 = tpu.memref_squeeze %446 : memref<1x1x128xf32, #tpu.memory_space<vmem>> -> memref<128xf32, #tpu.memory_space<vmem>>
    %448 = tpu.memref_slice %arg6[%c5_i32_386, %c4_i32_387] : memref<8x8x!tpu.dma_semaphore, #tpu.memory_space<semaphore_mem>> -> memref<1x1x!tpu.dma_semaphore, #tpu.memory_space<semaphore_mem>>
    %449 = tpu.memref_squeeze %448 : memref<1x1x!tpu.dma_semaphore, #tpu.memory_space<semaphore_mem>> -> memref<!tpu.dma_semaphore, #tpu.memory_space<semaphore_mem>>
    tpu.enqueue_dma source(%445 : memref<128xf32, #tpu.memory_space<any>>) target(%447 : memref<128xf32, #tpu.memory_space<vmem>>) target_semaphore(%449 : memref<!tpu.dma_semaphore, #tpu.memory_space<semaphore_mem>>)
    %c8_i32_390 = arith.constant 8 : i32
    %450 = arith.muli %arg0, %c8_i32_390 : i32
    %c5_i32_391 = arith.constant 5 : i32
    %451 = arith.addi %450, %c5_i32_391 : i32
    %452 = arith.index_cast %451 : i32 to index
    %c5_392 = arith.constant 5 : index
    %453 = memref.load %arg1[%452, %c5_392] : memref<8x8xi32, #tpu.memory_space<smem>>
    %c5_i32_393 = arith.constant 5 : i32
    %c5_i32_394 = arith.constant 5 : i32
    %c5_i32_395 = arith.constant 5 : i32
    %c5_i32_396 = arith.constant 5 : i32
    %c0_i32_397 = arith.constant 0 : i32
    %454 = tpu.memref_slice %arg3[%453, %c0_i32_397] : memref<256x128xf32, #tpu.memory_space<any>> -> memref<1x128xf32, #tpu.memory_space<any>>
    %455 = tpu.memref_squeeze %454 : memref<1x128xf32, #tpu.memory_space<any>> -> memref<128xf32, #tpu.memory_space<any>>
    %c0_i32_398 = arith.constant 0 : i32
    %456 = tpu.memref_slice %arg5[%c5_i32_393, %c5_i32_394, %c0_i32_398] : memref<8x8x128xf32, #tpu.memory_space<vmem>> -> memref<1x1x128xf32, #tpu.memory_space<vmem>>
    %457 = tpu.memref_squeeze %456 : memref<1x1x128xf32, #tpu.memory_space<vmem>> -> memref<128xf32, #tpu.memory_space<vmem>>
    %458 = tpu.memref_slice %arg6[%c5_i32_395, %c5_i32_396] : memref<8x8x!tpu.dma_semaphore, #tpu.memory_space<semaphore_mem>> -> memref<1x1x!tpu.dma_semaphore, #tpu.memory_space<semaphore_mem>>
    %459 = tpu.memref_squeeze %458 : memref<1x1x!tpu.dma_semaphore, #tpu.memory_space<semaphore_mem>> -> memref<!tpu.dma_semaphore, #tpu.memory_space<semaphore_mem>>
    tpu.enqueue_dma source(%455 : memref<128xf32, #tpu.memory_space<any>>) target(%457 : memref<128xf32, #tpu.memory_space<vmem>>) target_semaphore(%459 : memref<!tpu.dma_semaphore, #tpu.memory_space<semaphore_mem>>)
    %c8_i32_399 = arith.constant 8 : i32
    %460 = arith.muli %arg0, %c8_i32_399 : i32
    %c6_i32_400 = arith.constant 6 : i32
    %461 = arith.addi %460, %c6_i32_400 : i32
    %462 = arith.index_cast %461 : i32 to index
    %c5_401 = arith.constant 5 : index
    %463 = memref.load %arg1[%462, %c5_401] : memref<8x8xi32, #tpu.memory_space<smem>>
    %c5_i32_402 = arith.constant 5 : i32
    %c6_i32_403 = arith.constant 6 : i32
    %c5_i32_404 = arith.constant 5 : i32
    %c6_i32_405 = arith.constant 6 : i32
    %c0_i32_406 = arith.constant 0 : i32
    %464 = tpu.memref_slice %arg3[%463, %c0_i32_406] : memref<256x128xf32, #tpu.memory_space<any>> -> memref<1x128xf32, #tpu.memory_space<any>>
    %465 = tpu.memref_squeeze %464 : memref<1x128xf32, #tpu.memory_space<any>> -> memref<128xf32, #tpu.memory_space<any>>
    %c0_i32_407 = arith.constant 0 : i32
    %466 = tpu.memref_slice %arg5[%c5_i32_402, %c6_i32_403, %c0_i32_407] : memref<8x8x128xf32, #tpu.memory_space<vmem>> -> memref<1x1x128xf32, #tpu.memory_space<vmem>>
    %467 = tpu.memref_squeeze %466 : memref<1x1x128xf32, #tpu.memory_space<vmem>> -> memref<128xf32, #tpu.memory_space<vmem>>
    %468 = tpu.memref_slice %arg6[%c5_i32_404, %c6_i32_405] : memref<8x8x!tpu.dma_semaphore, #tpu.memory_space<semaphore_mem>> -> memref<1x1x!tpu.dma_semaphore, #tpu.memory_space<semaphore_mem>>
    %469 = tpu.memref_squeeze %468 : memref<1x1x!tpu.dma_semaphore, #tpu.memory_space<semaphore_mem>> -> memref<!tpu.dma_semaphore, #tpu.memory_space<semaphore_mem>>
    tpu.enqueue_dma source(%465 : memref<128xf32, #tpu.memory_space<any>>) target(%467 : memref<128xf32, #tpu.memory_space<vmem>>) target_semaphore(%469 : memref<!tpu.dma_semaphore, #tpu.memory_space<semaphore_mem>>)
    %c8_i32_408 = arith.constant 8 : i32
    %470 = arith.muli %arg0, %c8_i32_408 : i32
    %c7_i32_409 = arith.constant 7 : i32
    %471 = arith.addi %470, %c7_i32_409 : i32
    %472 = arith.index_cast %471 : i32 to index
    %c5_410 = arith.constant 5 : index
    %473 = memref.load %arg1[%472, %c5_410] : memref<8x8xi32, #tpu.memory_space<smem>>
    %c5_i32_411 = arith.constant 5 : i32
    %c7_i32_412 = arith.constant 7 : i32
    %c5_i32_413 = arith.constant 5 : i32
    %c7_i32_414 = arith.constant 7 : i32
    %c0_i32_415 = arith.constant 0 : i32
    %474 = tpu.memref_slice %arg3[%473, %c0_i32_415] : memref<256x128xf32, #tpu.memory_space<any>> -> memref<1x128xf32, #tpu.memory_space<any>>
    %475 = tpu.memref_squeeze %474 : memref<1x128xf32, #tpu.memory_space<any>> -> memref<128xf32, #tpu.memory_space<any>>
    %c0_i32_416 = arith.constant 0 : i32
    %476 = tpu.memref_slice %arg5[%c5_i32_411, %c7_i32_412, %c0_i32_416] : memref<8x8x128xf32, #tpu.memory_space<vmem>> -> memref<1x1x128xf32, #tpu.memory_space<vmem>>
    %477 = tpu.memref_squeeze %476 : memref<1x1x128xf32, #tpu.memory_space<vmem>> -> memref<128xf32, #tpu.memory_space<vmem>>
    %478 = tpu.memref_slice %arg6[%c5_i32_413, %c7_i32_414] : memref<8x8x!tpu.dma_semaphore, #tpu.memory_space<semaphore_mem>> -> memref<1x1x!tpu.dma_semaphore, #tpu.memory_space<semaphore_mem>>
    %479 = tpu.memref_squeeze %478 : memref<1x1x!tpu.dma_semaphore, #tpu.memory_space<semaphore_mem>> -> memref<!tpu.dma_semaphore, #tpu.memory_space<semaphore_mem>>
    tpu.enqueue_dma source(%475 : memref<128xf32, #tpu.memory_space<any>>) target(%477 : memref<128xf32, #tpu.memory_space<vmem>>) target_semaphore(%479 : memref<!tpu.dma_semaphore, #tpu.memory_space<semaphore_mem>>)
    %c8_i32_417 = arith.constant 8 : i32
    %480 = arith.muli %arg0, %c8_i32_417 : i32
    %c0_i32_418 = arith.constant 0 : i32
    %481 = arith.addi %480, %c0_i32_418 : i32
    %482 = arith.index_cast %481 : i32 to index
    %c6 = arith.constant 6 : index
    %483 = memref.load %arg1[%482, %c6] : memref<8x8xi32, #tpu.memory_space<smem>>
    %c6_i32_419 = arith.constant 6 : i32
    %c0_i32_420 = arith.constant 0 : i32
    %c6_i32_421 = arith.constant 6 : i32
    %c0_i32_422 = arith.constant 0 : i32
    %c0_i32_423 = arith.constant 0 : i32
    %484 = tpu.memref_slice %arg3[%483, %c0_i32_423] : memref<256x128xf32, #tpu.memory_space<any>> -> memref<1x128xf32, #tpu.memory_space<any>>
    %485 = tpu.memref_squeeze %484 : memref<1x128xf32, #tpu.memory_space<any>> -> memref<128xf32, #tpu.memory_space<any>>
    %c0_i32_424 = arith.constant 0 : i32
    %486 = tpu.memref_slice %arg5[%c6_i32_419, %c0_i32_420, %c0_i32_424] : memref<8x8x128xf32, #tpu.memory_space<vmem>> -> memref<1x1x128xf32, #tpu.memory_space<vmem>>
    %487 = tpu.memref_squeeze %486 : memref<1x1x128xf32, #tpu.memory_space<vmem>> -> memref<128xf32, #tpu.memory_space<vmem>>
    %488 = tpu.memref_slice %arg6[%c6_i32_421, %c0_i32_422] : memref<8x8x!tpu.dma_semaphore, #tpu.memory_space<semaphore_mem>> -> memref<1x1x!tpu.dma_semaphore, #tpu.memory_space<semaphore_mem>>
    %489 = tpu.memref_squeeze %488 : memref<1x1x!tpu.dma_semaphore, #tpu.memory_space<semaphore_mem>> -> memref<!tpu.dma_semaphore, #tpu.memory_space<semaphore_mem>>
    tpu.enqueue_dma source(%485 : memref<128xf32, #tpu.memory_space<any>>) target(%487 : memref<128xf32, #tpu.memory_space<vmem>>) target_semaphore(%489 : memref<!tpu.dma_semaphore, #tpu.memory_space<semaphore_mem>>)
    %c8_i32_425 = arith.constant 8 : i32
    %490 = arith.muli %arg0, %c8_i32_425 : i32
    %c1_i32_426 = arith.constant 1 : i32
    %491 = arith.addi %490, %c1_i32_426 : i32
    %492 = arith.index_cast %491 : i32 to index
    %c6_427 = arith.constant 6 : index
    %493 = memref.load %arg1[%492, %c6_427] : memref<8x8xi32, #tpu.memory_space<smem>>
    %c6_i32_428 = arith.constant 6 : i32
    %c1_i32_429 = arith.constant 1 : i32
    %c6_i32_430 = arith.constant 6 : i32
    %c1_i32_431 = arith.constant 1 : i32
    %c0_i32_432 = arith.constant 0 : i32
    %494 = tpu.memref_slice %arg3[%493, %c0_i32_432] : memref<256x128xf32, #tpu.memory_space<any>> -> memref<1x128xf32, #tpu.memory_space<any>>
    %495 = tpu.memref_squeeze %494 : memref<1x128xf32, #tpu.memory_space<any>> -> memref<128xf32, #tpu.memory_space<any>>
    %c0_i32_433 = arith.constant 0 : i32
    %496 = tpu.memref_slice %arg5[%c6_i32_428, %c1_i32_429, %c0_i32_433] : memref<8x8x128xf32, #tpu.memory_space<vmem>> -> memref<1x1x128xf32, #tpu.memory_space<vmem>>
    %497 = tpu.memref_squeeze %496 : memref<1x1x128xf32, #tpu.memory_space<vmem>> -> memref<128xf32, #tpu.memory_space<vmem>>
    %498 = tpu.memref_slice %arg6[%c6_i32_430, %c1_i32_431] : memref<8x8x!tpu.dma_semaphore, #tpu.memory_space<semaphore_mem>> -> memref<1x1x!tpu.dma_semaphore, #tpu.memory_space<semaphore_mem>>
    %499 = tpu.memref_squeeze %498 : memref<1x1x!tpu.dma_semaphore, #tpu.memory_space<semaphore_mem>> -> memref<!tpu.dma_semaphore, #tpu.memory_space<semaphore_mem>>
    tpu.enqueue_dma source(%495 : memref<128xf32, #tpu.memory_space<any>>) target(%497 : memref<128xf32, #tpu.memory_space<vmem>>) target_semaphore(%499 : memref<!tpu.dma_semaphore, #tpu.memory_space<semaphore_mem>>)
    %c8_i32_434 = arith.constant 8 : i32
    %500 = arith.muli %arg0, %c8_i32_434 : i32
    %c2_i32_435 = arith.constant 2 : i32
    %501 = arith.addi %500, %c2_i32_435 : i32
    %502 = arith.index_cast %501 : i32 to index
    %c6_436 = arith.constant 6 : index
    %503 = memref.load %arg1[%502, %c6_436] : memref<8x8xi32, #tpu.memory_space<smem>>
    %c6_i32_437 = arith.constant 6 : i32
    %c2_i32_438 = arith.constant 2 : i32
    %c6_i32_439 = arith.constant 6 : i32
    %c2_i32_440 = arith.constant 2 : i32
    %c0_i32_441 = arith.constant 0 : i32
    %504 = tpu.memref_slice %arg3[%503, %c0_i32_441] : memref<256x128xf32, #tpu.memory_space<any>> -> memref<1x128xf32, #tpu.memory_space<any>>
    %505 = tpu.memref_squeeze %504 : memref<1x128xf32, #tpu.memory_space<any>> -> memref<128xf32, #tpu.memory_space<any>>
    %c0_i32_442 = arith.constant 0 : i32
    %506 = tpu.memref_slice %arg5[%c6_i32_437, %c2_i32_438, %c0_i32_442] : memref<8x8x128xf32, #tpu.memory_space<vmem>> -> memref<1x1x128xf32, #tpu.memory_space<vmem>>
    %507 = tpu.memref_squeeze %506 : memref<1x1x128xf32, #tpu.memory_space<vmem>> -> memref<128xf32, #tpu.memory_space<vmem>>
    %508 = tpu.memref_slice %arg6[%c6_i32_439, %c2_i32_440] : memref<8x8x!tpu.dma_semaphore, #tpu.memory_space<semaphore_mem>> -> memref<1x1x!tpu.dma_semaphore, #tpu.memory_space<semaphore_mem>>
    %509 = tpu.memref_squeeze %508 : memref<1x1x!tpu.dma_semaphore, #tpu.memory_space<semaphore_mem>> -> memref<!tpu.dma_semaphore, #tpu.memory_space<semaphore_mem>>
    tpu.enqueue_dma source(%505 : memref<128xf32, #tpu.memory_space<any>>) target(%507 : memref<128xf32, #tpu.memory_space<vmem>>) target_semaphore(%509 : memref<!tpu.dma_semaphore, #tpu.memory_space<semaphore_mem>>)
    %c8_i32_443 = arith.constant 8 : i32
    %510 = arith.muli %arg0, %c8_i32_443 : i32
    %c3_i32_444 = arith.constant 3 : i32
    %511 = arith.addi %510, %c3_i32_444 : i32
    %512 = arith.index_cast %511 : i32 to index
    %c6_445 = arith.constant 6 : index
    %513 = memref.load %arg1[%512, %c6_445] : memref<8x8xi32, #tpu.memory_space<smem>>
    %c6_i32_446 = arith.constant 6 : i32
    %c3_i32_447 = arith.constant 3 : i32
    %c6_i32_448 = arith.constant 6 : i32
    %c3_i32_449 = arith.constant 3 : i32
    %c0_i32_450 = arith.constant 0 : i32
    %514 = tpu.memref_slice %arg3[%513, %c0_i32_450] : memref<256x128xf32, #tpu.memory_space<any>> -> memref<1x128xf32, #tpu.memory_space<any>>
    %515 = tpu.memref_squeeze %514 : memref<1x128xf32, #tpu.memory_space<any>> -> memref<128xf32, #tpu.memory_space<any>>
    %c0_i32_451 = arith.constant 0 : i32
    %516 = tpu.memref_slice %arg5[%c6_i32_446, %c3_i32_447, %c0_i32_451] : memref<8x8x128xf32, #tpu.memory_space<vmem>> -> memref<1x1x128xf32, #tpu.memory_space<vmem>>
    %517 = tpu.memref_squeeze %516 : memref<1x1x128xf32, #tpu.memory_space<vmem>> -> memref<128xf32, #tpu.memory_space<vmem>>
    %518 = tpu.memref_slice %arg6[%c6_i32_448, %c3_i32_449] : memref<8x8x!tpu.dma_semaphore, #tpu.memory_space<semaphore_mem>> -> memref<1x1x!tpu.dma_semaphore, #tpu.memory_space<semaphore_mem>>
    %519 = tpu.memref_squeeze %518 : memref<1x1x!tpu.dma_semaphore, #tpu.memory_space<semaphore_mem>> -> memref<!tpu.dma_semaphore, #tpu.memory_space<semaphore_mem>>
    tpu.enqueue_dma source(%515 : memref<128xf32, #tpu.memory_space<any>>) target(%517 : memref<128xf32, #tpu.memory_space<vmem>>) target_semaphore(%519 : memref<!tpu.dma_semaphore, #tpu.memory_space<semaphore_mem>>)
    %c8_i32_452 = arith.constant 8 : i32
    %520 = arith.muli %arg0, %c8_i32_452 : i32
    %c4_i32_453 = arith.constant 4 : i32
    %521 = arith.addi %520, %c4_i32_453 : i32
    %522 = arith.index_cast %521 : i32 to index
    %c6_454 = arith.constant 6 : index
    %523 = memref.load %arg1[%522, %c6_454] : memref<8x8xi32, #tpu.memory_space<smem>>
    %c6_i32_455 = arith.constant 6 : i32
    %c4_i32_456 = arith.constant 4 : i32
    %c6_i32_457 = arith.constant 6 : i32
    %c4_i32_458 = arith.constant 4 : i32
    %c0_i32_459 = arith.constant 0 : i32
    %524 = tpu.memref_slice %arg3[%523, %c0_i32_459] : memref<256x128xf32, #tpu.memory_space<any>> -> memref<1x128xf32, #tpu.memory_space<any>>
    %525 = tpu.memref_squeeze %524 : memref<1x128xf32, #tpu.memory_space<any>> -> memref<128xf32, #tpu.memory_space<any>>
    %c0_i32_460 = arith.constant 0 : i32
    %526 = tpu.memref_slice %arg5[%c6_i32_455, %c4_i32_456, %c0_i32_460] : memref<8x8x128xf32, #tpu.memory_space<vmem>> -> memref<1x1x128xf32, #tpu.memory_space<vmem>>
    %527 = tpu.memref_squeeze %526 : memref<1x1x128xf32, #tpu.memory_space<vmem>> -> memref<128xf32, #tpu.memory_space<vmem>>
    %528 = tpu.memref_slice %arg6[%c6_i32_457, %c4_i32_458] : memref<8x8x!tpu.dma_semaphore, #tpu.memory_space<semaphore_mem>> -> memref<1x1x!tpu.dma_semaphore, #tpu.memory_space<semaphore_mem>>
    %529 = tpu.memref_squeeze %528 : memref<1x1x!tpu.dma_semaphore, #tpu.memory_space<semaphore_mem>> -> memref<!tpu.dma_semaphore, #tpu.memory_space<semaphore_mem>>
    tpu.enqueue_dma source(%525 : memref<128xf32, #tpu.memory_space<any>>) target(%527 : memref<128xf32, #tpu.memory_space<vmem>>) target_semaphore(%529 : memref<!tpu.dma_semaphore, #tpu.memory_space<semaphore_mem>>)
    %c8_i32_461 = arith.constant 8 : i32
    %530 = arith.muli %arg0, %c8_i32_461 : i32
    %c5_i32_462 = arith.constant 5 : i32
    %531 = arith.addi %530, %c5_i32_462 : i32
    %532 = arith.index_cast %531 : i32 to index
    %c6_463 = arith.constant 6 : index
    %533 = memref.load %arg1[%532, %c6_463] : memref<8x8xi32, #tpu.memory_space<smem>>
    %c6_i32_464 = arith.constant 6 : i32
    %c5_i32_465 = arith.constant 5 : i32
    %c6_i32_466 = arith.constant 6 : i32
    %c5_i32_467 = arith.constant 5 : i32
    %c0_i32_468 = arith.constant 0 : i32
    %534 = tpu.memref_slice %arg3[%533, %c0_i32_468] : memref<256x128xf32, #tpu.memory_space<any>> -> memref<1x128xf32, #tpu.memory_space<any>>
    %535 = tpu.memref_squeeze %534 : memref<1x128xf32, #tpu.memory_space<any>> -> memref<128xf32, #tpu.memory_space<any>>
    %c0_i32_469 = arith.constant 0 : i32
    %536 = tpu.memref_slice %arg5[%c6_i32_464, %c5_i32_465, %c0_i32_469] : memref<8x8x128xf32, #tpu.memory_space<vmem>> -> memref<1x1x128xf32, #tpu.memory_space<vmem>>
    %537 = tpu.memref_squeeze %536 : memref<1x1x128xf32, #tpu.memory_space<vmem>> -> memref<128xf32, #tpu.memory_space<vmem>>
    %538 = tpu.memref_slice %arg6[%c6_i32_466, %c5_i32_467] : memref<8x8x!tpu.dma_semaphore, #tpu.memory_space<semaphore_mem>> -> memref<1x1x!tpu.dma_semaphore, #tpu.memory_space<semaphore_mem>>
    %539 = tpu.memref_squeeze %538 : memref<1x1x!tpu.dma_semaphore, #tpu.memory_space<semaphore_mem>> -> memref<!tpu.dma_semaphore, #tpu.memory_space<semaphore_mem>>
    tpu.enqueue_dma source(%535 : memref<128xf32, #tpu.memory_space<any>>) target(%537 : memref<128xf32, #tpu.memory_space<vmem>>) target_semaphore(%539 : memref<!tpu.dma_semaphore, #tpu.memory_space<semaphore_mem>>)
    %c8_i32_470 = arith.constant 8 : i32
    %540 = arith.muli %arg0, %c8_i32_470 : i32
    %c6_i32_471 = arith.constant 6 : i32
    %541 = arith.addi %540, %c6_i32_471 : i32
    %542 = arith.index_cast %541 : i32 to index
    %c6_472 = arith.constant 6 : index
    %543 = memref.load %arg1[%542, %c6_472] : memref<8x8xi32, #tpu.memory_space<smem>>
    %c6_i32_473 = arith.constant 6 : i32
    %c6_i32_474 = arith.constant 6 : i32
    %c6_i32_475 = arith.constant 6 : i32
    %c6_i32_476 = arith.constant 6 : i32
    %c0_i32_477 = arith.constant 0 : i32
    %544 = tpu.memref_slice %arg3[%543, %c0_i32_477] : memref<256x128xf32, #tpu.memory_space<any>> -> memref<1x128xf32, #tpu.memory_space<any>>
    %545 = tpu.memref_squeeze %544 : memref<1x128xf32, #tpu.memory_space<any>> -> memref<128xf32, #tpu.memory_space<any>>
    %c0_i32_478 = arith.constant 0 : i32
    %546 = tpu.memref_slice %arg5[%c6_i32_473, %c6_i32_474, %c0_i32_478] : memref<8x8x128xf32, #tpu.memory_space<vmem>> -> memref<1x1x128xf32, #tpu.memory_space<vmem>>
    %547 = tpu.memref_squeeze %546 : memref<1x1x128xf32, #tpu.memory_space<vmem>> -> memref<128xf32, #tpu.memory_space<vmem>>
    %548 = tpu.memref_slice %arg6[%c6_i32_475, %c6_i32_476] : memref<8x8x!tpu.dma_semaphore, #tpu.memory_space<semaphore_mem>> -> memref<1x1x!tpu.dma_semaphore, #tpu.memory_space<semaphore_mem>>
    %549 = tpu.memref_squeeze %548 : memref<1x1x!tpu.dma_semaphore, #tpu.memory_space<semaphore_mem>> -> memref<!tpu.dma_semaphore, #tpu.memory_space<semaphore_mem>>
    tpu.enqueue_dma source(%545 : memref<128xf32, #tpu.memory_space<any>>) target(%547 : memref<128xf32, #tpu.memory_space<vmem>>) target_semaphore(%549 : memref<!tpu.dma_semaphore, #tpu.memory_space<semaphore_mem>>)
    %c8_i32_479 = arith.constant 8 : i32
    %550 = arith.muli %arg0, %c8_i32_479 : i32
    %c7_i32_480 = arith.constant 7 : i32
    %551 = arith.addi %550, %c7_i32_480 : i32
    %552 = arith.index_cast %551 : i32 to index
    %c6_481 = arith.constant 6 : index
    %553 = memref.load %arg1[%552, %c6_481] : memref<8x8xi32, #tpu.memory_space<smem>>
    %c6_i32_482 = arith.constant 6 : i32
    %c7_i32_483 = arith.constant 7 : i32
    %c6_i32_484 = arith.constant 6 : i32
    %c7_i32_485 = arith.constant 7 : i32
    %c0_i32_486 = arith.constant 0 : i32
    %554 = tpu.memref_slice %arg3[%553, %c0_i32_486] : memref<256x128xf32, #tpu.memory_space<any>> -> memref<1x128xf32, #tpu.memory_space<any>>
    %555 = tpu.memref_squeeze %554 : memref<1x128xf32, #tpu.memory_space<any>> -> memref<128xf32, #tpu.memory_space<any>>
    %c0_i32_487 = arith.constant 0 : i32
    %556 = tpu.memref_slice %arg5[%c6_i32_482, %c7_i32_483, %c0_i32_487] : memref<8x8x128xf32, #tpu.memory_space<vmem>> -> memref<1x1x128xf32, #tpu.memory_space<vmem>>
    %557 = tpu.memref_squeeze %556 : memref<1x1x128xf32, #tpu.memory_space<vmem>> -> memref<128xf32, #tpu.memory_space<vmem>>
    %558 = tpu.memref_slice %arg6[%c6_i32_484, %c7_i32_485] : memref<8x8x!tpu.dma_semaphore, #tpu.memory_space<semaphore_mem>> -> memref<1x1x!tpu.dma_semaphore, #tpu.memory_space<semaphore_mem>>
    %559 = tpu.memref_squeeze %558 : memref<1x1x!tpu.dma_semaphore, #tpu.memory_space<semaphore_mem>> -> memref<!tpu.dma_semaphore, #tpu.memory_space<semaphore_mem>>
    tpu.enqueue_dma source(%555 : memref<128xf32, #tpu.memory_space<any>>) target(%557 : memref<128xf32, #tpu.memory_space<vmem>>) target_semaphore(%559 : memref<!tpu.dma_semaphore, #tpu.memory_space<semaphore_mem>>)
    %c8_i32_488 = arith.constant 8 : i32
    %560 = arith.muli %arg0, %c8_i32_488 : i32
    %c0_i32_489 = arith.constant 0 : i32
    %561 = arith.addi %560, %c0_i32_489 : i32
    %562 = arith.index_cast %561 : i32 to index
    %c7 = arith.constant 7 : index
    %563 = memref.load %arg1[%562, %c7] : memref<8x8xi32, #tpu.memory_space<smem>>
    %c7_i32_490 = arith.constant 7 : i32
    %c0_i32_491 = arith.constant 0 : i32
    %c7_i32_492 = arith.constant 7 : i32
    %c0_i32_493 = arith.constant 0 : i32
    %c0_i32_494 = arith.constant 0 : i32
    %564 = tpu.memref_slice %arg3[%563, %c0_i32_494] : memref<256x128xf32, #tpu.memory_space<any>> -> memref<1x128xf32, #tpu.memory_space<any>>
    %565 = tpu.memref_squeeze %564 : memref<1x128xf32, #tpu.memory_space<any>> -> memref<128xf32, #tpu.memory_space<any>>
    %c0_i32_495 = arith.constant 0 : i32
    %566 = tpu.memref_slice %arg5[%c7_i32_490, %c0_i32_491, %c0_i32_495] : memref<8x8x128xf32, #tpu.memory_space<vmem>> -> memref<1x1x128xf32, #tpu.memory_space<vmem>>
    %567 = tpu.memref_squeeze %566 : memref<1x1x128xf32, #tpu.memory_space<vmem>> -> memref<128xf32, #tpu.memory_space<vmem>>
    %568 = tpu.memref_slice %arg6[%c7_i32_492, %c0_i32_493] : memref<8x8x!tpu.dma_semaphore, #tpu.memory_space<semaphore_mem>> -> memref<1x1x!tpu.dma_semaphore, #tpu.memory_space<semaphore_mem>>
    %569 = tpu.memref_squeeze %568 : memref<1x1x!tpu.dma_semaphore, #tpu.memory_space<semaphore_mem>> -> memref<!tpu.dma_semaphore, #tpu.memory_space<semaphore_mem>>
    tpu.enqueue_dma source(%565 : memref<128xf32, #tpu.memory_space<any>>) target(%567 : memref<128xf32, #tpu.memory_space<vmem>>) target_semaphore(%569 : memref<!tpu.dma_semaphore, #tpu.memory_space<semaphore_mem>>)
    %c8_i32_496 = arith.constant 8 : i32
    %570 = arith.muli %arg0, %c8_i32_496 : i32
    %c1_i32_497 = arith.constant 1 : i32
    %571 = arith.addi %570, %c1_i32_497 : i32
    %572 = arith.index_cast %571 : i32 to index
    %c7_498 = arith.constant 7 : index
    %573 = memref.load %arg1[%572, %c7_498] : memref<8x8xi32, #tpu.memory_space<smem>>
    %c7_i32_499 = arith.constant 7 : i32
    %c1_i32_500 = arith.constant 1 : i32
    %c7_i32_501 = arith.constant 7 : i32
    %c1_i32_502 = arith.constant 1 : i32
    %c0_i32_503 = arith.constant 0 : i32
    %574 = tpu.memref_slice %arg3[%573, %c0_i32_503] : memref<256x128xf32, #tpu.memory_space<any>> -> memref<1x128xf32, #tpu.memory_space<any>>
    %575 = tpu.memref_squeeze %574 : memref<1x128xf32, #tpu.memory_space<any>> -> memref<128xf32, #tpu.memory_space<any>>
    %c0_i32_504 = arith.constant 0 : i32
    %576 = tpu.memref_slice %arg5[%c7_i32_499, %c1_i32_500, %c0_i32_504] : memref<8x8x128xf32, #tpu.memory_space<vmem>> -> memref<1x1x128xf32, #tpu.memory_space<vmem>>
    %577 = tpu.memref_squeeze %576 : memref<1x1x128xf32, #tpu.memory_space<vmem>> -> memref<128xf32, #tpu.memory_space<vmem>>
    %578 = tpu.memref_slice %arg6[%c7_i32_501, %c1_i32_502] : memref<8x8x!tpu.dma_semaphore, #tpu.memory_space<semaphore_mem>> -> memref<1x1x!tpu.dma_semaphore, #tpu.memory_space<semaphore_mem>>
    %579 = tpu.memref_squeeze %578 : memref<1x1x!tpu.dma_semaphore, #tpu.memory_space<semaphore_mem>> -> memref<!tpu.dma_semaphore, #tpu.memory_space<semaphore_mem>>
    tpu.enqueue_dma source(%575 : memref<128xf32, #tpu.memory_space<any>>) target(%577 : memref<128xf32, #tpu.memory_space<vmem>>) target_semaphore(%579 : memref<!tpu.dma_semaphore, #tpu.memory_space<semaphore_mem>>)
    %c8_i32_505 = arith.constant 8 : i32
    %580 = arith.muli %arg0, %c8_i32_505 : i32
    %c2_i32_506 = arith.constant 2 : i32
    %581 = arith.addi %580, %c2_i32_506 : i32
    %582 = arith.index_cast %581 : i32 to index
    %c7_507 = arith.constant 7 : index
    %583 = memref.load %arg1[%582, %c7_507] : memref<8x8xi32, #tpu.memory_space<smem>>
    %c7_i32_508 = arith.constant 7 : i32
    %c2_i32_509 = arith.constant 2 : i32
    %c7_i32_510 = arith.constant 7 : i32
    %c2_i32_511 = arith.constant 2 : i32
    %c0_i32_512 = arith.constant 0 : i32
    %584 = tpu.memref_slice %arg3[%583, %c0_i32_512] : memref<256x128xf32, #tpu.memory_space<any>> -> memref<1x128xf32, #tpu.memory_space<any>>
    %585 = tpu.memref_squeeze %584 : memref<1x128xf32, #tpu.memory_space<any>> -> memref<128xf32, #tpu.memory_space<any>>
    %c0_i32_513 = arith.constant 0 : i32
    %586 = tpu.memref_slice %arg5[%c7_i32_508, %c2_i32_509, %c0_i32_513] : memref<8x8x128xf32, #tpu.memory_space<vmem>> -> memref<1x1x128xf32, #tpu.memory_space<vmem>>
    %587 = tpu.memref_squeeze %586 : memref<1x1x128xf32, #tpu.memory_space<vmem>> -> memref<128xf32, #tpu.memory_space<vmem>>
    %588 = tpu.memref_slice %arg6[%c7_i32_510, %c2_i32_511] : memref<8x8x!tpu.dma_semaphore, #tpu.memory_space<semaphore_mem>> -> memref<1x1x!tpu.dma_semaphore, #tpu.memory_space<semaphore_mem>>
    %589 = tpu.memref_squeeze %588 : memref<1x1x!tpu.dma_semaphore, #tpu.memory_space<semaphore_mem>> -> memref<!tpu.dma_semaphore, #tpu.memory_space<semaphore_mem>>
    tpu.enqueue_dma source(%585 : memref<128xf32, #tpu.memory_space<any>>) target(%587 : memref<128xf32, #tpu.memory_space<vmem>>) target_semaphore(%589 : memref<!tpu.dma_semaphore, #tpu.memory_space<semaphore_mem>>)
    %c8_i32_514 = arith.constant 8 : i32
    %590 = arith.muli %arg0, %c8_i32_514 : i32
    %c3_i32_515 = arith.constant 3 : i32
    %591 = arith.addi %590, %c3_i32_515 : i32
    %592 = arith.index_cast %591 : i32 to index
    %c7_516 = arith.constant 7 : index
    %593 = memref.load %arg1[%592, %c7_516] : memref<8x8xi32, #tpu.memory_space<smem>>
    %c7_i32_517 = arith.constant 7 : i32
    %c3_i32_518 = arith.constant 3 : i32
    %c7_i32_519 = arith.constant 7 : i32
    %c3_i32_520 = arith.constant 3 : i32
    %c0_i32_521 = arith.constant 0 : i32
    %594 = tpu.memref_slice %arg3[%593, %c0_i32_521] : memref<256x128xf32, #tpu.memory_space<any>> -> memref<1x128xf32, #tpu.memory_space<any>>
    %595 = tpu.memref_squeeze %594 : memref<1x128xf32, #tpu.memory_space<any>> -> memref<128xf32, #tpu.memory_space<any>>
    %c0_i32_522 = arith.constant 0 : i32
    %596 = tpu.memref_slice %arg5[%c7_i32_517, %c3_i32_518, %c0_i32_522] : memref<8x8x128xf32, #tpu.memory_space<vmem>> -> memref<1x1x128xf32, #tpu.memory_space<vmem>>
    %597 = tpu.memref_squeeze %596 : memref<1x1x128xf32, #tpu.memory_space<vmem>> -> memref<128xf32, #tpu.memory_space<vmem>>
    %598 = tpu.memref_slice %arg6[%c7_i32_519, %c3_i32_520] : memref<8x8x!tpu.dma_semaphore, #tpu.memory_space<semaphore_mem>> -> memref<1x1x!tpu.dma_semaphore, #tpu.memory_space<semaphore_mem>>
    %599 = tpu.memref_squeeze %598 : memref<1x1x!tpu.dma_semaphore, #tpu.memory_space<semaphore_mem>> -> memref<!tpu.dma_semaphore, #tpu.memory_space<semaphore_mem>>
    tpu.enqueue_dma source(%595 : memref<128xf32, #tpu.memory_space<any>>) target(%597 : memref<128xf32, #tpu.memory_space<vmem>>) target_semaphore(%599 : memref<!tpu.dma_semaphore, #tpu.memory_space<semaphore_mem>>)
    %c8_i32_523 = arith.constant 8 : i32
    %600 = arith.muli %arg0, %c8_i32_523 : i32
    %c4_i32_524 = arith.constant 4 : i32
    %601 = arith.addi %600, %c4_i32_524 : i32
    %602 = arith.index_cast %601 : i32 to index
    %c7_525 = arith.constant 7 : index
    %603 = memref.load %arg1[%602, %c7_525] : memref<8x8xi32, #tpu.memory_space<smem>>
    %c7_i32_526 = arith.constant 7 : i32
    %c4_i32_527 = arith.constant 4 : i32
    %c7_i32_528 = arith.constant 7 : i32
    %c4_i32_529 = arith.constant 4 : i32
    %c0_i32_530 = arith.constant 0 : i32
    %604 = tpu.memref_slice %arg3[%603, %c0_i32_530] : memref<256x128xf32, #tpu.memory_space<any>> -> memref<1x128xf32, #tpu.memory_space<any>>
    %605 = tpu.memref_squeeze %604 : memref<1x128xf32, #tpu.memory_space<any>> -> memref<128xf32, #tpu.memory_space<any>>
    %c0_i32_531 = arith.constant 0 : i32
    %606 = tpu.memref_slice %arg5[%c7_i32_526, %c4_i32_527, %c0_i32_531] : memref<8x8x128xf32, #tpu.memory_space<vmem>> -> memref<1x1x128xf32, #tpu.memory_space<vmem>>
    %607 = tpu.memref_squeeze %606 : memref<1x1x128xf32, #tpu.memory_space<vmem>> -> memref<128xf32, #tpu.memory_space<vmem>>
    %608 = tpu.memref_slice %arg6[%c7_i32_528, %c4_i32_529] : memref<8x8x!tpu.dma_semaphore, #tpu.memory_space<semaphore_mem>> -> memref<1x1x!tpu.dma_semaphore, #tpu.memory_space<semaphore_mem>>
    %609 = tpu.memref_squeeze %608 : memref<1x1x!tpu.dma_semaphore, #tpu.memory_space<semaphore_mem>> -> memref<!tpu.dma_semaphore, #tpu.memory_space<semaphore_mem>>
    tpu.enqueue_dma source(%605 : memref<128xf32, #tpu.memory_space<any>>) target(%607 : memref<128xf32, #tpu.memory_space<vmem>>) target_semaphore(%609 : memref<!tpu.dma_semaphore, #tpu.memory_space<semaphore_mem>>)
    %c8_i32_532 = arith.constant 8 : i32
    %610 = arith.muli %arg0, %c8_i32_532 : i32
    %c5_i32_533 = arith.constant 5 : i32
    %611 = arith.addi %610, %c5_i32_533 : i32
    %612 = arith.index_cast %611 : i32 to index
    %c7_534 = arith.constant 7 : index
    %613 = memref.load %arg1[%612, %c7_534] : memref<8x8xi32, #tpu.memory_space<smem>>
    %c7_i32_535 = arith.constant 7 : i32
    %c5_i32_536 = arith.constant 5 : i32
    %c7_i32_537 = arith.constant 7 : i32
    %c5_i32_538 = arith.constant 5 : i32
    %c0_i32_539 = arith.constant 0 : i32
    %614 = tpu.memref_slice %arg3[%613, %c0_i32_539] : memref<256x128xf32, #tpu.memory_space<any>> -> memref<1x128xf32, #tpu.memory_space<any>>
    %615 = tpu.memref_squeeze %614 : memref<1x128xf32, #tpu.memory_space<any>> -> memref<128xf32, #tpu.memory_space<any>>
    %c0_i32_540 = arith.constant 0 : i32
    %616 = tpu.memref_slice %arg5[%c7_i32_535, %c5_i32_536, %c0_i32_540] : memref<8x8x128xf32, #tpu.memory_space<vmem>> -> memref<1x1x128xf32, #tpu.memory_space<vmem>>
    %617 = tpu.memref_squeeze %616 : memref<1x1x128xf32, #tpu.memory_space<vmem>> -> memref<128xf32, #tpu.memory_space<vmem>>
    %618 = tpu.memref_slice %arg6[%c7_i32_537, %c5_i32_538] : memref<8x8x!tpu.dma_semaphore, #tpu.memory_space<semaphore_mem>> -> memref<1x1x!tpu.dma_semaphore, #tpu.memory_space<semaphore_mem>>
    %619 = tpu.memref_squeeze %618 : memref<1x1x!tpu.dma_semaphore, #tpu.memory_space<semaphore_mem>> -> memref<!tpu.dma_semaphore, #tpu.memory_space<semaphore_mem>>
    tpu.enqueue_dma source(%615 : memref<128xf32, #tpu.memory_space<any>>) target(%617 : memref<128xf32, #tpu.memory_space<vmem>>) target_semaphore(%619 : memref<!tpu.dma_semaphore, #tpu.memory_space<semaphore_mem>>)
    %c8_i32_541 = arith.constant 8 : i32
    %620 = arith.muli %arg0, %c8_i32_541 : i32
    %c6_i32_542 = arith.constant 6 : i32
    %621 = arith.addi %620, %c6_i32_542 : i32
    %622 = arith.index_cast %621 : i32 to index
    %c7_543 = arith.constant 7 : index
    %623 = memref.load %arg1[%622, %c7_543] : memref<8x8xi32, #tpu.memory_space<smem>>
    %c7_i32_544 = arith.constant 7 : i32
    %c6_i32_545 = arith.constant 6 : i32
    %c7_i32_546 = arith.constant 7 : i32
    %c6_i32_547 = arith.constant 6 : i32
    %c0_i32_548 = arith.constant 0 : i32
    %624 = tpu.memref_slice %arg3[%623, %c0_i32_548] : memref<256x128xf32, #tpu.memory_space<any>> -> memref<1x128xf32, #tpu.memory_space<any>>
    %625 = tpu.memref_squeeze %624 : memref<1x128xf32, #tpu.memory_space<any>> -> memref<128xf32, #tpu.memory_space<any>>
    %c0_i32_549 = arith.constant 0 : i32
    %626 = tpu.memref_slice %arg5[%c7_i32_544, %c6_i32_545, %c0_i32_549] : memref<8x8x128xf32, #tpu.memory_space<vmem>> -> memref<1x1x128xf32, #tpu.memory_space<vmem>>
    %627 = tpu.memref_squeeze %626 : memref<1x1x128xf32, #tpu.memory_space<vmem>> -> memref<128xf32, #tpu.memory_space<vmem>>
    %628 = tpu.memref_slice %arg6[%c7_i32_546, %c6_i32_547] : memref<8x8x!tpu.dma_semaphore, #tpu.memory_space<semaphore_mem>> -> memref<1x1x!tpu.dma_semaphore, #tpu.memory_space<semaphore_mem>>
    %629 = tpu.memref_squeeze %628 : memref<1x1x!tpu.dma_semaphore, #tpu.memory_space<semaphore_mem>> -> memref<!tpu.dma_semaphore, #tpu.memory_space<semaphore_mem>>
    tpu.enqueue_dma source(%625 : memref<128xf32, #tpu.memory_space<any>>) target(%627 : memref<128xf32, #tpu.memory_space<vmem>>) target_semaphore(%629 : memref<!tpu.dma_semaphore, #tpu.memory_space<semaphore_mem>>)
    %c8_i32_550 = arith.constant 8 : i32
    %630 = arith.muli %arg0, %c8_i32_550 : i32
    %c7_i32_551 = arith.constant 7 : i32
    %631 = arith.addi %630, %c7_i32_551 : i32
    %632 = arith.index_cast %631 : i32 to index
    %c7_552 = arith.constant 7 : index
    %633 = memref.load %arg1[%632, %c7_552] : memref<8x8xi32, #tpu.memory_space<smem>>
    %c7_i32_553 = arith.constant 7 : i32
    %c7_i32_554 = arith.constant 7 : i32
    %c7_i32_555 = arith.constant 7 : i32
    %c7_i32_556 = arith.constant 7 : i32
    %c0_i32_557 = arith.constant 0 : i32
    %634 = tpu.memref_slice %arg3[%633, %c0_i32_557] : memref<256x128xf32, #tpu.memory_space<any>> -> memref<1x128xf32, #tpu.memory_space<any>>
    %635 = tpu.memref_squeeze %634 : memref<1x128xf32, #tpu.memory_space<any>> -> memref<128xf32, #tpu.memory_space<any>>
    %c0_i32_558 = arith.constant 0 : i32
    %636 = tpu.memref_slice %arg5[%c7_i32_553, %c7_i32_554, %c0_i32_558] : memref<8x8x128xf32, #tpu.memory_space<vmem>> -> memref<1x1x128xf32, #tpu.memory_space<vmem>>
    %637 = tpu.memref_squeeze %636 : memref<1x1x128xf32, #tpu.memory_space<vmem>> -> memref<128xf32, #tpu.memory_space<vmem>>
    %638 = tpu.memref_slice %arg6[%c7_i32_555, %c7_i32_556] : memref<8x8x!tpu.dma_semaphore, #tpu.memory_space<semaphore_mem>> -> memref<1x1x!tpu.dma_semaphore, #tpu.memory_space<semaphore_mem>>
    %639 = tpu.memref_squeeze %638 : memref<1x1x!tpu.dma_semaphore, #tpu.memory_space<semaphore_mem>> -> memref<!tpu.dma_semaphore, #tpu.memory_space<semaphore_mem>>
    tpu.enqueue_dma source(%635 : memref<128xf32, #tpu.memory_space<any>>) target(%637 : memref<128xf32, #tpu.memory_space<vmem>>) target_semaphore(%639 : memref<!tpu.dma_semaphore, #tpu.memory_space<semaphore_mem>>)
    %c0_i32_559 = arith.constant 0 : i32
    %c0_i32_560 = arith.constant 0 : i32
    %c0_i32_561 = arith.constant 0 : i32
    %c0_i32_562 = arith.constant 0 : i32
    %c0_i32_563 = arith.constant 0 : i32
    %c0_i32_564 = arith.constant 0 : i32
    %640 = tpu.memref_slice %arg3[%c0_i32_559, %c0_i32_564] : memref<256x128xf32, #tpu.memory_space<any>> -> memref<1x128xf32, #tpu.memory_space<any>>
    %641 = tpu.memref_squeeze %640 : memref<1x128xf32, #tpu.memory_space<any>> -> memref<128xf32, #tpu.memory_space<any>>
    %c0_i32_565 = arith.constant 0 : i32
    %642 = tpu.memref_slice %arg5[%c0_i32_560, %c0_i32_561, %c0_i32_565] : memref<8x8x128xf32, #tpu.memory_space<vmem>> -> memref<1x1x128xf32, #tpu.memory_space<vmem>>
    %643 = tpu.memref_squeeze %642 : memref<1x1x128xf32, #tpu.memory_space<vmem>> -> memref<128xf32, #tpu.memory_space<vmem>>
    %644 = tpu.memref_slice %arg6[%c0_i32_562, %c0_i32_563] : memref<8x8x!tpu.dma_semaphore, #tpu.memory_space<semaphore_mem>> -> memref<1x1x!tpu.dma_semaphore, #tpu.memory_space<semaphore_mem>>
    %645 = tpu.memref_squeeze %644 : memref<1x1x!tpu.dma_semaphore, #tpu.memory_space<semaphore_mem>> -> memref<!tpu.dma_semaphore, #tpu.memory_space<semaphore_mem>>
    tpu.wait_dma2 semaphore(%645 : memref<!tpu.dma_semaphore, #tpu.memory_space<semaphore_mem>>) src(%641 : memref<128xf32, #tpu.memory_space<any>>) dst(%643 : memref<128xf32, #tpu.memory_space<vmem>>)
    %c0_i32_566 = arith.constant 0 : i32
    %c0_i32_567 = arith.constant 0 : i32
    %c1_i32_568 = arith.constant 1 : i32
    %c0_i32_569 = arith.constant 0 : i32
    %c1_i32_570 = arith.constant 1 : i32
    %c0_i32_571 = arith.constant 0 : i32
    %646 = tpu.memref_slice %arg3[%c0_i32_566, %c0_i32_571] : memref<256x128xf32, #tpu.memory_space<any>> -> memref<1x128xf32, #tpu.memory_space<any>>
    %647 = tpu.memref_squeeze %646 : memref<1x128xf32, #tpu.memory_space<any>> -> memref<128xf32, #tpu.memory_space<any>>
    %c0_i32_572 = arith.constant 0 : i32
    %648 = tpu.memref_slice %arg5[%c0_i32_567, %c1_i32_568, %c0_i32_572] : memref<8x8x128xf32, #tpu.memory_space<vmem>> -> memref<1x1x128xf32, #tpu.memory_space<vmem>>
    %649 = tpu.memref_squeeze %648 : memref<1x1x128xf32, #tpu.memory_space<vmem>> -> memref<128xf32, #tpu.memory_space<vmem>>
    %650 = tpu.memref_slice %arg6[%c0_i32_569, %c1_i32_570] : memref<8x8x!tpu.dma_semaphore, #tpu.memory_space<semaphore_mem>> -> memref<1x1x!tpu.dma_semaphore, #tpu.memory_space<semaphore_mem>>
    %651 = tpu.memref_squeeze %650 : memref<1x1x!tpu.dma_semaphore, #tpu.memory_space<semaphore_mem>> -> memref<!tpu.dma_semaphore, #tpu.memory_space<semaphore_mem>>
    tpu.wait_dma2 semaphore(%651 : memref<!tpu.dma_semaphore, #tpu.memory_space<semaphore_mem>>) src(%647 : memref<128xf32, #tpu.memory_space<any>>) dst(%649 : memref<128xf32, #tpu.memory_space<vmem>>)
    %c0_i32_573 = arith.constant 0 : i32
    %c0_i32_574 = arith.constant 0 : i32
    %c2_i32_575 = arith.constant 2 : i32
    %c0_i32_576 = arith.constant 0 : i32
    %c2_i32_577 = arith.constant 2 : i32
    %c0_i32_578 = arith.constant 0 : i32
    %652 = tpu.memref_slice %arg3[%c0_i32_573, %c0_i32_578] : memref<256x128xf32, #tpu.memory_space<any>> -> memref<1x128xf32, #tpu.memory_space<any>>
    %653 = tpu.memref_squeeze %652 : memref<1x128xf32, #tpu.memory_space<any>> -> memref<128xf32, #tpu.memory_space<any>>
    %c0_i32_579 = arith.constant 0 : i32
    %654 = tpu.memref_slice %arg5[%c0_i32_574, %c2_i32_575, %c0_i32_579] : memref<8x8x128xf32, #tpu.memory_space<vmem>> -> memref<1x1x128xf32, #tpu.memory_space<vmem>>
    %655 = tpu.memref_squeeze %654 : memref<1x1x128xf32, #tpu.memory_space<vmem>> -> memref<128xf32, #tpu.memory_space<vmem>>
    %656 = tpu.memref_slice %arg6[%c0_i32_576, %c2_i32_577] : memref<8x8x!tpu.dma_semaphore, #tpu.memory_space<semaphore_mem>> -> memref<1x1x!tpu.dma_semaphore, #tpu.memory_space<semaphore_mem>>
    %657 = tpu.memref_squeeze %656 : memref<1x1x!tpu.dma_semaphore, #tpu.memory_space<semaphore_mem>> -> memref<!tpu.dma_semaphore, #tpu.memory_space<semaphore_mem>>
    tpu.wait_dma2 semaphore(%657 : memref<!tpu.dma_semaphore, #tpu.memory_space<semaphore_mem>>) src(%653 : memref<128xf32, #tpu.memory_space<any>>) dst(%655 : memref<128xf32, #tpu.memory_space<vmem>>)
    %c0_i32_580 = arith.constant 0 : i32
    %c0_i32_581 = arith.constant 0 : i32
    %c3_i32_582 = arith.constant 3 : i32
    %c0_i32_583 = arith.constant 0 : i32
    %c3_i32_584 = arith.constant 3 : i32
    %c0_i32_585 = arith.constant 0 : i32
    %658 = tpu.memref_slice %arg3[%c0_i32_580, %c0_i32_585] : memref<256x128xf32, #tpu.memory_space<any>> -> memref<1x128xf32, #tpu.memory_space<any>>
    %659 = tpu.memref_squeeze %658 : memref<1x128xf32, #tpu.memory_space<any>> -> memref<128xf32, #tpu.memory_space<any>>
    %c0_i32_586 = arith.constant 0 : i32
    %660 = tpu.memref_slice %arg5[%c0_i32_581, %c3_i32_582, %c0_i32_586] : memref<8x8x128xf32, #tpu.memory_space<vmem>> -> memref<1x1x128xf32, #tpu.memory_space<vmem>>
    %661 = tpu.memref_squeeze %660 : memref<1x1x128xf32, #tpu.memory_space<vmem>> -> memref<128xf32, #tpu.memory_space<vmem>>
    %662 = tpu.memref_slice %arg6[%c0_i32_583, %c3_i32_584] : memref<8x8x!tpu.dma_semaphore, #tpu.memory_space<semaphore_mem>> -> memref<1x1x!tpu.dma_semaphore, #tpu.memory_space<semaphore_mem>>
    %663 = tpu.memref_squeeze %662 : memref<1x1x!tpu.dma_semaphore, #tpu.memory_space<semaphore_mem>> -> memref<!tpu.dma_semaphore, #tpu.memory_space<semaphore_mem>>
    tpu.wait_dma2 semaphore(%663 : memref<!tpu.dma_semaphore, #tpu.memory_space<semaphore_mem>>) src(%659 : memref<128xf32, #tpu.memory_space<any>>) dst(%661 : memref<128xf32, #tpu.memory_space<vmem>>)
    %c0_i32_587 = arith.constant 0 : i32
    %c0_i32_588 = arith.constant 0 : i32
    %c4_i32_589 = arith.constant 4 : i32
    %c0_i32_590 = arith.constant 0 : i32
    %c4_i32_591 = arith.constant 4 : i32
    %c0_i32_592 = arith.constant 0 : i32
    %664 = tpu.memref_slice %arg3[%c0_i32_587, %c0_i32_592] : memref<256x128xf32, #tpu.memory_space<any>> -> memref<1x128xf32, #tpu.memory_space<any>>
    %665 = tpu.memref_squeeze %664 : memref<1x128xf32, #tpu.memory_space<any>> -> memref<128xf32, #tpu.memory_space<any>>
    %c0_i32_593 = arith.constant 0 : i32
    %666 = tpu.memref_slice %arg5[%c0_i32_588, %c4_i32_589, %c0_i32_593] : memref<8x8x128xf32, #tpu.memory_space<vmem>> -> memref<1x1x128xf32, #tpu.memory_space<vmem>>
    %667 = tpu.memref_squeeze %666 : memref<1x1x128xf32, #tpu.memory_space<vmem>> -> memref<128xf32, #tpu.memory_space<vmem>>
    %668 = tpu.memref_slice %arg6[%c0_i32_590, %c4_i32_591] : memref<8x8x!tpu.dma_semaphore, #tpu.memory_space<semaphore_mem>> -> memref<1x1x!tpu.dma_semaphore, #tpu.memory_space<semaphore_mem>>
    %669 = tpu.memref_squeeze %668 : memref<1x1x!tpu.dma_semaphore, #tpu.memory_space<semaphore_mem>> -> memref<!tpu.dma_semaphore, #tpu.memory_space<semaphore_mem>>
    tpu.wait_dma2 semaphore(%669 : memref<!tpu.dma_semaphore, #tpu.memory_space<semaphore_mem>>) src(%665 : memref<128xf32, #tpu.memory_space<any>>) dst(%667 : memref<128xf32, #tpu.memory_space<vmem>>)
    %c0_i32_594 = arith.constant 0 : i32
    %c0_i32_595 = arith.constant 0 : i32
    %c5_i32_596 = arith.constant 5 : i32
    %c0_i32_597 = arith.constant 0 : i32
    %c5_i32_598 = arith.constant 5 : i32
    %c0_i32_599 = arith.constant 0 : i32
    %670 = tpu.memref_slice %arg3[%c0_i32_594, %c0_i32_599] : memref<256x128xf32, #tpu.memory_space<any>> -> memref<1x128xf32, #tpu.memory_space<any>>
    %671 = tpu.memref_squeeze %670 : memref<1x128xf32, #tpu.memory_space<any>> -> memref<128xf32, #tpu.memory_space<any>>
    %c0_i32_600 = arith.constant 0 : i32
    %672 = tpu.memref_slice %arg5[%c0_i32_595, %c5_i32_596, %c0_i32_600] : memref<8x8x128xf32, #tpu.memory_space<vmem>> -> memref<1x1x128xf32, #tpu.memory_space<vmem>>
    %673 = tpu.memref_squeeze %672 : memref<1x1x128xf32, #tpu.memory_space<vmem>> -> memref<128xf32, #tpu.memory_space<vmem>>
    %674 = tpu.memref_slice %arg6[%c0_i32_597, %c5_i32_598] : memref<8x8x!tpu.dma_semaphore, #tpu.memory_space<semaphore_mem>> -> memref<1x1x!tpu.dma_semaphore, #tpu.memory_space<semaphore_mem>>
    %675 = tpu.memref_squeeze %674 : memref<1x1x!tpu.dma_semaphore, #tpu.memory_space<semaphore_mem>> -> memref<!tpu.dma_semaphore, #tpu.memory_space<semaphore_mem>>
    tpu.wait_dma2 semaphore(%675 : memref<!tpu.dma_semaphore, #tpu.memory_space<semaphore_mem>>) src(%671 : memref<128xf32, #tpu.memory_space<any>>) dst(%673 : memref<128xf32, #tpu.memory_space<vmem>>)
    %c0_i32_601 = arith.constant 0 : i32
    %c0_i32_602 = arith.constant 0 : i32
    %c6_i32_603 = arith.constant 6 : i32
    %c0_i32_604 = arith.constant 0 : i32
    %c6_i32_605 = arith.constant 6 : i32
    %c0_i32_606 = arith.constant 0 : i32
    %676 = tpu.memref_slice %arg3[%c0_i32_601, %c0_i32_606] : memref<256x128xf32, #tpu.memory_space<any>> -> memref<1x128xf32, #tpu.memory_space<any>>
    %677 = tpu.memref_squeeze %676 : memref<1x128xf32, #tpu.memory_space<any>> -> memref<128xf32, #tpu.memory_space<any>>
    %c0_i32_607 = arith.constant 0 : i32
    %678 = tpu.memref_slice %arg5[%c0_i32_602, %c6_i32_603, %c0_i32_607] : memref<8x8x128xf32, #tpu.memory_space<vmem>> -> memref<1x1x128xf32, #tpu.memory_space<vmem>>
    %679 = tpu.memref_squeeze %678 : memref<1x1x128xf32, #tpu.memory_space<vmem>> -> memref<128xf32, #tpu.memory_space<vmem>>
    %680 = tpu.memref_slice %arg6[%c0_i32_604, %c6_i32_605] : memref<8x8x!tpu.dma_semaphore, #tpu.memory_space<semaphore_mem>> -> memref<1x1x!tpu.dma_semaphore, #tpu.memory_space<semaphore_mem>>
    %681 = tpu.memref_squeeze %680 : memref<1x1x!tpu.dma_semaphore, #tpu.memory_space<semaphore_mem>> -> memref<!tpu.dma_semaphore, #tpu.memory_space<semaphore_mem>>
    tpu.wait_dma2 semaphore(%681 : memref<!tpu.dma_semaphore, #tpu.memory_space<semaphore_mem>>) src(%677 : memref<128xf32, #tpu.memory_space<any>>) dst(%679 : memref<128xf32, #tpu.memory_space<vmem>>)
    %c0_i32_608 = arith.constant 0 : i32
    %c0_i32_609 = arith.constant 0 : i32
    %c7_i32_610 = arith.constant 7 : i32
    %c0_i32_611 = arith.constant 0 : i32
    %c7_i32_612 = arith.constant 7 : i32
    %c0_i32_613 = arith.constant 0 : i32
    %682 = tpu.memref_slice %arg3[%c0_i32_608, %c0_i32_613] : memref<256x128xf32, #tpu.memory_space<any>> -> memref<1x128xf32, #tpu.memory_space<any>>
    %683 = tpu.memref_squeeze %682 : memref<1x128xf32, #tpu.memory_space<any>> -> memref<128xf32, #tpu.memory_space<any>>
    %c0_i32_614 = arith.constant 0 : i32
    %684 = tpu.memref_slice %arg5[%c0_i32_609, %c7_i32_610, %c0_i32_614] : memref<8x8x128xf32, #tpu.memory_space<vmem>> -> memref<1x1x128xf32, #tpu.memory_space<vmem>>
    %685 = tpu.memref_squeeze %684 : memref<1x1x128xf32, #tpu.memory_space<vmem>> -> memref<128xf32, #tpu.memory_space<vmem>>
    %686 = tpu.memref_slice %arg6[%c0_i32_611, %c7_i32_612] : memref<8x8x!tpu.dma_semaphore, #tpu.memory_space<semaphore_mem>> -> memref<1x1x!tpu.dma_semaphore, #tpu.memory_space<semaphore_mem>>
    %687 = tpu.memref_squeeze %686 : memref<1x1x!tpu.dma_semaphore, #tpu.memory_space<semaphore_mem>> -> memref<!tpu.dma_semaphore, #tpu.memory_space<semaphore_mem>>
    tpu.wait_dma2 semaphore(%687 : memref<!tpu.dma_semaphore, #tpu.memory_space<semaphore_mem>>) src(%683 : memref<128xf32, #tpu.memory_space<any>>) dst(%685 : memref<128xf32, #tpu.memory_space<vmem>>)
    %c0_i32_615 = arith.constant 0 : i32
    %c1_i32_616 = arith.constant 1 : i32
    %c0_i32_617 = arith.constant 0 : i32
    %c1_i32_618 = arith.constant 1 : i32
    %c0_i32_619 = arith.constant 0 : i32
    %c0_i32_620 = arith.constant 0 : i32
    %688 = tpu.memref_slice %arg3[%c0_i32_615, %c0_i32_620] : memref<256x128xf32, #tpu.memory_space<any>> -> memref<1x128xf32, #tpu.memory_space<any>>
    %689 = tpu.memref_squeeze %688 : memref<1x128xf32, #tpu.memory_space<any>> -> memref<128xf32, #tpu.memory_space<any>>
    %c0_i32_621 = arith.constant 0 : i32
    %690 = tpu.memref_slice %arg5[%c1_i32_616, %c0_i32_617, %c0_i32_621] : memref<8x8x128xf32, #tpu.memory_space<vmem>> -> memref<1x1x128xf32, #tpu.memory_space<vmem>>
    %691 = tpu.memref_squeeze %690 : memref<1x1x128xf32, #tpu.memory_space<vmem>> -> memref<128xf32, #tpu.memory_space<vmem>>
    %692 = tpu.memref_slice %arg6[%c1_i32_618, %c0_i32_619] : memref<8x8x!tpu.dma_semaphore, #tpu.memory_space<semaphore_mem>> -> memref<1x1x!tpu.dma_semaphore, #tpu.memory_space<semaphore_mem>>
    %693 = tpu.memref_squeeze %692 : memref<1x1x!tpu.dma_semaphore, #tpu.memory_space<semaphore_mem>> -> memref<!tpu.dma_semaphore, #tpu.memory_space<semaphore_mem>>
    tpu.wait_dma2 semaphore(%693 : memref<!tpu.dma_semaphore, #tpu.memory_space<semaphore_mem>>) src(%689 : memref<128xf32, #tpu.memory_space<any>>) dst(%691 : memref<128xf32, #tpu.memory_space<vmem>>)
    %c0_i32_622 = arith.constant 0 : i32
    %c1_i32_623 = arith.constant 1 : i32
    %c1_i32_624 = arith.constant 1 : i32
    %c1_i32_625 = arith.constant 1 : i32
    %c1_i32_626 = arith.constant 1 : i32
    %c0_i32_627 = arith.constant 0 : i32
    %694 = tpu.memref_slice %arg3[%c0_i32_622, %c0_i32_627] : memref<256x128xf32, #tpu.memory_space<any>> -> memref<1x128xf32, #tpu.memory_space<any>>
    %695 = tpu.memref_squeeze %694 : memref<1x128xf32, #tpu.memory_space<any>> -> memref<128xf32, #tpu.memory_space<any>>
    %c0_i32_628 = arith.constant 0 : i32
    %696 = tpu.memref_slice %arg5[%c1_i32_623, %c1_i32_624, %c0_i32_628] : memref<8x8x128xf32, #tpu.memory_space<vmem>> -> memref<1x1x128xf32, #tpu.memory_space<vmem>>
    %697 = tpu.memref_squeeze %696 : memref<1x1x128xf32, #tpu.memory_space<vmem>> -> memref<128xf32, #tpu.memory_space<vmem>>
    %698 = tpu.memref_slice %arg6[%c1_i32_625, %c1_i32_626] : memref<8x8x!tpu.dma_semaphore, #tpu.memory_space<semaphore_mem>> -> memref<1x1x!tpu.dma_semaphore, #tpu.memory_space<semaphore_mem>>
    %699 = tpu.memref_squeeze %698 : memref<1x1x!tpu.dma_semaphore, #tpu.memory_space<semaphore_mem>> -> memref<!tpu.dma_semaphore, #tpu.memory_space<semaphore_mem>>
    tpu.wait_dma2 semaphore(%699 : memref<!tpu.dma_semaphore, #tpu.memory_space<semaphore_mem>>) src(%695 : memref<128xf32, #tpu.memory_space<any>>) dst(%697 : memref<128xf32, #tpu.memory_space<vmem>>)
    %c0_i32_629 = arith.constant 0 : i32
    %c1_i32_630 = arith.constant 1 : i32
    %c2_i32_631 = arith.constant 2 : i32
    %c1_i32_632 = arith.constant 1 : i32
    %c2_i32_633 = arith.constant 2 : i32
    %c0_i32_634 = arith.constant 0 : i32
    %700 = tpu.memref_slice %arg3[%c0_i32_629, %c0_i32_634] : memref<256x128xf32, #tpu.memory_space<any>> -> memref<1x128xf32, #tpu.memory_space<any>>
    %701 = tpu.memref_squeeze %700 : memref<1x128xf32, #tpu.memory_space<any>> -> memref<128xf32, #tpu.memory_space<any>>
    %c0_i32_635 = arith.constant 0 : i32
    %702 = tpu.memref_slice %arg5[%c1_i32_630, %c2_i32_631, %c0_i32_635] : memref<8x8x128xf32, #tpu.memory_space<vmem>> -> memref<1x1x128xf32, #tpu.memory_space<vmem>>
    %703 = tpu.memref_squeeze %702 : memref<1x1x128xf32, #tpu.memory_space<vmem>> -> memref<128xf32, #tpu.memory_space<vmem>>
    %704 = tpu.memref_slice %arg6[%c1_i32_632, %c2_i32_633] : memref<8x8x!tpu.dma_semaphore, #tpu.memory_space<semaphore_mem>> -> memref<1x1x!tpu.dma_semaphore, #tpu.memory_space<semaphore_mem>>
    %705 = tpu.memref_squeeze %704 : memref<1x1x!tpu.dma_semaphore, #tpu.memory_space<semaphore_mem>> -> memref<!tpu.dma_semaphore, #tpu.memory_space<semaphore_mem>>
    tpu.wait_dma2 semaphore(%705 : memref<!tpu.dma_semaphore, #tpu.memory_space<semaphore_mem>>) src(%701 : memref<128xf32, #tpu.memory_space<any>>) dst(%703 : memref<128xf32, #tpu.memory_space<vmem>>)
    %c0_i32_636 = arith.constant 0 : i32
    %c1_i32_637 = arith.constant 1 : i32
    %c3_i32_638 = arith.constant 3 : i32
    %c1_i32_639 = arith.constant 1 : i32
    %c3_i32_640 = arith.constant 3 : i32
    %c0_i32_641 = arith.constant 0 : i32
    %706 = tpu.memref_slice %arg3[%c0_i32_636, %c0_i32_641] : memref<256x128xf32, #tpu.memory_space<any>> -> memref<1x128xf32, #tpu.memory_space<any>>
    %707 = tpu.memref_squeeze %706 : memref<1x128xf32, #tpu.memory_space<any>> -> memref<128xf32, #tpu.memory_space<any>>
    %c0_i32_642 = arith.constant 0 : i32
    %708 = tpu.memref_slice %arg5[%c1_i32_637, %c3_i32_638, %c0_i32_642] : memref<8x8x128xf32, #tpu.memory_space<vmem>> -> memref<1x1x128xf32, #tpu.memory_space<vmem>>
    %709 = tpu.memref_squeeze %708 : memref<1x1x128xf32, #tpu.memory_space<vmem>> -> memref<128xf32, #tpu.memory_space<vmem>>
    %710 = tpu.memref_slice %arg6[%c1_i32_639, %c3_i32_640] : memref<8x8x!tpu.dma_semaphore, #tpu.memory_space<semaphore_mem>> -> memref<1x1x!tpu.dma_semaphore, #tpu.memory_space<semaphore_mem>>
    %711 = tpu.memref_squeeze %710 : memref<1x1x!tpu.dma_semaphore, #tpu.memory_space<semaphore_mem>> -> memref<!tpu.dma_semaphore, #tpu.memory_space<semaphore_mem>>
    tpu.wait_dma2 semaphore(%711 : memref<!tpu.dma_semaphore, #tpu.memory_space<semaphore_mem>>) src(%707 : memref<128xf32, #tpu.memory_space<any>>) dst(%709 : memref<128xf32, #tpu.memory_space<vmem>>)
    %c0_i32_643 = arith.constant 0 : i32
    %c1_i32_644 = arith.constant 1 : i32
    %c4_i32_645 = arith.constant 4 : i32
    %c1_i32_646 = arith.constant 1 : i32
    %c4_i32_647 = arith.constant 4 : i32
    %c0_i32_648 = arith.constant 0 : i32
    %712 = tpu.memref_slice %arg3[%c0_i32_643, %c0_i32_648] : memref<256x128xf32, #tpu.memory_space<any>> -> memref<1x128xf32, #tpu.memory_space<any>>
    %713 = tpu.memref_squeeze %712 : memref<1x128xf32, #tpu.memory_space<any>> -> memref<128xf32, #tpu.memory_space<any>>
    %c0_i32_649 = arith.constant 0 : i32
    %714 = tpu.memref_slice %arg5[%c1_i32_644, %c4_i32_645, %c0_i32_649] : memref<8x8x128xf32, #tpu.memory_space<vmem>> -> memref<1x1x128xf32, #tpu.memory_space<vmem>>
    %715 = tpu.memref_squeeze %714 : memref<1x1x128xf32, #tpu.memory_space<vmem>> -> memref<128xf32, #tpu.memory_space<vmem>>
    %716 = tpu.memref_slice %arg6[%c1_i32_646, %c4_i32_647] : memref<8x8x!tpu.dma_semaphore, #tpu.memory_space<semaphore_mem>> -> memref<1x1x!tpu.dma_semaphore, #tpu.memory_space<semaphore_mem>>
    %717 = tpu.memref_squeeze %716 : memref<1x1x!tpu.dma_semaphore, #tpu.memory_space<semaphore_mem>> -> memref<!tpu.dma_semaphore, #tpu.memory_space<semaphore_mem>>
    tpu.wait_dma2 semaphore(%717 : memref<!tpu.dma_semaphore, #tpu.memory_space<semaphore_mem>>) src(%713 : memref<128xf32, #tpu.memory_space<any>>) dst(%715 : memref<128xf32, #tpu.memory_space<vmem>>)
    %c0_i32_650 = arith.constant 0 : i32
    %c1_i32_651 = arith.constant 1 : i32
    %c5_i32_652 = arith.constant 5 : i32
    %c1_i32_653 = arith.constant 1 : i32
    %c5_i32_654 = arith.constant 5 : i32
    %c0_i32_655 = arith.constant 0 : i32
    %718 = tpu.memref_slice %arg3[%c0_i32_650, %c0_i32_655] : memref<256x128xf32, #tpu.memory_space<any>> -> memref<1x128xf32, #tpu.memory_space<any>>
    %719 = tpu.memref_squeeze %718 : memref<1x128xf32, #tpu.memory_space<any>> -> memref<128xf32, #tpu.memory_space<any>>
    %c0_i32_656 = arith.constant 0 : i32
    %720 = tpu.memref_slice %arg5[%c1_i32_651, %c5_i32_652, %c0_i32_656] : memref<8x8x128xf32, #tpu.memory_space<vmem>> -> memref<1x1x128xf32, #tpu.memory_space<vmem>>
    %721 = tpu.memref_squeeze %720 : memref<1x1x128xf32, #tpu.memory_space<vmem>> -> memref<128xf32, #tpu.memory_space<vmem>>
    %722 = tpu.memref_slice %arg6[%c1_i32_653, %c5_i32_654] : memref<8x8x!tpu.dma_semaphore, #tpu.memory_space<semaphore_mem>> -> memref<1x1x!tpu.dma_semaphore, #tpu.memory_space<semaphore_mem>>
    %723 = tpu.memref_squeeze %722 : memref<1x1x!tpu.dma_semaphore, #tpu.memory_space<semaphore_mem>> -> memref<!tpu.dma_semaphore, #tpu.memory_space<semaphore_mem>>
    tpu.wait_dma2 semaphore(%723 : memref<!tpu.dma_semaphore, #tpu.memory_space<semaphore_mem>>) src(%719 : memref<128xf32, #tpu.memory_space<any>>) dst(%721 : memref<128xf32, #tpu.memory_space<vmem>>)
    %c0_i32_657 = arith.constant 0 : i32
    %c1_i32_658 = arith.constant 1 : i32
    %c6_i32_659 = arith.constant 6 : i32
    %c1_i32_660 = arith.constant 1 : i32
    %c6_i32_661 = arith.constant 6 : i32
    %c0_i32_662 = arith.constant 0 : i32
    %724 = tpu.memref_slice %arg3[%c0_i32_657, %c0_i32_662] : memref<256x128xf32, #tpu.memory_space<any>> -> memref<1x128xf32, #tpu.memory_space<any>>
    %725 = tpu.memref_squeeze %724 : memref<1x128xf32, #tpu.memory_space<any>> -> memref<128xf32, #tpu.memory_space<any>>
    %c0_i32_663 = arith.constant 0 : i32
    %726 = tpu.memref_slice %arg5[%c1_i32_658, %c6_i32_659, %c0_i32_663] : memref<8x8x128xf32, #tpu.memory_space<vmem>> -> memref<1x1x128xf32, #tpu.memory_space<vmem>>
    %727 = tpu.memref_squeeze %726 : memref<1x1x128xf32, #tpu.memory_space<vmem>> -> memref<128xf32, #tpu.memory_space<vmem>>
    %728 = tpu.memref_slice %arg6[%c1_i32_660, %c6_i32_661] : memref<8x8x!tpu.dma_semaphore, #tpu.memory_space<semaphore_mem>> -> memref<1x1x!tpu.dma_semaphore, #tpu.memory_space<semaphore_mem>>
    %729 = tpu.memref_squeeze %728 : memref<1x1x!tpu.dma_semaphore, #tpu.memory_space<semaphore_mem>> -> memref<!tpu.dma_semaphore, #tpu.memory_space<semaphore_mem>>
    tpu.wait_dma2 semaphore(%729 : memref<!tpu.dma_semaphore, #tpu.memory_space<semaphore_mem>>) src(%725 : memref<128xf32, #tpu.memory_space<any>>) dst(%727 : memref<128xf32, #tpu.memory_space<vmem>>)
    %c0_i32_664 = arith.constant 0 : i32
    %c1_i32_665 = arith.constant 1 : i32
    %c7_i32_666 = arith.constant 7 : i32
    %c1_i32_667 = arith.constant 1 : i32
    %c7_i32_668 = arith.constant 7 : i32
    %c0_i32_669 = arith.constant 0 : i32
    %730 = tpu.memref_slice %arg3[%c0_i32_664, %c0_i32_669] : memref<256x128xf32, #tpu.memory_space<any>> -> memref<1x128xf32, #tpu.memory_space<any>>
    %731 = tpu.memref_squeeze %730 : memref<1x128xf32, #tpu.memory_space<any>> -> memref<128xf32, #tpu.memory_space<any>>
    %c0_i32_670 = arith.constant 0 : i32
    %732 = tpu.memref_slice %arg5[%c1_i32_665, %c7_i32_666, %c0_i32_670] : memref<8x8x128xf32, #tpu.memory_space<vmem>> -> memref<1x1x128xf32, #tpu.memory_space<vmem>>
    %733 = tpu.memref_squeeze %732 : memref<1x1x128xf32, #tpu.memory_space<vmem>> -> memref<128xf32, #tpu.memory_space<vmem>>
    %734 = tpu.memref_slice %arg6[%c1_i32_667, %c7_i32_668] : memref<8x8x!tpu.dma_semaphore, #tpu.memory_space<semaphore_mem>> -> memref<1x1x!tpu.dma_semaphore, #tpu.memory_space<semaphore_mem>>
    %735 = tpu.memref_squeeze %734 : memref<1x1x!tpu.dma_semaphore, #tpu.memory_space<semaphore_mem>> -> memref<!tpu.dma_semaphore, #tpu.memory_space<semaphore_mem>>
    tpu.wait_dma2 semaphore(%735 : memref<!tpu.dma_semaphore, #tpu.memory_space<semaphore_mem>>) src(%731 : memref<128xf32, #tpu.memory_space<any>>) dst(%733 : memref<128xf32, #tpu.memory_space<vmem>>)
    %c0_i32_671 = arith.constant 0 : i32
    %c2_i32_672 = arith.constant 2 : i32
    %c0_i32_673 = arith.constant 0 : i32
    %c2_i32_674 = arith.constant 2 : i32
    %c0_i32_675 = arith.constant 0 : i32
    %c0_i32_676 = arith.constant 0 : i32
    %736 = tpu.memref_slice %arg3[%c0_i32_671, %c0_i32_676] : memref<256x128xf32, #tpu.memory_space<any>> -> memref<1x128xf32, #tpu.memory_space<any>>
    %737 = tpu.memref_squeeze %736 : memref<1x128xf32, #tpu.memory_space<any>> -> memref<128xf32, #tpu.memory_space<any>>
    %c0_i32_677 = arith.constant 0 : i32
    %738 = tpu.memref_slice %arg5[%c2_i32_672, %c0_i32_673, %c0_i32_677] : memref<8x8x128xf32, #tpu.memory_space<vmem>> -> memref<1x1x128xf32, #tpu.memory_space<vmem>>
    %739 = tpu.memref_squeeze %738 : memref<1x1x128xf32, #tpu.memory_space<vmem>> -> memref<128xf32, #tpu.memory_space<vmem>>
    %740 = tpu.memref_slice %arg6[%c2_i32_674, %c0_i32_675] : memref<8x8x!tpu.dma_semaphore, #tpu.memory_space<semaphore_mem>> -> memref<1x1x!tpu.dma_semaphore, #tpu.memory_space<semaphore_mem>>
    %741 = tpu.memref_squeeze %740 : memref<1x1x!tpu.dma_semaphore, #tpu.memory_space<semaphore_mem>> -> memref<!tpu.dma_semaphore, #tpu.memory_space<semaphore_mem>>
    tpu.wait_dma2 semaphore(%741 : memref<!tpu.dma_semaphore, #tpu.memory_space<semaphore_mem>>) src(%737 : memref<128xf32, #tpu.memory_space<any>>) dst(%739 : memref<128xf32, #tpu.memory_space<vmem>>)
    %c0_i32_678 = arith.constant 0 : i32
    %c2_i32_679 = arith.constant 2 : i32
    %c1_i32_680 = arith.constant 1 : i32
    %c2_i32_681 = arith.constant 2 : i32
    %c1_i32_682 = arith.constant 1 : i32
    %c0_i32_683 = arith.constant 0 : i32
    %742 = tpu.memref_slice %arg3[%c0_i32_678, %c0_i32_683] : memref<256x128xf32, #tpu.memory_space<any>> -> memref<1x128xf32, #tpu.memory_space<any>>
    %743 = tpu.memref_squeeze %742 : memref<1x128xf32, #tpu.memory_space<any>> -> memref<128xf32, #tpu.memory_space<any>>
    %c0_i32_684 = arith.constant 0 : i32
    %744 = tpu.memref_slice %arg5[%c2_i32_679, %c1_i32_680, %c0_i32_684] : memref<8x8x128xf32, #tpu.memory_space<vmem>> -> memref<1x1x128xf32, #tpu.memory_space<vmem>>
    %745 = tpu.memref_squeeze %744 : memref<1x1x128xf32, #tpu.memory_space<vmem>> -> memref<128xf32, #tpu.memory_space<vmem>>
    %746 = tpu.memref_slice %arg6[%c2_i32_681, %c1_i32_682] : memref<8x8x!tpu.dma_semaphore, #tpu.memory_space<semaphore_mem>> -> memref<1x1x!tpu.dma_semaphore, #tpu.memory_space<semaphore_mem>>
    %747 = tpu.memref_squeeze %746 : memref<1x1x!tpu.dma_semaphore, #tpu.memory_space<semaphore_mem>> -> memref<!tpu.dma_semaphore, #tpu.memory_space<semaphore_mem>>
    tpu.wait_dma2 semaphore(%747 : memref<!tpu.dma_semaphore, #tpu.memory_space<semaphore_mem>>) src(%743 : memref<128xf32, #tpu.memory_space<any>>) dst(%745 : memref<128xf32, #tpu.memory_space<vmem>>)
    %c0_i32_685 = arith.constant 0 : i32
    %c2_i32_686 = arith.constant 2 : i32
    %c2_i32_687 = arith.constant 2 : i32
    %c2_i32_688 = arith.constant 2 : i32
    %c2_i32_689 = arith.constant 2 : i32
    %c0_i32_690 = arith.constant 0 : i32
    %748 = tpu.memref_slice %arg3[%c0_i32_685, %c0_i32_690] : memref<256x128xf32, #tpu.memory_space<any>> -> memref<1x128xf32, #tpu.memory_space<any>>
    %749 = tpu.memref_squeeze %748 : memref<1x128xf32, #tpu.memory_space<any>> -> memref<128xf32, #tpu.memory_space<any>>
    %c0_i32_691 = arith.constant 0 : i32
    %750 = tpu.memref_slice %arg5[%c2_i32_686, %c2_i32_687, %c0_i32_691] : memref<8x8x128xf32, #tpu.memory_space<vmem>> -> memref<1x1x128xf32, #tpu.memory_space<vmem>>
    %751 = tpu.memref_squeeze %750 : memref<1x1x128xf32, #tpu.memory_space<vmem>> -> memref<128xf32, #tpu.memory_space<vmem>>
    %752 = tpu.memref_slice %arg6[%c2_i32_688, %c2_i32_689] : memref<8x8x!tpu.dma_semaphore, #tpu.memory_space<semaphore_mem>> -> memref<1x1x!tpu.dma_semaphore, #tpu.memory_space<semaphore_mem>>
    %753 = tpu.memref_squeeze %752 : memref<1x1x!tpu.dma_semaphore, #tpu.memory_space<semaphore_mem>> -> memref<!tpu.dma_semaphore, #tpu.memory_space<semaphore_mem>>
    tpu.wait_dma2 semaphore(%753 : memref<!tpu.dma_semaphore, #tpu.memory_space<semaphore_mem>>) src(%749 : memref<128xf32, #tpu.memory_space<any>>) dst(%751 : memref<128xf32, #tpu.memory_space<vmem>>)
    %c0_i32_692 = arith.constant 0 : i32
    %c2_i32_693 = arith.constant 2 : i32
    %c3_i32_694 = arith.constant 3 : i32
    %c2_i32_695 = arith.constant 2 : i32
    %c3_i32_696 = arith.constant 3 : i32
    %c0_i32_697 = arith.constant 0 : i32
    %754 = tpu.memref_slice %arg3[%c0_i32_692, %c0_i32_697] : memref<256x128xf32, #tpu.memory_space<any>> -> memref<1x128xf32, #tpu.memory_space<any>>
    %755 = tpu.memref_squeeze %754 : memref<1x128xf32, #tpu.memory_space<any>> -> memref<128xf32, #tpu.memory_space<any>>
    %c0_i32_698 = arith.constant 0 : i32
    %756 = tpu.memref_slice %arg5[%c2_i32_693, %c3_i32_694, %c0_i32_698] : memref<8x8x128xf32, #tpu.memory_space<vmem>> -> memref<1x1x128xf32, #tpu.memory_space<vmem>>
    %757 = tpu.memref_squeeze %756 : memref<1x1x128xf32, #tpu.memory_space<vmem>> -> memref<128xf32, #tpu.memory_space<vmem>>
    %758 = tpu.memref_slice %arg6[%c2_i32_695, %c3_i32_696] : memref<8x8x!tpu.dma_semaphore, #tpu.memory_space<semaphore_mem>> -> memref<1x1x!tpu.dma_semaphore, #tpu.memory_space<semaphore_mem>>
    %759 = tpu.memref_squeeze %758 : memref<1x1x!tpu.dma_semaphore, #tpu.memory_space<semaphore_mem>> -> memref<!tpu.dma_semaphore, #tpu.memory_space<semaphore_mem>>
    tpu.wait_dma2 semaphore(%759 : memref<!tpu.dma_semaphore, #tpu.memory_space<semaphore_mem>>) src(%755 : memref<128xf32, #tpu.memory_space<any>>) dst(%757 : memref<128xf32, #tpu.memory_space<vmem>>)
    %c0_i32_699 = arith.constant 0 : i32
    %c2_i32_700 = arith.constant 2 : i32
    %c4_i32_701 = arith.constant 4 : i32
    %c2_i32_702 = arith.constant 2 : i32
    %c4_i32_703 = arith.constant 4 : i32
    %c0_i32_704 = arith.constant 0 : i32
    %760 = tpu.memref_slice %arg3[%c0_i32_699, %c0_i32_704] : memref<256x128xf32, #tpu.memory_space<any>> -> memref<1x128xf32, #tpu.memory_space<any>>
    %761 = tpu.memref_squeeze %760 : memref<1x128xf32, #tpu.memory_space<any>> -> memref<128xf32, #tpu.memory_space<any>>
    %c0_i32_705 = arith.constant 0 : i32
    %762 = tpu.memref_slice %arg5[%c2_i32_700, %c4_i32_701, %c0_i32_705] : memref<8x8x128xf32, #tpu.memory_space<vmem>> -> memref<1x1x128xf32, #tpu.memory_space<vmem>>
    %763 = tpu.memref_squeeze %762 : memref<1x1x128xf32, #tpu.memory_space<vmem>> -> memref<128xf32, #tpu.memory_space<vmem>>
    %764 = tpu.memref_slice %arg6[%c2_i32_702, %c4_i32_703] : memref<8x8x!tpu.dma_semaphore, #tpu.memory_space<semaphore_mem>> -> memref<1x1x!tpu.dma_semaphore, #tpu.memory_space<semaphore_mem>>
    %765 = tpu.memref_squeeze %764 : memref<1x1x!tpu.dma_semaphore, #tpu.memory_space<semaphore_mem>> -> memref<!tpu.dma_semaphore, #tpu.memory_space<semaphore_mem>>
    tpu.wait_dma2 semaphore(%765 : memref<!tpu.dma_semaphore, #tpu.memory_space<semaphore_mem>>) src(%761 : memref<128xf32, #tpu.memory_space<any>>) dst(%763 : memref<128xf32, #tpu.memory_space<vmem>>)
    %c0_i32_706 = arith.constant 0 : i32
    %c2_i32_707 = arith.constant 2 : i32
    %c5_i32_708 = arith.constant 5 : i32
    %c2_i32_709 = arith.constant 2 : i32
    %c5_i32_710 = arith.constant 5 : i32
    %c0_i32_711 = arith.constant 0 : i32
    %766 = tpu.memref_slice %arg3[%c0_i32_706, %c0_i32_711] : memref<256x128xf32, #tpu.memory_space<any>> -> memref<1x128xf32, #tpu.memory_space<any>>
    %767 = tpu.memref_squeeze %766 : memref<1x128xf32, #tpu.memory_space<any>> -> memref<128xf32, #tpu.memory_space<any>>
    %c0_i32_712 = arith.constant 0 : i32
    %768 = tpu.memref_slice %arg5[%c2_i32_707, %c5_i32_708, %c0_i32_712] : memref<8x8x128xf32, #tpu.memory_space<vmem>> -> memref<1x1x128xf32, #tpu.memory_space<vmem>>
    %769 = tpu.memref_squeeze %768 : memref<1x1x128xf32, #tpu.memory_space<vmem>> -> memref<128xf32, #tpu.memory_space<vmem>>
    %770 = tpu.memref_slice %arg6[%c2_i32_709, %c5_i32_710] : memref<8x8x!tpu.dma_semaphore, #tpu.memory_space<semaphore_mem>> -> memref<1x1x!tpu.dma_semaphore, #tpu.memory_space<semaphore_mem>>
    %771 = tpu.memref_squeeze %770 : memref<1x1x!tpu.dma_semaphore, #tpu.memory_space<semaphore_mem>> -> memref<!tpu.dma_semaphore, #tpu.memory_space<semaphore_mem>>
    tpu.wait_dma2 semaphore(%771 : memref<!tpu.dma_semaphore, #tpu.memory_space<semaphore_mem>>) src(%767 : memref<128xf32, #tpu.memory_space<any>>) dst(%769 : memref<128xf32, #tpu.memory_space<vmem>>)
    %c0_i32_713 = arith.constant 0 : i32
    %c2_i32_714 = arith.constant 2 : i32
    %c6_i32_715 = arith.constant 6 : i32
    %c2_i32_716 = arith.constant 2 : i32
    %c6_i32_717 = arith.constant 6 : i32
    %c0_i32_718 = arith.constant 0 : i32
    %772 = tpu.memref_slice %arg3[%c0_i32_713, %c0_i32_718] : memref<256x128xf32, #tpu.memory_space<any>> -> memref<1x128xf32, #tpu.memory_space<any>>
    %773 = tpu.memref_squeeze %772 : memref<1x128xf32, #tpu.memory_space<any>> -> memref<128xf32, #tpu.memory_space<any>>
    %c0_i32_719 = arith.constant 0 : i32
    %774 = tpu.memref_slice %arg5[%c2_i32_714, %c6_i32_715, %c0_i32_719] : memref<8x8x128xf32, #tpu.memory_space<vmem>> -> memref<1x1x128xf32, #tpu.memory_space<vmem>>
    %775 = tpu.memref_squeeze %774 : memref<1x1x128xf32, #tpu.memory_space<vmem>> -> memref<128xf32, #tpu.memory_space<vmem>>
    %776 = tpu.memref_slice %arg6[%c2_i32_716, %c6_i32_717] : memref<8x8x!tpu.dma_semaphore, #tpu.memory_space<semaphore_mem>> -> memref<1x1x!tpu.dma_semaphore, #tpu.memory_space<semaphore_mem>>
    %777 = tpu.memref_squeeze %776 : memref<1x1x!tpu.dma_semaphore, #tpu.memory_space<semaphore_mem>> -> memref<!tpu.dma_semaphore, #tpu.memory_space<semaphore_mem>>
    tpu.wait_dma2 semaphore(%777 : memref<!tpu.dma_semaphore, #tpu.memory_space<semaphore_mem>>) src(%773 : memref<128xf32, #tpu.memory_space<any>>) dst(%775 : memref<128xf32, #tpu.memory_space<vmem>>)
    %c0_i32_720 = arith.constant 0 : i32
    %c2_i32_721 = arith.constant 2 : i32
    %c7_i32_722 = arith.constant 7 : i32
    %c2_i32_723 = arith.constant 2 : i32
    %c7_i32_724 = arith.constant 7 : i32
    %c0_i32_725 = arith.constant 0 : i32
    %778 = tpu.memref_slice %arg3[%c0_i32_720, %c0_i32_725] : memref<256x128xf32, #tpu.memory_space<any>> -> memref<1x128xf32, #tpu.memory_space<any>>
    %779 = tpu.memref_squeeze %778 : memref<1x128xf32, #tpu.memory_space<any>> -> memref<128xf32, #tpu.memory_space<any>>
    %c0_i32_726 = arith.constant 0 : i32
    %780 = tpu.memref_slice %arg5[%c2_i32_721, %c7_i32_722, %c0_i32_726] : memref<8x8x128xf32, #tpu.memory_space<vmem>> -> memref<1x1x128xf32, #tpu.memory_space<vmem>>
    %781 = tpu.memref_squeeze %780 : memref<1x1x128xf32, #tpu.memory_space<vmem>> -> memref<128xf32, #tpu.memory_space<vmem>>
    %782 = tpu.memref_slice %arg6[%c2_i32_723, %c7_i32_724] : memref<8x8x!tpu.dma_semaphore, #tpu.memory_space<semaphore_mem>> -> memref<1x1x!tpu.dma_semaphore, #tpu.memory_space<semaphore_mem>>
    %783 = tpu.memref_squeeze %782 : memref<1x1x!tpu.dma_semaphore, #tpu.memory_space<semaphore_mem>> -> memref<!tpu.dma_semaphore, #tpu.memory_space<semaphore_mem>>
    tpu.wait_dma2 semaphore(%783 : memref<!tpu.dma_semaphore, #tpu.memory_space<semaphore_mem>>) src(%779 : memref<128xf32, #tpu.memory_space<any>>) dst(%781 : memref<128xf32, #tpu.memory_space<vmem>>)
    %c0_i32_727 = arith.constant 0 : i32
    %c3_i32_728 = arith.constant 3 : i32
    %c0_i32_729 = arith.constant 0 : i32
    %c3_i32_730 = arith.constant 3 : i32
    %c0_i32_731 = arith.constant 0 : i32
    %c0_i32_732 = arith.constant 0 : i32
    %784 = tpu.memref_slice %arg3[%c0_i32_727, %c0_i32_732] : memref<256x128xf32, #tpu.memory_space<any>> -> memref<1x128xf32, #tpu.memory_space<any>>
    %785 = tpu.memref_squeeze %784 : memref<1x128xf32, #tpu.memory_space<any>> -> memref<128xf32, #tpu.memory_space<any>>
    %c0_i32_733 = arith.constant 0 : i32
    %786 = tpu.memref_slice %arg5[%c3_i32_728, %c0_i32_729, %c0_i32_733] : memref<8x8x128xf32, #tpu.memory_space<vmem>> -> memref<1x1x128xf32, #tpu.memory_space<vmem>>
    %787 = tpu.memref_squeeze %786 : memref<1x1x128xf32, #tpu.memory_space<vmem>> -> memref<128xf32, #tpu.memory_space<vmem>>
    %788 = tpu.memref_slice %arg6[%c3_i32_730, %c0_i32_731] : memref<8x8x!tpu.dma_semaphore, #tpu.memory_space<semaphore_mem>> -> memref<1x1x!tpu.dma_semaphore, #tpu.memory_space<semaphore_mem>>
    %789 = tpu.memref_squeeze %788 : memref<1x1x!tpu.dma_semaphore, #tpu.memory_space<semaphore_mem>> -> memref<!tpu.dma_semaphore, #tpu.memory_space<semaphore_mem>>
    tpu.wait_dma2 semaphore(%789 : memref<!tpu.dma_semaphore, #tpu.memory_space<semaphore_mem>>) src(%785 : memref<128xf32, #tpu.memory_space<any>>) dst(%787 : memref<128xf32, #tpu.memory_space<vmem>>)
    %c0_i32_734 = arith.constant 0 : i32
    %c3_i32_735 = arith.constant 3 : i32
    %c1_i32_736 = arith.constant 1 : i32
    %c3_i32_737 = arith.constant 3 : i32
    %c1_i32_738 = arith.constant 1 : i32
    %c0_i32_739 = arith.constant 0 : i32
    %790 = tpu.memref_slice %arg3[%c0_i32_734, %c0_i32_739] : memref<256x128xf32, #tpu.memory_space<any>> -> memref<1x128xf32, #tpu.memory_space<any>>
    %791 = tpu.memref_squeeze %790 : memref<1x128xf32, #tpu.memory_space<any>> -> memref<128xf32, #tpu.memory_space<any>>
    %c0_i32_740 = arith.constant 0 : i32
    %792 = tpu.memref_slice %arg5[%c3_i32_735, %c1_i32_736, %c0_i32_740] : memref<8x8x128xf32, #tpu.memory_space<vmem>> -> memref<1x1x128xf32, #tpu.memory_space<vmem>>
    %793 = tpu.memref_squeeze %792 : memref<1x1x128xf32, #tpu.memory_space<vmem>> -> memref<128xf32, #tpu.memory_space<vmem>>
    %794 = tpu.memref_slice %arg6[%c3_i32_737, %c1_i32_738] : memref<8x8x!tpu.dma_semaphore, #tpu.memory_space<semaphore_mem>> -> memref<1x1x!tpu.dma_semaphore, #tpu.memory_space<semaphore_mem>>
    %795 = tpu.memref_squeeze %794 : memref<1x1x!tpu.dma_semaphore, #tpu.memory_space<semaphore_mem>> -> memref<!tpu.dma_semaphore, #tpu.memory_space<semaphore_mem>>
    tpu.wait_dma2 semaphore(%795 : memref<!tpu.dma_semaphore, #tpu.memory_space<semaphore_mem>>) src(%791 : memref<128xf32, #tpu.memory_space<any>>) dst(%793 : memref<128xf32, #tpu.memory_space<vmem>>)
    %c0_i32_741 = arith.constant 0 : i32
    %c3_i32_742 = arith.constant 3 : i32
    %c2_i32_743 = arith.constant 2 : i32
    %c3_i32_744 = arith.constant 3 : i32
    %c2_i32_745 = arith.constant 2 : i32
    %c0_i32_746 = arith.constant 0 : i32
    %796 = tpu.memref_slice %arg3[%c0_i32_741, %c0_i32_746] : memref<256x128xf32, #tpu.memory_space<any>> -> memref<1x128xf32, #tpu.memory_space<any>>
    %797 = tpu.memref_squeeze %796 : memref<1x128xf32, #tpu.memory_space<any>> -> memref<128xf32, #tpu.memory_space<any>>
    %c0_i32_747 = arith.constant 0 : i32
    %798 = tpu.memref_slice %arg5[%c3_i32_742, %c2_i32_743, %c0_i32_747] : memref<8x8x128xf32, #tpu.memory_space<vmem>> -> memref<1x1x128xf32, #tpu.memory_space<vmem>>
    %799 = tpu.memref_squeeze %798 : memref<1x1x128xf32, #tpu.memory_space<vmem>> -> memref<128xf32, #tpu.memory_space<vmem>>
    %800 = tpu.memref_slice %arg6[%c3_i32_744, %c2_i32_745] : memref<8x8x!tpu.dma_semaphore, #tpu.memory_space<semaphore_mem>> -> memref<1x1x!tpu.dma_semaphore, #tpu.memory_space<semaphore_mem>>
    %801 = tpu.memref_squeeze %800 : memref<1x1x!tpu.dma_semaphore, #tpu.memory_space<semaphore_mem>> -> memref<!tpu.dma_semaphore, #tpu.memory_space<semaphore_mem>>
    tpu.wait_dma2 semaphore(%801 : memref<!tpu.dma_semaphore, #tpu.memory_space<semaphore_mem>>) src(%797 : memref<128xf32, #tpu.memory_space<any>>) dst(%799 : memref<128xf32, #tpu.memory_space<vmem>>)
    %c0_i32_748 = arith.constant 0 : i32
    %c3_i32_749 = arith.constant 3 : i32
    %c3_i32_750 = arith.constant 3 : i32
    %c3_i32_751 = arith.constant 3 : i32
    %c3_i32_752 = arith.constant 3 : i32
    %c0_i32_753 = arith.constant 0 : i32
    %802 = tpu.memref_slice %arg3[%c0_i32_748, %c0_i32_753] : memref<256x128xf32, #tpu.memory_space<any>> -> memref<1x128xf32, #tpu.memory_space<any>>
    %803 = tpu.memref_squeeze %802 : memref<1x128xf32, #tpu.memory_space<any>> -> memref<128xf32, #tpu.memory_space<any>>
    %c0_i32_754 = arith.constant 0 : i32
    %804 = tpu.memref_slice %arg5[%c3_i32_749, %c3_i32_750, %c0_i32_754] : memref<8x8x128xf32, #tpu.memory_space<vmem>> -> memref<1x1x128xf32, #tpu.memory_space<vmem>>
    %805 = tpu.memref_squeeze %804 : memref<1x1x128xf32, #tpu.memory_space<vmem>> -> memref<128xf32, #tpu.memory_space<vmem>>
    %806 = tpu.memref_slice %arg6[%c3_i32_751, %c3_i32_752] : memref<8x8x!tpu.dma_semaphore, #tpu.memory_space<semaphore_mem>> -> memref<1x1x!tpu.dma_semaphore, #tpu.memory_space<semaphore_mem>>
    %807 = tpu.memref_squeeze %806 : memref<1x1x!tpu.dma_semaphore, #tpu.memory_space<semaphore_mem>> -> memref<!tpu.dma_semaphore, #tpu.memory_space<semaphore_mem>>
    tpu.wait_dma2 semaphore(%807 : memref<!tpu.dma_semaphore, #tpu.memory_space<semaphore_mem>>) src(%803 : memref<128xf32, #tpu.memory_space<any>>) dst(%805 : memref<128xf32, #tpu.memory_space<vmem>>)
    %c0_i32_755 = arith.constant 0 : i32
    %c3_i32_756 = arith.constant 3 : i32
    %c4_i32_757 = arith.constant 4 : i32
    %c3_i32_758 = arith.constant 3 : i32
    %c4_i32_759 = arith.constant 4 : i32
    %c0_i32_760 = arith.constant 0 : i32
    %808 = tpu.memref_slice %arg3[%c0_i32_755, %c0_i32_760] : memref<256x128xf32, #tpu.memory_space<any>> -> memref<1x128xf32, #tpu.memory_space<any>>
    %809 = tpu.memref_squeeze %808 : memref<1x128xf32, #tpu.memory_space<any>> -> memref<128xf32, #tpu.memory_space<any>>
    %c0_i32_761 = arith.constant 0 : i32
    %810 = tpu.memref_slice %arg5[%c3_i32_756, %c4_i32_757, %c0_i32_761] : memref<8x8x128xf32, #tpu.memory_space<vmem>> -> memref<1x1x128xf32, #tpu.memory_space<vmem>>
    %811 = tpu.memref_squeeze %810 : memref<1x1x128xf32, #tpu.memory_space<vmem>> -> memref<128xf32, #tpu.memory_space<vmem>>
    %812 = tpu.memref_slice %arg6[%c3_i32_758, %c4_i32_759] : memref<8x8x!tpu.dma_semaphore, #tpu.memory_space<semaphore_mem>> -> memref<1x1x!tpu.dma_semaphore, #tpu.memory_space<semaphore_mem>>
    %813 = tpu.memref_squeeze %812 : memref<1x1x!tpu.dma_semaphore, #tpu.memory_space<semaphore_mem>> -> memref<!tpu.dma_semaphore, #tpu.memory_space<semaphore_mem>>
    tpu.wait_dma2 semaphore(%813 : memref<!tpu.dma_semaphore, #tpu.memory_space<semaphore_mem>>) src(%809 : memref<128xf32, #tpu.memory_space<any>>) dst(%811 : memref<128xf32, #tpu.memory_space<vmem>>)
    %c0_i32_762 = arith.constant 0 : i32
    %c3_i32_763 = arith.constant 3 : i32
    %c5_i32_764 = arith.constant 5 : i32
    %c3_i32_765 = arith.constant 3 : i32
    %c5_i32_766 = arith.constant 5 : i32
    %c0_i32_767 = arith.constant 0 : i32
    %814 = tpu.memref_slice %arg3[%c0_i32_762, %c0_i32_767] : memref<256x128xf32, #tpu.memory_space<any>> -> memref<1x128xf32, #tpu.memory_space<any>>
    %815 = tpu.memref_squeeze %814 : memref<1x128xf32, #tpu.memory_space<any>> -> memref<128xf32, #tpu.memory_space<any>>
    %c0_i32_768 = arith.constant 0 : i32
    %816 = tpu.memref_slice %arg5[%c3_i32_763, %c5_i32_764, %c0_i32_768] : memref<8x8x128xf32, #tpu.memory_space<vmem>> -> memref<1x1x128xf32, #tpu.memory_space<vmem>>
    %817 = tpu.memref_squeeze %816 : memref<1x1x128xf32, #tpu.memory_space<vmem>> -> memref<128xf32, #tpu.memory_space<vmem>>
    %818 = tpu.memref_slice %arg6[%c3_i32_765, %c5_i32_766] : memref<8x8x!tpu.dma_semaphore, #tpu.memory_space<semaphore_mem>> -> memref<1x1x!tpu.dma_semaphore, #tpu.memory_space<semaphore_mem>>
    %819 = tpu.memref_squeeze %818 : memref<1x1x!tpu.dma_semaphore, #tpu.memory_space<semaphore_mem>> -> memref<!tpu.dma_semaphore, #tpu.memory_space<semaphore_mem>>
    tpu.wait_dma2 semaphore(%819 : memref<!tpu.dma_semaphore, #tpu.memory_space<semaphore_mem>>) src(%815 : memref<128xf32, #tpu.memory_space<any>>) dst(%817 : memref<128xf32, #tpu.memory_space<vmem>>)
    %c0_i32_769 = arith.constant 0 : i32
    %c3_i32_770 = arith.constant 3 : i32
    %c6_i32_771 = arith.constant 6 : i32
    %c3_i32_772 = arith.constant 3 : i32
    %c6_i32_773 = arith.constant 6 : i32
    %c0_i32_774 = arith.constant 0 : i32
    %820 = tpu.memref_slice %arg3[%c0_i32_769, %c0_i32_774] : memref<256x128xf32, #tpu.memory_space<any>> -> memref<1x128xf32, #tpu.memory_space<any>>
    %821 = tpu.memref_squeeze %820 : memref<1x128xf32, #tpu.memory_space<any>> -> memref<128xf32, #tpu.memory_space<any>>
    %c0_i32_775 = arith.constant 0 : i32
    %822 = tpu.memref_slice %arg5[%c3_i32_770, %c6_i32_771, %c0_i32_775] : memref<8x8x128xf32, #tpu.memory_space<vmem>> -> memref<1x1x128xf32, #tpu.memory_space<vmem>>
    %823 = tpu.memref_squeeze %822 : memref<1x1x128xf32, #tpu.memory_space<vmem>> -> memref<128xf32, #tpu.memory_space<vmem>>
    %824 = tpu.memref_slice %arg6[%c3_i32_772, %c6_i32_773] : memref<8x8x!tpu.dma_semaphore, #tpu.memory_space<semaphore_mem>> -> memref<1x1x!tpu.dma_semaphore, #tpu.memory_space<semaphore_mem>>
    %825 = tpu.memref_squeeze %824 : memref<1x1x!tpu.dma_semaphore, #tpu.memory_space<semaphore_mem>> -> memref<!tpu.dma_semaphore, #tpu.memory_space<semaphore_mem>>
    tpu.wait_dma2 semaphore(%825 : memref<!tpu.dma_semaphore, #tpu.memory_space<semaphore_mem>>) src(%821 : memref<128xf32, #tpu.memory_space<any>>) dst(%823 : memref<128xf32, #tpu.memory_space<vmem>>)
    %c0_i32_776 = arith.constant 0 : i32
    %c3_i32_777 = arith.constant 3 : i32
    %c7_i32_778 = arith.constant 7 : i32
    %c3_i32_779 = arith.constant 3 : i32
    %c7_i32_780 = arith.constant 7 : i32
    %c0_i32_781 = arith.constant 0 : i32
    %826 = tpu.memref_slice %arg3[%c0_i32_776, %c0_i32_781] : memref<256x128xf32, #tpu.memory_space<any>> -> memref<1x128xf32, #tpu.memory_space<any>>
    %827 = tpu.memref_squeeze %826 : memref<1x128xf32, #tpu.memory_space<any>> -> memref<128xf32, #tpu.memory_space<any>>
    %c0_i32_782 = arith.constant 0 : i32
    %828 = tpu.memref_slice %arg5[%c3_i32_777, %c7_i32_778, %c0_i32_782] : memref<8x8x128xf32, #tpu.memory_space<vmem>> -> memref<1x1x128xf32, #tpu.memory_space<vmem>>
    %829 = tpu.memref_squeeze %828 : memref<1x1x128xf32, #tpu.memory_space<vmem>> -> memref<128xf32, #tpu.memory_space<vmem>>
    %830 = tpu.memref_slice %arg6[%c3_i32_779, %c7_i32_780] : memref<8x8x!tpu.dma_semaphore, #tpu.memory_space<semaphore_mem>> -> memref<1x1x!tpu.dma_semaphore, #tpu.memory_space<semaphore_mem>>
    %831 = tpu.memref_squeeze %830 : memref<1x1x!tpu.dma_semaphore, #tpu.memory_space<semaphore_mem>> -> memref<!tpu.dma_semaphore, #tpu.memory_space<semaphore_mem>>
    tpu.wait_dma2 semaphore(%831 : memref<!tpu.dma_semaphore, #tpu.memory_space<semaphore_mem>>) src(%827 : memref<128xf32, #tpu.memory_space<any>>) dst(%829 : memref<128xf32, #tpu.memory_space<vmem>>)
    %c0_i32_783 = arith.constant 0 : i32
    %c4_i32_784 = arith.constant 4 : i32
    %c0_i32_785 = arith.constant 0 : i32
    %c4_i32_786 = arith.constant 4 : i32
    %c0_i32_787 = arith.constant 0 : i32
    %c0_i32_788 = arith.constant 0 : i32
    %832 = tpu.memref_slice %arg3[%c0_i32_783, %c0_i32_788] : memref<256x128xf32, #tpu.memory_space<any>> -> memref<1x128xf32, #tpu.memory_space<any>>
    %833 = tpu.memref_squeeze %832 : memref<1x128xf32, #tpu.memory_space<any>> -> memref<128xf32, #tpu.memory_space<any>>
    %c0_i32_789 = arith.constant 0 : i32
    %834 = tpu.memref_slice %arg5[%c4_i32_784, %c0_i32_785, %c0_i32_789] : memref<8x8x128xf32, #tpu.memory_space<vmem>> -> memref<1x1x128xf32, #tpu.memory_space<vmem>>
    %835 = tpu.memref_squeeze %834 : memref<1x1x128xf32, #tpu.memory_space<vmem>> -> memref<128xf32, #tpu.memory_space<vmem>>
    %836 = tpu.memref_slice %arg6[%c4_i32_786, %c0_i32_787] : memref<8x8x!tpu.dma_semaphore, #tpu.memory_space<semaphore_mem>> -> memref<1x1x!tpu.dma_semaphore, #tpu.memory_space<semaphore_mem>>
    %837 = tpu.memref_squeeze %836 : memref<1x1x!tpu.dma_semaphore, #tpu.memory_space<semaphore_mem>> -> memref<!tpu.dma_semaphore, #tpu.memory_space<semaphore_mem>>
    tpu.wait_dma2 semaphore(%837 : memref<!tpu.dma_semaphore, #tpu.memory_space<semaphore_mem>>) src(%833 : memref<128xf32, #tpu.memory_space<any>>) dst(%835 : memref<128xf32, #tpu.memory_space<vmem>>)
    %c0_i32_790 = arith.constant 0 : i32
    %c4_i32_791 = arith.constant 4 : i32
    %c1_i32_792 = arith.constant 1 : i32
    %c4_i32_793 = arith.constant 4 : i32
    %c1_i32_794 = arith.constant 1 : i32
    %c0_i32_795 = arith.constant 0 : i32
    %838 = tpu.memref_slice %arg3[%c0_i32_790, %c0_i32_795] : memref<256x128xf32, #tpu.memory_space<any>> -> memref<1x128xf32, #tpu.memory_space<any>>
    %839 = tpu.memref_squeeze %838 : memref<1x128xf32, #tpu.memory_space<any>> -> memref<128xf32, #tpu.memory_space<any>>
    %c0_i32_796 = arith.constant 0 : i32
    %840 = tpu.memref_slice %arg5[%c4_i32_791, %c1_i32_792, %c0_i32_796] : memref<8x8x128xf32, #tpu.memory_space<vmem>> -> memref<1x1x128xf32, #tpu.memory_space<vmem>>
    %841 = tpu.memref_squeeze %840 : memref<1x1x128xf32, #tpu.memory_space<vmem>> -> memref<128xf32, #tpu.memory_space<vmem>>
    %842 = tpu.memref_slice %arg6[%c4_i32_793, %c1_i32_794] : memref<8x8x!tpu.dma_semaphore, #tpu.memory_space<semaphore_mem>> -> memref<1x1x!tpu.dma_semaphore, #tpu.memory_space<semaphore_mem>>
    %843 = tpu.memref_squeeze %842 : memref<1x1x!tpu.dma_semaphore, #tpu.memory_space<semaphore_mem>> -> memref<!tpu.dma_semaphore, #tpu.memory_space<semaphore_mem>>
    tpu.wait_dma2 semaphore(%843 : memref<!tpu.dma_semaphore, #tpu.memory_space<semaphore_mem>>) src(%839 : memref<128xf32, #tpu.memory_space<any>>) dst(%841 : memref<128xf32, #tpu.memory_space<vmem>>)
    %c0_i32_797 = arith.constant 0 : i32
    %c4_i32_798 = arith.constant 4 : i32
    %c2_i32_799 = arith.constant 2 : i32
    %c4_i32_800 = arith.constant 4 : i32
    %c2_i32_801 = arith.constant 2 : i32
    %c0_i32_802 = arith.constant 0 : i32
    %844 = tpu.memref_slice %arg3[%c0_i32_797, %c0_i32_802] : memref<256x128xf32, #tpu.memory_space<any>> -> memref<1x128xf32, #tpu.memory_space<any>>
    %845 = tpu.memref_squeeze %844 : memref<1x128xf32, #tpu.memory_space<any>> -> memref<128xf32, #tpu.memory_space<any>>
    %c0_i32_803 = arith.constant 0 : i32
    %846 = tpu.memref_slice %arg5[%c4_i32_798, %c2_i32_799, %c0_i32_803] : memref<8x8x128xf32, #tpu.memory_space<vmem>> -> memref<1x1x128xf32, #tpu.memory_space<vmem>>
    %847 = tpu.memref_squeeze %846 : memref<1x1x128xf32, #tpu.memory_space<vmem>> -> memref<128xf32, #tpu.memory_space<vmem>>
    %848 = tpu.memref_slice %arg6[%c4_i32_800, %c2_i32_801] : memref<8x8x!tpu.dma_semaphore, #tpu.memory_space<semaphore_mem>> -> memref<1x1x!tpu.dma_semaphore, #tpu.memory_space<semaphore_mem>>
    %849 = tpu.memref_squeeze %848 : memref<1x1x!tpu.dma_semaphore, #tpu.memory_space<semaphore_mem>> -> memref<!tpu.dma_semaphore, #tpu.memory_space<semaphore_mem>>
    tpu.wait_dma2 semaphore(%849 : memref<!tpu.dma_semaphore, #tpu.memory_space<semaphore_mem>>) src(%845 : memref<128xf32, #tpu.memory_space<any>>) dst(%847 : memref<128xf32, #tpu.memory_space<vmem>>)
    %c0_i32_804 = arith.constant 0 : i32
    %c4_i32_805 = arith.constant 4 : i32
    %c3_i32_806 = arith.constant 3 : i32
    %c4_i32_807 = arith.constant 4 : i32
    %c3_i32_808 = arith.constant 3 : i32
    %c0_i32_809 = arith.constant 0 : i32
    %850 = tpu.memref_slice %arg3[%c0_i32_804, %c0_i32_809] : memref<256x128xf32, #tpu.memory_space<any>> -> memref<1x128xf32, #tpu.memory_space<any>>
    %851 = tpu.memref_squeeze %850 : memref<1x128xf32, #tpu.memory_space<any>> -> memref<128xf32, #tpu.memory_space<any>>
    %c0_i32_810 = arith.constant 0 : i32
    %852 = tpu.memref_slice %arg5[%c4_i32_805, %c3_i32_806, %c0_i32_810] : memref<8x8x128xf32, #tpu.memory_space<vmem>> -> memref<1x1x128xf32, #tpu.memory_space<vmem>>
    %853 = tpu.memref_squeeze %852 : memref<1x1x128xf32, #tpu.memory_space<vmem>> -> memref<128xf32, #tpu.memory_space<vmem>>
    %854 = tpu.memref_slice %arg6[%c4_i32_807, %c3_i32_808] : memref<8x8x!tpu.dma_semaphore, #tpu.memory_space<semaphore_mem>> -> memref<1x1x!tpu.dma_semaphore, #tpu.memory_space<semaphore_mem>>
    %855 = tpu.memref_squeeze %854 : memref<1x1x!tpu.dma_semaphore, #tpu.memory_space<semaphore_mem>> -> memref<!tpu.dma_semaphore, #tpu.memory_space<semaphore_mem>>
    tpu.wait_dma2 semaphore(%855 : memref<!tpu.dma_semaphore, #tpu.memory_space<semaphore_mem>>) src(%851 : memref<128xf32, #tpu.memory_space<any>>) dst(%853 : memref<128xf32, #tpu.memory_space<vmem>>)
    %c0_i32_811 = arith.constant 0 : i32
    %c4_i32_812 = arith.constant 4 : i32
    %c4_i32_813 = arith.constant 4 : i32
    %c4_i32_814 = arith.constant 4 : i32
    %c4_i32_815 = arith.constant 4 : i32
    %c0_i32_816 = arith.constant 0 : i32
    %856 = tpu.memref_slice %arg3[%c0_i32_811, %c0_i32_816] : memref<256x128xf32, #tpu.memory_space<any>> -> memref<1x128xf32, #tpu.memory_space<any>>
    %857 = tpu.memref_squeeze %856 : memref<1x128xf32, #tpu.memory_space<any>> -> memref<128xf32, #tpu.memory_space<any>>
    %c0_i32_817 = arith.constant 0 : i32
    %858 = tpu.memref_slice %arg5[%c4_i32_812, %c4_i32_813, %c0_i32_817] : memref<8x8x128xf32, #tpu.memory_space<vmem>> -> memref<1x1x128xf32, #tpu.memory_space<vmem>>
    %859 = tpu.memref_squeeze %858 : memref<1x1x128xf32, #tpu.memory_space<vmem>> -> memref<128xf32, #tpu.memory_space<vmem>>
    %860 = tpu.memref_slice %arg6[%c4_i32_814, %c4_i32_815] : memref<8x8x!tpu.dma_semaphore, #tpu.memory_space<semaphore_mem>> -> memref<1x1x!tpu.dma_semaphore, #tpu.memory_space<semaphore_mem>>
    %861 = tpu.memref_squeeze %860 : memref<1x1x!tpu.dma_semaphore, #tpu.memory_space<semaphore_mem>> -> memref<!tpu.dma_semaphore, #tpu.memory_space<semaphore_mem>>
    tpu.wait_dma2 semaphore(%861 : memref<!tpu.dma_semaphore, #tpu.memory_space<semaphore_mem>>) src(%857 : memref<128xf32, #tpu.memory_space<any>>) dst(%859 : memref<128xf32, #tpu.memory_space<vmem>>)
    %c0_i32_818 = arith.constant 0 : i32
    %c4_i32_819 = arith.constant 4 : i32
    %c5_i32_820 = arith.constant 5 : i32
    %c4_i32_821 = arith.constant 4 : i32
    %c5_i32_822 = arith.constant 5 : i32
    %c0_i32_823 = arith.constant 0 : i32
    %862 = tpu.memref_slice %arg3[%c0_i32_818, %c0_i32_823] : memref<256x128xf32, #tpu.memory_space<any>> -> memref<1x128xf32, #tpu.memory_space<any>>
    %863 = tpu.memref_squeeze %862 : memref<1x128xf32, #tpu.memory_space<any>> -> memref<128xf32, #tpu.memory_space<any>>
    %c0_i32_824 = arith.constant 0 : i32
    %864 = tpu.memref_slice %arg5[%c4_i32_819, %c5_i32_820, %c0_i32_824] : memref<8x8x128xf32, #tpu.memory_space<vmem>> -> memref<1x1x128xf32, #tpu.memory_space<vmem>>
    %865 = tpu.memref_squeeze %864 : memref<1x1x128xf32, #tpu.memory_space<vmem>> -> memref<128xf32, #tpu.memory_space<vmem>>
    %866 = tpu.memref_slice %arg6[%c4_i32_821, %c5_i32_822] : memref<8x8x!tpu.dma_semaphore, #tpu.memory_space<semaphore_mem>> -> memref<1x1x!tpu.dma_semaphore, #tpu.memory_space<semaphore_mem>>
    %867 = tpu.memref_squeeze %866 : memref<1x1x!tpu.dma_semaphore, #tpu.memory_space<semaphore_mem>> -> memref<!tpu.dma_semaphore, #tpu.memory_space<semaphore_mem>>
    tpu.wait_dma2 semaphore(%867 : memref<!tpu.dma_semaphore, #tpu.memory_space<semaphore_mem>>) src(%863 : memref<128xf32, #tpu.memory_space<any>>) dst(%865 : memref<128xf32, #tpu.memory_space<vmem>>)
    %c0_i32_825 = arith.constant 0 : i32
    %c4_i32_826 = arith.constant 4 : i32
    %c6_i32_827 = arith.constant 6 : i32
    %c4_i32_828 = arith.constant 4 : i32
    %c6_i32_829 = arith.constant 6 : i32
    %c0_i32_830 = arith.constant 0 : i32
    %868 = tpu.memref_slice %arg3[%c0_i32_825, %c0_i32_830] : memref<256x128xf32, #tpu.memory_space<any>> -> memref<1x128xf32, #tpu.memory_space<any>>
    %869 = tpu.memref_squeeze %868 : memref<1x128xf32, #tpu.memory_space<any>> -> memref<128xf32, #tpu.memory_space<any>>
    %c0_i32_831 = arith.constant 0 : i32
    %870 = tpu.memref_slice %arg5[%c4_i32_826, %c6_i32_827, %c0_i32_831] : memref<8x8x128xf32, #tpu.memory_space<vmem>> -> memref<1x1x128xf32, #tpu.memory_space<vmem>>
    %871 = tpu.memref_squeeze %870 : memref<1x1x128xf32, #tpu.memory_space<vmem>> -> memref<128xf32, #tpu.memory_space<vmem>>
    %872 = tpu.memref_slice %arg6[%c4_i32_828, %c6_i32_829] : memref<8x8x!tpu.dma_semaphore, #tpu.memory_space<semaphore_mem>> -> memref<1x1x!tpu.dma_semaphore, #tpu.memory_space<semaphore_mem>>
    %873 = tpu.memref_squeeze %872 : memref<1x1x!tpu.dma_semaphore, #tpu.memory_space<semaphore_mem>> -> memref<!tpu.dma_semaphore, #tpu.memory_space<semaphore_mem>>
    tpu.wait_dma2 semaphore(%873 : memref<!tpu.dma_semaphore, #tpu.memory_space<semaphore_mem>>) src(%869 : memref<128xf32, #tpu.memory_space<any>>) dst(%871 : memref<128xf32, #tpu.memory_space<vmem>>)
    %c0_i32_832 = arith.constant 0 : i32
    %c4_i32_833 = arith.constant 4 : i32
    %c7_i32_834 = arith.constant 7 : i32
    %c4_i32_835 = arith.constant 4 : i32
    %c7_i32_836 = arith.constant 7 : i32
    %c0_i32_837 = arith.constant 0 : i32
    %874 = tpu.memref_slice %arg3[%c0_i32_832, %c0_i32_837] : memref<256x128xf32, #tpu.memory_space<any>> -> memref<1x128xf32, #tpu.memory_space<any>>
    %875 = tpu.memref_squeeze %874 : memref<1x128xf32, #tpu.memory_space<any>> -> memref<128xf32, #tpu.memory_space<any>>
    %c0_i32_838 = arith.constant 0 : i32
    %876 = tpu.memref_slice %arg5[%c4_i32_833, %c7_i32_834, %c0_i32_838] : memref<8x8x128xf32, #tpu.memory_space<vmem>> -> memref<1x1x128xf32, #tpu.memory_space<vmem>>
    %877 = tpu.memref_squeeze %876 : memref<1x1x128xf32, #tpu.memory_space<vmem>> -> memref<128xf32, #tpu.memory_space<vmem>>
    %878 = tpu.memref_slice %arg6[%c4_i32_835, %c7_i32_836] : memref<8x8x!tpu.dma_semaphore, #tpu.memory_space<semaphore_mem>> -> memref<1x1x!tpu.dma_semaphore, #tpu.memory_space<semaphore_mem>>
    %879 = tpu.memref_squeeze %878 : memref<1x1x!tpu.dma_semaphore, #tpu.memory_space<semaphore_mem>> -> memref<!tpu.dma_semaphore, #tpu.memory_space<semaphore_mem>>
    tpu.wait_dma2 semaphore(%879 : memref<!tpu.dma_semaphore, #tpu.memory_space<semaphore_mem>>) src(%875 : memref<128xf32, #tpu.memory_space<any>>) dst(%877 : memref<128xf32, #tpu.memory_space<vmem>>)
    %c0_i32_839 = arith.constant 0 : i32
    %c5_i32_840 = arith.constant 5 : i32
    %c0_i32_841 = arith.constant 0 : i32
    %c5_i32_842 = arith.constant 5 : i32
    %c0_i32_843 = arith.constant 0 : i32
    %c0_i32_844 = arith.constant 0 : i32
    %880 = tpu.memref_slice %arg3[%c0_i32_839, %c0_i32_844] : memref<256x128xf32, #tpu.memory_space<any>> -> memref<1x128xf32, #tpu.memory_space<any>>
    %881 = tpu.memref_squeeze %880 : memref<1x128xf32, #tpu.memory_space<any>> -> memref<128xf32, #tpu.memory_space<any>>
    %c0_i32_845 = arith.constant 0 : i32
    %882 = tpu.memref_slice %arg5[%c5_i32_840, %c0_i32_841, %c0_i32_845] : memref<8x8x128xf32, #tpu.memory_space<vmem>> -> memref<1x1x128xf32, #tpu.memory_space<vmem>>
    %883 = tpu.memref_squeeze %882 : memref<1x1x128xf32, #tpu.memory_space<vmem>> -> memref<128xf32, #tpu.memory_space<vmem>>
    %884 = tpu.memref_slice %arg6[%c5_i32_842, %c0_i32_843] : memref<8x8x!tpu.dma_semaphore, #tpu.memory_space<semaphore_mem>> -> memref<1x1x!tpu.dma_semaphore, #tpu.memory_space<semaphore_mem>>
    %885 = tpu.memref_squeeze %884 : memref<1x1x!tpu.dma_semaphore, #tpu.memory_space<semaphore_mem>> -> memref<!tpu.dma_semaphore, #tpu.memory_space<semaphore_mem>>
    tpu.wait_dma2 semaphore(%885 : memref<!tpu.dma_semaphore, #tpu.memory_space<semaphore_mem>>) src(%881 : memref<128xf32, #tpu.memory_space<any>>) dst(%883 : memref<128xf32, #tpu.memory_space<vmem>>)
    %c0_i32_846 = arith.constant 0 : i32
    %c5_i32_847 = arith.constant 5 : i32
    %c1_i32_848 = arith.constant 1 : i32
    %c5_i32_849 = arith.constant 5 : i32
    %c1_i32_850 = arith.constant 1 : i32
    %c0_i32_851 = arith.constant 0 : i32
    %886 = tpu.memref_slice %arg3[%c0_i32_846, %c0_i32_851] : memref<256x128xf32, #tpu.memory_space<any>> -> memref<1x128xf32, #tpu.memory_space<any>>
    %887 = tpu.memref_squeeze %886 : memref<1x128xf32, #tpu.memory_space<any>> -> memref<128xf32, #tpu.memory_space<any>>
    %c0_i32_852 = arith.constant 0 : i32
    %888 = tpu.memref_slice %arg5[%c5_i32_847, %c1_i32_848, %c0_i32_852] : memref<8x8x128xf32, #tpu.memory_space<vmem>> -> memref<1x1x128xf32, #tpu.memory_space<vmem>>
    %889 = tpu.memref_squeeze %888 : memref<1x1x128xf32, #tpu.memory_space<vmem>> -> memref<128xf32, #tpu.memory_space<vmem>>
    %890 = tpu.memref_slice %arg6[%c5_i32_849, %c1_i32_850] : memref<8x8x!tpu.dma_semaphore, #tpu.memory_space<semaphore_mem>> -> memref<1x1x!tpu.dma_semaphore, #tpu.memory_space<semaphore_mem>>
    %891 = tpu.memref_squeeze %890 : memref<1x1x!tpu.dma_semaphore, #tpu.memory_space<semaphore_mem>> -> memref<!tpu.dma_semaphore, #tpu.memory_space<semaphore_mem>>
    tpu.wait_dma2 semaphore(%891 : memref<!tpu.dma_semaphore, #tpu.memory_space<semaphore_mem>>) src(%887 : memref<128xf32, #tpu.memory_space<any>>) dst(%889 : memref<128xf32, #tpu.memory_space<vmem>>)
    %c0_i32_853 = arith.constant 0 : i32
    %c5_i32_854 = arith.constant 5 : i32
    %c2_i32_855 = arith.constant 2 : i32
    %c5_i32_856 = arith.constant 5 : i32
    %c2_i32_857 = arith.constant 2 : i32
    %c0_i32_858 = arith.constant 0 : i32
    %892 = tpu.memref_slice %arg3[%c0_i32_853, %c0_i32_858] : memref<256x128xf32, #tpu.memory_space<any>> -> memref<1x128xf32, #tpu.memory_space<any>>
    %893 = tpu.memref_squeeze %892 : memref<1x128xf32, #tpu.memory_space<any>> -> memref<128xf32, #tpu.memory_space<any>>
    %c0_i32_859 = arith.constant 0 : i32
    %894 = tpu.memref_slice %arg5[%c5_i32_854, %c2_i32_855, %c0_i32_859] : memref<8x8x128xf32, #tpu.memory_space<vmem>> -> memref<1x1x128xf32, #tpu.memory_space<vmem>>
    %895 = tpu.memref_squeeze %894 : memref<1x1x128xf32, #tpu.memory_space<vmem>> -> memref<128xf32, #tpu.memory_space<vmem>>
    %896 = tpu.memref_slice %arg6[%c5_i32_856, %c2_i32_857] : memref<8x8x!tpu.dma_semaphore, #tpu.memory_space<semaphore_mem>> -> memref<1x1x!tpu.dma_semaphore, #tpu.memory_space<semaphore_mem>>
    %897 = tpu.memref_squeeze %896 : memref<1x1x!tpu.dma_semaphore, #tpu.memory_space<semaphore_mem>> -> memref<!tpu.dma_semaphore, #tpu.memory_space<semaphore_mem>>
    tpu.wait_dma2 semaphore(%897 : memref<!tpu.dma_semaphore, #tpu.memory_space<semaphore_mem>>) src(%893 : memref<128xf32, #tpu.memory_space<any>>) dst(%895 : memref<128xf32, #tpu.memory_space<vmem>>)
    %c0_i32_860 = arith.constant 0 : i32
    %c5_i32_861 = arith.constant 5 : i32
    %c3_i32_862 = arith.constant 3 : i32
    %c5_i32_863 = arith.constant 5 : i32
    %c3_i32_864 = arith.constant 3 : i32
    %c0_i32_865 = arith.constant 0 : i32
    %898 = tpu.memref_slice %arg3[%c0_i32_860, %c0_i32_865] : memref<256x128xf32, #tpu.memory_space<any>> -> memref<1x128xf32, #tpu.memory_space<any>>
    %899 = tpu.memref_squeeze %898 : memref<1x128xf32, #tpu.memory_space<any>> -> memref<128xf32, #tpu.memory_space<any>>
    %c0_i32_866 = arith.constant 0 : i32
    %900 = tpu.memref_slice %arg5[%c5_i32_861, %c3_i32_862, %c0_i32_866] : memref<8x8x128xf32, #tpu.memory_space<vmem>> -> memref<1x1x128xf32, #tpu.memory_space<vmem>>
    %901 = tpu.memref_squeeze %900 : memref<1x1x128xf32, #tpu.memory_space<vmem>> -> memref<128xf32, #tpu.memory_space<vmem>>
    %902 = tpu.memref_slice %arg6[%c5_i32_863, %c3_i32_864] : memref<8x8x!tpu.dma_semaphore, #tpu.memory_space<semaphore_mem>> -> memref<1x1x!tpu.dma_semaphore, #tpu.memory_space<semaphore_mem>>
    %903 = tpu.memref_squeeze %902 : memref<1x1x!tpu.dma_semaphore, #tpu.memory_space<semaphore_mem>> -> memref<!tpu.dma_semaphore, #tpu.memory_space<semaphore_mem>>
    tpu.wait_dma2 semaphore(%903 : memref<!tpu.dma_semaphore, #tpu.memory_space<semaphore_mem>>) src(%899 : memref<128xf32, #tpu.memory_space<any>>) dst(%901 : memref<128xf32, #tpu.memory_space<vmem>>)
    %c0_i32_867 = arith.constant 0 : i32
    %c5_i32_868 = arith.constant 5 : i32
    %c4_i32_869 = arith.constant 4 : i32
    %c5_i32_870 = arith.constant 5 : i32
    %c4_i32_871 = arith.constant 4 : i32
    %c0_i32_872 = arith.constant 0 : i32
    %904 = tpu.memref_slice %arg3[%c0_i32_867, %c0_i32_872] : memref<256x128xf32, #tpu.memory_space<any>> -> memref<1x128xf32, #tpu.memory_space<any>>
    %905 = tpu.memref_squeeze %904 : memref<1x128xf32, #tpu.memory_space<any>> -> memref<128xf32, #tpu.memory_space<any>>
    %c0_i32_873 = arith.constant 0 : i32
    %906 = tpu.memref_slice %arg5[%c5_i32_868, %c4_i32_869, %c0_i32_873] : memref<8x8x128xf32, #tpu.memory_space<vmem>> -> memref<1x1x128xf32, #tpu.memory_space<vmem>>
    %907 = tpu.memref_squeeze %906 : memref<1x1x128xf32, #tpu.memory_space<vmem>> -> memref<128xf32, #tpu.memory_space<vmem>>
    %908 = tpu.memref_slice %arg6[%c5_i32_870, %c4_i32_871] : memref<8x8x!tpu.dma_semaphore, #tpu.memory_space<semaphore_mem>> -> memref<1x1x!tpu.dma_semaphore, #tpu.memory_space<semaphore_mem>>
    %909 = tpu.memref_squeeze %908 : memref<1x1x!tpu.dma_semaphore, #tpu.memory_space<semaphore_mem>> -> memref<!tpu.dma_semaphore, #tpu.memory_space<semaphore_mem>>
    tpu.wait_dma2 semaphore(%909 : memref<!tpu.dma_semaphore, #tpu.memory_space<semaphore_mem>>) src(%905 : memref<128xf32, #tpu.memory_space<any>>) dst(%907 : memref<128xf32, #tpu.memory_space<vmem>>)
    %c0_i32_874 = arith.constant 0 : i32
    %c5_i32_875 = arith.constant 5 : i32
    %c5_i32_876 = arith.constant 5 : i32
    %c5_i32_877 = arith.constant 5 : i32
    %c5_i32_878 = arith.constant 5 : i32
    %c0_i32_879 = arith.constant 0 : i32
    %910 = tpu.memref_slice %arg3[%c0_i32_874, %c0_i32_879] : memref<256x128xf32, #tpu.memory_space<any>> -> memref<1x128xf32, #tpu.memory_space<any>>
    %911 = tpu.memref_squeeze %910 : memref<1x128xf32, #tpu.memory_space<any>> -> memref<128xf32, #tpu.memory_space<any>>
    %c0_i32_880 = arith.constant 0 : i32
    %912 = tpu.memref_slice %arg5[%c5_i32_875, %c5_i32_876, %c0_i32_880] : memref<8x8x128xf32, #tpu.memory_space<vmem>> -> memref<1x1x128xf32, #tpu.memory_space<vmem>>
    %913 = tpu.memref_squeeze %912 : memref<1x1x128xf32, #tpu.memory_space<vmem>> -> memref<128xf32, #tpu.memory_space<vmem>>
    %914 = tpu.memref_slice %arg6[%c5_i32_877, %c5_i32_878] : memref<8x8x!tpu.dma_semaphore, #tpu.memory_space<semaphore_mem>> -> memref<1x1x!tpu.dma_semaphore, #tpu.memory_space<semaphore_mem>>
    %915 = tpu.memref_squeeze %914 : memref<1x1x!tpu.dma_semaphore, #tpu.memory_space<semaphore_mem>> -> memref<!tpu.dma_semaphore, #tpu.memory_space<semaphore_mem>>
    tpu.wait_dma2 semaphore(%915 : memref<!tpu.dma_semaphore, #tpu.memory_space<semaphore_mem>>) src(%911 : memref<128xf32, #tpu.memory_space<any>>) dst(%913 : memref<128xf32, #tpu.memory_space<vmem>>)
    %c0_i32_881 = arith.constant 0 : i32
    %c5_i32_882 = arith.constant 5 : i32
    %c6_i32_883 = arith.constant 6 : i32
    %c5_i32_884 = arith.constant 5 : i32
    %c6_i32_885 = arith.constant 6 : i32
    %c0_i32_886 = arith.constant 0 : i32
    %916 = tpu.memref_slice %arg3[%c0_i32_881, %c0_i32_886] : memref<256x128xf32, #tpu.memory_space<any>> -> memref<1x128xf32, #tpu.memory_space<any>>
    %917 = tpu.memref_squeeze %916 : memref<1x128xf32, #tpu.memory_space<any>> -> memref<128xf32, #tpu.memory_space<any>>
    %c0_i32_887 = arith.constant 0 : i32
    %918 = tpu.memref_slice %arg5[%c5_i32_882, %c6_i32_883, %c0_i32_887] : memref<8x8x128xf32, #tpu.memory_space<vmem>> -> memref<1x1x128xf32, #tpu.memory_space<vmem>>
    %919 = tpu.memref_squeeze %918 : memref<1x1x128xf32, #tpu.memory_space<vmem>> -> memref<128xf32, #tpu.memory_space<vmem>>
    %920 = tpu.memref_slice %arg6[%c5_i32_884, %c6_i32_885] : memref<8x8x!tpu.dma_semaphore, #tpu.memory_space<semaphore_mem>> -> memref<1x1x!tpu.dma_semaphore, #tpu.memory_space<semaphore_mem>>
    %921 = tpu.memref_squeeze %920 : memref<1x1x!tpu.dma_semaphore, #tpu.memory_space<semaphore_mem>> -> memref<!tpu.dma_semaphore, #tpu.memory_space<semaphore_mem>>
    tpu.wait_dma2 semaphore(%921 : memref<!tpu.dma_semaphore, #tpu.memory_space<semaphore_mem>>) src(%917 : memref<128xf32, #tpu.memory_space<any>>) dst(%919 : memref<128xf32, #tpu.memory_space<vmem>>)
    %c0_i32_888 = arith.constant 0 : i32
    %c5_i32_889 = arith.constant 5 : i32
    %c7_i32_890 = arith.constant 7 : i32
    %c5_i32_891 = arith.constant 5 : i32
    %c7_i32_892 = arith.constant 7 : i32
    %c0_i32_893 = arith.constant 0 : i32
    %922 = tpu.memref_slice %arg3[%c0_i32_888, %c0_i32_893] : memref<256x128xf32, #tpu.memory_space<any>> -> memref<1x128xf32, #tpu.memory_space<any>>
    %923 = tpu.memref_squeeze %922 : memref<1x128xf32, #tpu.memory_space<any>> -> memref<128xf32, #tpu.memory_space<any>>
    %c0_i32_894 = arith.constant 0 : i32
    %924 = tpu.memref_slice %arg5[%c5_i32_889, %c7_i32_890, %c0_i32_894] : memref<8x8x128xf32, #tpu.memory_space<vmem>> -> memref<1x1x128xf32, #tpu.memory_space<vmem>>
    %925 = tpu.memref_squeeze %924 : memref<1x1x128xf32, #tpu.memory_space<vmem>> -> memref<128xf32, #tpu.memory_space<vmem>>
    %926 = tpu.memref_slice %arg6[%c5_i32_891, %c7_i32_892] : memref<8x8x!tpu.dma_semaphore, #tpu.memory_space<semaphore_mem>> -> memref<1x1x!tpu.dma_semaphore, #tpu.memory_space<semaphore_mem>>
    %927 = tpu.memref_squeeze %926 : memref<1x1x!tpu.dma_semaphore, #tpu.memory_space<semaphore_mem>> -> memref<!tpu.dma_semaphore, #tpu.memory_space<semaphore_mem>>
    tpu.wait_dma2 semaphore(%927 : memref<!tpu.dma_semaphore, #tpu.memory_space<semaphore_mem>>) src(%923 : memref<128xf32, #tpu.memory_space<any>>) dst(%925 : memref<128xf32, #tpu.memory_space<vmem>>)
    %c0_i32_895 = arith.constant 0 : i32
    %c6_i32_896 = arith.constant 6 : i32
    %c0_i32_897 = arith.constant 0 : i32
    %c6_i32_898 = arith.constant 6 : i32
    %c0_i32_899 = arith.constant 0 : i32
    %c0_i32_900 = arith.constant 0 : i32
    %928 = tpu.memref_slice %arg3[%c0_i32_895, %c0_i32_900] : memref<256x128xf32, #tpu.memory_space<any>> -> memref<1x128xf32, #tpu.memory_space<any>>
    %929 = tpu.memref_squeeze %928 : memref<1x128xf32, #tpu.memory_space<any>> -> memref<128xf32, #tpu.memory_space<any>>
    %c0_i32_901 = arith.constant 0 : i32
    %930 = tpu.memref_slice %arg5[%c6_i32_896, %c0_i32_897, %c0_i32_901] : memref<8x8x128xf32, #tpu.memory_space<vmem>> -> memref<1x1x128xf32, #tpu.memory_space<vmem>>
    %931 = tpu.memref_squeeze %930 : memref<1x1x128xf32, #tpu.memory_space<vmem>> -> memref<128xf32, #tpu.memory_space<vmem>>
    %932 = tpu.memref_slice %arg6[%c6_i32_898, %c0_i32_899] : memref<8x8x!tpu.dma_semaphore, #tpu.memory_space<semaphore_mem>> -> memref<1x1x!tpu.dma_semaphore, #tpu.memory_space<semaphore_mem>>
    %933 = tpu.memref_squeeze %932 : memref<1x1x!tpu.dma_semaphore, #tpu.memory_space<semaphore_mem>> -> memref<!tpu.dma_semaphore, #tpu.memory_space<semaphore_mem>>
    tpu.wait_dma2 semaphore(%933 : memref<!tpu.dma_semaphore, #tpu.memory_space<semaphore_mem>>) src(%929 : memref<128xf32, #tpu.memory_space<any>>) dst(%931 : memref<128xf32, #tpu.memory_space<vmem>>)
    %c0_i32_902 = arith.constant 0 : i32
    %c6_i32_903 = arith.constant 6 : i32
    %c1_i32_904 = arith.constant 1 : i32
    %c6_i32_905 = arith.constant 6 : i32
    %c1_i32_906 = arith.constant 1 : i32
    %c0_i32_907 = arith.constant 0 : i32
    %934 = tpu.memref_slice %arg3[%c0_i32_902, %c0_i32_907] : memref<256x128xf32, #tpu.memory_space<any>> -> memref<1x128xf32, #tpu.memory_space<any>>
    %935 = tpu.memref_squeeze %934 : memref<1x128xf32, #tpu.memory_space<any>> -> memref<128xf32, #tpu.memory_space<any>>
    %c0_i32_908 = arith.constant 0 : i32
    %936 = tpu.memref_slice %arg5[%c6_i32_903, %c1_i32_904, %c0_i32_908] : memref<8x8x128xf32, #tpu.memory_space<vmem>> -> memref<1x1x128xf32, #tpu.memory_space<vmem>>
    %937 = tpu.memref_squeeze %936 : memref<1x1x128xf32, #tpu.memory_space<vmem>> -> memref<128xf32, #tpu.memory_space<vmem>>
    %938 = tpu.memref_slice %arg6[%c6_i32_905, %c1_i32_906] : memref<8x8x!tpu.dma_semaphore, #tpu.memory_space<semaphore_mem>> -> memref<1x1x!tpu.dma_semaphore, #tpu.memory_space<semaphore_mem>>
    %939 = tpu.memref_squeeze %938 : memref<1x1x!tpu.dma_semaphore, #tpu.memory_space<semaphore_mem>> -> memref<!tpu.dma_semaphore, #tpu.memory_space<semaphore_mem>>
    tpu.wait_dma2 semaphore(%939 : memref<!tpu.dma_semaphore, #tpu.memory_space<semaphore_mem>>) src(%935 : memref<128xf32, #tpu.memory_space<any>>) dst(%937 : memref<128xf32, #tpu.memory_space<vmem>>)
    %c0_i32_909 = arith.constant 0 : i32
    %c6_i32_910 = arith.constant 6 : i32
    %c2_i32_911 = arith.constant 2 : i32
    %c6_i32_912 = arith.constant 6 : i32
    %c2_i32_913 = arith.constant 2 : i32
    %c0_i32_914 = arith.constant 0 : i32
    %940 = tpu.memref_slice %arg3[%c0_i32_909, %c0_i32_914] : memref<256x128xf32, #tpu.memory_space<any>> -> memref<1x128xf32, #tpu.memory_space<any>>
    %941 = tpu.memref_squeeze %940 : memref<1x128xf32, #tpu.memory_space<any>> -> memref<128xf32, #tpu.memory_space<any>>
    %c0_i32_915 = arith.constant 0 : i32
    %942 = tpu.memref_slice %arg5[%c6_i32_910, %c2_i32_911, %c0_i32_915] : memref<8x8x128xf32, #tpu.memory_space<vmem>> -> memref<1x1x128xf32, #tpu.memory_space<vmem>>
    %943 = tpu.memref_squeeze %942 : memref<1x1x128xf32, #tpu.memory_space<vmem>> -> memref<128xf32, #tpu.memory_space<vmem>>
    %944 = tpu.memref_slice %arg6[%c6_i32_912, %c2_i32_913] : memref<8x8x!tpu.dma_semaphore, #tpu.memory_space<semaphore_mem>> -> memref<1x1x!tpu.dma_semaphore, #tpu.memory_space<semaphore_mem>>
    %945 = tpu.memref_squeeze %944 : memref<1x1x!tpu.dma_semaphore, #tpu.memory_space<semaphore_mem>> -> memref<!tpu.dma_semaphore, #tpu.memory_space<semaphore_mem>>
    tpu.wait_dma2 semaphore(%945 : memref<!tpu.dma_semaphore, #tpu.memory_space<semaphore_mem>>) src(%941 : memref<128xf32, #tpu.memory_space<any>>) dst(%943 : memref<128xf32, #tpu.memory_space<vmem>>)
    %c0_i32_916 = arith.constant 0 : i32
    %c6_i32_917 = arith.constant 6 : i32
    %c3_i32_918 = arith.constant 3 : i32
    %c6_i32_919 = arith.constant 6 : i32
    %c3_i32_920 = arith.constant 3 : i32
    %c0_i32_921 = arith.constant 0 : i32
    %946 = tpu.memref_slice %arg3[%c0_i32_916, %c0_i32_921] : memref<256x128xf32, #tpu.memory_space<any>> -> memref<1x128xf32, #tpu.memory_space<any>>
    %947 = tpu.memref_squeeze %946 : memref<1x128xf32, #tpu.memory_space<any>> -> memref<128xf32, #tpu.memory_space<any>>
    %c0_i32_922 = arith.constant 0 : i32
    %948 = tpu.memref_slice %arg5[%c6_i32_917, %c3_i32_918, %c0_i32_922] : memref<8x8x128xf32, #tpu.memory_space<vmem>> -> memref<1x1x128xf32, #tpu.memory_space<vmem>>
    %949 = tpu.memref_squeeze %948 : memref<1x1x128xf32, #tpu.memory_space<vmem>> -> memref<128xf32, #tpu.memory_space<vmem>>
    %950 = tpu.memref_slice %arg6[%c6_i32_919, %c3_i32_920] : memref<8x8x!tpu.dma_semaphore, #tpu.memory_space<semaphore_mem>> -> memref<1x1x!tpu.dma_semaphore, #tpu.memory_space<semaphore_mem>>
    %951 = tpu.memref_squeeze %950 : memref<1x1x!tpu.dma_semaphore, #tpu.memory_space<semaphore_mem>> -> memref<!tpu.dma_semaphore, #tpu.memory_space<semaphore_mem>>
    tpu.wait_dma2 semaphore(%951 : memref<!tpu.dma_semaphore, #tpu.memory_space<semaphore_mem>>) src(%947 : memref<128xf32, #tpu.memory_space<any>>) dst(%949 : memref<128xf32, #tpu.memory_space<vmem>>)
    %c0_i32_923 = arith.constant 0 : i32
    %c6_i32_924 = arith.constant 6 : i32
    %c4_i32_925 = arith.constant 4 : i32
    %c6_i32_926 = arith.constant 6 : i32
    %c4_i32_927 = arith.constant 4 : i32
    %c0_i32_928 = arith.constant 0 : i32
    %952 = tpu.memref_slice %arg3[%c0_i32_923, %c0_i32_928] : memref<256x128xf32, #tpu.memory_space<any>> -> memref<1x128xf32, #tpu.memory_space<any>>
    %953 = tpu.memref_squeeze %952 : memref<1x128xf32, #tpu.memory_space<any>> -> memref<128xf32, #tpu.memory_space<any>>
    %c0_i32_929 = arith.constant 0 : i32
    %954 = tpu.memref_slice %arg5[%c6_i32_924, %c4_i32_925, %c0_i32_929] : memref<8x8x128xf32, #tpu.memory_space<vmem>> -> memref<1x1x128xf32, #tpu.memory_space<vmem>>
    %955 = tpu.memref_squeeze %954 : memref<1x1x128xf32, #tpu.memory_space<vmem>> -> memref<128xf32, #tpu.memory_space<vmem>>
    %956 = tpu.memref_slice %arg6[%c6_i32_926, %c4_i32_927] : memref<8x8x!tpu.dma_semaphore, #tpu.memory_space<semaphore_mem>> -> memref<1x1x!tpu.dma_semaphore, #tpu.memory_space<semaphore_mem>>
    %957 = tpu.memref_squeeze %956 : memref<1x1x!tpu.dma_semaphore, #tpu.memory_space<semaphore_mem>> -> memref<!tpu.dma_semaphore, #tpu.memory_space<semaphore_mem>>
    tpu.wait_dma2 semaphore(%957 : memref<!tpu.dma_semaphore, #tpu.memory_space<semaphore_mem>>) src(%953 : memref<128xf32, #tpu.memory_space<any>>) dst(%955 : memref<128xf32, #tpu.memory_space<vmem>>)
    %c0_i32_930 = arith.constant 0 : i32
    %c6_i32_931 = arith.constant 6 : i32
    %c5_i32_932 = arith.constant 5 : i32
    %c6_i32_933 = arith.constant 6 : i32
    %c5_i32_934 = arith.constant 5 : i32
    %c0_i32_935 = arith.constant 0 : i32
    %958 = tpu.memref_slice %arg3[%c0_i32_930, %c0_i32_935] : memref<256x128xf32, #tpu.memory_space<any>> -> memref<1x128xf32, #tpu.memory_space<any>>
    %959 = tpu.memref_squeeze %958 : memref<1x128xf32, #tpu.memory_space<any>> -> memref<128xf32, #tpu.memory_space<any>>
    %c0_i32_936 = arith.constant 0 : i32
    %960 = tpu.memref_slice %arg5[%c6_i32_931, %c5_i32_932, %c0_i32_936] : memref<8x8x128xf32, #tpu.memory_space<vmem>> -> memref<1x1x128xf32, #tpu.memory_space<vmem>>
    %961 = tpu.memref_squeeze %960 : memref<1x1x128xf32, #tpu.memory_space<vmem>> -> memref<128xf32, #tpu.memory_space<vmem>>
    %962 = tpu.memref_slice %arg6[%c6_i32_933, %c5_i32_934] : memref<8x8x!tpu.dma_semaphore, #tpu.memory_space<semaphore_mem>> -> memref<1x1x!tpu.dma_semaphore, #tpu.memory_space<semaphore_mem>>
    %963 = tpu.memref_squeeze %962 : memref<1x1x!tpu.dma_semaphore, #tpu.memory_space<semaphore_mem>> -> memref<!tpu.dma_semaphore, #tpu.memory_space<semaphore_mem>>
    tpu.wait_dma2 semaphore(%963 : memref<!tpu.dma_semaphore, #tpu.memory_space<semaphore_mem>>) src(%959 : memref<128xf32, #tpu.memory_space<any>>) dst(%961 : memref<128xf32, #tpu.memory_space<vmem>>)
    %c0_i32_937 = arith.constant 0 : i32
    %c6_i32_938 = arith.constant 6 : i32
    %c6_i32_939 = arith.constant 6 : i32
    %c6_i32_940 = arith.constant 6 : i32
    %c6_i32_941 = arith.constant 6 : i32
    %c0_i32_942 = arith.constant 0 : i32
    %964 = tpu.memref_slice %arg3[%c0_i32_937, %c0_i32_942] : memref<256x128xf32, #tpu.memory_space<any>> -> memref<1x128xf32, #tpu.memory_space<any>>
    %965 = tpu.memref_squeeze %964 : memref<1x128xf32, #tpu.memory_space<any>> -> memref<128xf32, #tpu.memory_space<any>>
    %c0_i32_943 = arith.constant 0 : i32
    %966 = tpu.memref_slice %arg5[%c6_i32_938, %c6_i32_939, %c0_i32_943] : memref<8x8x128xf32, #tpu.memory_space<vmem>> -> memref<1x1x128xf32, #tpu.memory_space<vmem>>
    %967 = tpu.memref_squeeze %966 : memref<1x1x128xf32, #tpu.memory_space<vmem>> -> memref<128xf32, #tpu.memory_space<vmem>>
    %968 = tpu.memref_slice %arg6[%c6_i32_940, %c6_i32_941] : memref<8x8x!tpu.dma_semaphore, #tpu.memory_space<semaphore_mem>> -> memref<1x1x!tpu.dma_semaphore, #tpu.memory_space<semaphore_mem>>
    %969 = tpu.memref_squeeze %968 : memref<1x1x!tpu.dma_semaphore, #tpu.memory_space<semaphore_mem>> -> memref<!tpu.dma_semaphore, #tpu.memory_space<semaphore_mem>>
    tpu.wait_dma2 semaphore(%969 : memref<!tpu.dma_semaphore, #tpu.memory_space<semaphore_mem>>) src(%965 : memref<128xf32, #tpu.memory_space<any>>) dst(%967 : memref<128xf32, #tpu.memory_space<vmem>>)
    %c0_i32_944 = arith.constant 0 : i32
    %c6_i32_945 = arith.constant 6 : i32
    %c7_i32_946 = arith.constant 7 : i32
    %c6_i32_947 = arith.constant 6 : i32
    %c7_i32_948 = arith.constant 7 : i32
    %c0_i32_949 = arith.constant 0 : i32
    %970 = tpu.memref_slice %arg3[%c0_i32_944, %c0_i32_949] : memref<256x128xf32, #tpu.memory_space<any>> -> memref<1x128xf32, #tpu.memory_space<any>>
    %971 = tpu.memref_squeeze %970 : memref<1x128xf32, #tpu.memory_space<any>> -> memref<128xf32, #tpu.memory_space<any>>
    %c0_i32_950 = arith.constant 0 : i32
    %972 = tpu.memref_slice %arg5[%c6_i32_945, %c7_i32_946, %c0_i32_950] : memref<8x8x128xf32, #tpu.memory_space<vmem>> -> memref<1x1x128xf32, #tpu.memory_space<vmem>>
    %973 = tpu.memref_squeeze %972 : memref<1x1x128xf32, #tpu.memory_space<vmem>> -> memref<128xf32, #tpu.memory_space<vmem>>
    %974 = tpu.memref_slice %arg6[%c6_i32_947, %c7_i32_948] : memref<8x8x!tpu.dma_semaphore, #tpu.memory_space<semaphore_mem>> -> memref<1x1x!tpu.dma_semaphore, #tpu.memory_space<semaphore_mem>>
    %975 = tpu.memref_squeeze %974 : memref<1x1x!tpu.dma_semaphore, #tpu.memory_space<semaphore_mem>> -> memref<!tpu.dma_semaphore, #tpu.memory_space<semaphore_mem>>
    tpu.wait_dma2 semaphore(%975 : memref<!tpu.dma_semaphore, #tpu.memory_space<semaphore_mem>>) src(%971 : memref<128xf32, #tpu.memory_space<any>>) dst(%973 : memref<128xf32, #tpu.memory_space<vmem>>)
    %c0_i32_951 = arith.constant 0 : i32
    %c7_i32_952 = arith.constant 7 : i32
    %c0_i32_953 = arith.constant 0 : i32
    %c7_i32_954 = arith.constant 7 : i32
    %c0_i32_955 = arith.constant 0 : i32
    %c0_i32_956 = arith.constant 0 : i32
    %976 = tpu.memref_slice %arg3[%c0_i32_951, %c0_i32_956] : memref<256x128xf32, #tpu.memory_space<any>> -> memref<1x128xf32, #tpu.memory_space<any>>
    %977 = tpu.memref_squeeze %976 : memref<1x128xf32, #tpu.memory_space<any>> -> memref<128xf32, #tpu.memory_space<any>>
    %c0_i32_957 = arith.constant 0 : i32
    %978 = tpu.memref_slice %arg5[%c7_i32_952, %c0_i32_953, %c0_i32_957] : memref<8x8x128xf32, #tpu.memory_space<vmem>> -> memref<1x1x128xf32, #tpu.memory_space<vmem>>
    %979 = tpu.memref_squeeze %978 : memref<1x1x128xf32, #tpu.memory_space<vmem>> -> memref<128xf32, #tpu.memory_space<vmem>>
    %980 = tpu.memref_slice %arg6[%c7_i32_954, %c0_i32_955] : memref<8x8x!tpu.dma_semaphore, #tpu.memory_space<semaphore_mem>> -> memref<1x1x!tpu.dma_semaphore, #tpu.memory_space<semaphore_mem>>
    %981 = tpu.memref_squeeze %980 : memref<1x1x!tpu.dma_semaphore, #tpu.memory_space<semaphore_mem>> -> memref<!tpu.dma_semaphore, #tpu.memory_space<semaphore_mem>>
    tpu.wait_dma2 semaphore(%981 : memref<!tpu.dma_semaphore, #tpu.memory_space<semaphore_mem>>) src(%977 : memref<128xf32, #tpu.memory_space<any>>) dst(%979 : memref<128xf32, #tpu.memory_space<vmem>>)
    %c0_i32_958 = arith.constant 0 : i32
    %c7_i32_959 = arith.constant 7 : i32
    %c1_i32_960 = arith.constant 1 : i32
    %c7_i32_961 = arith.constant 7 : i32
    %c1_i32_962 = arith.constant 1 : i32
    %c0_i32_963 = arith.constant 0 : i32
    %982 = tpu.memref_slice %arg3[%c0_i32_958, %c0_i32_963] : memref<256x128xf32, #tpu.memory_space<any>> -> memref<1x128xf32, #tpu.memory_space<any>>
    %983 = tpu.memref_squeeze %982 : memref<1x128xf32, #tpu.memory_space<any>> -> memref<128xf32, #tpu.memory_space<any>>
    %c0_i32_964 = arith.constant 0 : i32
    %984 = tpu.memref_slice %arg5[%c7_i32_959, %c1_i32_960, %c0_i32_964] : memref<8x8x128xf32, #tpu.memory_space<vmem>> -> memref<1x1x128xf32, #tpu.memory_space<vmem>>
    %985 = tpu.memref_squeeze %984 : memref<1x1x128xf32, #tpu.memory_space<vmem>> -> memref<128xf32, #tpu.memory_space<vmem>>
    %986 = tpu.memref_slice %arg6[%c7_i32_961, %c1_i32_962] : memref<8x8x!tpu.dma_semaphore, #tpu.memory_space<semaphore_mem>> -> memref<1x1x!tpu.dma_semaphore, #tpu.memory_space<semaphore_mem>>
    %987 = tpu.memref_squeeze %986 : memref<1x1x!tpu.dma_semaphore, #tpu.memory_space<semaphore_mem>> -> memref<!tpu.dma_semaphore, #tpu.memory_space<semaphore_mem>>
    tpu.wait_dma2 semaphore(%987 : memref<!tpu.dma_semaphore, #tpu.memory_space<semaphore_mem>>) src(%983 : memref<128xf32, #tpu.memory_space<any>>) dst(%985 : memref<128xf32, #tpu.memory_space<vmem>>)
    %c0_i32_965 = arith.constant 0 : i32
    %c7_i32_966 = arith.constant 7 : i32
    %c2_i32_967 = arith.constant 2 : i32
    %c7_i32_968 = arith.constant 7 : i32
    %c2_i32_969 = arith.constant 2 : i32
    %c0_i32_970 = arith.constant 0 : i32
    %988 = tpu.memref_slice %arg3[%c0_i32_965, %c0_i32_970] : memref<256x128xf32, #tpu.memory_space<any>> -> memref<1x128xf32, #tpu.memory_space<any>>
    %989 = tpu.memref_squeeze %988 : memref<1x128xf32, #tpu.memory_space<any>> -> memref<128xf32, #tpu.memory_space<any>>
    %c0_i32_971 = arith.constant 0 : i32
    %990 = tpu.memref_slice %arg5[%c7_i32_966, %c2_i32_967, %c0_i32_971] : memref<8x8x128xf32, #tpu.memory_space<vmem>> -> memref<1x1x128xf32, #tpu.memory_space<vmem>>
    %991 = tpu.memref_squeeze %990 : memref<1x1x128xf32, #tpu.memory_space<vmem>> -> memref<128xf32, #tpu.memory_space<vmem>>
    %992 = tpu.memref_slice %arg6[%c7_i32_968, %c2_i32_969] : memref<8x8x!tpu.dma_semaphore, #tpu.memory_space<semaphore_mem>> -> memref<1x1x!tpu.dma_semaphore, #tpu.memory_space<semaphore_mem>>
    %993 = tpu.memref_squeeze %992 : memref<1x1x!tpu.dma_semaphore, #tpu.memory_space<semaphore_mem>> -> memref<!tpu.dma_semaphore, #tpu.memory_space<semaphore_mem>>
    tpu.wait_dma2 semaphore(%993 : memref<!tpu.dma_semaphore, #tpu.memory_space<semaphore_mem>>) src(%989 : memref<128xf32, #tpu.memory_space<any>>) dst(%991 : memref<128xf32, #tpu.memory_space<vmem>>)
    %c0_i32_972 = arith.constant 0 : i32
    %c7_i32_973 = arith.constant 7 : i32
    %c3_i32_974 = arith.constant 3 : i32
    %c7_i32_975 = arith.constant 7 : i32
    %c3_i32_976 = arith.constant 3 : i32
    %c0_i32_977 = arith.constant 0 : i32
    %994 = tpu.memref_slice %arg3[%c0_i32_972, %c0_i32_977] : memref<256x128xf32, #tpu.memory_space<any>> -> memref<1x128xf32, #tpu.memory_space<any>>
    %995 = tpu.memref_squeeze %994 : memref<1x128xf32, #tpu.memory_space<any>> -> memref<128xf32, #tpu.memory_space<any>>
    %c0_i32_978 = arith.constant 0 : i32
    %996 = tpu.memref_slice %arg5[%c7_i32_973, %c3_i32_974, %c0_i32_978] : memref<8x8x128xf32, #tpu.memory_space<vmem>> -> memref<1x1x128xf32, #tpu.memory_space<vmem>>
    %997 = tpu.memref_squeeze %996 : memref<1x1x128xf32, #tpu.memory_space<vmem>> -> memref<128xf32, #tpu.memory_space<vmem>>
    %998 = tpu.memref_slice %arg6[%c7_i32_975, %c3_i32_976] : memref<8x8x!tpu.dma_semaphore, #tpu.memory_space<semaphore_mem>> -> memref<1x1x!tpu.dma_semaphore, #tpu.memory_space<semaphore_mem>>
    %999 = tpu.memref_squeeze %998 : memref<1x1x!tpu.dma_semaphore, #tpu.memory_space<semaphore_mem>> -> memref<!tpu.dma_semaphore, #tpu.memory_space<semaphore_mem>>
    tpu.wait_dma2 semaphore(%999 : memref<!tpu.dma_semaphore, #tpu.memory_space<semaphore_mem>>) src(%995 : memref<128xf32, #tpu.memory_space<any>>) dst(%997 : memref<128xf32, #tpu.memory_space<vmem>>)
    %c0_i32_979 = arith.constant 0 : i32
    %c7_i32_980 = arith.constant 7 : i32
    %c4_i32_981 = arith.constant 4 : i32
    %c7_i32_982 = arith.constant 7 : i32
    %c4_i32_983 = arith.constant 4 : i32
    %c0_i32_984 = arith.constant 0 : i32
    %1000 = tpu.memref_slice %arg3[%c0_i32_979, %c0_i32_984] : memref<256x128xf32, #tpu.memory_space<any>> -> memref<1x128xf32, #tpu.memory_space<any>>
    %1001 = tpu.memref_squeeze %1000 : memref<1x128xf32, #tpu.memory_space<any>> -> memref<128xf32, #tpu.memory_space<any>>
    %c0_i32_985 = arith.constant 0 : i32
    %1002 = tpu.memref_slice %arg5[%c7_i32_980, %c4_i32_981, %c0_i32_985] : memref<8x8x128xf32, #tpu.memory_space<vmem>> -> memref<1x1x128xf32, #tpu.memory_space<vmem>>
    %1003 = tpu.memref_squeeze %1002 : memref<1x1x128xf32, #tpu.memory_space<vmem>> -> memref<128xf32, #tpu.memory_space<vmem>>
    %1004 = tpu.memref_slice %arg6[%c7_i32_982, %c4_i32_983] : memref<8x8x!tpu.dma_semaphore, #tpu.memory_space<semaphore_mem>> -> memref<1x1x!tpu.dma_semaphore, #tpu.memory_space<semaphore_mem>>
    %1005 = tpu.memref_squeeze %1004 : memref<1x1x!tpu.dma_semaphore, #tpu.memory_space<semaphore_mem>> -> memref<!tpu.dma_semaphore, #tpu.memory_space<semaphore_mem>>
    tpu.wait_dma2 semaphore(%1005 : memref<!tpu.dma_semaphore, #tpu.memory_space<semaphore_mem>>) src(%1001 : memref<128xf32, #tpu.memory_space<any>>) dst(%1003 : memref<128xf32, #tpu.memory_space<vmem>>)
    %c0_i32_986 = arith.constant 0 : i32
    %c7_i32_987 = arith.constant 7 : i32
    %c5_i32_988 = arith.constant 5 : i32
    %c7_i32_989 = arith.constant 7 : i32
    %c5_i32_990 = arith.constant 5 : i32
    %c0_i32_991 = arith.constant 0 : i32
    %1006 = tpu.memref_slice %arg3[%c0_i32_986, %c0_i32_991] : memref<256x128xf32, #tpu.memory_space<any>> -> memref<1x128xf32, #tpu.memory_space<any>>
    %1007 = tpu.memref_squeeze %1006 : memref<1x128xf32, #tpu.memory_space<any>> -> memref<128xf32, #tpu.memory_space<any>>
    %c0_i32_992 = arith.constant 0 : i32
    %1008 = tpu.memref_slice %arg5[%c7_i32_987, %c5_i32_988, %c0_i32_992] : memref<8x8x128xf32, #tpu.memory_space<vmem>> -> memref<1x1x128xf32, #tpu.memory_space<vmem>>
    %1009 = tpu.memref_squeeze %1008 : memref<1x1x128xf32, #tpu.memory_space<vmem>> -> memref<128xf32, #tpu.memory_space<vmem>>
    %1010 = tpu.memref_slice %arg6[%c7_i32_989, %c5_i32_990] : memref<8x8x!tpu.dma_semaphore, #tpu.memory_space<semaphore_mem>> -> memref<1x1x!tpu.dma_semaphore, #tpu.memory_space<semaphore_mem>>
    %1011 = tpu.memref_squeeze %1010 : memref<1x1x!tpu.dma_semaphore, #tpu.memory_space<semaphore_mem>> -> memref<!tpu.dma_semaphore, #tpu.memory_space<semaphore_mem>>
    tpu.wait_dma2 semaphore(%1011 : memref<!tpu.dma_semaphore, #tpu.memory_space<semaphore_mem>>) src(%1007 : memref<128xf32, #tpu.memory_space<any>>) dst(%1009 : memref<128xf32, #tpu.memory_space<vmem>>)
    %c0_i32_993 = arith.constant 0 : i32
    %c7_i32_994 = arith.constant 7 : i32
    %c6_i32_995 = arith.constant 6 : i32
    %c7_i32_996 = arith.constant 7 : i32
    %c6_i32_997 = arith.constant 6 : i32
    %c0_i32_998 = arith.constant 0 : i32
    %1012 = tpu.memref_slice %arg3[%c0_i32_993, %c0_i32_998] : memref<256x128xf32, #tpu.memory_space<any>> -> memref<1x128xf32, #tpu.memory_space<any>>
    %1013 = tpu.memref_squeeze %1012 : memref<1x128xf32, #tpu.memory_space<any>> -> memref<128xf32, #tpu.memory_space<any>>
    %c0_i32_999 = arith.constant 0 : i32
    %1014 = tpu.memref_slice %arg5[%c7_i32_994, %c6_i32_995, %c0_i32_999] : memref<8x8x128xf32, #tpu.memory_space<vmem>> -> memref<1x1x128xf32, #tpu.memory_space<vmem>>
    %1015 = tpu.memref_squeeze %1014 : memref<1x1x128xf32, #tpu.memory_space<vmem>> -> memref<128xf32, #tpu.memory_space<vmem>>
    %1016 = tpu.memref_slice %arg6[%c7_i32_996, %c6_i32_997] : memref<8x8x!tpu.dma_semaphore, #tpu.memory_space<semaphore_mem>> -> memref<1x1x!tpu.dma_semaphore, #tpu.memory_space<semaphore_mem>>
    %1017 = tpu.memref_squeeze %1016 : memref<1x1x!tpu.dma_semaphore, #tpu.memory_space<semaphore_mem>> -> memref<!tpu.dma_semaphore, #tpu.memory_space<semaphore_mem>>
    tpu.wait_dma2 semaphore(%1017 : memref<!tpu.dma_semaphore, #tpu.memory_space<semaphore_mem>>) src(%1013 : memref<128xf32, #tpu.memory_space<any>>) dst(%1015 : memref<128xf32, #tpu.memory_space<vmem>>)
    %c0_i32_1000 = arith.constant 0 : i32
    %c7_i32_1001 = arith.constant 7 : i32
    %c7_i32_1002 = arith.constant 7 : i32
    %c7_i32_1003 = arith.constant 7 : i32
    %c7_i32_1004 = arith.constant 7 : i32
    %c0_i32_1005 = arith.constant 0 : i32
    %1018 = tpu.memref_slice %arg3[%c0_i32_1000, %c0_i32_1005] : memref<256x128xf32, #tpu.memory_space<any>> -> memref<1x128xf32, #tpu.memory_space<any>>
    %1019 = tpu.memref_squeeze %1018 : memref<1x128xf32, #tpu.memory_space<any>> -> memref<128xf32, #tpu.memory_space<any>>
    %c0_i32_1006 = arith.constant 0 : i32
    %1020 = tpu.memref_slice %arg5[%c7_i32_1001, %c7_i32_1002, %c0_i32_1006] : memref<8x8x128xf32, #tpu.memory_space<vmem>> -> memref<1x1x128xf32, #tpu.memory_space<vmem>>
    %1021 = tpu.memref_squeeze %1020 : memref<1x1x128xf32, #tpu.memory_space<vmem>> -> memref<128xf32, #tpu.memory_space<vmem>>
    %1022 = tpu.memref_slice %arg6[%c7_i32_1003, %c7_i32_1004] : memref<8x8x!tpu.dma_semaphore, #tpu.memory_space<semaphore_mem>> -> memref<1x1x!tpu.dma_semaphore, #tpu.memory_space<semaphore_mem>>
    %1023 = tpu.memref_squeeze %1022 : memref<1x1x!tpu.dma_semaphore, #tpu.memory_space<semaphore_mem>> -> memref<!tpu.dma_semaphore, #tpu.memory_space<semaphore_mem>>
    tpu.wait_dma2 semaphore(%1023 : memref<!tpu.dma_semaphore, #tpu.memory_space<semaphore_mem>>) src(%1019 : memref<128xf32, #tpu.memory_space<any>>) dst(%1021 : memref<128xf32, #tpu.memory_space<vmem>>)
    %c0_1007 = arith.constant 0 : index
    %c0_1008 = arith.constant 0 : index
    %1024 = vector.load %arg2[%c0_1007, %c0_1008] : memref<8x8xf32, #tpu.memory_space<vmem>>, vector<8x8xf32>
    %cst = arith.constant 0.000000e+00 : f32
    %1025 = vector.broadcast %cst : f32 to vector<8x128xf32>
    %c0_1009 = arith.constant 0 : index
    %c0_1010 = arith.constant 0 : index
    %c0_1011 = arith.constant 0 : index
    %1026 = vector.load %arg5[%c0_1009, %c0_1010, %c0_1011] : memref<8x8x128xf32, #tpu.memory_space<vmem>>, vector<1x8x128xf32>
    %1027 = vector.shape_cast %1026 : vector<1x8x128xf32> to vector<8x128xf32>
    %1028 = vector.extract_strided_slice %1024 {offsets = [0, 0], sizes = [8, 1], strides = [1, 1]} : vector<8x8xf32> to vector<8x1xf32>
    %1029 = vector.broadcast %1028 : vector<8x1xf32> to vector<8x128xf32>
    %1030 = arith.mulf %1027, %1029 : vector<8x128xf32>
    %1031 = arith.addf %1025, %1030 : vector<8x128xf32>
    %c1_1012 = arith.constant 1 : index
    %c0_1013 = arith.constant 0 : index
    %c0_1014 = arith.constant 0 : index
    %1032 = vector.load %arg5[%c1_1012, %c0_1013, %c0_1014] : memref<8x8x128xf32, #tpu.memory_space<vmem>>, vector<1x8x128xf32>
    %1033 = vector.shape_cast %1032 : vector<1x8x128xf32> to vector<8x128xf32>
    %1034 = vector.extract_strided_slice %1024 {offsets = [0, 1], sizes = [8, 1], strides = [1, 1]} : vector<8x8xf32> to vector<8x1xf32>
    %1035 = vector.broadcast %1034 : vector<8x1xf32> to vector<8x128xf32>
    %1036 = arith.mulf %1033, %1035 : vector<8x128xf32>
    %1037 = arith.addf %1031, %1036 : vector<8x128xf32>
    %c2_1015 = arith.constant 2 : index
    %c0_1016 = arith.constant 0 : index
    %c0_1017 = arith.constant 0 : index
    %1038 = vector.load %arg5[%c2_1015, %c0_1016, %c0_1017] : memref<8x8x128xf32, #tpu.memory_space<vmem>>, vector<1x8x128xf32>
    %1039 = vector.shape_cast %1038 : vector<1x8x128xf32> to vector<8x128xf32>
    %1040 = vector.extract_strided_slice %1024 {offsets = [0, 2], sizes = [8, 1], strides = [1, 1]} : vector<8x8xf32> to vector<8x1xf32>
    %1041 = vector.broadcast %1040 : vector<8x1xf32> to vector<8x128xf32>
    %1042 = arith.mulf %1039, %1041 : vector<8x128xf32>
    %1043 = arith.addf %1037, %1042 : vector<8x128xf32>
    %c3_1018 = arith.constant 3 : index
    %c0_1019 = arith.constant 0 : index
    %c0_1020 = arith.constant 0 : index
    %1044 = vector.load %arg5[%c3_1018, %c0_1019, %c0_1020] : memref<8x8x128xf32, #tpu.memory_space<vmem>>, vector<1x8x128xf32>
    %1045 = vector.shape_cast %1044 : vector<1x8x128xf32> to vector<8x128xf32>
    %1046 = vector.extract_strided_slice %1024 {offsets = [0, 3], sizes = [8, 1], strides = [1, 1]} : vector<8x8xf32> to vector<8x1xf32>
    %1047 = vector.broadcast %1046 : vector<8x1xf32> to vector<8x128xf32>
    %1048 = arith.mulf %1045, %1047 : vector<8x128xf32>
    %1049 = arith.addf %1043, %1048 : vector<8x128xf32>
    %c4_1021 = arith.constant 4 : index
    %c0_1022 = arith.constant 0 : index
    %c0_1023 = arith.constant 0 : index
    %1050 = vector.load %arg5[%c4_1021, %c0_1022, %c0_1023] : memref<8x8x128xf32, #tpu.memory_space<vmem>>, vector<1x8x128xf32>
    %1051 = vector.shape_cast %1050 : vector<1x8x128xf32> to vector<8x128xf32>
    %1052 = vector.extract_strided_slice %1024 {offsets = [0, 4], sizes = [8, 1], strides = [1, 1]} : vector<8x8xf32> to vector<8x1xf32>
    %1053 = vector.broadcast %1052 : vector<8x1xf32> to vector<8x128xf32>
    %1054 = arith.mulf %1051, %1053 : vector<8x128xf32>
    %1055 = arith.addf %1049, %1054 : vector<8x128xf32>
    %c5_1024 = arith.constant 5 : index
    %c0_1025 = arith.constant 0 : index
    %c0_1026 = arith.constant 0 : index
    %1056 = vector.load %arg5[%c5_1024, %c0_1025, %c0_1026] : memref<8x8x128xf32, #tpu.memory_space<vmem>>, vector<1x8x128xf32>
    %1057 = vector.shape_cast %1056 : vector<1x8x128xf32> to vector<8x128xf32>
    %1058 = vector.extract_strided_slice %1024 {offsets = [0, 5], sizes = [8, 1], strides = [1, 1]} : vector<8x8xf32> to vector<8x1xf32>
    %1059 = vector.broadcast %1058 : vector<8x1xf32> to vector<8x128xf32>
    %1060 = arith.mulf %1057, %1059 : vector<8x128xf32>
    %1061 = arith.addf %1055, %1060 : vector<8x128xf32>
    %c6_1027 = arith.constant 6 : index
    %c0_1028 = arith.constant 0 : index
    %c0_1029 = arith.constant 0 : index
    %1062 = vector.load %arg5[%c6_1027, %c0_1028, %c0_1029] : memref<8x8x128xf32, #tpu.memory_space<vmem>>, vector<1x8x128xf32>
    %1063 = vector.shape_cast %1062 : vector<1x8x128xf32> to vector<8x128xf32>
    %1064 = vector.extract_strided_slice %1024 {offsets = [0, 6], sizes = [8, 1], strides = [1, 1]} : vector<8x8xf32> to vector<8x1xf32>
    %1065 = vector.broadcast %1064 : vector<8x1xf32> to vector<8x128xf32>
    %1066 = arith.mulf %1063, %1065 : vector<8x128xf32>
    %1067 = arith.addf %1061, %1066 : vector<8x128xf32>
    %c7_1030 = arith.constant 7 : index
    %c0_1031 = arith.constant 0 : index
    %c0_1032 = arith.constant 0 : index
    %1068 = vector.load %arg5[%c7_1030, %c0_1031, %c0_1032] : memref<8x8x128xf32, #tpu.memory_space<vmem>>, vector<1x8x128xf32>
    %1069 = vector.shape_cast %1068 : vector<1x8x128xf32> to vector<8x128xf32>
    %1070 = vector.extract_strided_slice %1024 {offsets = [0, 7], sizes = [8, 1], strides = [1, 1]} : vector<8x8xf32> to vector<8x1xf32>
    %1071 = vector.broadcast %1070 : vector<8x1xf32> to vector<8x128xf32>
    %1072 = arith.mulf %1069, %1071 : vector<8x128xf32>
    %1073 = arith.addf %1067, %1072 : vector<8x128xf32>
    %cst_1033 = arith.constant dense<0.000000e+00> : vector<8xf32>
    %1074 = vector.multi_reduction <add>, %1024, %cst_1033 [1] : vector<8x8xf32> to vector<8xf32>
    %1075 = vector.shape_cast %1074 : vector<8xf32> to vector<8x1xf32>
    %cst_1034 = arith.constant 1.000000e+00 : f32
    %1076 = vector.broadcast %cst_1034 : f32 to vector<8x1xf32>
    %1077 = arith.maximumf %1075, %1076 : vector<8x1xf32>
    %1078 = tpu.reciprocal %1077 : vector<8x1xf32> -> vector<8x1xf32>
    %1079 = vector.broadcast %1078 : vector<8x1xf32> to vector<8x128xf32>
    %1080 = arith.mulf %1073, %1079 : vector<8x128xf32>
    %c0_1035 = arith.constant 0 : index
    %c0_1036 = arith.constant 0 : index
    %1081 = vector.load %arg4[%c0_1035, %c0_1036] : memref<8x128xf32, #tpu.memory_space<vmem>>, vector<8x128xf32>
    tpu.vector_store %arg4[%c0_1035, %c0_1036], %1080 {strides = array<i32>} : memref<8x128xf32, #tpu.memory_space<vmem>>, vector<8x128xf32>,
    return
  }
  func.func @transform_0(%arg0: i32, %arg1: memref<8x8xi32, #tpu.memory_space<smem>>) -> (i32, i32) {
    %c0_i32 = arith.constant 0 : i32
    %c0_i32_0 = arith.constant 0 : i32
    return %arg0, %c0_i32 : i32, i32
  }
  func.func @transform_2(%arg0: i32, %arg1: memref<8x8xi32, #tpu.memory_space<smem>>) -> (i32, i32) {
    %c0_i32 = arith.constant 0 : i32
    %c0_i32_0 = arith.constant 0 : i32
    return %arg0, %c0_i32 : i32, i32
  }
}

</mosaic_0001>

<bundles_post_ra>
// kernel: tpu_custom_call.1
= control target key start
LH: loop header
LB: loop body
LE: loop exit
PB: predicated region body
PF: predicated region fallthrough
CT: control target
= control target key end

     0   :  { %s5056_s0 = inlined_call_operand.hbm [shape: s32[8,8], index: 0, kind: input, shape index: {}]   ;;  %s5057_s1 = inlined_call_operand.hbm [shape: f32[8,8], index: 1, kind: input, shape index: {}]   ;;  %s5058_s2 = inlined_call_operand.hbm [shape: f32[256,128], index: 2, kind: input, shape index: {}]   ;;  %s5059_s3 = inlined_call_operand.hbm [shape: f32[8,128], index: 3, kind: output, shape index: {}]  }
   0x1   :  { %s2182_s14 = scalar_lea.hbm %s5056_s0, 128 }
   0x2   :  { %p2183_p0 = scmp.ne.s32.totalorder %s5056_s0, %s2182_s14  ;;  %p2186_p1 = scmp.lt.u32.totalorder %s2182_s14, %s5056_s0 }
   0x4   :  { %p2188_p2 = pnand %p2186_p1, %p2183_p0 }
   0x6   :  { %2191 = shalt.err (!%p2188_p2)  }
   0x7   :  { %s3906_s19 = smov [#allocation5]  }
   0x8   :  { %9 = dma.hbm_to_smem %s5056_s0, 128, %s3906_s19, [#allocation4] }
   0x9   :  { %3772 = dma.done.wait [#allocation4], 128 }
   0xa   :  { %3773 = vsyncadd [#allocation4], 4294967168 }
   0xb   :  { %11 = sfence }
   0xc   :  { %12 = vsyncpa [#allocation7], 0 }
   0xd   :  { %13 = vsyncpa [#allocation8], 0  ;;  %s3907_s22 = smov [#allocation6]   ;;  %s2192_s26 = scalar_lea.hbm %s5057_s1, 128 }
   0xe   :  { %s20_s23 = sshll.u32 %s3907_s22, 4  ;;  %p2193_p3 = scmp.ne.s32.totalorder %s5057_s1, %s2192_s26  ;;  %s21_s23 = int_to_ptr.vmem [resolvable:$true] %s20_s23 }
   0xf   :  { %p2196_p4 = scmp.lt.u32.totalorder %s2192_s26, %s5057_s1 }
  0x11   :  { %p2198_p5 = pnand %p2196_p4, %p2193_p3 }
  0x13   :  { %2201 = shalt.err (!%p2198_p5)
}
  0x14   :  { %s2202_s0 = scalar_lea.vmem %s21_s23, 128  ;;  %p2207_p7 = scmp.lt.s32.totalorder %s21_s23, %s21_s23 }
  0x15   :  { %p2203_p6 = scmp.ne.s32.totalorder %s21_s23, %s2202_s0  ;;  %p2208_p8 = scmp.lt.s32.totalorder %s2202_s0, %s2202_s0 }
  0x17   :  { %p2209_p9 = por %p2208_p8, %p2207_p7 }
  0x19   :  { %p2210_p10 = pnand %p2209_p9, %p2203_p6 }
  0x1b   :  { %2213 = shalt.err (!%p2210_p10)
}
  0x1c   :  { %23 = dma.hbm_to_vmem [thread:$0]  %s5057_s1, 128, %s21_s23, [#allocation7]  }
  0x1d   :  { %3774 = dma.done.wait [#allocation7], 128  }
  0x1e   :  { %3775 = vsyncadd [#allocation7], 4294967168  ;;  %s29_s6 = sld [smem:[#allocation5]]  ;;  %s3908_s7 = smov [#allocation2]  }
  0x1f   :  { %s39_s8 = sshll.u32 %s3908_s7, 4  ;;  %s4027_s9 = sld [smem:[#allocation5 + $0x80]]  ;;  %s4025_s8 = int_to_ptr.vmem [resolvable:$true] %s39_s8 }
  0x20   :  { %s3909_s10 = smov [#allocation2 + $0x1]   ;;  %s4029_s12 = sld [smem:[#allocation5 + $0x100]] }
  0x21   :  { %s57_s11 = sshll.u32 %s3909_s10, 4  ;;  %s3910_s13 = smov [#allocation2 + $0x2]   ;;  %s4031_s11 = int_to_ptr.vmem [resolvable:$true] %s57_s11 }
  0x22   :  { %s75_s14 = sshll.u32 %s3910_s13, 4  ;;  %s4033_s15 = sld [smem:[#allocation5 + $0x180]]  ;;  %s4035_s14 = int_to_ptr.vmem [resolvable:$true] %s75_s14 }
  0x23   :  { %s3911_s16 = smov [#allocation2 + $0x3]   ;;  %s4046_s25 = scalar_lea.hbm %s5058_s2, 4096 }
  0x24   :  { %s1905_s1 = sshll.u32 %s29_s6, 4  ;;  %s4037_s17 = sshll.u32 %s3911_s16, 4  ;;  %s94_s17 = int_to_ptr.vmem [resolvable:$true] %s4037_s17 }
  0x25   :  { %s31_s20 = scalar_lea.hbm %s5058_s2, %s1905_s1  ;;  %s1907_s21 = sshll.u32 %s4027_s9, 4 }
  0x26   :  { %s2214_s22 = scalar_lea.hbm %s31_s20, 16  ;;  %p2217_p12 = scmp.lt.u32.totalorder %s31_s20, %s5058_s2 }
  0x27   :  { %p2215_p11 = scmp.ne.s32.totalorder %s31_s20, %s2214_s22  ;;  %p2218_p13 = scmp.lt.u32.totalorder %s4046_s25, %s2214_s22 }
  0x28   :  { %p2220_p1 = scmp.lt.u32.totalorder %s2214_s22, %s31_s20 }
  0x29   :  { %p2219_p0 = por %p2218_p13, %p2217_p12 }
  0x2b   :  { %p2221_p2 = por %p2220_p1, %p2219_p0 }
  0x2d   :  { %p2222_p3 = pnand %p2221_p2, %p2215_p11 }
  0x2f   :  { %2225 = shalt.err (!%p2222_p3)  }
  0x30   :  { %s2226_s28 = scalar_lea.vmem %s4025_s8, 16  ;;  %s4055_s29 = scalar_lea.vmem %s4025_s8, 1024 }
  0x31   :  { %p2227_p4 = scmp.ne.s32.totalorder %s4025_s8, %s2226_s28  ;;  %p2231_p5 = scmp.lt.s32.totalorder %s4025_s8, %s4025_s8 }
  0x32   :  { %p2232_p6 = scmp.lt.s32.totalorder %s4055_s29, %s2226_s28 }
  0x34   :  { %p2233_p7 = por %p2232_p6, %p2231_p5 }
  0x36   :  { %p2234_p8 = pnand %p2233_p7, %p2227_p4 }
  0x38   :  { %2237 = shalt.err (!%p2234_p8)  }
  0x39   :  { %42 = dma.hbm_to_vmem [thread:$0]  %s31_s20, 16, %s4025_s8, [#allocation3] }
  0x3a   :  { %s47_s4 = scalar_lea.hbm %s5058_s2, %s1907_s21  ;;  %s1909_s5 = sshll.u32 %s4029_s12, 4 }
  0x3b   :  { %s2238_s6 = scalar_lea.hbm %s47_s4, 16  ;;  %p2241_p10 = scmp.lt.u32.totalorder %s47_s4, %s5058_s2 }
  0x3c   :  { %p2239_p9 = scmp.ne.s32.totalorder %s47_s4, %s2238_s6  ;;  %p2242_p11 = scmp.lt.u32.totalorder %s4046_s25, %s2238_s6 }
  0x3d   :  { %p2244_p13 = scmp.lt.u32.totalorder %s2238_s6, %s47_s4 }
  0x3e   :  { %p2243_p12 = por %p2242_p11, %p2241_p10 }
  0x40   :  { %p2245_p0 = por %p2244_p13, %p2243_p12 }
  0x42   :  { %p2246_p1 = pnand %p2245_p0, %p2239_p9 }
  0x44   :  { %2249 = shalt.err (!%p2246_p1)  }
  0x45   :  { %s2250_s10 = scalar_lea.vmem %s4031_s11, 16  ;;  %p2255_p3 = scmp.lt.s32.totalorder %s4031_s11, %s4025_s8 }
  0x46   :  { %p2251_p2 = scmp.ne.s32.totalorder %s4031_s11, %s2250_s10  ;;  %p2256_p4 = scmp.lt.s32.totalorder %s4055_s29, %s2250_s10 }
  0x48   :  { %p2257_p5 = por %p2256_p4, %p2255_p3 }
  0x4a   :  { %p2258_p6 = pnand %p2257_p5, %p2251_p2 }
  0x4c   :  { %2261 = shalt.err (!%p2258_p6)  }
  0x4d   :  { %60 = dma.hbm_to_vmem [thread:$0]  %s47_s4, 16, %s4031_s11, [#allocation3 + $0x1] }
  0x4e   :  { %s65_s1 = scalar_lea.hbm %s5058_s2, %s1909_s5  ;;  %s1911_s16 = sshll.u32 %s4033_s15, 4 }
  0x4f   :  { %s2262_s18 = scalar_lea.hbm %s65_s1, 16  ;;  %p2265_p8 = scmp.lt.u32.totalorder %s65_s1, %s5058_s2 }
  0x50   :  { %p2263_p7 = scmp.ne.s32.totalorder %s65_s1, %s2262_s18  ;;  %p2266_p9 = scmp.lt.u32.totalorder %s4046_s25, %s2262_s18 }
  0x51   :  { %p2268_p11 = scmp.lt.u32.totalorder %s2262_s18, %s65_s1 }
  0x52   :  { %p2267_p10 = por %p2266_p9, %p2265_p8 }
  0x54   :  { %p2269_p12 = por %p2268_p11, %p2267_p10 }
  0x56   :  { %p2270_p13 = pnand %p2269_p12, %p2263_p7 }
  0x58   :  { %2273 = shalt.err (!%p2270_p13)  }
  0x59   :  { %s2274_s11 = scalar_lea.vmem %s4035_s14, 16  ;;  %p2279_p1 = scmp.lt.s32.totalorder %s4035_s14, %s4025_s8 }
  0x5a   :  { %p2275_p0 = scmp.ne.s32.totalorder %s4035_s14, %s2274_s11  ;;  %p2280_p2 = scmp.lt.s32.totalorder %s4055_s29, %s2274_s11 }
  0x5c   :  { %p2281_p3 = por %p2280_p2, %p2279_p1 }
  0x5e   :  { %p2282_p4 = pnand %p2281_p3, %p2275_p0 }
  0x60   :  { %2285 = shalt.err (!%p2282_p4)  }
  0x61   :  { %78 = dma.hbm_to_vmem [thread:$0]  %s65_s1, 16, %s4035_s14, [#allocation3 + $0x2] }
  0x62   :  { %s83_s22 = scalar_lea.hbm %s5058_s2, %s1911_s16 }
  0x63   :  { %s2286_s23 = scalar_lea.hbm %s83_s22, 16  ;;  %p2289_p6 = scmp.lt.u32.totalorder %s83_s22, %s5058_s2 }
  0x64   :  { %p2287_p5 = scmp.ne.s32.totalorder %s83_s22, %s2286_s23  ;;  %p2290_p7 = scmp.lt.u32.totalorder %s4046_s25, %s2286_s23 }
  0x65   :  { %p2292_p9 = scmp.lt.u32.totalorder %s2286_s23, %s83_s22 }
  0x66   :  { %p2291_p8 = por %p2290_p7, %p2289_p6 }
  0x68   :  { %p2293_p10 = por %p2292_p9, %p2291_p8 }
  0x6a   :  { %p2294_p11 = pnand %p2293_p10, %p2287_p5 }
  0x6c   :  { %2297 = shalt.err (!%p2294_p11)  }
  0x6d   :  { %s2298_s27 = scalar_lea.vmem %s94_s17, 16  ;;  %p2303_p13 = scmp.lt.s32.totalorder %s94_s17, %s4025_s8 }
  0x6e   :  { %p2299_p12 = scmp.ne.s32.totalorder %s94_s17, %s2298_s27  ;;  %p2304_p0 = scmp.lt.s32.totalorder %s4055_s29, %s2298_s27 }
  0x70   :  { %p2305_p1 = por %p2304_p0, %p2303_p13 }
  0x72   :  { %p2306_p2 = pnand %p2305_p1, %p2299_p12 }
  0x74   :  { %2309 = shalt.err (!%p2306_p2)  }
  0x75   :  { %96 = dma.hbm_to_vmem [thread:$0]  %s83_s22, 16, %s94_s17, [#allocation3 + $0x3] }
  0x76   :  { %s1912_s14 = sld [smem:[#allocation5 + $0x200]]  ;;  %s3912_s28 = smov [#allocation2 + $0x4]  }
  0x77   :  { %s111_s30 = sshll.u32 %s3912_s28, 4  ;;  %s4099_s0 = sld [smem:[#allocation5 + $0x280]]  ;;  %s112_s30 = int_to_ptr.vmem [resolvable:$true] %s111_s30 }
  0x78   :  { %s3913_s4 = smov [#allocation2 + $0x5]   ;;  %s4101_s6 = sld [smem:[#allocation5 + $0x300]] }
  0x79   :  { %s129_s5 = sshll.u32 %s3913_s4, 4  ;;  %s3914_s7 = smov [#allocation2 + $0x6]   ;;  %s4103_s5 = int_to_ptr.vmem [resolvable:$true] %s129_s5 }
  0x7a   :  { %s147_s9 = sshll.u32 %s3914_s7, 4  ;;  %s4105_s10 = sld [smem:[#allocation5 + $0x380]]  ;;  %s4107_s9 = int_to_ptr.vmem [resolvable:$true] %s147_s9 }
  0x7c   :  { %s1913_s12 = sshll.u32 %s1912_s14, 4 }
  0x7d   :  { %s101_s1 = scalar_lea.hbm %s5058_s2, %s1913_s12  ;;  %s1915_s16 = sshll.u32 %s4099_s0, 4 }
  0x7e   :  { %s2310_s18 = scalar_lea.hbm %s101_s1, 16  ;;  %p2313_p4 = scmp.lt.u32.totalorder %s101_s1, %s5058_s2 }
  0x7f   :  { %p2311_p3 = scmp.ne.s32.totalorder %s101_s1, %s2310_s18  ;;  %p2314_p5 = scmp.lt.u32.totalorder %s4046_s25, %s2310_s18 }
  0x80   :  { %p2316_p7 = scmp.lt.u32.totalorder %s2310_s18, %s101_s1 }
  0x81   :  { %p2315_p6 = por %p2314_p5, %p2313_p4 }
  0x83   :  { %p2317_p8 = por %p2316_p7, %p2315_p6 }
  0x85   :  { %p2318_p9 = pnand %p2317_p8, %p2311_p3 }
  0x87   :  { %2321 = shalt.err (!%p2318_p9)  }
  0x88   :  { %s2322_s11 = scalar_lea.vmem %s112_s30, 16  ;;  %p2327_p11 = scmp.lt.s32.totalorder %s112_s30, %s4025_s8 }
  0x89   :  { %p2323_p10 = scmp.ne.s32.totalorder %s112_s30, %s2322_s11  ;;  %p2328_p12 = scmp.lt.s32.totalorder %s4055_s29, %s2322_s11 }
  0x8b   :  { %p2329_p13 = por %p2328_p12, %p2327_p11 }
  0x8d   :  { %p2330_p0 = pnand %p2329_p13, %p2323_p10 }
  0x8f   :  { %2333 = shalt.err (!%p2330_p0)  }
  0x90   :  { %114 = dma.hbm_to_vmem [thread:$0]  %s101_s1, 16, %s112_s30, [#allocation3 + $0x4] }
  0x91   :  { %s119_s22 = scalar_lea.hbm %s5058_s2, %s1915_s16  ;;  %s1917_s23 = sshll.u32 %s4101_s6, 4 }
  0x92   :  { %s2334_s24 = scalar_lea.hbm %s119_s22, 16  ;;  %p2337_p2 = scmp.lt.u32.totalorder %s119_s22, %s5058_s2 }
  0x93   :  { %p2335_p1 = scmp.ne.s32.totalorder %s119_s22, %s2334_s24  ;;  %p2338_p3 = scmp.lt.u32.totalorder %s4046_s25, %s2334_s24 }
  0x94   :  { %p2340_p5 = scmp.lt.u32.totalorder %s2334_s24, %s119_s22 }
  0x95   :  { %p2339_p4 = por %p2338_p3, %p2337_p2 }
  0x97   :  { %p2341_p6 = por %p2340_p5, %p2339_p4 }
  0x99   :  { %p2342_p7 = pnand %p2341_p6, %p2335_p1 }
  0x9b   :  { %2345 = shalt.err (!%p2342_p7)  }
  0x9c   :  { %s2346_s14 = scalar_lea.vmem %s4103_s5, 16  ;;  %p2351_p9 = scmp.lt.s32.totalorder %s4103_s5, %s4025_s8 }
  0x9d   :  { %p2347_p8 = scmp.ne.s32.totalorder %s4103_s5, %s2346_s14  ;;  %p2352_p10 = scmp.lt.s32.totalorder %s4055_s29, %s2346_s14 }
  0x9f   :  { %p2353_p11 = por %p2352_p10, %p2351_p9 }
  0xa1   :  { %p2354_p12 = pnand %p2353_p11, %p2347_p8 }
  0xa3   :  { %2357 = shalt.err (!%p2354_p12)  }
  0xa4   :  { %132 = dma.hbm_to_vmem [thread:$0]  %s119_s22, 16, %s4103_s5, [#allocation3 + $0x5] }
  0xa5   :  { %s137_s0 = scalar_lea.hbm %s5058_s2, %s1917_s23  ;;  %s1919_s4 = sshll.u32 %s4105_s10, 4 }
  0xa6   :  { %s2358_s6 = scalar_lea.hbm %s137_s0, 16  ;;  %p2361_p0 = scmp.lt.u32.totalorder %s137_s0, %s5058_s2 }
  0xa7   :  { %p2359_p13 = scmp.ne.s32.totalorder %s137_s0, %s2358_s6  ;;  %p2362_p1 = scmp.lt.u32.totalorder %s4046_s25, %s2358_s6 }
  0xa8   :  { %p2364_p3 = scmp.lt.u32.totalorder %s2358_s6, %s137_s0 }
  0xa9   :  { %p2363_p2 = por %p2362_p1, %p2361_p0 }
  0xab   :  { %p2365_p4 = por %p2364_p3, %p2363_p2 }
  0xad   :  { %p2366_p5 = pnand %p2365_p4, %p2359_p13 }
  0xaf   :  { %2369 = shalt.err (!%p2366_p5)  }
  0xb0   :  { %s2370_s5 = scalar_lea.vmem %s4107_s9, 16  ;;  %p2375_p7 = scmp.lt.s32.totalorder %s4107_s9, %s4025_s8 }
  0xb1   :  { %p2371_p6 = scmp.ne.s32.totalorder %s4107_s9, %s2370_s5  ;;  %p2376_p8 = scmp.lt.s32.totalorder %s4055_s29, %s2370_s5 }
  0xb3   :  { %p2377_p9 = por %p2376_p8, %p2375_p7 }
  0xb5   :  { %p2378_p10 = pnand %p2377_p9, %p2371_p6 }
  0xb7   :  { %2381 = shalt.err (!%p2378_p10)  }
  0xb8   :  { %150 = dma.hbm_to_vmem [thread:$0]  %s137_s0, 16, %s4107_s9, [#allocation3 + $0x6] }
  0xb9   :  { %s155_s13 = scalar_lea.hbm %s5058_s2, %s1919_s4  ;;  %s3915_s1 = smov [#allocation2 + $0x7]  }
  0xba   :  { %s165_s16 = sshll.u32 %s3915_s1, 4  ;;  %s4150_s18 = sld [smem:[#allocation5 + $0x1]]  ;;  %s166_s16 = int_to_ptr.vmem [resolvable:$true] %s165_s16 }
  0xbb   :  { %s2382_s19 = scalar_lea.hbm %s155_s13, 16  ;;  %p2385_p12 = scmp.lt.u32.totalorder %s155_s13, %s5058_s2 }
  0xbc   :  { %p2383_p11 = scmp.ne.s32.totalorder %s155_s13, %s2382_s19  ;;  %p2386_p13 = scmp.lt.u32.totalorder %s4046_s25, %s2382_s19 }
  0xbd   :  { %p2388_p1 = scmp.lt.u32.totalorder %s2382_s19, %s155_s13 }
  0xbe   :  { %p2387_p0 = por %p2386_p13, %p2385_p12 }
  0xc0   :  { %p2389_p2 = por %p2388_p1, %p2387_p0 }
  0xc2   :  { %p2390_p3 = pnand %p2389_p2, %p2383_p11 }
  0xc4   :  { %2393 = shalt.err (!%p2390_p3)  }
  0xc5   :  { %s2394_s9 = scalar_lea.vmem %s166_s16, 16  ;;  %p2399_p5 = scmp.lt.s32.totalorder %s166_s16, %s4025_s8 }
  0xc6   :  { %p2395_p4 = scmp.ne.s32.totalorder %s166_s16, %s2394_s9  ;;  %p2400_p6 = scmp.lt.s32.totalorder %s4055_s29, %s2394_s9 }
  0xc8   :  { %p2401_p7 = por %p2400_p6, %p2399_p5 }
  0xca   :  { %p2402_p8 = pnand %p2401_p7, %p2395_p4 }
  0xcc   :  { %2405 = shalt.err (!%p2402_p8)  }
  0xcd   :  { %168 = dma.hbm_to_vmem [thread:$0]  %s155_s13, 16, %s166_s16, [#allocation3 + $0x7] }
  0xce   :  { %s3916_s15 = smov [#allocation2 + $0x8]   ;;  %s4158_s22 = sld [smem:[#allocation5 + $0x81]] }
  0xcf   :  { %s182_s21 = sshll.u32 %s3916_s15, 4  ;;  %s3917_s23 = smov [#allocation2 + $0x9]   ;;  %s183_s21 = int_to_ptr.vmem [resolvable:$true] %s182_s21 }
  0xd0   :  { %s199_s24 = sshll.u32 %s3917_s23, 4  ;;  %s4160_s26 = sld [smem:[#allocation5 + $0x101]]  ;;  %s4163_s24 = int_to_ptr.vmem [resolvable:$true] %s199_s24 }
  0xd1   :  { %s1921_s27 = sshll.u32 %s4150_s18, 4 }
  0xd2   :  { %s172_s30 = scalar_lea.hbm %s5058_s2, %s1921_s27 }
  0xd3   :  { %s2406_s0 = scalar_lea.hbm %s172_s30, 16  ;;  %p2409_p10 = scmp.lt.u32.totalorder %s172_s30, %s5058_s2 }
  0xd4   :  { %p2407_p9 = scmp.ne.s32.totalorder %s172_s30, %s2406_s0  ;;  %p2410_p11 = scmp.lt.u32.totalorder %s4046_s25, %s2406_s0 }
  0xd5   :  { %p2412_p13 = scmp.lt.u32.totalorder %s2406_s0, %s172_s30 }
  0xd6   :  { %p2411_p12 = por %p2410_p11, %p2409_p10 }
  0xd8   :  { %p2413_p0 = por %p2412_p13, %p2411_p12 }
  0xda   :  { %p2414_p1 = pnand %p2413_p0, %p2407_p9 }
  0xdc   :  { %2417 = shalt.err (!%p2414_p1)  }
  0xdd   :  { %s2418_s7 = scalar_lea.vmem %s183_s21, 16  ;;  %p2423_p3 = scmp.lt.s32.totalorder %s183_s21, %s4025_s8 }
  0xde   :  { %p2419_p2 = scmp.ne.s32.totalorder %s183_s21, %s2418_s7  ;;  %p2424_p4 = scmp.lt.s32.totalorder %s4055_s29, %s2418_s7 }
  0xe0   :  { %p2425_p5 = por %p2424_p4, %p2423_p3 }
  0xe2   :  { %p2426_p6 = pnand %p2425_p5, %p2419_p2 }
  0xe4   :  { %2429 = shalt.err (!%p2426_p6)  }
  0xe5   :  { %185 = dma.hbm_to_vmem [thread:$0]  %s172_s30, 16, %s183_s21, [#allocation3 + $0x8] }
  0xe6   :  { %s1923_s12 = sshll.u32 %s4158_s22, 4  ;;  %s3918_s5 = smov [#allocation2 + $0xa]  }
  0xe7   :  { %s216_s10 = sshll.u32 %s3918_s5, 4  ;;  %s189_s1 = scalar_lea.hbm %s5058_s2, %s1923_s12  ;;  %s4178_s10 = int_to_ptr.vmem [resolvable:$true] %s216_s10 }
  0xe8   :  { %s2430_s16 = scalar_lea.hbm %s189_s1, 16  ;;  %p2433_p8 = scmp.lt.u32.totalorder %s189_s1, %s5058_s2 }
  0xe9   :  { %p2431_p7 = scmp.ne.s32.totalorder %s189_s1, %s2430_s16  ;;  %p2434_p9 = scmp.lt.u32.totalorder %s4046_s25, %s2430_s16 }
  0xea   :  { %p2436_p11 = scmp.lt.u32.totalorder %s2430_s16, %s189_s1 }
  0xeb   :  { %p2435_p10 = por %p2434_p9, %p2433_p8 }
  0xed   :  { %p2437_p12 = por %p2436_p11, %p2435_p10 }
  0xef   :  { %p2438_p13 = pnand %p2437_p12, %p2431_p7 }
  0xf1   :  { %2441 = shalt.err (!%p2438_p13)  }
  0xf2   :  { %s2442_s20 = scalar_lea.vmem %s4163_s24, 16  ;;  %p2447_p1 = scmp.lt.s32.totalorder %s4163_s24, %s4025_s8 }
  0xf3   :  { %p2443_p0 = scmp.ne.s32.totalorder %s4163_s24, %s2442_s20  ;;  %p2448_p2 = scmp.lt.s32.totalorder %s4055_s29, %s2442_s20 }
  0xf5   :  { %p2449_p3 = por %p2448_p2, %p2447_p1 }
  0xf7   :  { %p2450_p4 = pnand %p2449_p3, %p2443_p0 }
  0xf9   :  { %2453 = shalt.err (!%p2450_p4)  }
  0xfa   :  { %202 = dma.hbm_to_vmem [thread:$0]  %s189_s1, 16, %s4163_s24, [#allocation3 + $0x9] }
  0xfb   :  { %s1925_s11 = sshll.u32 %s4160_s26, 4  ;;  %s4191_s9 = sld [smem:[#allocation5 + $0x181]] }
  0xfc   :  { %s206_s22 = scalar_lea.hbm %s5058_s2, %s1925_s11 }
  0xfd   :  { %s2454_s23 = scalar_lea.hbm %s206_s22, 16  ;;  %p2457_p6 = scmp.lt.u32.totalorder %s206_s22, %s5058_s2 }
  0xfe   :  { %p2455_p5 = scmp.ne.s32.totalorder %s206_s22, %s2454_s23  ;;  %p2458_p7 = scmp.lt.u32.totalorder %s4046_s25, %s2454_s23 }
  0xff   :  { %p2460_p9 = scmp.lt.u32.totalorder %s2454_s23, %s206_s22 }
 0x100   :  { %p2459_p8 = por %p2458_p7, %p2457_p6 }
 0x102   :  { %p2461_p10 = por %p2460_p9, %p2459_p8 }
 0x104   :  { %p2462_p11 = pnand %p2461_p10, %p2455_p5 }
 0x106   :  { %2465 = shalt.err (!%p2462_p11)  }
 0x107   :  { %s2466_s24 = scalar_lea.vmem %s4178_s10, 16  ;;  %p2471_p13 = scmp.lt.s32.totalorder %s4178_s10, %s4025_s8 }
 0x108   :  { %p2467_p12 = scmp.ne.s32.totalorder %s4178_s10, %s2466_s24  ;;  %p2472_p0 = scmp.lt.s32.totalorder %s4055_s29, %s2466_s24 }
 0x10a   :  { %p2473_p1 = por %p2472_p0, %p2471_p13 }
 0x10c   :  { %p2474_p2 = pnand %p2473_p1, %p2467_p12 }
 0x10e   :  { %2477 = shalt.err (!%p2474_p2)  }
 0x10f   :  { %219 = dma.hbm_to_vmem [thread:$0]  %s206_s22, 16, %s4178_s10, [#allocation3 + $0xa] }
 0x110   :  { %s3919_s26 = smov [#allocation2 + $0xb]   ;;  %s4206_s30 = sld [smem:[#allocation5 + $0x201]] }
 0x111   :  { %s233_s28 = sshll.u32 %s3919_s26, 4  ;;  %s3920_s0 = smov [#allocation2 + $0xc]   ;;  %s234_s28 = int_to_ptr.vmem [resolvable:$true] %s233_s28 }
 0x112   :  { %s250_s4 = sshll.u32 %s3920_s0, 4  ;;  %s4208_s6 = sld [smem:[#allocation5 + $0x281]]  ;;  %s4211_s4 = int_to_ptr.vmem [resolvable:$true] %s250_s4 }
 0x113   :  { %s1927_s7 = sshll.u32 %s4191_s9, 4 }
 0x114   :  { %s223_s17 = scalar_lea.hbm %s5058_s2, %s1927_s7 }
 0x115   :  { %s2478_s13 = scalar_lea.hbm %s223_s17, 16  ;;  %p2481_p4 = scmp.lt.u32.totalorder %s223_s17, %s5058_s2 }
 0x116   :  { %p2479_p3 = scmp.ne.s32.totalorder %s223_s17, %s2478_s13  ;;  %p2482_p5 = scmp.lt.u32.totalorder %s4046_s25, %s2478_s13 }
 0x117   :  { %p2484_p7 = scmp.lt.u32.totalorder %s2478_s13, %s223_s17 }
 0x118   :  { %p2483_p6 = por %p2482_p5, %p2481_p4 }
 0x11a   :  { %p2485_p8 = por %p2484_p7, %p2483_p6 }
 0x11c   :  { %p2486_p9 = pnand %p2485_p8, %p2479_p3 }
 0x11e   :  { %2489 = shalt.err (!%p2486_p9)  }
 0x11f   :  { %s2490_s16 = scalar_lea.vmem %s234_s28, 16  ;;  %p2495_p11 = scmp.lt.s32.totalorder %s234_s28, %s4025_s8 }
 0x120   :  { %p2491_p10 = scmp.ne.s32.totalorder %s234_s28, %s2490_s16  ;;  %p2496_p12 = scmp.lt.s32.totalorder %s4055_s29, %s2490_s16 }
 0x122   :  { %p2497_p13 = por %p2496_p12, %p2495_p11 }
 0x124   :  { %p2498_p0 = pnand %p2497_p13, %p2491_p10 }
 0x126   :  { %2501 = shalt.err (!%p2498_p0)  }
 0x127   :  { %236 = dma.hbm_to_vmem [thread:$0]  %s223_s17, 16, %s234_s28, [#allocation3 + $0xb] }
 0x128   :  { %s1929_s18 = sshll.u32 %s4206_s30, 4  ;;  %s3921_s19 = smov [#allocation2 + $0xd]  }
 0x129   :  { %s267_s20 = sshll.u32 %s3921_s19, 4  ;;  %s240_s15 = scalar_lea.hbm %s5058_s2, %s1929_s18  ;;  %s4226_s20 = int_to_ptr.vmem [resolvable:$true] %s267_s20 }
 0x12a   :  { %s2502_s21 = scalar_lea.hbm %s240_s15, 16  ;;  %p2505_p2 = scmp.lt.u32.totalorder %s240_s15, %s5058_s2 }
 0x12b   :  { %p2503_p1 = scmp.ne.s32.totalorder %s240_s15, %s2502_s21  ;;  %p2506_p3 = scmp.lt.u32.totalorder %s4046_s25, %s2502_s21 }
 0x12c   :  { %p2508_p5 = scmp.lt.u32.totalorder %s2502_s21, %s240_s15 }
 0x12d   :  { %p2507_p4 = por %p2506_p3, %p2505_p2 }
 0x12f   :  { %p2509_p6 = por %p2508_p5, %p2507_p4 }
 0x131   :  { %p2510_p7 = pnand %p2509_p6, %p2503_p1 }
 0x133   :  { %2513 = shalt.err (!%p2510_p7)  }
 0x134   :  { %s2514_s27 = scalar_lea.vmem %s4211_s4, 16  ;;  %p2519_p9 = scmp.lt.s32.totalorder %s4211_s4, %s4025_s8 }
 0x135   :  { %p2515_p8 = scmp.ne.s32.totalorder %s4211_s4, %s2514_s27  ;;  %p2520_p10 = scmp.lt.s32.totalorder %s4055_s29, %s2514_s27 }
 0x137   :  { %p2521_p11 = por %p2520_p10, %p2519_p9 }
 0x139   :  { %p2522_p12 = pnand %p2521_p11, %p2515_p8 }
 0x13b   :  { %2525 = shalt.err (!%p2522_p12)  }
 0x13c   :  { %253 = dma.hbm_to_vmem [thread:$0]  %s240_s15, 16, %s4211_s4, [#allocation3 + $0xc] }
 0x13d   :  { %s1931_s14 = sshll.u32 %s4208_s6, 4  ;;  %s4239_s24 = sld [smem:[#allocation5 + $0x301]] }
 0x13e   :  { %s257_s30 = scalar_lea.hbm %s5058_s2, %s1931_s14 }
 0x13f   :  { %s2526_s0 = scalar_lea.hbm %s257_s30, 16  ;;  %p2529_p0 = scmp.lt.u32.totalorder %s257_s30, %s5058_s2 }
 0x140   :  { %p2527_p13 = scmp.ne.s32.totalorder %s257_s30, %s2526_s0  ;;  %p2530_p1 = scmp.lt.u32.totalorder %s4046_s25, %s2526_s0 }
 0x141   :  { %p2532_p3 = scmp.lt.u32.totalorder %s2526_s0, %s257_s30 }
 0x142   :  { %p2531_p2 = por %p2530_p1, %p2529_p0 }
 0x144   :  { %p2533_p4 = por %p2532_p3, %p2531_p2 }
 0x146   :  { %p2534_p5 = pnand %p2533_p4, %p2527_p13 }
 0x148   :  { %2537 = shalt.err (!%p2534_p5)  }
 0x149   :  { %s2538_s4 = scalar_lea.vmem %s4226_s20, 16  ;;  %p2543_p7 = scmp.lt.s32.totalorder %s4226_s20, %s4025_s8 }
 0x14a   :  { %p2539_p6 = scmp.ne.s32.totalorder %s4226_s20, %s2538_s4  ;;  %p2544_p8 = scmp.lt.s32.totalorder %s4055_s29, %s2538_s4 }
 0x14c   :  { %p2545_p9 = por %p2544_p8, %p2543_p7 }
 0x14e   :  { %p2546_p10 = pnand %p2545_p9, %p2539_p6 }
 0x150   :  { %2549 = shalt.err (!%p2546_p10)  }
 0x151   :  { %270 = dma.hbm_to_vmem [thread:$0]  %s257_s30, 16, %s4226_s20, [#allocation3 + $0xd] }
 0x152   :  { %s3922_s6 = smov [#allocation2 + $0xe]   ;;  %s4254_s17 = sld [smem:[#allocation5 + $0x381]] }
 0x153   :  { %s284_s5 = sshll.u32 %s3922_s6, 4  ;;  %s3923_s13 = smov [#allocation2 + $0xf]   ;;  %s285_s5 = int_to_ptr.vmem [resolvable:$true] %s284_s5 }
 0x154   :  { %s301_s1 = sshll.u32 %s3923_s13, 4  ;;  %s4256_s10 = sld [smem:[#allocation5 + $0x2]]  ;;  %s4259_s1 = int_to_ptr.vmem [resolvable:$true] %s301_s1 }
 0x155   :  { %s1933_s16 = sshll.u32 %s4239_s24, 4 }
 0x156   :  { %s274_s11 = scalar_lea.hbm %s5058_s2, %s1933_s16 }
 0x157   :  { %s2550_s9 = scalar_lea.hbm %s274_s11, 16  ;;  %p2553_p12 = scmp.lt.u32.totalorder %s274_s11, %s5058_s2 }
 0x158   :  { %p2551_p11 = scmp.ne.s32.totalorder %s274_s11, %s2550_s9  ;;  %p2554_p13 = scmp.lt.u32.totalorder %s4046_s25, %s2550_s9 }
 0x159   :  { %p2556_p1 = scmp.lt.u32.totalorder %s2550_s9, %s274_s11 }
 0x15a   :  { %p2555_p0 = por %p2554_p13, %p2553_p12 }
 0x15c   :  { %p2557_p2 = por %p2556_p1, %p2555_p0 }
 0x15e   :  { %p2558_p3 = pnand %p2557_p2, %p2551_p11 }
 0x160   :  { %2561 = shalt.err (!%p2558_p3)  }
 0x161   :  { %s2562_s21 = scalar_lea.vmem %s285_s5, 16  ;;  %p2567_p5 = scmp.lt.s32.totalorder %s285_s5, %s4025_s8 }
 0x162   :  { %p2563_p4 = scmp.ne.s32.totalorder %s285_s5, %s2562_s21  ;;  %p2568_p6 = scmp.lt.s32.totalorder %s4055_s29, %s2562_s21 }
 0x164   :  { %p2569_p7 = por %p2568_p6, %p2567_p5 }
 0x166   :  { %p2570_p8 = pnand %p2569_p7, %p2563_p4 }
 0x168   :  { %2573 = shalt.err (!%p2570_p8)  }
 0x169   :  { %287 = dma.hbm_to_vmem [thread:$0]  %s274_s11, 16, %s285_s5, [#allocation3 + $0xe] }
 0x16a   :  { %s1935_s22 = sshll.u32 %s4254_s17, 4  ;;  %s3924_s23 = smov [#allocation2 + $0x10]  }
 0x16b   :  { %s318_s27 = sshll.u32 %s3924_s23, 4  ;;  %s291_s26 = scalar_lea.hbm %s5058_s2, %s1935_s22  ;;  %s4274_s27 = int_to_ptr.vmem [resolvable:$true] %s318_s27 }
 0x16c   :  { %s2574_s28 = scalar_lea.hbm %s291_s26, 16  ;;  %p2577_p10 = scmp.lt.u32.totalorder %s291_s26, %s5058_s2 }
 0x16d   :  { %p2575_p9 = scmp.ne.s32.totalorder %s291_s26, %s2574_s28  ;;  %p2578_p11 = scmp.lt.u32.totalorder %s4046_s25, %s2574_s28 }
 0x16e   :  { %p2580_p13 = scmp.lt.u32.totalorder %s2574_s28, %s291_s26 }
 0x16f   :  { %p2579_p12 = por %p2578_p11, %p2577_p10 }
 0x171   :  { %p2581_p0 = por %p2580_p13, %p2579_p12 }
 0x173   :  { %p2582_p1 = pnand %p2581_p0, %p2575_p9 }
 0x175   :  { %2585 = shalt.err (!%p2582_p1)  }
 0x176   :  { %s2586_s7 = scalar_lea.vmem %s4259_s1, 16  ;;  %p2591_p3 = scmp.lt.s32.totalorder %s4259_s1, %s4025_s8 }
 0x177   :  { %p2587_p2 = scmp.ne.s32.totalorder %s4259_s1, %s2586_s7  ;;  %p2592_p4 = scmp.lt.s32.totalorder %s4055_s29, %s2586_s7 }
 0x179   :  { %p2593_p5 = por %p2592_p4, %p2591_p3 }
 0x17b   :  { %p2594_p6 = pnand %p2593_p5, %p2587_p2 }
 0x17d   :  { %2597 = shalt.err (!%p2594_p6)  }
 0x17e   :  { %304 = dma.hbm_to_vmem [thread:$0]  %s291_s26, 16, %s4259_s1, [#allocation3 + $0xf] }
 0x17f   :  { %s1937_s12 = sshll.u32 %s4256_s10, 4  ;;  %s4287_s4 = sld [smem:[#allocation5 + $0x82]] }
 0x180   :  { %s308_s17 = scalar_lea.hbm %s5058_s2, %s1937_s12 }
 0x181   :  { %s2598_s13 = scalar_lea.hbm %s308_s17, 16  ;;  %p2601_p8 = scmp.lt.u32.totalorder %s308_s17, %s5058_s2 }
 0x182   :  { %p2599_p7 = scmp.ne.s32.totalorder %s308_s17, %s2598_s13  ;;  %p2602_p9 = scmp.lt.u32.totalorder %s4046_s25, %s2598_s13 }
 0x183   :  { %p2604_p11 = scmp.lt.u32.totalorder %s2598_s13, %s308_s17 }
 0x184   :  { %p2603_p10 = por %p2602_p9, %p2601_p8 }
 0x186   :  { %p2605_p12 = por %p2604_p11, %p2603_p10 }
 0x188   :  { %p2606_p13 = pnand %p2605_p12, %p2599_p7 }
 0x18a   :  { %2609 = shalt.err (!%p2606_p13)  }
 0x18b   :  { %s2610_s1 = scalar_lea.vmem %s4274_s27, 16  ;;  %p2615_p1 = scmp.lt.s32.totalorder %s4274_s27, %s4025_s8 }
 0x18c   :  { %p2611_p0 = scmp.ne.s32.totalorder %s4274_s27, %s2610_s1  ;;  %p2616_p2 = scmp.lt.s32.totalorder %s4055_s29, %s2610_s1 }
 0x18e   :  { %p2617_p3 = por %p2616_p2, %p2615_p1 }
 0x190   :  { %p2618_p4 = pnand %p2617_p3, %p2611_p0 }
 0x192   :  { %2621 = shalt.err (!%p2618_p4)  }
 0x193   :  { %321 = dma.hbm_to_vmem [thread:$0]  %s308_s17, 16, %s4274_s27, [#allocation3 + $0x10] }
 0x194   :  { %s3925_s10 = smov [#allocation2 + $0x11]   ;;  %s4302_s11 = sld [smem:[#allocation5 + $0x102]] }
 0x195   :  { %s335_s19 = sshll.u32 %s3925_s10, 4  ;;  %s3926_s9 = smov [#allocation2 + $0x12]   ;;  %s336_s19 = int_to_ptr.vmem [resolvable:$true] %s335_s19 }
 0x196   :  { %s352_s15 = sshll.u32 %s3926_s9, 4  ;;  %s4304_s20 = sld [smem:[#allocation5 + $0x182]]  ;;  %s4307_s15 = int_to_ptr.vmem [resolvable:$true] %s352_s15 }
 0x197   :  { %s1939_s21 = sshll.u32 %s4287_s4, 4 }
 0x198   :  { %s325_s14 = scalar_lea.hbm %s5058_s2, %s1939_s21 }
 0x199   :  { %s2622_s24 = scalar_lea.hbm %s325_s14, 16  ;;  %p2625_p6 = scmp.lt.u32.totalorder %s325_s14, %s5058_s2 }
 0x19a   :  { %p2623_p5 = scmp.ne.s32.totalorder %s325_s14, %s2622_s24  ;;  %p2626_p7 = scmp.lt.u32.totalorder %s4046_s25, %s2622_s24 }
 0x19b   :  { %p2628_p9 = scmp.lt.u32.totalorder %s2622_s24, %s325_s14 }
 0x19c   :  { %p2627_p8 = por %p2626_p7, %p2625_p6 }
 0x19e   :  { %p2629_p10 = por %p2628_p9, %p2627_p8 }
 0x1a0   :  { %p2630_p11 = pnand %p2629_p10, %p2623_p5 }
 0x1a2   :  { %2633 = shalt.err (!%p2630_p11)  }
 0x1a3   :  { %s2634_s28 = scalar_lea.vmem %s336_s19, 16  ;;  %p2639_p13 = scmp.lt.s32.totalorder %s336_s19, %s4025_s8 }
 0x1a4   :  { %p2635_p12 = scmp.ne.s32.totalorder %s336_s19, %s2634_s28  ;;  %p2640_p0 = scmp.lt.s32.totalorder %s4055_s29, %s2634_s28 }
 0x1a6   :  { %p2641_p1 = por %p2640_p0, %p2639_p13 }
 0x1a8   :  { %p2642_p2 = pnand %p2641_p1, %p2635_p12 }
 0x1aa   :  { %2645 = shalt.err (!%p2642_p2)  }
 0x1ab   :  { %338 = dma.hbm_to_vmem [thread:$0]  %s325_s14, 16, %s336_s19, [#allocation3 + $0x11] }
 0x1ac   :  { %s1941_s30 = sshll.u32 %s4302_s11, 4  ;;  %s3927_s0 = smov [#allocation2 + $0x13]  }
 0x1ad   :  { %s369_s7 = sshll.u32 %s3927_s0, 4  ;;  %s342_s6 = scalar_lea.hbm %s5058_s2, %s1941_s30  ;;  %s4322_s7 = int_to_ptr.vmem [resolvable:$true] %s369_s7 }
 0x1ae   :  { %s2646_s5 = scalar_lea.hbm %s342_s6, 16  ;;  %p2649_p4 = scmp.lt.u32.totalorder %s342_s6, %s5058_s2 }
 0x1af   :  { %p2647_p3 = scmp.ne.s32.totalorder %s342_s6, %s2646_s5  ;;  %p2650_p5 = scmp.lt.u32.totalorder %s4046_s25, %s2646_s5 }
 0x1b0   :  { %p2652_p7 = scmp.lt.u32.totalorder %s2646_s5, %s342_s6 }
 0x1b1   :  { %p2651_p6 = por %p2650_p5, %p2649_p4 }
 0x1b3   :  { %p2653_p8 = por %p2652_p7, %p2651_p6 }
 0x1b5   :  { %p2654_p9 = pnand %p2653_p8, %p2647_p3 }
 0x1b7   :  { %2657 = shalt.err (!%p2654_p9)  }
 0x1b8   :  { %s2658_s16 = scalar_lea.vmem %s4307_s15, 16  ;;  %p2663_p11 = scmp.lt.s32.totalorder %s4307_s15, %s4025_s8 }
 0x1b9   :  { %p2659_p10 = scmp.ne.s32.totalorder %s4307_s15, %s2658_s16  ;;  %p2664_p12 = scmp.lt.s32.totalorder %s4055_s29, %s2658_s16 }
 0x1bb   :  { %p2665_p13 = por %p2664_p12, %p2663_p11 }
 0x1bd   :  { %p2666_p0 = pnand %p2665_p13, %p2659_p10 }
 0x1bf   :  { %2669 = shalt.err (!%p2666_p0)  }
 0x1c0   :  { %355 = dma.hbm_to_vmem [thread:$0]  %s342_s6, 16, %s4307_s15, [#allocation3 + $0x12] }
 0x1c1   :  { %s1943_s18 = sshll.u32 %s4304_s20, 4  ;;  %s4335_s1 = sld [smem:[#allocation5 + $0x202]] }
 0x1c2   :  { %s359_s11 = scalar_lea.hbm %s5058_s2, %s1943_s18 }
 0x1c3   :  { %s2670_s9 = scalar_lea.hbm %s359_s11, 16  ;;  %p2673_p2 = scmp.lt.u32.totalorder %s359_s11, %s5058_s2 }
 0x1c4   :  { %p2671_p1 = scmp.ne.s32.totalorder %s359_s11, %s2670_s9  ;;  %p2674_p3 = scmp.lt.u32.totalorder %s4046_s25, %s2670_s9 }
 0x1c5   :  { %p2676_p5 = scmp.lt.u32.totalorder %s2670_s9, %s359_s11 }
 0x1c6   :  { %p2675_p4 = por %p2674_p3, %p2673_p2 }
 0x1c8   :  { %p2677_p6 = por %p2676_p5, %p2675_p4 }
 0x1ca   :  { %p2678_p7 = pnand %p2677_p6, %p2671_p1 }
 0x1cc   :  { %2681 = shalt.err (!%p2678_p7)  }
 0x1cd   :  { %s2682_s15 = scalar_lea.vmem %s4322_s7, 16  ;;  %p2687_p9 = scmp.lt.s32.totalorder %s4322_s7, %s4025_s8 }
 0x1ce   :  { %p2683_p8 = scmp.ne.s32.totalorder %s4322_s7, %s2682_s15  ;;  %p2688_p10 = scmp.lt.s32.totalorder %s4055_s29, %s2682_s15 }
 0x1d0   :  { %p2689_p11 = por %p2688_p10, %p2687_p9 }
 0x1d2   :  { %p2690_p12 = pnand %p2689_p11, %p2683_p8 }
 0x1d4   :  { %2693 = shalt.err (!%p2690_p12)  }
 0x1d5   :  { %372 = dma.hbm_to_vmem [thread:$0]  %s359_s11, 16, %s4322_s7, [#allocation3 + $0x13] }
 0x1d6   :  { %s3928_s20 = smov [#allocation2 + $0x14]   ;;  %s4350_s14 = sld [smem:[#allocation5 + $0x282]] }
 0x1d7   :  { %s386_s23 = sshll.u32 %s3928_s20, 4  ;;  %s3929_s24 = smov [#allocation2 + $0x15]   ;;  %s387_s23 = int_to_ptr.vmem [resolvable:$true] %s386_s23 }
 0x1d8   :  { %s403_s26 = sshll.u32 %s3929_s24, 4  ;;  %s4352_s27 = sld [smem:[#allocation5 + $0x302]]  ;;  %s4355_s26 = int_to_ptr.vmem [resolvable:$true] %s403_s26 }
 0x1d9   :  { %s1945_s28 = sshll.u32 %s4335_s1, 4 }
 0x1da   :  { %s376_s12 = scalar_lea.hbm %s5058_s2, %s1945_s28 }
 0x1db   :  { %s2694_s4 = scalar_lea.hbm %s376_s12, 16  ;;  %p2697_p0 = scmp.lt.u32.totalorder %s376_s12, %s5058_s2 }
 0x1dc   :  { %p2695_p13 = scmp.ne.s32.totalorder %s376_s12, %s2694_s4  ;;  %p2698_p1 = scmp.lt.u32.totalorder %s4046_s25, %s2694_s4 }
 0x1dd   :  { %p2700_p3 = scmp.lt.u32.totalorder %s2694_s4, %s376_s12 }
 0x1de   :  { %p2699_p2 = por %p2698_p1, %p2697_p0 }
 0x1e0   :  { %p2701_p4 = por %p2700_p3, %p2699_p2 }
 0x1e2   :  { %p2702_p5 = pnand %p2701_p4, %p2695_p13 }
 0x1e4   :  { %2705 = shalt.err (!%p2702_p5)  }
 0x1e5   :  { %s2706_s5 = scalar_lea.vmem %s387_s23, 16  ;;  %p2711_p7 = scmp.lt.s32.totalorder %s387_s23, %s4025_s8 }
 0x1e6   :  { %p2707_p6 = scmp.ne.s32.totalorder %s387_s23, %s2706_s5  ;;  %p2712_p8 = scmp.lt.s32.totalorder %s4055_s29, %s2706_s5 }
 0x1e8   :  { %p2713_p9 = por %p2712_p8, %p2711_p7 }
 0x1ea   :  { %p2714_p10 = pnand %p2713_p9, %p2707_p6 }
 0x1ec   :  { %2717 = shalt.err (!%p2714_p10)  }
 0x1ed   :  { %389 = dma.hbm_to_vmem [thread:$0]  %s376_s12, 16, %s387_s23, [#allocation3 + $0x14] }
 0x1ee   :  { %s1947_s17 = sshll.u32 %s4350_s14, 4  ;;  %s3930_s13 = smov [#allocation2 + $0x16]  }
 0x1ef   :  { %s420_s16 = sshll.u32 %s3930_s13, 4  ;;  %s393_s10 = scalar_lea.hbm %s5058_s2, %s1947_s17  ;;  %s4370_s16 = int_to_ptr.vmem [resolvable:$true] %s420_s16 }
 0x1f0   :  { %s2718_s19 = scalar_lea.hbm %s393_s10, 16  ;;  %p2721_p12 = scmp.lt.u32.totalorder %s393_s10, %s5058_s2 }
 0x1f1   :  { %p2719_p11 = scmp.ne.s32.totalorder %s393_s10, %s2718_s19  ;;  %p2722_p13 = scmp.lt.u32.totalorder %s4046_s25, %s2718_s19 }
 0x1f2   :  { %p2724_p1 = scmp.lt.u32.totalorder %s2718_s19, %s393_s10 }
 0x1f3   :  { %p2723_p0 = por %p2722_p13, %p2721_p12 }
 0x1f5   :  { %p2725_p2 = por %p2724_p1, %p2723_p0 }
 0x1f7   :  { %p2726_p3 = pnand %p2725_p2, %p2719_p11 }
 0x1f9   :  { %2729 = shalt.err (!%p2726_p3)  }
 0x1fa   :  { %s2730_s21 = scalar_lea.vmem %s4355_s26, 16  ;;  %p2735_p5 = scmp.lt.s32.totalorder %s4355_s26, %s4025_s8 }
 0x1fb   :  { %p2731_p4 = scmp.ne.s32.totalorder %s4355_s26, %s2730_s21  ;;  %p2736_p6 = scmp.lt.s32.totalorder %s4055_s29, %s2730_s21 }
 0x1fd   :  { %p2737_p7 = por %p2736_p6, %p2735_p5 }
 0x1ff   :  { %p2738_p8 = pnand %p2737_p7, %p2731_p4 }
 0x201   :  { %2741 = shalt.err (!%p2738_p8)  }
 0x202   :  { %406 = dma.hbm_to_vmem [thread:$0]  %s393_s10, 16, %s4355_s26, [#allocation3 + $0x15] }
 0x203   :  { %s1949_s22 = sshll.u32 %s4352_s27, 4  ;;  %s4383_s15 = sld [smem:[#allocation5 + $0x382]] }
 0x204   :  { %s410_s14 = scalar_lea.hbm %s5058_s2, %s1949_s22 }
 0x205   :  { %s2742_s24 = scalar_lea.hbm %s410_s14, 16  ;;  %p2745_p10 = scmp.lt.u32.totalorder %s410_s14, %s5058_s2 }
 0x206   :  { %p2743_p9 = scmp.ne.s32.totalorder %s410_s14, %s2742_s24  ;;  %p2746_p11 = scmp.lt.u32.totalorder %s4046_s25, %s2742_s24 }
 0x207   :  { %p2748_p13 = scmp.lt.u32.totalorder %s2742_s24, %s410_s14 }
 0x208   :  { %p2747_p12 = por %p2746_p11, %p2745_p10 }
 0x20a   :  { %p2749_p0 = por %p2748_p13, %p2747_p12 }
 0x20c   :  { %p2750_p1 = pnand %p2749_p0, %p2743_p9 }
 0x20e   :  { %2753 = shalt.err (!%p2750_p1)  }
 0x20f   :  { %s2754_s26 = scalar_lea.vmem %s4370_s16, 16  ;;  %p2759_p3 = scmp.lt.s32.totalorder %s4370_s16, %s4025_s8 }
 0x210   :  { %p2755_p2 = scmp.ne.s32.totalorder %s4370_s16, %s2754_s26  ;;  %p2760_p4 = scmp.lt.s32.totalorder %s4055_s29, %s2754_s26 }
 0x212   :  { %p2761_p5 = por %p2760_p4, %p2759_p3 }
 0x214   :  { %p2762_p6 = pnand %p2761_p5, %p2755_p2 }
 0x216   :  { %2765 = shalt.err (!%p2762_p6)  }
 0x217   :  { %423 = dma.hbm_to_vmem [thread:$0]  %s410_s14, 16, %s4370_s16, [#allocation3 + $0x16] }
 0x218   :  { %s3931_s27 = smov [#allocation2 + $0x17]   ;;  %s4398_s12 = sld [smem:[#allocation5 + $0x3]] }
 0x219   :  { %s437_s0 = sshll.u32 %s3931_s27, 4  ;;  %s3932_s4 = smov [#allocation2 + $0x18]   ;;  %s438_s0 = int_to_ptr.vmem [resolvable:$true] %s437_s0 }
 0x21a   :  { %s454_s6 = sshll.u32 %s3932_s4, 4  ;;  %s4400_s7 = sld [smem:[#allocation5 + $0x83]]  ;;  %s4403_s6 = int_to_ptr.vmem [resolvable:$true] %s454_s6 }
 0x21b   :  { %s1951_s5 = sshll.u32 %s4383_s15, 4 }
 0x21c   :  { %s427_s18 = scalar_lea.hbm %s5058_s2, %s1951_s5 }
 0x21d   :  { %s2766_s1 = scalar_lea.hbm %s427_s18, 16  ;;  %p2769_p8 = scmp.lt.u32.totalorder %s427_s18, %s5058_s2 }
 0x21e   :  { %p2767_p7 = scmp.ne.s32.totalorder %s427_s18, %s2766_s1  ;;  %p2770_p9 = scmp.lt.u32.totalorder %s4046_s25, %s2766_s1 }
 0x21f   :  { %p2772_p11 = scmp.lt.u32.totalorder %s2766_s1, %s427_s18 }
 0x220   :  { %p2771_p10 = por %p2770_p9, %p2769_p8 }
 0x222   :  { %p2773_p12 = por %p2772_p11, %p2771_p10 }
 0x224   :  { %p2774_p13 = pnand %p2773_p12, %p2767_p7 }
 0x226   :  { %2777 = shalt.err (!%p2774_p13)  }
 0x227   :  { %s2778_s19 = scalar_lea.vmem %s438_s0, 16  ;;  %p2783_p1 = scmp.lt.s32.totalorder %s438_s0, %s4025_s8 }
 0x228   :  { %p2779_p0 = scmp.ne.s32.totalorder %s438_s0, %s2778_s19  ;;  %p2784_p2 = scmp.lt.s32.totalorder %s4055_s29, %s2778_s19 }
 0x22a   :  { %p2785_p3 = por %p2784_p2, %p2783_p1 }
 0x22c   :  { %p2786_p4 = pnand %p2785_p3, %p2779_p0 }
 0x22e   :  { %2789 = shalt.err (!%p2786_p4)  }
 0x22f   :  { %440 = dma.hbm_to_vmem [thread:$0]  %s427_s18, 16, %s438_s0, [#allocation3 + $0x17] }
 0x230   :  { %s1953_s11 = sshll.u32 %s4398_s12, 4  ;;  %s3933_s9 = smov [#allocation2 + $0x19]  }
 0x231   :  { %s471_s21 = sshll.u32 %s3933_s9, 4  ;;  %s444_s20 = scalar_lea.hbm %s5058_s2, %s1953_s11  ;;  %s4418_s21 = int_to_ptr.vmem [resolvable:$true] %s471_s21 }
 0x232   :  { %s2790_s23 = scalar_lea.hbm %s444_s20, 16  ;;  %p2793_p6 = scmp.lt.u32.totalorder %s444_s20, %s5058_s2 }
 0x233   :  { %p2791_p5 = scmp.ne.s32.totalorder %s444_s20, %s2790_s23  ;;  %p2794_p7 = scmp.lt.u32.totalorder %s4046_s25, %s2790_s23 }
 0x234   :  { %p2796_p9 = scmp.lt.u32.totalorder %s2790_s23, %s444_s20 }
 0x235   :  { %p2795_p8 = por %p2794_p7, %p2793_p6 }
 0x237   :  { %p2797_p10 = por %p2796_p9, %p2795_p8 }
 0x239   :  { %p2798_p11 = pnand %p2797_p10, %p2791_p5 }
 0x23b   :  { %2801 = shalt.err (!%p2798_p11)  }
 0x23c   :  { %s2802_s28 = scalar_lea.vmem %s4403_s6, 16  ;;  %p2807_p13 = scmp.lt.s32.totalorder %s4403_s6, %s4025_s8 }
 0x23d   :  { %p2803_p12 = scmp.ne.s32.totalorder %s4403_s6, %s2802_s28  ;;  %p2808_p0 = scmp.lt.s32.totalorder %s4055_s29, %s2802_s28 }
 0x23f   :  { %p2809_p1 = por %p2808_p0, %p2807_p13 }
 0x241   :  { %p2810_p2 = pnand %p2809_p1, %p2803_p12 }
 0x243   :  { %2813 = shalt.err (!%p2810_p2)  }
 0x244   :  { %457 = dma.hbm_to_vmem [thread:$0]  %s444_s20, 16, %s4403_s6, [#allocation3 + $0x18] }
 0x245   :  { %s1955_s30 = sshll.u32 %s4400_s7, 4  ;;  %s4431_s26 = sld [smem:[#allocation5 + $0x103]] }
 0x246   :  { %s461_s12 = scalar_lea.hbm %s5058_s2, %s1955_s30 }
 0x247   :  { %s2814_s4 = scalar_lea.hbm %s461_s12, 16  ;;  %p2817_p4 = scmp.lt.u32.totalorder %s461_s12, %s5058_s2 }
 0x248   :  { %p2815_p3 = scmp.ne.s32.totalorder %s461_s12, %s2814_s4  ;;  %p2818_p5 = scmp.lt.u32.totalorder %s4046_s25, %s2814_s4 }
 0x249   :  { %p2820_p7 = scmp.lt.u32.totalorder %s2814_s4, %s461_s12 }
 0x24a   :  { %p2819_p6 = por %p2818_p5, %p2817_p4 }
 0x24c   :  { %p2821_p8 = por %p2820_p7, %p2819_p6 }
 0x24e   :  { %p2822_p9 = pnand %p2821_p8, %p2815_p3 }
 0x250   :  { %2825 = shalt.err (!%p2822_p9)  }
 0x251   :  { %s2826_s6 = scalar_lea.vmem %s4418_s21, 16  ;;  %p2831_p11 = scmp.lt.s32.totalorder %s4418_s21, %s4025_s8 }
 0x252   :  { %p2827_p10 = scmp.ne.s32.totalorder %s4418_s21, %s2826_s6  ;;  %p2832_p12 = scmp.lt.s32.totalorder %s4055_s29, %s2826_s6 }
 0x254   :  { %p2833_p13 = por %p2832_p12, %p2831_p11 }
 0x256   :  { %p2834_p0 = pnand %p2833_p13, %p2827_p10 }
 0x258   :  { %2837 = shalt.err (!%p2834_p0)  }
 0x259   :  { %474 = dma.hbm_to_vmem [thread:$0]  %s461_s12, 16, %s4418_s21, [#allocation3 + $0x19] }
 0x25a   :  { %s3934_s7 = smov [#allocation2 + $0x1a]   ;;  %s4446_s18 = sld [smem:[#allocation5 + $0x183]] }
 0x25b   :  { %s488_s13 = sshll.u32 %s3934_s7, 4  ;;  %s3935_s1 = smov [#allocation2 + $0x1b]   ;;  %s489_s13 = int_to_ptr.vmem [resolvable:$true] %s488_s13 }
 0x25c   :  { %s505_s10 = sshll.u32 %s3935_s1, 4  ;;  %s4448_s16 = sld [smem:[#allocation5 + $0x203]]  ;;  %s4451_s10 = int_to_ptr.vmem [resolvable:$true] %s505_s10 }
 0x25d   :  { %s1957_s19 = sshll.u32 %s4431_s26, 4 }
 0x25e   :  { %s478_s22 = scalar_lea.hbm %s5058_s2, %s1957_s19 }
 0x25f   :  { %s2838_s15 = scalar_lea.hbm %s478_s22, 16  ;;  %p2841_p2 = scmp.lt.u32.totalorder %s478_s22, %s5058_s2 }
 0x260   :  { %p2839_p1 = scmp.ne.s32.totalorder %s478_s22, %s2838_s15  ;;  %p2842_p3 = scmp.lt.u32.totalorder %s4046_s25, %s2838_s15 }
 0x261   :  { %p2844_p5 = scmp.lt.u32.totalorder %s2838_s15, %s478_s22 }
 0x262   :  { %p2843_p4 = por %p2842_p3, %p2841_p2 }
 0x264   :  { %p2845_p6 = por %p2844_p5, %p2843_p4 }
 0x266   :  { %p2846_p7 = pnand %p2845_p6, %p2839_p1 }
 0x268   :  { %2849 = shalt.err (!%p2846_p7)  }
 0x269   :  { %s2850_s23 = scalar_lea.vmem %s489_s13, 16  ;;  %p2855_p9 = scmp.lt.s32.totalorder %s489_s13, %s4025_s8 }
 0x26a   :  { %p2851_p8 = scmp.ne.s32.totalorder %s489_s13, %s2850_s23  ;;  %p2856_p10 = scmp.lt.s32.totalorder %s4055_s29, %s2850_s23 }
 0x26c   :  { %p2857_p11 = por %p2856_p10, %p2855_p9 }
 0x26e   :  { %p2858_p12 = pnand %p2857_p11, %p2851_p8 }
 0x270   :  { %2861 = shalt.err (!%p2858_p12)  }
 0x271   :  { %491 = dma.hbm_to_vmem [thread:$0]  %s478_s22, 16, %s489_s13, [#allocation3 + $0x1a] }
 0x272   :  { %s1959_s14 = sshll.u32 %s4446_s18, 4  ;;  %s3936_s24 = smov [#allocation2 + $0x1c]  }
 0x273   :  { %s522_s28 = sshll.u32 %s3936_s24, 4  ;;  %s495_s27 = scalar_lea.hbm %s5058_s2, %s1959_s14  ;;  %s4466_s28 = int_to_ptr.vmem [resolvable:$true] %s522_s28 }
 0x274   :  { %s2862_s0 = scalar_lea.hbm %s495_s27, 16  ;;  %p2865_p0 = scmp.lt.u32.totalorder %s495_s27, %s5058_s2 }
 0x275   :  { %p2863_p13 = scmp.ne.s32.totalorder %s495_s27, %s2862_s0  ;;  %p2866_p1 = scmp.lt.u32.totalorder %s4046_s25, %s2862_s0 }
 0x276   :  { %p2868_p3 = scmp.lt.u32.totalorder %s2862_s0, %s495_s27 }
 0x277   :  { %p2867_p2 = por %p2866_p1, %p2865_p0 }
 0x279   :  { %p2869_p4 = por %p2868_p3, %p2867_p2 }
 0x27b   :  { %p2870_p5 = pnand %p2869_p4, %p2863_p13 }
 0x27d   :  { %2873 = shalt.err (!%p2870_p5)  }
 0x27e   :  { %s2874_s5 = scalar_lea.vmem %s4451_s10, 16  ;;  %p2879_p7 = scmp.lt.s32.totalorder %s4451_s10, %s4025_s8 }
 0x27f   :  { %p2875_p6 = scmp.ne.s32.totalorder %s4451_s10, %s2874_s5  ;;  %p2880_p8 = scmp.lt.s32.totalorder %s4055_s29, %s2874_s5 }
 0x281   :  { %p2881_p9 = por %p2880_p8, %p2879_p7 }
 0x283   :  { %p2882_p10 = pnand %p2881_p9, %p2875_p6 }
 0x285   :  { %2885 = shalt.err (!%p2882_p10)  }
 0x286   :  { %508 = dma.hbm_to_vmem [thread:$0]  %s495_s27, 16, %s4451_s10, [#allocation3 + $0x1b] }
 0x287   :  { %s1961_s17 = sshll.u32 %s4448_s16, 4  ;;  %s4479_s6 = sld [smem:[#allocation5 + $0x283]] }
 0x288   :  { %s512_s18 = scalar_lea.hbm %s5058_s2, %s1961_s17 }
 0x289   :  { %s2886_s1 = scalar_lea.hbm %s512_s18, 16  ;;  %p2889_p12 = scmp.lt.u32.totalorder %s512_s18, %s5058_s2 }
 0x28a   :  { %p2887_p11 = scmp.ne.s32.totalorder %s512_s18, %s2886_s1  ;;  %p2890_p13 = scmp.lt.u32.totalorder %s4046_s25, %s2886_s1 }
 0x28b   :  { %p2892_p1 = scmp.lt.u32.totalorder %s2886_s1, %s512_s18 }
 0x28c   :  { %p2891_p0 = por %p2890_p13, %p2889_p12 }
 0x28e   :  { %p2893_p2 = por %p2892_p1, %p2891_p0 }
 0x290   :  { %p2894_p3 = pnand %p2893_p2, %p2887_p11 }
 0x292   :  { %2897 = shalt.err (!%p2894_p3)  }
 0x293   :  { %s2898_s10 = scalar_lea.vmem %s4466_s28, 16  ;;  %p2903_p5 = scmp.lt.s32.totalorder %s4466_s28, %s4025_s8 }
 0x294   :  { %p2899_p4 = scmp.ne.s32.totalorder %s4466_s28, %s2898_s10  ;;  %p2904_p6 = scmp.lt.s32.totalorder %s4055_s29, %s2898_s10 }
 0x296   :  { %p2905_p7 = por %p2904_p6, %p2903_p5 }
 0x298   :  { %p2906_p8 = pnand %p2905_p7, %p2899_p4 }
 0x29a   :  { %2909 = shalt.err (!%p2906_p8)  }
 0x29b   :  { %525 = dma.hbm_to_vmem [thread:$0]  %s512_s18, 16, %s4466_s28, [#allocation3 + $0x1c] }
 0x29c   :  { %s3937_s16 = smov [#allocation2 + $0x1d]   ;;  %s4494_s22 = sld [smem:[#allocation5 + $0x303]] }
 0x29d   :  { %s539_s9 = sshll.u32 %s3937_s16, 4  ;;  %s3938_s15 = smov [#allocation2 + $0x1e]   ;;  %s540_s9 = int_to_ptr.vmem [resolvable:$true] %s539_s9 }
 0x29e   :  { %s556_s20 = sshll.u32 %s3938_s15, 4  ;;  %s4496_s21 = sld [smem:[#allocation5 + $0x383]]  ;;  %s4499_s20 = int_to_ptr.vmem [resolvable:$true] %s556_s20 }
 0x29f   :  { %s1963_s23 = sshll.u32 %s4479_s6, 4 }
 0x2a0   :  { %s529_s30 = scalar_lea.hbm %s5058_s2, %s1963_s23 }
 0x2a1   :  { %s2910_s26 = scalar_lea.hbm %s529_s30, 16  ;;  %p2913_p10 = scmp.lt.u32.totalorder %s529_s30, %s5058_s2 }
 0x2a2   :  { %p2911_p9 = scmp.ne.s32.totalorder %s529_s30, %s2910_s26  ;;  %p2914_p11 = scmp.lt.u32.totalorder %s4046_s25, %s2910_s26 }
 0x2a3   :  { %p2916_p13 = scmp.lt.u32.totalorder %s2910_s26, %s529_s30 }
 0x2a4   :  { %p2915_p12 = por %p2914_p11, %p2913_p10 }
 0x2a6   :  { %p2917_p0 = por %p2916_p13, %p2915_p12 }
 0x2a8   :  { %p2918_p1 = pnand %p2917_p0, %p2911_p9 }
 0x2aa   :  { %2921 = shalt.err (!%p2918_p1)  }
 0x2ab   :  { %s2922_s0 = scalar_lea.vmem %s540_s9, 16  ;;  %p2927_p3 = scmp.lt.s32.totalorder %s540_s9, %s4025_s8 }
 0x2ac   :  { %p2923_p2 = scmp.ne.s32.totalorder %s540_s9, %s2922_s0  ;;  %p2928_p4 = scmp.lt.s32.totalorder %s4055_s29, %s2922_s0 }
 0x2ae   :  { %p2929_p5 = por %p2928_p4, %p2927_p3 }
 0x2b0   :  { %p2930_p6 = pnand %p2929_p5, %p2923_p2 }
 0x2b2   :  { %2933 = shalt.err (!%p2930_p6)  }
 0x2b3   :  { %542 = dma.hbm_to_vmem [thread:$0]  %s529_s30, 16, %s540_s9, [#allocation3 + $0x1d] }
 0x2b4   :  { %s1965_s12 = sshll.u32 %s4494_s22, 4  ;;  %s3939_s4 = smov [#allocation2 + $0x1f]  }
 0x2b5   :  { %s573_s5 = sshll.u32 %s3939_s4, 4  ;;  %s546_s7 = scalar_lea.hbm %s5058_s2, %s1965_s12  ;;  %s4514_s5 = int_to_ptr.vmem [resolvable:$true] %s573_s5 }
 0x2b6   :  { %s2934_s13 = scalar_lea.hbm %s546_s7, 16  ;;  %p2937_p8 = scmp.lt.u32.totalorder %s546_s7, %s5058_s2 }
 0x2b7   :  { %p2935_p7 = scmp.ne.s32.totalorder %s546_s7, %s2934_s13  ;;  %p2938_p9 = scmp.lt.u32.totalorder %s4046_s25, %s2934_s13 }
 0x2b8   :  { %p2940_p11 = scmp.lt.u32.totalorder %s2934_s13, %s546_s7 }
 0x2b9   :  { %p2939_p10 = por %p2938_p9, %p2937_p8 }
 0x2bb   :  { %p2941_p12 = por %p2940_p11, %p2939_p10 }
 0x2bd   :  { %p2942_p13 = pnand %p2941_p12, %p2935_p7 }
 0x2bf   :  { %2945 = shalt.err (!%p2942_p13)  }
 0x2c0   :  { %s2946_s19 = scalar_lea.vmem %s4499_s20, 16  ;;  %p2951_p1 = scmp.lt.s32.totalorder %s4499_s20, %s4025_s8 }
 0x2c1   :  { %p2947_p0 = scmp.ne.s32.totalorder %s4499_s20, %s2946_s19  ;;  %p2952_p2 = scmp.lt.s32.totalorder %s4055_s29, %s2946_s19 }
 0x2c3   :  { %p2953_p3 = por %p2952_p2, %p2951_p1 }
 0x2c5   :  { %p2954_p4 = pnand %p2953_p3, %p2947_p0 }
 0x2c7   :  { %2957 = shalt.err (!%p2954_p4)  }
 0x2c8   :  { %559 = dma.hbm_to_vmem [thread:$0]  %s546_s7, 16, %s4499_s20, [#allocation3 + $0x1e] }
 0x2c9   :  { %s1967_s11 = sshll.u32 %s4496_s21, 4  ;;  %s4527_s10 = sld [smem:[#allocation5 + $0x4]] }
 0x2ca   :  { %s563_s22 = scalar_lea.hbm %s5058_s2, %s1967_s11 }
 0x2cb   :  { %s2958_s15 = scalar_lea.hbm %s563_s22, 16  ;;  %p2961_p6 = scmp.lt.u32.totalorder %s563_s22, %s5058_s2 }
 0x2cc   :  { %p2959_p5 = scmp.ne.s32.totalorder %s563_s22, %s2958_s15  ;;  %p2962_p7 = scmp.lt.u32.totalorder %s4046_s25, %s2958_s15 }
 0x2cd   :  { %p2964_p9 = scmp.lt.u32.totalorder %s2958_s15, %s563_s22 }
 0x2ce   :  { %p2963_p8 = por %p2962_p7, %p2961_p6 }
 0x2d0   :  { %p2965_p10 = por %p2964_p9, %p2963_p8 }
 0x2d2   :  { %p2966_p11 = pnand %p2965_p10, %p2959_p5 }
 0x2d4   :  { %2969 = shalt.err (!%p2966_p11)  }
 0x2d5   :  { %s2970_s20 = scalar_lea.vmem %s4514_s5, 16  ;;  %p2975_p13 = scmp.lt.s32.totalorder %s4514_s5, %s4025_s8 }
 0x2d6   :  { %p2971_p12 = scmp.ne.s32.totalorder %s4514_s5, %s2970_s20  ;;  %p2976_p0 = scmp.lt.s32.totalorder %s4055_s29, %s2970_s20 }
 0x2d8   :  { %p2977_p1 = por %p2976_p0, %p2975_p13 }
 0x2da   :  { %p2978_p2 = pnand %p2977_p1, %p2971_p12 }
 0x2dc   :  { %2981 = shalt.err (!%p2978_p2)  }
 0x2dd   :  { %576 = dma.hbm_to_vmem [thread:$0]  %s563_s22, 16, %s4514_s5, [#allocation3 + $0x1f] }
 0x2de   :  { %s3940_s21 = smov [#allocation2 + $0x20]   ;;  %s4542_s30 = sld [smem:[#allocation5 + $0x84]] }
 0x2df   :  { %s590_s24 = sshll.u32 %s3940_s21, 4  ;;  %s3941_s26 = smov [#allocation2 + $0x21]   ;;  %s591_s24 = int_to_ptr.vmem [resolvable:$true] %s590_s24 }
 0x2e0   :  { %s607_s27 = sshll.u32 %s3941_s26, 4  ;;  %s4544_s28 = sld [smem:[#allocation5 + $0x104]]  ;;  %s4547_s27 = int_to_ptr.vmem [resolvable:$true] %s607_s27 }
 0x2e1   :  { %s1969_s0 = sshll.u32 %s4527_s10, 4 }
 0x2e2   :  { %s580_s17 = scalar_lea.hbm %s5058_s2, %s1969_s0 }
 0x2e3   :  { %s2982_s6 = scalar_lea.hbm %s580_s17, 16  ;;  %p2985_p4 = scmp.lt.u32.totalorder %s580_s17, %s5058_s2 }
 0x2e4   :  { %p2983_p3 = scmp.ne.s32.totalorder %s580_s17, %s2982_s6  ;;  %p2986_p5 = scmp.lt.u32.totalorder %s4046_s25, %s2982_s6 }
 0x2e5   :  { %p2988_p7 = scmp.lt.u32.totalorder %s2982_s6, %s580_s17 }
 0x2e6   :  { %p2987_p6 = por %p2986_p5, %p2985_p4 }
 0x2e8   :  { %p2989_p8 = por %p2988_p7, %p2987_p6 }
 0x2ea   :  { %p2990_p9 = pnand %p2989_p8, %p2983_p3 }
 0x2ec   :  { %2993 = shalt.err (!%p2990_p9)  }
 0x2ed   :  { %s2994_s13 = scalar_lea.vmem %s591_s24, 16  ;;  %p2999_p11 = scmp.lt.s32.totalorder %s591_s24, %s4025_s8 }
 0x2ee   :  { %p2995_p10 = scmp.ne.s32.totalorder %s591_s24, %s2994_s13  ;;  %p3000_p12 = scmp.lt.s32.totalorder %s4055_s29, %s2994_s13 }
 0x2f0   :  { %p3001_p13 = por %p3000_p12, %p2999_p11 }
 0x2f2   :  { %p3002_p0 = pnand %p3001_p13, %p2995_p10 }
 0x2f4   :  { %3005 = shalt.err (!%p3002_p0)  }
 0x2f5   :  { %593 = dma.hbm_to_vmem [thread:$0]  %s580_s17, 16, %s591_s24, [#allocation3 + $0x20] }
 0x2f6   :  { %s1971_s18 = sshll.u32 %s4542_s30, 4  ;;  %s3942_s1 = smov [#allocation2 + $0x22]  }
 0x2f7   :  { %s624_s19 = sshll.u32 %s3942_s1, 4  ;;  %s597_s16 = scalar_lea.hbm %s5058_s2, %s1971_s18  ;;  %s4562_s19 = int_to_ptr.vmem [resolvable:$true] %s624_s19 }
 0x2f8   :  { %s3006_s9 = scalar_lea.hbm %s597_s16, 16  ;;  %p3009_p2 = scmp.lt.u32.totalorder %s597_s16, %s5058_s2 }
 0x2f9   :  { %p3007_p1 = scmp.ne.s32.totalorder %s597_s16, %s3006_s9  ;;  %p3010_p3 = scmp.lt.u32.totalorder %s4046_s25, %s3006_s9 }
 0x2fa   :  { %p3012_p5 = scmp.lt.u32.totalorder %s3006_s9, %s597_s16 }
 0x2fb   :  { %p3011_p4 = por %p3010_p3, %p3009_p2 }
 0x2fd   :  { %p3013_p6 = por %p3012_p5, %p3011_p4 }
 0x2ff   :  { %p3014_p7 = pnand %p3013_p6, %p3007_p1 }
 0x301   :  { %3017 = shalt.err (!%p3014_p7)  }
 0x302   :  { %s3018_s23 = scalar_lea.vmem %s4547_s27, 16  ;;  %p3023_p9 = scmp.lt.s32.totalorder %s4547_s27, %s4025_s8 }
 0x303   :  { %p3019_p8 = scmp.ne.s32.totalorder %s4547_s27, %s3018_s23  ;;  %p3024_p10 = scmp.lt.s32.totalorder %s4055_s29, %s3018_s23 }
 0x305   :  { %p3025_p11 = por %p3024_p10, %p3023_p9 }
 0x307   :  { %p3026_p12 = pnand %p3025_p11, %p3019_p8 }
 0x309   :  { %3029 = shalt.err (!%p3026_p12)  }
 0x30a   :  { %610 = dma.hbm_to_vmem [thread:$0]  %s597_s16, 16, %s4547_s27, [#allocation3 + $0x21] }
 0x30b   :  { %s1973_s14 = sshll.u32 %s4544_s28, 4  ;;  %s4575_s20 = sld [smem:[#allocation5 + $0x184]] }
 0x30c   :  { %s614_s30 = scalar_lea.hbm %s5058_s2, %s1973_s14 }
 0x30d   :  { %s3030_s26 = scalar_lea.hbm %s614_s30, 16  ;;  %p3033_p0 = scmp.lt.u32.totalorder %s614_s30, %s5058_s2 }
 0x30e   :  { %p3031_p13 = scmp.ne.s32.totalorder %s614_s30, %s3030_s26  ;;  %p3034_p1 = scmp.lt.u32.totalorder %s4046_s25, %s3030_s26 }
 0x30f   :  { %p3036_p3 = scmp.lt.u32.totalorder %s3030_s26, %s614_s30 }
 0x310   :  { %p3035_p2 = por %p3034_p1, %p3033_p0 }
 0x312   :  { %p3037_p4 = por %p3036_p3, %p3035_p2 }
 0x314   :  { %p3038_p5 = pnand %p3037_p4, %p3031_p13 }
 0x316   :  { %3041 = shalt.err (!%p3038_p5)  }
 0x317   :  { %s3042_s27 = scalar_lea.vmem %s4562_s19, 16  ;;  %p3047_p7 = scmp.lt.s32.totalorder %s4562_s19, %s4025_s8 }
 0x318   :  { %p3043_p6 = scmp.ne.s32.totalorder %s4562_s19, %s3042_s27  ;;  %p3048_p8 = scmp.lt.s32.totalorder %s4055_s29, %s3042_s27 }
 0x31a   :  { %p3049_p9 = por %p3048_p8, %p3047_p7 }
 0x31c   :  { %p3050_p10 = pnand %p3049_p9, %p3043_p6 }
 0x31e   :  { %3053 = shalt.err (!%p3050_p10)  }
 0x31f   :  { %627 = dma.hbm_to_vmem [thread:$0]  %s614_s30, 16, %s4562_s19, [#allocation3 + $0x22] }
 0x320   :  { %s3943_s28 = smov [#allocation2 + $0x23]   ;;  %s4590_s17 = sld [smem:[#allocation5 + $0x204]] }
 0x321   :  { %s641_s4 = sshll.u32 %s3943_s28, 4  ;;  %s3944_s6 = smov [#allocation2 + $0x24]   ;;  %s642_s4 = int_to_ptr.vmem [resolvable:$true] %s641_s4 }
 0x322   :  { %s658_s7 = sshll.u32 %s3944_s6, 4  ;;  %s4592_s5 = sld [smem:[#allocation5 + $0x284]]  ;;  %s4595_s7 = int_to_ptr.vmem [resolvable:$true] %s658_s7 }
 0x323   :  { %s1975_s13 = sshll.u32 %s4575_s20, 4 }
 0x324   :  { %s631_s11 = scalar_lea.hbm %s5058_s2, %s1975_s13 }
 0x325   :  { %s3054_s10 = scalar_lea.hbm %s631_s11, 16  ;;  %p3057_p12 = scmp.lt.u32.totalorder %s631_s11, %s5058_s2 }
 0x326   :  { %p3055_p11 = scmp.ne.s32.totalorder %s631_s11, %s3054_s10  ;;  %p3058_p13 = scmp.lt.u32.totalorder %s4046_s25, %s3054_s10 }
 0x327   :  { %p3060_p1 = scmp.lt.u32.totalorder %s3054_s10, %s631_s11 }
 0x328   :  { %p3059_p0 = por %p3058_p13, %p3057_p12 }
 0x32a   :  { %p3061_p2 = por %p3060_p1, %p3059_p0 }
 0x32c   :  { %p3062_p3 = pnand %p3061_p2, %p3055_p11 }
 0x32e   :  { %3065 = shalt.err (!%p3062_p3)  }
 0x32f   :  { %s3066_s9 = scalar_lea.vmem %s642_s4, 16  ;;  %p3071_p5 = scmp.lt.s32.totalorder %s642_s4, %s4025_s8 }
 0x330   :  { %p3067_p4 = scmp.ne.s32.totalorder %s642_s4, %s3066_s9  ;;  %p3072_p6 = scmp.lt.s32.totalorder %s4055_s29, %s3066_s9 }
 0x332   :  { %p3073_p7 = por %p3072_p6, %p3071_p5 }
 0x334   :  { %p3074_p8 = pnand %p3073_p7, %p3067_p4 }
 0x336   :  { %3077 = shalt.err (!%p3074_p8)  }
 0x337   :  { %644 = dma.hbm_to_vmem [thread:$0]  %s631_s11, 16, %s642_s4, [#allocation3 + $0x23] }
 0x338   :  { %s1977_s22 = sshll.u32 %s4590_s17, 4  ;;  %s3945_s15 = smov [#allocation2 + $0x25]  }
 0x339   :  { %s675_s23 = sshll.u32 %s3945_s15, 4  ;;  %s648_s21 = scalar_lea.hbm %s5058_s2, %s1977_s22  ;;  %s4610_s23 = int_to_ptr.vmem [resolvable:$true] %s675_s23 }
 0x33a   :  { %s3078_s24 = scalar_lea.hbm %s648_s21, 16  ;;  %p3081_p10 = scmp.lt.u32.totalorder %s648_s21, %s5058_s2 }
 0x33b   :  { %p3079_p9 = scmp.ne.s32.totalorder %s648_s21, %s3078_s24  ;;  %p3082_p11 = scmp.lt.u32.totalorder %s4046_s25, %s3078_s24 }
 0x33c   :  { %p3084_p13 = scmp.lt.u32.totalorder %s3078_s24, %s648_s21 }
 0x33d   :  { %p3083_p12 = por %p3082_p11, %p3081_p10 }
 0x33f   :  { %p3085_p0 = por %p3084_p13, %p3083_p12 }
 0x341   :  { %p3086_p1 = pnand %p3085_p0, %p3079_p9 }
 0x343   :  { %3089 = shalt.err (!%p3086_p1)  }
 0x344   :  { %s3090_s0 = scalar_lea.vmem %s4595_s7, 16  ;;  %p3095_p3 = scmp.lt.s32.totalorder %s4595_s7, %s4025_s8 }
 0x345   :  { %p3091_p2 = scmp.ne.s32.totalorder %s4595_s7, %s3090_s0  ;;  %p3096_p4 = scmp.lt.s32.totalorder %s4055_s29, %s3090_s0 }
 0x347   :  { %p3097_p5 = por %p3096_p4, %p3095_p3 }
 0x349   :  { %p3098_p6 = pnand %p3097_p5, %p3091_p2 }
 0x34b   :  { %3101 = shalt.err (!%p3098_p6)  }
 0x34c   :  { %661 = dma.hbm_to_vmem [thread:$0]  %s648_s21, 16, %s4595_s7, [#allocation3 + $0x24] }
 0x34d   :  { %s1979_s12 = sshll.u32 %s4592_s5, 4  ;;  %s4623_s27 = sld [smem:[#allocation5 + $0x304]] }
 0x34e   :  { %s665_s17 = scalar_lea.hbm %s5058_s2, %s1979_s12 }
 0x34f   :  { %s3102_s6 = scalar_lea.hbm %s665_s17, 16  ;;  %p3105_p8 = scmp.lt.u32.totalorder %s665_s17, %s5058_s2 }
 0x350   :  { %p3103_p7 = scmp.ne.s32.totalorder %s665_s17, %s3102_s6  ;;  %p3106_p9 = scmp.lt.u32.totalorder %s4046_s25, %s3102_s6 }
 0x351   :  { %p3108_p11 = scmp.lt.u32.totalorder %s3102_s6, %s665_s17 }
 0x352   :  { %p3107_p10 = por %p3106_p9, %p3105_p8 }
 0x354   :  { %p3109_p12 = por %p3108_p11, %p3107_p10 }
 0x356   :  { %p3110_p13 = pnand %p3109_p12, %p3103_p7 }
 0x358   :  { %3113 = shalt.err (!%p3110_p13)  }
 0x359   :  { %s3114_s7 = scalar_lea.vmem %s4610_s23, 16  ;;  %p3119_p1 = scmp.lt.s32.totalorder %s4610_s23, %s4025_s8 }
 0x35a   :  { %p3115_p0 = scmp.ne.s32.totalorder %s4610_s23, %s3114_s7  ;;  %p3120_p2 = scmp.lt.s32.totalorder %s4055_s29, %s3114_s7 }
 0x35c   :  { %p3121_p3 = por %p3120_p2, %p3119_p1 }
 0x35e   :  { %p3122_p4 = pnand %p3121_p3, %p3115_p0 }
 0x360   :  { %3125 = shalt.err (!%p3122_p4)  }
 0x361   :  { %678 = dma.hbm_to_vmem [thread:$0]  %s665_s17, 16, %s4610_s23, [#allocation3 + $0x25] }
 0x362   :  { %s3946_s5 = smov [#allocation2 + $0x26]   ;;  %s4638_s11 = sld [smem:[#allocation5 + $0x384]] }
 0x363   :  { %s692_s1 = sshll.u32 %s3946_s5, 4  ;;  %s3947_s10 = smov [#allocation2 + $0x27]   ;;  %s693_s1 = int_to_ptr.vmem [resolvable:$true] %s692_s1 }
 0x364   :  { %s709_s16 = sshll.u32 %s3947_s10, 4  ;;  %s4640_s19 = sld [smem:[#allocation5 + $0x5]]  ;;  %s4643_s16 = int_to_ptr.vmem [resolvable:$true] %s709_s16 }
 0x365   :  { %s1981_s9 = sshll.u32 %s4623_s27, 4 }
 0x366   :  { %s682_s14 = scalar_lea.hbm %s5058_s2, %s1981_s9 }
 0x367   :  { %s3126_s20 = scalar_lea.hbm %s682_s14, 16  ;;  %p3129_p6 = scmp.lt.u32.totalorder %s682_s14, %s5058_s2 }
 0x368   :  { %p3127_p5 = scmp.ne.s32.totalorder %s682_s14, %s3126_s20  ;;  %p3130_p7 = scmp.lt.u32.totalorder %s4046_s25, %s3126_s20 }
 0x369   :  { %p3132_p9 = scmp.lt.u32.totalorder %s3126_s20, %s682_s14 }
 0x36a   :  { %p3131_p8 = por %p3130_p7, %p3129_p6 }
 0x36c   :  { %p3133_p10 = por %p3132_p9, %p3131_p8 }
 0x36e   :  { %p3134_p11 = pnand %p3133_p10, %p3127_p5 }
 0x370   :  { %3137 = shalt.err (!%p3134_p11)  }
 0x371   :  { %s3138_s24 = scalar_lea.vmem %s693_s1, 16  ;;  %p3143_p13 = scmp.lt.s32.totalorder %s693_s1, %s4025_s8 }
 0x372   :  { %p3139_p12 = scmp.ne.s32.totalorder %s693_s1, %s3138_s24  ;;  %p3144_p0 = scmp.lt.s32.totalorder %s4055_s29, %s3138_s24 }
 0x374   :  { %p3145_p1 = por %p3144_p0, %p3143_p13 }
 0x376   :  { %p3146_p2 = pnand %p3145_p1, %p3139_p12 }
 0x378   :  { %3149 = shalt.err (!%p3146_p2)  }
 0x379   :  { %695 = dma.hbm_to_vmem [thread:$0]  %s682_s14, 16, %s693_s1, [#allocation3 + $0x26] }
 0x37a   :  { %s1983_s30 = sshll.u32 %s4638_s11, 4  ;;  %s3948_s26 = smov [#allocation2 + $0x28]  }
 0x37b   :  { %s726_s0 = sshll.u32 %s3948_s26, 4  ;;  %s699_s28 = scalar_lea.hbm %s5058_s2, %s1983_s30  ;;  %s4658_s0 = int_to_ptr.vmem [resolvable:$true] %s726_s0 }
 0x37c   :  { %s3150_s4 = scalar_lea.hbm %s699_s28, 16  ;;  %p3153_p4 = scmp.lt.u32.totalorder %s699_s28, %s5058_s2 }
 0x37d   :  { %p3151_p3 = scmp.ne.s32.totalorder %s699_s28, %s3150_s4  ;;  %p3154_p5 = scmp.lt.u32.totalorder %s4046_s25, %s3150_s4 }
 0x37e   :  { %p3156_p7 = scmp.lt.u32.totalorder %s3150_s4, %s699_s28 }
 0x37f   :  { %p3155_p6 = por %p3154_p5, %p3153_p4 }
 0x381   :  { %p3157_p8 = por %p3156_p7, %p3155_p6 }
 0x383   :  { %p3158_p9 = pnand %p3157_p8, %p3151_p3 }
 0x385   :  { %3161 = shalt.err (!%p3158_p9)  }
 0x386   :  { %s3162_s13 = scalar_lea.vmem %s4643_s16, 16  ;;  %p3167_p11 = scmp.lt.s32.totalorder %s4643_s16, %s4025_s8 }
 0x387   :  { %p3163_p10 = scmp.ne.s32.totalorder %s4643_s16, %s3162_s13  ;;  %p3168_p12 = scmp.lt.s32.totalorder %s4055_s29, %s3162_s13 }
 0x389   :  { %p3169_p13 = por %p3168_p12, %p3167_p11 }
 0x38b   :  { %p3170_p0 = pnand %p3169_p13, %p3163_p10 }
 0x38d   :  { %3173 = shalt.err (!%p3170_p0)  }
 0x38e   :  { %712 = dma.hbm_to_vmem [thread:$0]  %s699_s28, 16, %s4643_s16, [#allocation3 + $0x27] }
 0x38f   :  { %s1985_s18 = sshll.u32 %s4640_s19, 4  ;;  %s4671_s7 = sld [smem:[#allocation5 + $0x85]] }
 0x390   :  { %s716_s11 = scalar_lea.hbm %s5058_s2, %s1985_s18 }
 0x391   :  { %s3174_s10 = scalar_lea.hbm %s716_s11, 16  ;;  %p3177_p2 = scmp.lt.u32.totalorder %s716_s11, %s5058_s2 }
 0x392   :  { %p3175_p1 = scmp.ne.s32.totalorder %s716_s11, %s3174_s10  ;;  %p3178_p3 = scmp.lt.u32.totalorder %s4046_s25, %s3174_s10 }
 0x393   :  { %p3180_p5 = scmp.lt.u32.totalorder %s3174_s10, %s716_s11 }
 0x394   :  { %p3179_p4 = por %p3178_p3, %p3177_p2 }
 0x396   :  { %p3181_p6 = por %p3180_p5, %p3179_p4 }
 0x398   :  { %p3182_p7 = pnand %p3181_p6, %p3175_p1 }
 0x39a   :  { %3185 = shalt.err (!%p3182_p7)  }
 0x39b   :  { %s3186_s16 = scalar_lea.vmem %s4658_s0, 16  ;;  %p3191_p9 = scmp.lt.s32.totalorder %s4658_s0, %s4025_s8 }
 0x39c   :  { %p3187_p8 = scmp.ne.s32.totalorder %s4658_s0, %s3186_s16  ;;  %p3192_p10 = scmp.lt.s32.totalorder %s4055_s29, %s3186_s16 }
 0x39e   :  { %p3193_p11 = por %p3192_p10, %p3191_p9 }
 0x3a0   :  { %p3194_p12 = pnand %p3193_p11, %p3187_p8 }
 0x3a2   :  { %3197 = shalt.err (!%p3194_p12)  }
 0x3a3   :  { %729 = dma.hbm_to_vmem [thread:$0]  %s716_s11, 16, %s4658_s0, [#allocation3 + $0x28] }
 0x3a4   :  { %s3949_s19 = smov [#allocation2 + $0x29]   ;;  %s4686_s14 = sld [smem:[#allocation5 + $0x105]] }
 0x3a5   :  { %s743_s15 = sshll.u32 %s3949_s19, 4  ;;  %s3950_s20 = smov [#allocation2 + $0x2a]   ;;  %s744_s15 = int_to_ptr.vmem [resolvable:$true] %s743_s15 }
 0x3a6   :  { %s760_s21 = sshll.u32 %s3950_s20, 4  ;;  %s4688_s23 = sld [smem:[#allocation5 + $0x185]]  ;;  %s4691_s21 = int_to_ptr.vmem [resolvable:$true] %s760_s21 }
 0x3a7   :  { %s1987_s24 = sshll.u32 %s4671_s7, 4 }
 0x3a8   :  { %s733_s12 = scalar_lea.hbm %s5058_s2, %s1987_s24 }
 0x3a9   :  { %s3198_s27 = scalar_lea.hbm %s733_s12, 16  ;;  %p3201_p0 = scmp.lt.u32.totalorder %s733_s12, %s5058_s2 }
 0x3aa   :  { %p3199_p13 = scmp.ne.s32.totalorder %s733_s12, %s3198_s27  ;;  %p3202_p1 = scmp.lt.u32.totalorder %s4046_s25, %s3198_s27 }
 0x3ab   :  { %p3204_p3 = scmp.lt.u32.totalorder %s3198_s27, %s733_s12 }
 0x3ac   :  { %p3203_p2 = por %p3202_p1, %p3201_p0 }
 0x3ae   :  { %p3205_p4 = por %p3204_p3, %p3203_p2 }
 0x3b0   :  { %p3206_p5 = pnand %p3205_p4, %p3199_p13 }
 0x3b2   :  { %3209 = shalt.err (!%p3206_p5)  }
 0x3b3   :  { %s3210_s4 = scalar_lea.vmem %s744_s15, 16  ;;  %p3215_p7 = scmp.lt.s32.totalorder %s744_s15, %s4025_s8 }
 0x3b4   :  { %p3211_p6 = scmp.ne.s32.totalorder %s744_s15, %s3210_s4  ;;  %p3216_p8 = scmp.lt.s32.totalorder %s4055_s29, %s3210_s4 }
 0x3b6   :  { %p3217_p9 = por %p3216_p8, %p3215_p7 }
 0x3b8   :  { %p3218_p10 = pnand %p3217_p9, %p3211_p6 }
 0x3ba   :  { %3221 = shalt.err (!%p3218_p10)  }
 0x3bb   :  { %746 = dma.hbm_to_vmem [thread:$0]  %s733_s12, 16, %s744_s15, [#allocation3 + $0x29] }
 0x3bc   :  { %s1989_s17 = sshll.u32 %s4686_s14, 4  ;;  %s3951_s6 = smov [#allocation2 + $0x2b]  }
 0x3bd   :  { %s777_s13 = sshll.u32 %s3951_s6, 4  ;;  %s750_s5 = scalar_lea.hbm %s5058_s2, %s1989_s17  ;;  %s4706_s13 = int_to_ptr.vmem [resolvable:$true] %s777_s13 }
 0x3be   :  { %s3222_s1 = scalar_lea.hbm %s750_s5, 16  ;;  %p3225_p12 = scmp.lt.u32.totalorder %s750_s5, %s5058_s2 }
 0x3bf   :  { %p3223_p11 = scmp.ne.s32.totalorder %s750_s5, %s3222_s1  ;;  %p3226_p13 = scmp.lt.u32.totalorder %s4046_s25, %s3222_s1 }
 0x3c0   :  { %p3228_p1 = scmp.lt.u32.totalorder %s3222_s1, %s750_s5 }
 0x3c1   :  { %p3227_p0 = por %p3226_p13, %p3225_p12 }
 0x3c3   :  { %p3229_p2 = por %p3228_p1, %p3227_p0 }
 0x3c5   :  { %p3230_p3 = pnand %p3229_p2, %p3223_p11 }
 0x3c7   :  { %3233 = shalt.err (!%p3230_p3)  }
 0x3c8   :  { %s3234_s9 = scalar_lea.vmem %s4691_s21, 16  ;;  %p3239_p5 = scmp.lt.s32.totalorder %s4691_s21, %s4025_s8 }
 0x3c9   :  { %p3235_p4 = scmp.ne.s32.totalorder %s4691_s21, %s3234_s9  ;;  %p3240_p6 = scmp.lt.s32.totalorder %s4055_s29, %s3234_s9 }
 0x3cb   :  { %p3241_p7 = por %p3240_p6, %p3239_p5 }
 0x3cd   :  { %p3242_p8 = pnand %p3241_p7, %p3235_p4 }
 0x3cf   :  { %3245 = shalt.err (!%p3242_p8)  }
 0x3d0   :  { %763 = dma.hbm_to_vmem [thread:$0]  %s750_s5, 16, %s4691_s21, [#allocation3 + $0x2a] }
 0x3d1   :  { %s1991_s22 = sshll.u32 %s4688_s23, 4  ;;  %s4719_s16 = sld [smem:[#allocation5 + $0x205]] }
 0x3d2   :  { %s767_s14 = scalar_lea.hbm %s5058_s2, %s1991_s22 }
 0x3d3   :  { %s3246_s20 = scalar_lea.hbm %s767_s14, 16  ;;  %p3249_p10 = scmp.lt.u32.totalorder %s767_s14, %s5058_s2 }
 0x3d4   :  { %p3247_p9 = scmp.ne.s32.totalorder %s767_s14, %s3246_s20  ;;  %p3250_p11 = scmp.lt.u32.totalorder %s4046_s25, %s3246_s20 }
 0x3d5   :  { %p3252_p13 = scmp.lt.u32.totalorder %s3246_s20, %s767_s14 }
 0x3d6   :  { %p3251_p12 = por %p3250_p11, %p3249_p10 }
 0x3d8   :  { %p3253_p0 = por %p3252_p13, %p3251_p12 }
 0x3da   :  { %p3254_p1 = pnand %p3253_p0, %p3247_p9 }
 0x3dc   :  { %3257 = shalt.err (!%p3254_p1)  }
 0x3dd   :  { %s3258_s21 = scalar_lea.vmem %s4706_s13, 16  ;;  %p3263_p3 = scmp.lt.s32.totalorder %s4706_s13, %s4025_s8 }
 0x3de   :  { %p3259_p2 = scmp.ne.s32.totalorder %s4706_s13, %s3258_s21  ;;  %p3264_p4 = scmp.lt.s32.totalorder %s4055_s29, %s3258_s21 }
 0x3e0   :  { %p3265_p5 = por %p3264_p4, %p3263_p3 }
 0x3e2   :  { %p3266_p6 = pnand %p3265_p5, %p3259_p2 }
 0x3e4   :  { %3269 = shalt.err (!%p3266_p6)  }
 0x3e5   :  { %780 = dma.hbm_to_vmem [thread:$0]  %s767_s14, 16, %s4706_s13, [#allocation3 + $0x2b] }
 0x3e6   :  { %s3952_s23 = smov [#allocation2 + $0x2c]   ;;  %s4734_s12 = sld [smem:[#allocation5 + $0x285]] }
 0x3e7   :  { %s794_s26 = sshll.u32 %s3952_s23, 4  ;;  %s3953_s27 = smov [#allocation2 + $0x2d]   ;;  %s795_s26 = int_to_ptr.vmem [resolvable:$true] %s794_s26 }
 0x3e8   :  { %s811_s28 = sshll.u32 %s3953_s27, 4  ;;  %s4736_s0 = sld [smem:[#allocation5 + $0x305]]  ;;  %s4739_s28 = int_to_ptr.vmem [resolvable:$true] %s811_s28 }
 0x3e9   :  { %s1993_s4 = sshll.u32 %s4719_s16, 4 }
 0x3ea   :  { %s784_s18 = scalar_lea.hbm %s5058_s2, %s1993_s4 }
 0x3eb   :  { %s3270_s7 = scalar_lea.hbm %s784_s18, 16  ;;  %p3273_p8 = scmp.lt.u32.totalorder %s784_s18, %s5058_s2 }
 0x3ec   :  { %p3271_p7 = scmp.ne.s32.totalorder %s784_s18, %s3270_s7  ;;  %p3274_p9 = scmp.lt.u32.totalorder %s4046_s25, %s3270_s7 }
 0x3ed   :  { %p3276_p11 = scmp.lt.u32.totalorder %s3270_s7, %s784_s18 }
 0x3ee   :  { %p3275_p10 = por %p3274_p9, %p3273_p8 }
 0x3f0   :  { %p3277_p12 = por %p3276_p11, %p3275_p10 }
 0x3f2   :  { %p3278_p13 = pnand %p3277_p12, %p3271_p7 }
 0x3f4   :  { %3281 = shalt.err (!%p3278_p13)  }
 0x3f5   :  { %s3282_s1 = scalar_lea.vmem %s795_s26, 16  ;;  %p3287_p1 = scmp.lt.s32.totalorder %s795_s26, %s4025_s8 }
 0x3f6   :  { %p3283_p0 = scmp.ne.s32.totalorder %s795_s26, %s3282_s1  ;;  %p3288_p2 = scmp.lt.s32.totalorder %s4055_s29, %s3282_s1 }
 0x3f8   :  { %p3289_p3 = por %p3288_p2, %p3287_p1 }
 0x3fa   :  { %p3290_p4 = pnand %p3289_p3, %p3283_p0 }
 0x3fc   :  { %3293 = shalt.err (!%p3290_p4)  }
 0x3fd   :  { %797 = dma.hbm_to_vmem [thread:$0]  %s784_s18, 16, %s795_s26, [#allocation3 + $0x2c] }
 0x3fe   :  { %s1995_s11 = sshll.u32 %s4734_s12, 4  ;;  %s3954_s10 = smov [#allocation2 + $0x2e]  }
 0x3ff   :  { %s828_s9 = sshll.u32 %s3954_s10, 4  ;;  %s801_s19 = scalar_lea.hbm %s5058_s2, %s1995_s11  ;;  %s4754_s9 = int_to_ptr.vmem [resolvable:$true] %s828_s9 }
 0x400   :  { %s3294_s15 = scalar_lea.hbm %s801_s19, 16  ;;  %p3297_p6 = scmp.lt.u32.totalorder %s801_s19, %s5058_s2 }
 0x401   :  { %p3295_p5 = scmp.ne.s32.totalorder %s801_s19, %s3294_s15  ;;  %p3298_p7 = scmp.lt.u32.totalorder %s4046_s25, %s3294_s15 }
 0x402   :  { %p3300_p9 = scmp.lt.u32.totalorder %s3294_s15, %s801_s19 }
 0x403   :  { %p3299_p8 = por %p3298_p7, %p3297_p6 }
 0x405   :  { %p3301_p10 = por %p3300_p9, %p3299_p8 }
 0x407   :  { %p3302_p11 = pnand %p3301_p10, %p3295_p5 }
 0x409   :  { %3305 = shalt.err (!%p3302_p11)  }
 0x40a   :  { %s3306_s24 = scalar_lea.vmem %s4739_s28, 16  ;;  %p3311_p13 = scmp.lt.s32.totalorder %s4739_s28, %s4025_s8 }
 0x40b   :  { %p3307_p12 = scmp.ne.s32.totalorder %s4739_s28, %s3306_s24  ;;  %p3312_p0 = scmp.lt.s32.totalorder %s4055_s29, %s3306_s24 }
 0x40d   :  { %p3313_p1 = por %p3312_p0, %p3311_p13 }
 0x40f   :  { %p3314_p2 = pnand %p3313_p1, %p3307_p12 }
 0x411   :  { %3317 = shalt.err (!%p3314_p2)  }
 0x412   :  { %814 = dma.hbm_to_vmem [thread:$0]  %s801_s19, 16, %s4739_s28, [#allocation3 + $0x2d] }
 0x413   :  { %s1997_s30 = sshll.u32 %s4736_s0, 4  ;;  %s4767_s21 = sld [smem:[#allocation5 + $0x385]] }
 0x414   :  { %s818_s12 = scalar_lea.hbm %s5058_s2, %s1997_s30 }
 0x415   :  { %s3318_s27 = scalar_lea.hbm %s818_s12, 16  ;;  %p3321_p4 = scmp.lt.u32.totalorder %s818_s12, %s5058_s2 }
 0x416   :  { %p3319_p3 = scmp.ne.s32.totalorder %s818_s12, %s3318_s27  ;;  %p3322_p5 = scmp.lt.u32.totalorder %s4046_s25, %s3318_s27 }
 0x417   :  { %p3324_p7 = scmp.lt.u32.totalorder %s3318_s27, %s818_s12 }
 0x418   :  { %p3323_p6 = por %p3322_p5, %p3321_p4 }
 0x41a   :  { %p3325_p8 = por %p3324_p7, %p3323_p6 }
 0x41c   :  { %p3326_p9 = pnand %p3325_p8, %p3319_p3 }
 0x41e   :  { %3329 = shalt.err (!%p3326_p9)  }
 0x41f   :  { %s3330_s28 = scalar_lea.vmem %s4754_s9, 16  ;;  %p3335_p11 = scmp.lt.s32.totalorder %s4754_s9, %s4025_s8 }
 0x420   :  { %p3331_p10 = scmp.ne.s32.totalorder %s4754_s9, %s3330_s28  ;;  %p3336_p12 = scmp.lt.s32.totalorder %s4055_s29, %s3330_s28 }
 0x422   :  { %p3337_p13 = por %p3336_p12, %p3335_p11 }
 0x424   :  { %p3338_p0 = pnand %p3337_p13, %p3331_p10 }
 0x426   :  { %3341 = shalt.err (!%p3338_p0)  }
 0x427   :  { %831 = dma.hbm_to_vmem [thread:$0]  %s818_s12, 16, %s4754_s9, [#allocation3 + $0x2e] }
 0x428   :  { %s3955_s0 = smov [#allocation2 + $0x2f]   ;;  %s4782_s18 = sld [smem:[#allocation5 + $0x6]] }
 0x429   :  { %s845_s6 = sshll.u32 %s3955_s0, 4  ;;  %s3956_s7 = smov [#allocation2 + $0x30]   ;;  %s846_s6 = int_to_ptr.vmem [resolvable:$true] %s845_s6 }
 0x42a   :  { %s862_s5 = sshll.u32 %s3956_s7, 4  ;;  %s4784_s13 = sld [smem:[#allocation5 + $0x86]]  ;;  %s4787_s5 = int_to_ptr.vmem [resolvable:$true] %s862_s5 }
 0x42b   :  { %s1999_s1 = sshll.u32 %s4767_s21, 4 }
 0x42c   :  { %s835_s22 = scalar_lea.hbm %s5058_s2, %s1999_s1 }
 0x42d   :  { %s3342_s16 = scalar_lea.hbm %s835_s22, 16  ;;  %p3345_p2 = scmp.lt.u32.totalorder %s835_s22, %s5058_s2 }
 0x42e   :  { %p3343_p1 = scmp.ne.s32.totalorder %s835_s22, %s3342_s16  ;;  %p3346_p3 = scmp.lt.u32.totalorder %s4046_s25, %s3342_s16 }
 0x42f   :  { %p3348_p5 = scmp.lt.u32.totalorder %s3342_s16, %s835_s22 }
 0x430   :  { %p3347_p4 = por %p3346_p3, %p3345_p2 }
 0x432   :  { %p3349_p6 = por %p3348_p5, %p3347_p4 }
 0x434   :  { %p3350_p7 = pnand %p3349_p6, %p3343_p1 }
 0x436   :  { %3353 = shalt.err (!%p3350_p7)  }
 0x437   :  { %s3354_s15 = scalar_lea.vmem %s846_s6, 16  ;;  %p3359_p9 = scmp.lt.s32.totalorder %s846_s6, %s4025_s8 }
 0x438   :  { %p3355_p8 = scmp.ne.s32.totalorder %s846_s6, %s3354_s15  ;;  %p3360_p10 = scmp.lt.s32.totalorder %s4055_s29, %s3354_s15 }
 0x43a   :  { %p3361_p11 = por %p3360_p10, %p3359_p9 }
 0x43c   :  { %p3362_p12 = pnand %p3361_p11, %p3355_p8 }
 0x43e   :  { %3365 = shalt.err (!%p3362_p12)  }
 0x43f   :  { %848 = dma.hbm_to_vmem [thread:$0]  %s835_s22, 16, %s846_s6, [#allocation3 + $0x2f] }
 0x440   :  { %s2001_s14 = sshll.u32 %s4782_s18, 4  ;;  %s3957_s20 = smov [#allocation2 + $0x31]  }
 0x441   :  { %s879_s24 = sshll.u32 %s3957_s20, 4  ;;  %s852_s23 = scalar_lea.hbm %s5058_s2, %s2001_s14  ;;  %s4802_s24 = int_to_ptr.vmem [resolvable:$true] %s879_s24 }
 0x442   :  { %s3366_s26 = scalar_lea.hbm %s852_s23, 16  ;;  %p3369_p0 = scmp.lt.u32.totalorder %s852_s23, %s5058_s2 }
 0x443   :  { %p3367_p13 = scmp.ne.s32.totalorder %s852_s23, %s3366_s26  ;;  %p3370_p1 = scmp.lt.u32.totalorder %s4046_s25, %s3366_s26 }
 0x444   :  { %p3372_p3 = scmp.lt.u32.totalorder %s3366_s26, %s852_s23 }
 0x445   :  { %p3371_p2 = por %p3370_p1, %p3369_p0 }
 0x447   :  { %p3373_p4 = por %p3372_p3, %p3371_p2 }
 0x449   :  { %p3374_p5 = pnand %p3373_p4, %p3367_p13 }
 0x44b   :  { %3377 = shalt.err (!%p3374_p5)  }
 0x44c   :  { %s3378_s4 = scalar_lea.vmem %s4787_s5, 16  ;;  %p3383_p7 = scmp.lt.s32.totalorder %s4787_s5, %s4025_s8 }
 0x44d   :  { %p3379_p6 = scmp.ne.s32.totalorder %s4787_s5, %s3378_s4  ;;  %p3384_p8 = scmp.lt.s32.totalorder %s4055_s29, %s3378_s4 }
 0x44f   :  { %p3385_p9 = por %p3384_p8, %p3383_p7 }
 0x451   :  { %p3386_p10 = pnand %p3385_p9, %p3379_p6 }
 0x453   :  { %3389 = shalt.err (!%p3386_p10)  }
 0x454   :  { %865 = dma.hbm_to_vmem [thread:$0]  %s852_s23, 16, %s4787_s5, [#allocation3 + $0x30] }
 0x455   :  { %s2003_s17 = sshll.u32 %s4784_s13, 4  ;;  %s4815_s28 = sld [smem:[#allocation5 + $0x106]] }
 0x456   :  { %s869_s18 = scalar_lea.hbm %s5058_s2, %s2003_s17 }
 0x457   :  { %s3390_s7 = scalar_lea.hbm %s869_s18, 16  ;;  %p3393_p12 = scmp.lt.u32.totalorder %s869_s18, %s5058_s2 }
 0x458   :  { %p3391_p11 = scmp.ne.s32.totalorder %s869_s18, %s3390_s7  ;;  %p3394_p13 = scmp.lt.u32.totalorder %s4046_s25, %s3390_s7 }
 0x459   :  { %p3396_p1 = scmp.lt.u32.totalorder %s3390_s7, %s869_s18 }
 0x45a   :  { %p3395_p0 = por %p3394_p13, %p3393_p12 }
 0x45c   :  { %p3397_p2 = por %p3396_p1, %p3395_p0 }
 0x45e   :  { %p3398_p3 = pnand %p3397_p2, %p3391_p11 }
 0x460   :  { %3401 = shalt.err (!%p3398_p3)  }
 0x461   :  { %s3402_s5 = scalar_lea.vmem %s4802_s24, 16  ;;  %p3407_p5 = scmp.lt.s32.totalorder %s4802_s24, %s4025_s8 }
 0x462   :  { %p3403_p4 = scmp.ne.s32.totalorder %s4802_s24, %s3402_s5  ;;  %p3408_p6 = scmp.lt.s32.totalorder %s4055_s29, %s3402_s5 }
 0x464   :  { %p3409_p7 = por %p3408_p6, %p3407_p5 }
 0x466   :  { %p3410_p8 = pnand %p3409_p7, %p3403_p4 }
 0x468   :  { %3413 = shalt.err (!%p3410_p8)  }
 0x469   :  { %882 = dma.hbm_to_vmem [thread:$0]  %s869_s18, 16, %s4802_s24, [#allocation3 + $0x31] }
 0x46a   :  { %s3958_s13 = smov [#allocation2 + $0x32]   ;;  %s4830_s22 = sld [smem:[#allocation5 + $0x186]] }
 0x46b   :  { %s896_s10 = sshll.u32 %s3958_s13, 4  ;;  %s3959_s16 = smov [#allocation2 + $0x33]   ;;  %s897_s10 = int_to_ptr.vmem [resolvable:$true] %s896_s10 }
 0x46c   :  { %s913_s19 = sshll.u32 %s3959_s16, 4  ;;  %s4832_s9 = sld [smem:[#allocation5 + $0x206]]  ;;  %s4835_s19 = int_to_ptr.vmem [resolvable:$true] %s913_s19 }
 0x46d   :  { %s2005_s15 = sshll.u32 %s4815_s28, 4 }
 0x46e   :  { %s886_s30 = scalar_lea.hbm %s5058_s2, %s2005_s15 }
 0x46f   :  { %s3414_s21 = scalar_lea.hbm %s886_s30, 16  ;;  %p3417_p10 = scmp.lt.u32.totalorder %s886_s30, %s5058_s2 }
 0x470   :  { %p3415_p9 = scmp.ne.s32.totalorder %s886_s30, %s3414_s21  ;;  %p3418_p11 = scmp.lt.u32.totalorder %s4046_s25, %s3414_s21 }
 0x471   :  { %p3420_p13 = scmp.lt.u32.totalorder %s3414_s21, %s886_s30 }
 0x472   :  { %p3419_p12 = por %p3418_p11, %p3417_p10 }
 0x474   :  { %p3421_p0 = por %p3420_p13, %p3419_p12 }
 0x476   :  { %p3422_p1 = pnand %p3421_p0, %p3415_p9 }
 0x478   :  { %3425 = shalt.err (!%p3422_p1)  }
 0x479   :  { %s3426_s26 = scalar_lea.vmem %s897_s10, 16  ;;  %p3431_p3 = scmp.lt.s32.totalorder %s897_s10, %s4025_s8 }
 0x47a   :  { %p3427_p2 = scmp.ne.s32.totalorder %s897_s10, %s3426_s26  ;;  %p3432_p4 = scmp.lt.s32.totalorder %s4055_s29, %s3426_s26 }
 0x47c   :  { %p3433_p5 = por %p3432_p4, %p3431_p3 }
 0x47e   :  { %p3434_p6 = pnand %p3433_p5, %p3427_p2 }
 0x480   :  { %3437 = shalt.err (!%p3434_p6)  }
 0x481   :  { %899 = dma.hbm_to_vmem [thread:$0]  %s886_s30, 16, %s897_s10, [#allocation3 + $0x32] }
 0x482   :  { %s2007_s12 = sshll.u32 %s4830_s22, 4  ;;  %s3960_s27 = smov [#allocation2 + $0x34]  }
 0x483   :  { %s930_s4 = sshll.u32 %s3960_s27, 4  ;;  %s903_s0 = scalar_lea.hbm %s5058_s2, %s2007_s12  ;;  %s4850_s4 = int_to_ptr.vmem [resolvable:$true] %s930_s4 }
 0x484   :  { %s3438_s6 = scalar_lea.hbm %s903_s0, 16  ;;  %p3441_p8 = scmp.lt.u32.totalorder %s903_s0, %s5058_s2 }
 0x485   :  { %p3439_p7 = scmp.ne.s32.totalorder %s903_s0, %s3438_s6  ;;  %p3442_p9 = scmp.lt.u32.totalorder %s4046_s25, %s3438_s6 }
 0x486   :  { %p3444_p11 = scmp.lt.u32.totalorder %s3438_s6, %s903_s0 }
 0x487   :  { %p3443_p10 = por %p3442_p9, %p3441_p8 }
 0x489   :  { %p3445_p12 = por %p3444_p11, %p3443_p10 }
 0x48b   :  { %p3446_p13 = pnand %p3445_p12, %p3439_p7 }
 0x48d   :  { %3449 = shalt.err (!%p3446_p13)  }
 0x48e   :  { %s3450_s1 = scalar_lea.vmem %s4835_s19, 16  ;;  %p3455_p1 = scmp.lt.s32.totalorder %s4835_s19, %s4025_s8 }
 0x48f   :  { %p3451_p0 = scmp.ne.s32.totalorder %s4835_s19, %s3450_s1  ;;  %p3456_p2 = scmp.lt.s32.totalorder %s4055_s29, %s3450_s1 }
 0x491   :  { %p3457_p3 = por %p3456_p2, %p3455_p1 }
 0x493   :  { %p3458_p4 = pnand %p3457_p3, %p3451_p0 }
 0x495   :  { %3461 = shalt.err (!%p3458_p4)  }
 0x496   :  { %916 = dma.hbm_to_vmem [thread:$0]  %s903_s0, 16, %s4835_s19, [#allocation3 + $0x33] }
 0x497   :  { %s2009_s11 = sshll.u32 %s4832_s9, 4  ;;  %s4863_s5 = sld [smem:[#allocation5 + $0x286]] }
 0x498   :  { %s920_s22 = scalar_lea.hbm %s5058_s2, %s2009_s11 }
 0x499   :  { %s3462_s16 = scalar_lea.hbm %s920_s22, 16  ;;  %p3465_p6 = scmp.lt.u32.totalorder %s920_s22, %s5058_s2 }
 0x49a   :  { %p3463_p5 = scmp.ne.s32.totalorder %s920_s22, %s3462_s16  ;;  %p3466_p7 = scmp.lt.u32.totalorder %s4046_s25, %s3462_s16 }
 0x49b   :  { %p3468_p9 = scmp.lt.u32.totalorder %s3462_s16, %s920_s22 }
 0x49c   :  { %p3467_p8 = por %p3466_p7, %p3465_p6 }
 0x49e   :  { %p3469_p10 = por %p3468_p9, %p3467_p8 }
 0x4a0   :  { %p3470_p11 = pnand %p3469_p10, %p3463_p5 }
 0x4a2   :  { %3473 = shalt.err (!%p3470_p11)  }
 0x4a3   :  { %s3474_s19 = scalar_lea.vmem %s4850_s4, 16  ;;  %p3479_p13 = scmp.lt.s32.totalorder %s4850_s4, %s4025_s8 }
 0x4a4   :  { %p3475_p12 = scmp.ne.s32.totalorder %s4850_s4, %s3474_s19  ;;  %p3480_p0 = scmp.lt.s32.totalorder %s4055_s29, %s3474_s19 }
 0x4a6   :  { %p3481_p1 = por %p3480_p0, %p3479_p13 }
 0x4a8   :  { %p3482_p2 = pnand %p3481_p1, %p3475_p12 }
 0x4aa   :  { %3485 = shalt.err (!%p3482_p2)  }
 0x4ab   :  { %933 = dma.hbm_to_vmem [thread:$0]  %s920_s22, 16, %s4850_s4, [#allocation3 + $0x34] }
 0x4ac   :  { %s3961_s9 = smov [#allocation2 + $0x35]   ;;  %s4878_s30 = sld [smem:[#allocation5 + $0x306]] }
 0x4ad   :  { %s947_s20 = sshll.u32 %s3961_s9, 4  ;;  %s3962_s21 = smov [#allocation2 + $0x36]   ;;  %s948_s20 = int_to_ptr.vmem [resolvable:$true] %s947_s20 }
 0x4ae   :  { %s964_s23 = sshll.u32 %s3962_s21, 4  ;;  %s4880_s24 = sld [smem:[#allocation5 + $0x386]]  ;;  %s4883_s23 = int_to_ptr.vmem [resolvable:$true] %s964_s23 }
 0x4af   :  { %s2011_s26 = sshll.u32 %s4863_s5, 4 }
 0x4b0   :  { %s937_s17 = scalar_lea.hbm %s5058_s2, %s2011_s26 }
 0x4b1   :  { %s3486_s28 = scalar_lea.hbm %s937_s17, 16  ;;  %p3489_p4 = scmp.lt.u32.totalorder %s937_s17, %s5058_s2 }
 0x4b2   :  { %p3487_p3 = scmp.ne.s32.totalorder %s937_s17, %s3486_s28  ;;  %p3490_p5 = scmp.lt.u32.totalorder %s4046_s25, %s3486_s28 }
 0x4b3   :  { %p3492_p7 = scmp.lt.u32.totalorder %s3486_s28, %s937_s17 }
 0x4b4   :  { %p3491_p6 = por %p3490_p5, %p3489_p4 }
 0x4b6   :  { %p3493_p8 = por %p3492_p7, %p3491_p6 }
 0x4b8   :  { %p3494_p9 = pnand %p3493_p8, %p3487_p3 }
 0x4ba   :  { %3497 = shalt.err (!%p3494_p9)  }
 0x4bb   :  { %s3498_s6 = scalar_lea.vmem %s948_s20, 16  ;;  %p3503_p11 = scmp.lt.s32.totalorder %s948_s20, %s4025_s8 }
 0x4bc   :  { %p3499_p10 = scmp.ne.s32.totalorder %s948_s20, %s3498_s6  ;;  %p3504_p12 = scmp.lt.s32.totalorder %s4055_s29, %s3498_s6 }
 0x4be   :  { %p3505_p13 = por %p3504_p12, %p3503_p11 }
 0x4c0   :  { %p3506_p0 = pnand %p3505_p13, %p3499_p10 }
 0x4c2   :  { %3509 = shalt.err (!%p3506_p0)  }
 0x4c3   :  { %950 = dma.hbm_to_vmem [thread:$0]  %s937_s17, 16, %s948_s20, [#allocation3 + $0x35] }
 0x4c4   :  { %s2013_s18 = sshll.u32 %s4878_s30, 4  ;;  %s3963_s7 = smov [#allocation2 + $0x37]  }
 0x4c5   :  { %s981_s1 = sshll.u32 %s3963_s7, 4  ;;  %s954_s13 = scalar_lea.hbm %s5058_s2, %s2013_s18  ;;  %s4898_s1 = int_to_ptr.vmem [resolvable:$true] %s981_s1 }
 0x4c6   :  { %s3510_s10 = scalar_lea.hbm %s954_s13, 16  ;;  %p3513_p2 = scmp.lt.u32.totalorder %s954_s13, %s5058_s2 }
 0x4c7   :  { %p3511_p1 = scmp.ne.s32.totalorder %s954_s13, %s3510_s10  ;;  %p3514_p3 = scmp.lt.u32.totalorder %s4046_s25, %s3510_s10 }
 0x4c8   :  { %p3516_p5 = scmp.lt.u32.totalorder %s3510_s10, %s954_s13 }
 0x4c9   :  { %p3515_p4 = por %p3514_p3, %p3513_p2 }
 0x4cb   :  { %p3517_p6 = por %p3516_p5, %p3515_p4 }
 0x4cd   :  { %p3518_p7 = pnand %p3517_p6, %p3511_p1 }
 0x4cf   :  { %3521 = shalt.err (!%p3518_p7)  }
 0x4d0   :  { %s3522_s15 = scalar_lea.vmem %s4883_s23, 16  ;;  %p3527_p9 = scmp.lt.s32.totalorder %s4883_s23, %s4025_s8 }
 0x4d1   :  { %p3523_p8 = scmp.ne.s32.totalorder %s4883_s23, %s3522_s15  ;;  %p3528_p10 = scmp.lt.s32.totalorder %s4055_s29, %s3522_s15 }
 0x4d3   :  { %p3529_p11 = por %p3528_p10, %p3527_p9 }
 0x4d5   :  { %p3530_p12 = pnand %p3529_p11, %p3523_p8 }
 0x4d7   :  { %3533 = shalt.err (!%p3530_p12)  }
 0x4d8   :  { %967 = dma.hbm_to_vmem [thread:$0]  %s954_s13, 16, %s4883_s23, [#allocation3 + $0x36] }
 0x4d9   :  { %s2015_s14 = sshll.u32 %s4880_s24, 4  ;;  %s4911_s19 = sld [smem:[#allocation5 + $0x7]] }
 0x4da   :  { %s971_s30 = scalar_lea.hbm %s5058_s2, %s2015_s14 }
 0x4db   :  { %s3534_s21 = scalar_lea.hbm %s971_s30, 16  ;;  %p3537_p0 = scmp.lt.u32.totalorder %s971_s30, %s5058_s2 }
 0x4dc   :  { %p3535_p13 = scmp.ne.s32.totalorder %s971_s30, %s3534_s21  ;;  %p3538_p1 = scmp.lt.u32.totalorder %s4046_s25, %s3534_s21 }
 0x4dd   :  { %p3540_p3 = scmp.lt.u32.totalorder %s3534_s21, %s971_s30 }
 0x4de   :  { %p3539_p2 = por %p3538_p1, %p3537_p0 }
 0x4e0   :  { %p3541_p4 = por %p3540_p3, %p3539_p2 }
 0x4e2   :  { %p3542_p5 = pnand %p3541_p4, %p3535_p13 }
 0x4e4   :  { %3545 = shalt.err (!%p3542_p5)  }
 0x4e5   :  { %s3546_s23 = scalar_lea.vmem %s4898_s1, 16  ;;  %p3551_p7 = scmp.lt.s32.totalorder %s4898_s1, %s4025_s8 }
 0x4e6   :  { %p3547_p6 = scmp.ne.s32.totalorder %s4898_s1, %s3546_s23  ;;  %p3552_p8 = scmp.lt.s32.totalorder %s4055_s29, %s3546_s23 }
 0x4e8   :  { %p3553_p9 = por %p3552_p8, %p3551_p7 }
 0x4ea   :  { %p3554_p10 = pnand %p3553_p9, %p3547_p6 }
 0x4ec   :  { %3557 = shalt.err (!%p3554_p10)  }
 0x4ed   :  { %984 = dma.hbm_to_vmem [thread:$0]  %s971_s30, 16, %s4898_s1, [#allocation3 + $0x37] }
 0x4ee   :  { %s3964_s24 = smov [#allocation2 + $0x38]   ;;  %s4926_s17 = sld [smem:[#allocation5 + $0x87]] }
 0x4ef   :  { %s998_s27 = sshll.u32 %s3964_s24, 4  ;;  %s3965_s28 = smov [#allocation2 + $0x39]   ;;  %s999_s27 = int_to_ptr.vmem [resolvable:$true] %s998_s27 }
 0x4f0   :  { %s1015_s0 = sshll.u32 %s3965_s28, 4  ;;  %s4928_s4 = sld [smem:[#allocation5 + $0x107]]  ;;  %s4931_s0 = int_to_ptr.vmem [resolvable:$true] %s1015_s0 }
 0x4f1   :  { %s2017_s6 = sshll.u32 %s4911_s19, 4 }
 0x4f2   :  { %s988_s11 = scalar_lea.hbm %s5058_s2, %s2017_s6 }
 0x4f3   :  { %s3558_s5 = scalar_lea.hbm %s988_s11, 16  ;;  %p3561_p12 = scmp.lt.u32.totalorder %s988_s11, %s5058_s2 }
 0x4f4   :  { %p3559_p11 = scmp.ne.s32.totalorder %s988_s11, %s3558_s5  ;;  %p3562_p13 = scmp.lt.u32.totalorder %s4046_s25, %s3558_s5 }
 0x4f5   :  { %p3564_p1 = scmp.lt.u32.totalorder %s3558_s5, %s988_s11 }
 0x4f6   :  { %p3563_p0 = por %p3562_p13, %p3561_p12 }
 0x4f8   :  { %p3565_p2 = por %p3564_p1, %p3563_p0 }
 0x4fa   :  { %p3566_p3 = pnand %p3565_p2, %p3559_p11 }
 0x4fc   :  { %3569 = shalt.err (!%p3566_p3)  }
 0x4fd   :  { %s3570_s10 = scalar_lea.vmem %s999_s27, 16  ;;  %p3575_p5 = scmp.lt.s32.totalorder %s999_s27, %s4025_s8 }
 0x4fe   :  { %p3571_p4 = scmp.ne.s32.totalorder %s999_s27, %s3570_s10  ;;  %p3576_p6 = scmp.lt.s32.totalorder %s4055_s29, %s3570_s10 }
 0x500   :  { %p3577_p7 = por %p3576_p6, %p3575_p5 }
 0x502   :  { %p3578_p8 = pnand %p3577_p7, %p3571_p4 }
 0x504   :  { %3581 = shalt.err (!%p3578_p8)  }
 0x505   :  { %1001 = dma.hbm_to_vmem [thread:$0]  %s988_s11, 16, %s999_s27, [#allocation3 + $0x38] }
 0x506   :  { %s2019_s22 = sshll.u32 %s4926_s17, 4  ;;  %s3966_s16 = smov [#allocation2 + $0x3a]  }
 0x507   :  { %s1032_s15 = sshll.u32 %s3966_s16, 4  ;;  %s1005_s9 = scalar_lea.hbm %s5058_s2, %s2019_s22  ;;  %s4946_s15 = int_to_ptr.vmem [resolvable:$true] %s1032_s15 }
 0x508   :  { %s3582_s20 = scalar_lea.hbm %s1005_s9, 16  ;;  %p3585_p10 = scmp.lt.u32.totalorder %s1005_s9, %s5058_s2 }
 0x509   :  { %p3583_p9 = scmp.ne.s32.totalorder %s1005_s9, %s3582_s20  ;;  %p3586_p11 = scmp.lt.u32.totalorder %s4046_s25, %s3582_s20 }
 0x50a   :  { %p3588_p13 = scmp.lt.u32.totalorder %s3582_s20, %s1005_s9 }
 0x50b   :  { %p3587_p12 = por %p3586_p11, %p3585_p10 }
 0x50d   :  { %p3589_p0 = por %p3588_p13, %p3587_p12 }
 0x50f   :  { %p3590_p1 = pnand %p3589_p0, %p3583_p9 }
 0x511   :  { %3593 = shalt.err (!%p3590_p1)  }
 0x512   :  { %s3594_s26 = scalar_lea.vmem %s4931_s0, 16  ;;  %p3599_p3 = scmp.lt.s32.totalorder %s4931_s0, %s4025_s8 }
 0x513   :  { %p3595_p2 = scmp.ne.s32.totalorder %s4931_s0, %s3594_s26  ;;  %p3600_p4 = scmp.lt.s32.totalorder %s4055_s29, %s3594_s26 }
 0x515   :  { %p3601_p5 = por %p3600_p4, %p3599_p3 }
 0x517   :  { %p3602_p6 = pnand %p3601_p5, %p3595_p2 }
 0x519   :  { %3605 = shalt.err (!%p3602_p6)  }
 0x51a   :  { %1018 = dma.hbm_to_vmem [thread:$0]  %s1005_s9, 16, %s4931_s0, [#allocation3 + $0x39] }
 0x51b   :  { %s2021_s12 = sshll.u32 %s4928_s4, 4  ;;  %s4959_s23 = sld [smem:[#allocation5 + $0x187]] }
 0x51c   :  { %s1022_s17 = scalar_lea.hbm %s5058_s2, %s2021_s12 }
 0x51d   :  { %s3606_s28 = scalar_lea.hbm %s1022_s17, 16  ;;  %p3609_p8 = scmp.lt.u32.totalorder %s1022_s17, %s5058_s2 }
 0x51e   :  { %p3607_p7 = scmp.ne.s32.totalorder %s1022_s17, %s3606_s28  ;;  %p3610_p9 = scmp.lt.u32.totalorder %s4046_s25, %s3606_s28 }
 0x51f   :  { %p3612_p11 = scmp.lt.u32.totalorder %s3606_s28, %s1022_s17 }
 0x520   :  { %p3611_p10 = por %p3610_p9, %p3609_p8 }
 0x522   :  { %p3613_p12 = por %p3612_p11, %p3611_p10 }
 0x524   :  { %p3614_p13 = pnand %p3613_p12, %p3607_p7 }
 0x526   :  { %3617 = shalt.err (!%p3614_p13)  }
 0x527   :  { %s3618_s0 = scalar_lea.vmem %s4946_s15, 16  ;;  %p3623_p1 = scmp.lt.s32.totalorder %s4946_s15, %s4025_s8 }
 0x528   :  { %p3619_p0 = scmp.ne.s32.totalorder %s4946_s15, %s3618_s0  ;;  %p3624_p2 = scmp.lt.s32.totalorder %s4055_s29, %s3618_s0 }
 0x52a   :  { %p3625_p3 = por %p3624_p2, %p3623_p1 }
 0x52c   :  { %p3626_p4 = pnand %p3625_p3, %p3619_p0 }
 0x52e   :  { %3629 = shalt.err (!%p3626_p4)  }
 0x52f   :  { %1035 = dma.hbm_to_vmem [thread:$0]  %s1022_s17, 16, %s4946_s15, [#allocation3 + $0x3a] }
 0x530   :  { %s3967_s4 = smov [#allocation2 + $0x3b]   ;;  %s4974_s11 = sld [smem:[#allocation5 + $0x207]] }
 0x531   :  { %s1049_s7 = sshll.u32 %s3967_s4, 4  ;;  %s3968_s5 = smov [#allocation2 + $0x3c]   ;;  %s1050_s7 = int_to_ptr.vmem [resolvable:$true] %s1049_s7 }
 0x532   :  { %s1066_s13 = sshll.u32 %s3968_s5, 4  ;;  %s4976_s1 = sld [smem:[#allocation5 + $0x287]]  ;;  %s4979_s13 = int_to_ptr.vmem [resolvable:$true] %s1066_s13 }
 0x533   :  { %s2023_s10 = sshll.u32 %s4959_s23, 4 }
 0x534   :  { %s1039_s14 = scalar_lea.hbm %s5058_s2, %s2023_s10 }
 0x535   :  { %s3630_s19 = scalar_lea.hbm %s1039_s14, 16  ;;  %p3633_p6 = scmp.lt.u32.totalorder %s1039_s14, %s5058_s2 }
 0x536   :  { %p3631_p5 = scmp.ne.s32.totalorder %s1039_s14, %s3630_s19  ;;  %p3634_p7 = scmp.lt.u32.totalorder %s4046_s25, %s3630_s19 }
 0x537   :  { %p3636_p9 = scmp.lt.u32.totalorder %s3630_s19, %s1039_s14 }
 0x538   :  { %p3635_p8 = por %p3634_p7, %p3633_p6 }
 0x53a   :  { %p3637_p10 = por %p3636_p9, %p3635_p8 }
 0x53c   :  { %p3638_p11 = pnand %p3637_p10, %p3631_p5 }
 0x53e   :  { %3641 = shalt.err (!%p3638_p11)  }
 0x53f   :  { %s3642_s20 = scalar_lea.vmem %s1050_s7, 16  ;;  %p3647_p13 = scmp.lt.s32.totalorder %s1050_s7, %s4025_s8 }
 0x540   :  { %p3643_p12 = scmp.ne.s32.totalorder %s1050_s7, %s3642_s20  ;;  %p3648_p0 = scmp.lt.s32.totalorder %s4055_s29, %s3642_s20 }
 0x542   :  { %p3649_p1 = por %p3648_p0, %p3647_p13 }
 0x544   :  { %p3650_p2 = pnand %p3649_p1, %p3643_p12 }
 0x546   :  { %3653 = shalt.err (!%p3650_p2)  }
 0x547   :  { %1052 = dma.hbm_to_vmem [thread:$0]  %s1039_s14, 16, %s1050_s7, [#allocation3 + $0x3b] }
 0x548   :  { %s2025_s30 = sshll.u32 %s4974_s11, 4  ;;  %s3969_s21 = smov [#allocation2 + $0x3d]  }
 0x549   :  { %s1083_s26 = sshll.u32 %s3969_s21, 4  ;;  %s1056_s24 = scalar_lea.hbm %s5058_s2, %s2025_s30  ;;  %s4994_s26 = int_to_ptr.vmem [resolvable:$true] %s1083_s26 }
 0x54a   :  { %s3654_s27 = scalar_lea.hbm %s1056_s24, 16  ;;  %p3657_p4 = scmp.lt.u32.totalorder %s1056_s24, %s5058_s2 }
 0x54b   :  { %p3655_p3 = scmp.ne.s32.totalorder %s1056_s24, %s3654_s27  ;;  %p3658_p5 = scmp.lt.u32.totalorder %s4046_s25, %s3654_s27 }
 0x54c   :  { %p3660_p7 = scmp.lt.u32.totalorder %s3654_s27, %s1056_s24 }
 0x54d   :  { %p3659_p6 = por %p3658_p5, %p3657_p4 }
 0x54f   :  { %p3661_p8 = por %p3660_p7, %p3659_p6 }
 0x551   :  { %p3662_p9 = pnand %p3661_p8, %p3655_p3 }
 0x553   :  { %3665 = shalt.err (!%p3662_p9)  }
 0x554   :  { %s3666_s6 = scalar_lea.vmem %s4979_s13, 16  ;;  %p3671_p11 = scmp.lt.s32.totalorder %s4979_s13, %s4025_s8 }
 0x555   :  { %p3667_p10 = scmp.ne.s32.totalorder %s4979_s13, %s3666_s6  ;;  %p3672_p12 = scmp.lt.s32.totalorder %s4055_s29, %s3666_s6 }
 0x557   :  { %p3673_p13 = por %p3672_p12, %p3671_p11 }
 0x559   :  { %p3674_p0 = pnand %p3673_p13, %p3667_p10 }
 0x55b   :  { %3677 = shalt.err (!%p3674_p0)  }
 0x55c   :  { %1069 = dma.hbm_to_vmem [thread:$0]  %s1056_s24, 16, %s4979_s13, [#allocation3 + $0x3c] }
 0x55d   :  { %s2027_s18 = sshll.u32 %s4976_s1, 4  ;;  %s2028_s0 = sld [smem:[#allocation5 + $0x307]] }
 0x55e   :  { %s1073_s11 = scalar_lea.hbm %s5058_s2, %s2027_s18 }
 0x55f   :  { %s3678_s5 = scalar_lea.hbm %s1073_s11, 16  ;;  %p3681_p2 = scmp.lt.u32.totalorder %s1073_s11, %s5058_s2 }
 0x560   :  { %p3679_p1 = scmp.ne.s32.totalorder %s1073_s11, %s3678_s5  ;;  %p3682_p3 = scmp.lt.u32.totalorder %s4046_s25, %s3678_s5 }
 0x561   :  { %p3684_p5 = scmp.lt.u32.totalorder %s3678_s5, %s1073_s11 }
 0x562   :  { %p3683_p4 = por %p3682_p3, %p3681_p2 }
 0x564   :  { %p3685_p6 = por %p3684_p5, %p3683_p4 }
 0x566   :  { %p3686_p7 = pnand %p3685_p6, %p3679_p1 }
 0x568   :  { %3689 = shalt.err (!%p3686_p7)  }
 0x569   :  { %s3690_s13 = scalar_lea.vmem %s4994_s26, 16  ;;  %p3695_p9 = scmp.lt.s32.totalorder %s4994_s26, %s4025_s8 }
 0x56a   :  { %p3691_p8 = scmp.ne.s32.totalorder %s4994_s26, %s3690_s13  ;;  %p3696_p10 = scmp.lt.s32.totalorder %s4055_s29, %s3690_s13 }
 0x56c   :  { %p3697_p11 = por %p3696_p10, %p3695_p9 }
 0x56e   :  { %p3698_p12 = pnand %p3697_p11, %p3691_p8 }
 0x570   :  { %3701 = shalt.err (!%p3698_p12)  }
 0x571   :  { %1086 = dma.hbm_to_vmem [thread:$0]  %s1073_s11, 16, %s4994_s26, [#allocation3 + $0x3d] }
 0x572   :  { %s3970_s1 = smov [#allocation2 + $0x3e]   ;;  %s2030_s14 = sld [smem:[#allocation5 + $0x387]] }
 0x573   :  { %s1100_s16 = sshll.u32 %s3970_s1, 4  ;;  %s3971_s19 = smov [#allocation2 + $0x3f]   ;;  %s1101_s16 = int_to_ptr.vmem [resolvable:$true] %s1100_s16 }
 0x574   :  { %s1117_s9 = sshll.u32 %s3971_s19, 4  ;;  %s2029_s15 = sshll.u32 %s2028_s0, 4  ;;  %s5023_s9 = int_to_ptr.vmem [resolvable:$true] %s1117_s9 }
 0x575   :  { %s1090_s21 = scalar_lea.hbm %s5058_s2, %s2029_s15 }
 0x576   :  { %s3702_s12 = scalar_lea.hbm %s1090_s21, 16  ;;  %p3705_p0 = scmp.lt.u32.totalorder %s1090_s21, %s5058_s2 }
 0x577   :  { %p3703_p13 = scmp.ne.s32.totalorder %s1090_s21, %s3702_s12  ;;  %p3706_p1 = scmp.lt.u32.totalorder %s4046_s25, %s3702_s12 }
 0x578   :  { %p3708_p3 = scmp.lt.u32.totalorder %s3702_s12, %s1090_s21 }
 0x579   :  { %p3707_p2 = por %p3706_p1, %p3705_p0 }
 0x57b   :  { %p3709_p4 = por %p3708_p3, %p3707_p2 }
 0x57d   :  { %p3710_p5 = pnand %p3709_p4, %p3703_p13 }
 0x57f   :  { %3713 = shalt.err (!%p3710_p5)  }
 0x580   :  { %s3714_s26 = scalar_lea.vmem %s1101_s16, 16  ;;  %p3719_p7 = scmp.lt.s32.totalorder %s1101_s16, %s4025_s8 }
 0x581   :  { %p3715_p6 = scmp.ne.s32.totalorder %s1101_s16, %s3714_s26  ;;  %p3720_p8 = scmp.lt.s32.totalorder %s4055_s29, %s3714_s26 }
 0x583   :  { %p3721_p9 = por %p3720_p8, %p3719_p7 }
 0x585   :  { %p3722_p10 = pnand %p3721_p9, %p3715_p6 }
 0x587   :  { %3725 = shalt.err (!%p3722_p10)  }
 0x588   :  { %1103 = dma.hbm_to_vmem [thread:$0]  %s1090_s21, 16, %s1101_s16, [#allocation3 + $0x3e] }
 0x589   :  { %s2031_s27 = sshll.u32 %s2030_s14, 4 }
 0x58a   :  { %s1107_s6 = scalar_lea.hbm %s5058_s2, %s2031_s27 }
 0x58b   :  { %s3726_s18 = scalar_lea.hbm %s1107_s6, 16  ;;  %p3729_p12 = scmp.lt.u32.totalorder %s1107_s6, %s5058_s2 }
 0x58c   :  { %p3727_p11 = scmp.ne.s32.totalorder %s1107_s6, %s3726_s18  ;;  %p3730_p13 = scmp.lt.u32.totalorder %s4046_s25, %s3726_s18 }
 0x58d   :  { %p3732_p1 = scmp.lt.u32.totalorder %s3726_s18, %s1107_s6 }
 0x58e   :  { %p3731_p0 = por %p3730_p13, %p3729_p12 }
 0x590   :  { %p3733_p2 = por %p3732_p1, %p3731_p0 }
 0x592   :  { %p3734_p3 = pnand %p3733_p2, %p3727_p11 }
 0x594   :  { %3737 = shalt.err (!%p3734_p3)  }
 0x595   :  { %s3738_s7 = scalar_lea.vmem %s5023_s9, 16  ;;  %p3743_p5 = scmp.lt.s32.totalorder %s5023_s9, %s4025_s8 }
 0x596   :  { %p3739_p4 = scmp.ne.s32.totalorder %s5023_s9, %s3738_s7  ;;  %p3744_p6 = scmp.lt.s32.totalorder %s4055_s29, %s3738_s7 }
 0x598   :  { %p3745_p7 = por %p3744_p6, %p3743_p5 }
 0x59a   :  { %p3746_p8 = pnand %p3745_p7, %p3739_p4 }
 0x59c   :  { %3749 = shalt.err (!%p3746_p8)  }
 0x59d   :  { %1120 = dma.hbm_to_vmem [thread:$0]  %s1107_s6, 16, %s5023_s9, [#allocation3 + $0x3f] }
 0x59e   :  { %3776 = dma.done.wait [#allocation3], 16 }
 0x59f   :  { %3777 = vsyncadd [#allocation3], 4294967280 }
 0x5a0   :  { %3778 = dma.done.wait [#allocation3 + $0x1], 16 }
 0x5a1   :  { %3779 = vsyncadd [#allocation3 + $0x1], 4294967280 }
 0x5a2   :  { %3780 = dma.done.wait [#allocation3 + $0x2], 16 }
 0x5a3   :  { %3781 = vsyncadd [#allocation3 + $0x2], 4294967280 }
 0x5a4   :  { %3782 = dma.done.wait [#allocation3 + $0x3], 16 }
 0x5a5   :  { %3783 = vsyncadd [#allocation3 + $0x3], 4294967280 }
 0x5a6   :  { %3784 = dma.done.wait [#allocation3 + $0x4], 16 }
 0x5a7   :  { %3785 = vsyncadd [#allocation3 + $0x4], 4294967280 }
 0x5a8   :  { %3786 = dma.done.wait [#allocation3 + $0x5], 16 }
 0x5a9   :  { %3787 = vsyncadd [#allocation3 + $0x5], 4294967280 }
 0x5aa   :  { %3788 = dma.done.wait [#allocation3 + $0x6], 16 }
 0x5ab   :  { %3789 = vsyncadd [#allocation3 + $0x6], 4294967280 }
 0x5ac   :  { %3790 = dma.done.wait [#allocation3 + $0x7], 16 }
 0x5ad   :  { %3791 = vsyncadd [#allocation3 + $0x7], 4294967280 }
 0x5ae   :  { %3792 = dma.done.wait [#allocation3 + $0x8], 16 }
 0x5af   :  { %3793 = vsyncadd [#allocation3 + $0x8], 4294967280 }
 0x5b0   :  { %3794 = dma.done.wait [#allocation3 + $0x9], 16 }
 0x5b1   :  { %3795 = vsyncadd [#allocation3 + $0x9], 4294967280 }
 0x5b2   :  { %3796 = dma.done.wait [#allocation3 + $0xa], 16 }
 0x5b3   :  { %3797 = vsyncadd [#allocation3 + $0xa], 4294967280 }
 0x5b4   :  { %3798 = dma.done.wait [#allocation3 + $0xb], 16 }
 0x5b5   :  { %3799 = vsyncadd [#allocation3 + $0xb], 4294967280 }
 0x5b6   :  { %3800 = dma.done.wait [#allocation3 + $0xc], 16 }
 0x5b7   :  { %3801 = vsyncadd [#allocation3 + $0xc], 4294967280 }
 0x5b8   :  { %3802 = dma.done.wait [#allocation3 + $0xd], 16 }
 0x5b9   :  { %3803 = vsyncadd [#allocation3 + $0xd], 4294967280 }
 0x5ba   :  { %3804 = dma.done.wait [#allocation3 + $0xe], 16 }
 0x5bb   :  { %3805 = vsyncadd [#allocation3 + $0xe], 4294967280 }
 0x5bc   :  { %3806 = dma.done.wait [#allocation3 + $0xf], 16 }
 0x5bd   :  { %3807 = vsyncadd [#allocation3 + $0xf], 4294967280 }
 0x5be   :  { %3808 = dma.done.wait [#allocation3 + $0x10], 16 }
 0x5bf   :  { %3809 = vsyncadd [#allocation3 + $0x10], 4294967280 }
 0x5c0   :  { %3810 = dma.done.wait [#allocation3 + $0x11], 16 }
 0x5c1   :  { %3811 = vsyncadd [#allocation3 + $0x11], 4294967280 }
 0x5c2   :  { %3812 = dma.done.wait [#allocation3 + $0x12], 16 }
 0x5c3   :  { %3813 = vsyncadd [#allocation3 + $0x12], 4294967280 }
 0x5c4   :  { %3814 = dma.done.wait [#allocation3 + $0x13], 16 }
 0x5c5   :  { %3815 = vsyncadd [#allocation3 + $0x13], 4294967280 }
 0x5c6   :  { %3816 = dma.done.wait [#allocation3 + $0x14], 16 }
 0x5c7   :  { %3817 = vsyncadd [#allocation3 + $0x14], 4294967280 }
 0x5c8   :  { %3818 = dma.done.wait [#allocation3 + $0x15], 16 }
 0x5c9   :  { %3819 = vsyncadd [#allocation3 + $0x15], 4294967280 }
 0x5ca   :  { %3820 = dma.done.wait [#allocation3 + $0x16], 16 }
 0x5cb   :  { %3821 = vsyncadd [#allocation3 + $0x16], 4294967280 }
 0x5cc   :  { %3822 = dma.done.wait [#allocation3 + $0x17], 16 }
 0x5cd   :  { %3823 = vsyncadd [#allocation3 + $0x17], 4294967280 }
 0x5ce   :  { %3824 = dma.done.wait [#allocation3 + $0x18], 16 }
 0x5cf   :  { %3825 = vsyncadd [#allocation3 + $0x18], 4294967280 }
 0x5d0   :  { %3826 = dma.done.wait [#allocation3 + $0x19], 16 }
 0x5d1   :  { %3827 = vsyncadd [#allocation3 + $0x19], 4294967280 }
 0x5d2   :  { %3828 = dma.done.wait [#allocation3 + $0x1a], 16 }
 0x5d3   :  { %3829 = vsyncadd [#allocation3 + $0x1a], 4294967280 }
 0x5d4   :  { %3830 = dma.done.wait [#allocation3 + $0x1b], 16 }
 0x5d5   :  { %3831 = vsyncadd [#allocation3 + $0x1b], 4294967280 }
 0x5d6   :  { %3832 = dma.done.wait [#allocation3 + $0x1c], 16 }
 0x5d7   :  { %3833 = vsyncadd [#allocation3 + $0x1c], 4294967280 }
 0x5d8   :  { %3834 = dma.done.wait [#allocation3 + $0x1d], 16 }
 0x5d9   :  { %3835 = vsyncadd [#allocation3 + $0x1d], 4294967280 }
 0x5da   :  { %3836 = dma.done.wait [#allocation3 + $0x1e], 16 }
 0x5db   :  { %3837 = vsyncadd [#allocation3 + $0x1e], 4294967280 }
 0x5dc   :  { %3838 = dma.done.wait [#allocation3 + $0x1f], 16 }
 0x5dd   :  { %3839 = vsyncadd [#allocation3 + $0x1f], 4294967280 }
 0x5de   :  { %3840 = dma.done.wait [#allocation3 + $0x20], 16 }
 0x5df   :  { %3841 = vsyncadd [#allocation3 + $0x20], 4294967280 }
 0x5e0   :  { %3842 = dma.done.wait [#allocation3 + $0x21], 16 }
 0x5e1   :  { %3843 = vsyncadd [#allocation3 + $0x21], 4294967280 }
 0x5e2   :  { %3844 = dma.done.wait [#allocation3 + $0x22], 16 }
 0x5e3   :  { %3845 = vsyncadd [#allocation3 + $0x22], 4294967280 }
 0x5e4   :  { %3846 = dma.done.wait [#allocation3 + $0x23], 16 }
 0x5e5   :  { %3847 = vsyncadd [#allocation3 + $0x23], 4294967280 }
 0x5e6   :  { %3848 = dma.done.wait [#allocation3 + $0x24], 16 }
 0x5e7   :  { %3849 = vsyncadd [#allocation3 + $0x24], 4294967280 }
 0x5e8   :  { %3850 = dma.done.wait [#allocation3 + $0x25], 16 }
 0x5e9   :  { %3851 = vsyncadd [#allocation3 + $0x25], 4294967280 }
 0x5ea   :  { %3852 = dma.done.wait [#allocation3 + $0x26], 16 }
 0x5eb   :  { %3853 = vsyncadd [#allocation3 + $0x26], 4294967280 }
 0x5ec   :  { %3854 = dma.done.wait [#allocation3 + $0x27], 16 }
 0x5ed   :  { %3855 = vsyncadd [#allocation3 + $0x27], 4294967280 }
 0x5ee   :  { %3856 = dma.done.wait [#allocation3 + $0x28], 16 }
 0x5ef   :  { %3857 = vsyncadd [#allocation3 + $0x28], 4294967280 }
 0x5f0   :  { %3858 = dma.done.wait [#allocation3 + $0x29], 16 }
 0x5f1   :  { %3859 = vsyncadd [#allocation3 + $0x29], 4294967280 }
 0x5f2   :  { %3860 = dma.done.wait [#allocation3 + $0x2a], 16 }
 0x5f3   :  { %3861 = vsyncadd [#allocation3 + $0x2a], 4294967280 }
 0x5f4   :  { %3862 = dma.done.wait [#allocation3 + $0x2b], 16 }
 0x5f5   :  { %3863 = vsyncadd [#allocation3 + $0x2b], 4294967280 }
 0x5f6   :  { %3864 = dma.done.wait [#allocation3 + $0x2c], 16 }
 0x5f7   :  { %3865 = vsyncadd [#allocation3 + $0x2c], 4294967280 }
 0x5f8   :  { %3866 = dma.done.wait [#allocation3 + $0x2d], 16 }
 0x5f9   :  { %3867 = vsyncadd [#allocation3 + $0x2d], 4294967280 }
 0x5fa   :  { %3868 = dma.done.wait [#allocation3 + $0x2e], 16 }
 0x5fb   :  { %3869 = vsyncadd [#allocation3 + $0x2e], 4294967280 }
 0x5fc   :  { %3870 = dma.done.wait [#allocation3 + $0x2f], 16 }
 0x5fd   :  { %3871 = vsyncadd [#allocation3 + $0x2f], 4294967280 }
 0x5fe   :  { %3872 = dma.done.wait [#allocation3 + $0x30], 16 }
 0x5ff   :  { %3873 = vsyncadd [#allocation3 + $0x30], 4294967280 }
 0x600   :  { %3874 = dma.done.wait [#allocation3 + $0x31], 16 }
 0x601   :  { %3875 = vsyncadd [#allocation3 + $0x31], 4294967280 }
 0x602   :  { %3876 = dma.done.wait [#allocation3 + $0x32], 16 }
 0x603   :  { %3877 = vsyncadd [#allocation3 + $0x32], 4294967280 }
 0x604   :  { %3878 = dma.done.wait [#allocation3 + $0x33], 16 }
 0x605   :  { %3879 = vsyncadd [#allocation3 + $0x33], 4294967280 }
 0x606   :  { %3880 = dma.done.wait [#allocation3 + $0x34], 16 }
 0x607   :  { %3881 = vsyncadd [#allocation3 + $0x34], 4294967280 }
 0x608   :  { %3882 = dma.done.wait [#allocation3 + $0x35], 16 }
 0x609   :  { %3883 = vsyncadd [#allocation3 + $0x35], 4294967280 }
 0x60a   :  { %3884 = dma.done.wait [#allocation3 + $0x36], 16 }
 0x60b   :  { %3885 = vsyncadd [#allocation3 + $0x36], 4294967280 }
 0x60c   :  { %3886 = dma.done.wait [#allocation3 + $0x37], 16 }
 0x60d   :  { %3887 = vsyncadd [#allocation3 + $0x37], 4294967280 }
 0x60e   :  { %3888 = dma.done.wait [#allocation3 + $0x38], 16 }
 0x60f   :  { %3889 = vsyncadd [#allocation3 + $0x38], 4294967280 }
 0x610   :  { %3890 = dma.done.wait [#allocation3 + $0x39], 16 }
 0x611   :  { %3891 = vsyncadd [#allocation3 + $0x39], 4294967280 }
 0x612   :  { %3892 = dma.done.wait [#allocation3 + $0x3a], 16 }
 0x613   :  { %3893 = vsyncadd [#allocation3 + $0x3a], 4294967280 }
 0x614   :  { %3894 = dma.done.wait [#allocation3 + $0x3b], 16 }
 0x615   :  { %3895 = vsyncadd [#allocation3 + $0x3b], 4294967280 }
 0x616   :  { %3896 = dma.done.wait [#allocation3 + $0x3c], 16 }
 0x617   :  { %3897 = vsyncadd [#allocation3 + $0x3c], 4294967280 }
 0x618   :  { %3898 = dma.done.wait [#allocation3 + $0x3d], 16 }
 0x619   :  { %3899 = vsyncadd [#allocation3 + $0x3d], 4294967280 }
 0x61a   :  { %3900 = dma.done.wait [#allocation3 + $0x3e], 16 }
 0x61b   :  { %3901 = vsyncadd [#allocation3 + $0x3e], 4294967280 }
 0x61c   :  { %3902 = dma.done.wait [#allocation3 + $0x3f], 16 }
 0x61d   :  { %3903 = vsyncadd [#allocation3 + $0x3f], 4294967280  ;;  %v3972_v0 = vmov 1   ;;  %v3973_v1 = vmov 0   ;;  %vm1307_vm0 = vcmask 64512   ;;  %v1249_v2 = vld [vmem:[#allocation6] sm:$0xff] }
 0x61e   :  { %2172 = vset.pattern.permute.xlu1 %v3972_v0  ;;  %2171 = vset.pattern.permute.xlu0 %v3973_v1  ;;  %v1308_v3 = vsel %vm1307_vm0, %v1249_v2, 0.0  ;;  %v3974_v4 = vmov 2   ;;  %v3975_v5 = vmov 3   ;;  %v3976_v6 = vmov 4   ;;  %v1258_v16 = vld [vmem:[#allocation2 + $0x8] sm:$0xff]  ;;  %v1250_v17 = vld [vmem:[#allocation2] sm:$0xff] }
 0x61f   :  { %1260 = vperm.xlu1 %2172, %v1249_v2   ;;  %1309 = vadd.xlane.f32.xlu0 %v1308_v3  ;;  %v3977_v7 = vmov 5   ;;  %v3978_v8 = vmov 6   ;;  %v3979_v9 = vmov 7   ;;  %v1265_v18 = vld [vmem:[#allocation2 + $0x10] sm:$0xff]  ;;  %v1272_v22 = vld [vmem:[#allocation2 + $0x18] sm:$0xff]  ;;  %v1279_v27 = vld [vmem:[#allocation2 + $0x20] sm:$0xff] }
 0x620   :  { %v1286_v30 = vld [vmem:[#allocation2 + $0x28] sm:$0xff]  ;;  %v1293_v33 = vld [vmem:[#allocation2 + $0x30] sm:$0xff]  ;;  %v1300_v34 = vld [vmem:[#allocation2 + $0x38] sm:$0xff]  ;;  %s3980_s2 = smov [#allocation9]  }
 0x621   :  { %s1321_s8 = sshll.u32 %s3980_s2, 4  ;;  %s1322_s8 = int_to_ptr.vmem [resolvable:$true] %s1321_s8 }
 0x622   :  { %s3750_s25 = scalar_lea.vmem %s1322_s8, 128  ;;  %p3755_p10 = scmp.lt.s32.totalorder %s1322_s8, %s1322_s8 }
 0x623   :  { %2173 = vset.pattern.permute.xlu1 %v3974_v4  ;;  %p3751_p9 = scmp.ne.s32.totalorder %s1322_s8, %s3750_s25  ;;  %p3756_p11 = scmp.lt.s32.totalorder %s3750_s25, %s3750_s25 }
 0x624   :  { %1267 = vperm.xlu1 %2173, %v1249_v2  }
 0x625   :  { %p3757_p12 = por %p3756_p11, %p3755_p10 }
 0x627   :  { %p3758_p13 = pnand %p3757_p12, %p3751_p9 }
 0x628   :  { %2174 = vset.pattern.permute.xlu1 %v3975_v5 }
 0x629   :  { %1274 = vperm.xlu1 %2174, %v1249_v2  }
 0x62d   :  { %2175 = vset.pattern.permute.xlu1 %v3976_v6 }
 0x62e   :  { %1281 = vperm.xlu1 %2175, %v1249_v2  }
 0x632   :  { %2176 = vset.pattern.permute.xlu1 %v3977_v7 }
 0x633   :  { %1288 = vperm.xlu1 %2176, %v1249_v2  }
 0x635   :  { %1253 = vperm.xlu0 %2171, %v1249_v2  }
 0x637   :  { %2177 = vset.pattern.permute.xlu1 %v3978_v8 }
 0x638   :  { %1295 = vperm.xlu1 %2177, %v1249_v2  }
 0x639   :  { %2179 = vset.pattern.permute.xlu0 %v3979_v9 }
 0x63c   :  { %2178 = vset.pattern.permute.xlu1 %v3979_v9 }
 0x63d   :  { %1302 = vperm.xlu1 %2178, %v1249_v2  }
 0x69e   :  { %v1261_v10 = vpop.permute.xlu1 %1260 }
 0x69f   :  { %v1263_v20 = vmul.f32 %v1261_v10, %v1258_v16 }
 0x6a3   :  { %v1268_v11 = vpop.permute.xlu1 %1267 }
 0x6a4   :  { %v1270_v25 = vmul.f32 %v1268_v11, %v1265_v18 }
 0x6a8   :  { %v1275_v12 = vpop.permute.xlu1 %1274 }
 0x6a9   :  { %v1277_v28 = vmul.f32 %v1275_v12, %v1272_v22 }
 0x6ac   :  { %v1310_v14 = vpop.xlane.xlu0 %1309 }
 0x6ad   :  { %v1282_v13 = vpop.permute.xlu1 %1281  ;;  %v1311_v23 = vmax.f32 %v1310_v14, 1.0 }
 0x6ae   :  { %v1284_v31 = vmul.f32 %v1282_v13, %v1279_v27 }
 0x6af   :  { %2180 = vrcp.f32 %v1311_v23 }
 0x6b2   :  { %v1289_v15 = vpop.permute.xlu1 %1288 }
 0x6b3   :  { %v1291_v37 = vmul.f32 %v1289_v15, %v1286_v30 }
 0x6b4   :  { %v1254_v19 = vpop.permute.xlu0 %1253 }
 0x6b5   :  { %v1256_v21 = vmul.f32 %v1254_v19, %v1250_v17 }
 0x6b7   :  { %v1296_v24 = vpop.permute.xlu1 %1295  ;;  %v1264_v26 = vadd.f32 %v1263_v20, %v1256_v21 }
 0x6b8   :  { %v1298_v39 = vmul.f32 %v1296_v24, %v1293_v33 }
 0x6b9   :  { %v1271_v29 = vadd.f32 %v1270_v25, %v1264_v26  ;;  %v2181_v43 = vpop.eup %2180 }
 0x6bb   :  { %v1278_v32 = vadd.f32 %v1277_v28, %v1271_v29 }
 0x6bc   :  { %v1303_v35 = vpop.permute.xlu1 %1302 }
 0x6bd   :  { %v1285_v36 = vadd.f32 %v1284_v31, %v1278_v32  ;;  %v1305_v40 = vmul.f32 %v1303_v35, %v1300_v34 }
 0x6bf   :  { %v1292_v38 = vadd.f32 %v1291_v37, %v1285_v36 }
 0x6c1   :  { %v1299_v41 = vadd.f32 %v1298_v39, %v1292_v38 }
 0x6c3   :  { %v1306_v42 = vadd.f32 %v1305_v40, %v1299_v41 }
 0x6c5   :  { %v1313_v44 = vmul.f32 %v2181_v43, %v1306_v42 }
 0x6c7   :  { %1314 = vst [vmem:[#allocation9] sm:$0xff] %v1313_v44 }
 0x6c8   :  { %3761 = shalt.err (!%p3758_p13)
}
 0x6c9   :  { %s3762_s5 = scalar_lea.hbm %s5059_s3, 128 }
 0x6ca   :  { %p3763_p0 = scmp.ne.s32.totalorder %s5059_s3, %s3762_s5  ;;  %p3766_p1 = scmp.lt.u32.totalorder %s3762_s5, %s5059_s3 }
 0x6cc   :  { %p3768_p2 = pnand %p3766_p1, %p3763_p0 }
 0x6ce   :  { %3771 = shalt.err (!%p3768_p2)
}
 0x6cf   :  { %1324 = dma.vmem_to_hbm [thread:$0]  %s1322_s8, 128, %s5059_s3, [#allocation8]  }
 0x6d0   :  { %3904 = dma.done.wait [#allocation8], 128  }
 0x6d1   :  { %3905 = vsyncadd [#allocation8], 4294967168 }
 0x6d2   :  { %1328 = vsyncpa [#allocation7], 1 }
 0x6d3   :  { %1329 = vsyncpa [#allocation8], 1 }
 0x6d4   :  { %1330 = vsyncmov [#allocation3] }
 0x6d7   :  { %s1331_s19 = vpop.sfrf %1330 }
 0x6d8   :  { %p2032_p3 = scmp.ne.s32.totalorder %s1331_s19, 0 }
 0x6da   :  { %1335 = shalt.err (%p2032_p3)  }
 0x6db   :  { %1337 = vsyncmov [#allocation3 + $0x1] }
 0x6de   :  { %s1338_s9 = vpop.sfrf %1337 }
 0x6df   :  { %p2033_p4 = scmp.ne.s32.totalorder %s1338_s9, 0 }
 0x6e1   :  { %1342 = shalt.err (%p2033_p4)  }
 0x6e2   :  { %1344 = vsyncmov [#allocation3 + $0x2] }
 0x6e5   :  { %s1345_s15 = vpop.sfrf %1344 }
 0x6e6   :  { %p2034_p5 = scmp.ne.s32.totalorder %s1345_s15, 0 }
 0x6e8   :  { %1349 = shalt.err (%p2034_p5)  }
 0x6e9   :  { %1351 = vsyncmov [#allocation3 + $0x3] }
 0x6ec   :  { %s1352_s20 = vpop.sfrf %1351 }
 0x6ed   :  { %p2035_p6 = scmp.ne.s32.totalorder %s1352_s20, 0 }
 0x6ef   :  { %1356 = shalt.err (%p2035_p6)  }
 0x6f0   :  { %1358 = vsyncmov [#allocation3 + $0x4] }
 0x6f3   :  { %s1359_s3 = vpop.sfrf %1358 }
 0x6f4   :  { %p2036_p7 = scmp.ne.s32.totalorder %s1359_s3, 0 }
 0x6f6   :  { %1363 = shalt.err (%p2036_p7)  }
 0x6f7   :  { %1365 = vsyncmov [#allocation3 + $0x5] }
 0x6fa   :  { %s1366_s30 = vpop.sfrf %1365 }
 0x6fb   :  { %p2037_p8 = scmp.ne.s32.totalorder %s1366_s30, 0 }
 0x6fd   :  { %1370 = shalt.err (%p2037_p8)  }
 0x6fe   :  { %1372 = vsyncmov [#allocation3 + $0x6] }
 0x701   :  { %s1373_s21 = vpop.sfrf %1372 }
 0x702   :  { %p2038_p9 = scmp.ne.s32.totalorder %s1373_s21, 0 }
 0x704   :  { %1377 = shalt.err (%p2038_p9)  }
 0x705   :  { %1379 = vsyncmov [#allocation3 + $0x7] }
 0x708   :  { %s1380_s12 = vpop.sfrf %1379 }
 0x709   :  { %p2039_p10 = scmp.ne.s32.totalorder %s1380_s12, 0 }
 0x70b   :  { %1384 = shalt.err (%p2039_p10)  }
 0x70c   :  { %1386 = vsyncmov [#allocation3 + $0x8] }
 0x70f   :  { %s1387_s23 = vpop.sfrf %1386 }
 0x710   :  { %p2040_p11 = scmp.ne.s32.totalorder %s1387_s23, 0 }
 0x712   :  { %1391 = shalt.err (%p2040_p11)  }
 0x713   :  { %1393 = vsyncmov [#allocation3 + $0x9] }
 0x716   :  { %s1394_s24 = vpop.sfrf %1393 }
 0x717   :  { %p2041_p12 = scmp.ne.s32.totalorder %s1394_s24, 0 }
 0x719   :  { %1398 = shalt.err (%p2041_p12)  }
 0x71a   :  { %1400 = vsyncmov [#allocation3 + $0xa] }
 0x71d   :  { %s1401_s26 = vpop.sfrf %1400 }
 0x71e   :  { %p2042_p13 = scmp.ne.s32.totalorder %s1401_s26, 0 }
 0x720   :  { %1405 = shalt.err (%p2042_p13)  }
 0x721   :  { %1407 = vsyncmov [#allocation3 + $0xb] }
 0x724   :  { %s1408_s27 = vpop.sfrf %1407 }
 0x725   :  { %p2043_p0 = scmp.ne.s32.totalorder %s1408_s27, 0 }
 0x727   :  { %1412 = shalt.err (%p2043_p0)  }
 0x728   :  { %1414 = vsyncmov [#allocation3 + $0xc] }
 0x72b   :  { %s1415_s17 = vpop.sfrf %1414 }
 0x72c   :  { %p2044_p1 = scmp.ne.s32.totalorder %s1415_s17, 0 }
 0x72e   :  { %1419 = shalt.err (%p2044_p1)  }
 0x72f   :  { %1421 = vsyncmov [#allocation3 + $0xd] }
 0x732   :  { %s1422_s28 = vpop.sfrf %1421 }
 0x733   :  { %p2045_p2 = scmp.ne.s32.totalorder %s1422_s28, 0 }
 0x735   :  { %1426 = shalt.err (%p2045_p2)  }
 0x736   :  { %1428 = vsyncmov [#allocation3 + $0xe] }
 0x739   :  { %s1429_s6 = vpop.sfrf %1428 }
 0x73a   :  { %p2046_p3 = scmp.ne.s32.totalorder %s1429_s6, 0 }
 0x73c   :  { %1433 = shalt.err (%p2046_p3)  }
 0x73d   :  { %1435 = vsyncmov [#allocation3 + $0xf] }
 0x740   :  { %s1436_s18 = vpop.sfrf %1435 }
 0x741   :  { %p2047_p4 = scmp.ne.s32.totalorder %s1436_s18, 0 }
 0x743   :  { %1440 = shalt.err (%p2047_p4)  }
 0x744   :  { %1442 = vsyncmov [#allocation3 + $0x10] }
 0x747   :  { %s1443_s0 = vpop.sfrf %1442 }
 0x748   :  { %p2048_p5 = scmp.ne.s32.totalorder %s1443_s0, 0 }
 0x74a   :  { %1447 = shalt.err (%p2048_p5)  }
 0x74b   :  { %1449 = vsyncmov [#allocation3 + $0x11] }
 0x74e   :  { %s1450_s4 = vpop.sfrf %1449 }
 0x74f   :  { %p2049_p6 = scmp.ne.s32.totalorder %s1450_s4, 0 }
 0x751   :  { %1454 = shalt.err (%p2049_p6)  }
 0x752   :  { %1456 = vsyncmov [#allocation3 + $0x12] }
 0x755   :  { %s1457_s7 = vpop.sfrf %1456 }
 0x756   :  { %p2050_p7 = scmp.ne.s32.totalorder %s1457_s7, 0 }
 0x758   :  { %1461 = shalt.err (%p2050_p7)  }
 0x759   :  { %1463 = vsyncmov [#allocation3 + $0x13] }
 0x75c   :  { %s1464_s2 = vpop.sfrf %1463 }
 0x75d   :  { %p2051_p8 = scmp.ne.s32.totalorder %s1464_s2, 0 }
 0x75f   :  { %1468 = shalt.err (%p2051_p8)  }
 0x760   :  { %1470 = vsyncmov [#allocation3 + $0x14] }
 0x763   :  { %s1471_s8 = vpop.sfrf %1470 }
 0x764   :  { %p2052_p9 = scmp.ne.s32.totalorder %s1471_s8, 0 }
 0x766   :  { %1475 = shalt.err (%p2052_p9)  }
 0x767   :  { %1477 = vsyncmov [#allocation3 + $0x15] }
 0x76a   :  { %s1478_s25 = vpop.sfrf %1477 }
 0x76b   :  { %p2053_p10 = scmp.ne.s32.totalorder %s1478_s25, 0 }
 0x76d   :  { %1482 = shalt.err (%p2053_p10)  }
 0x76e   :  { %1484 = vsyncmov [#allocation3 + $0x16] }
 0x771   :  { %s1485_s29 = vpop.sfrf %1484 }
 0x772   :  { %p2054_p11 = scmp.ne.s32.totalorder %s1485_s29, 0 }
 0x774   :  { %1489 = shalt.err (%p2054_p11)  }
 0x775   :  { %1491 = vsyncmov [#allocation3 + $0x17] }
 0x778   :  { %s1492_s11 = vpop.sfrf %1491 }
 0x779   :  { %p2055_p12 = scmp.ne.s32.totalorder %s1492_s11, 0 }
 0x77b   :  { %1496 = shalt.err (%p2055_p12)  }
 0x77c   :  { %1498 = vsyncmov [#allocation3 + $0x18] }
 0x77f   :  { %s1499_s5 = vpop.sfrf %1498 }
 0x780   :  { %p2056_p13 = scmp.ne.s32.totalorder %s1499_s5, 0 }
 0x782   :  { %1503 = shalt.err (%p2056_p13)  }
 0x783   :  { %1505 = vsyncmov [#allocation3 + $0x19] }
 0x786   :  { %s1506_s10 = vpop.sfrf %1505 }
 0x787   :  { %p2057_p0 = scmp.ne.s32.totalorder %s1506_s10, 0 }
 0x789   :  { %1510 = shalt.err (%p2057_p0)  }
 0x78a   :  { %1512 = vsyncmov [#allocation3 + $0x1a] }
 0x78d   :  { %s1513_s22 = vpop.sfrf %1512 }
 0x78e   :  { %p2058_p1 = scmp.ne.s32.totalorder %s1513_s22, 0 }
 0x790   :  { %1517 = shalt.err (%p2058_p1)  }
 0x791   :  { %1519 = vsyncmov [#allocation3 + $0x1b] }
 0x794   :  { %s1520_s13 = vpop.sfrf %1519 }
 0x795   :  { %p2059_p2 = scmp.ne.s32.totalorder %s1520_s13, 0 }
 0x797   :  { %1524 = shalt.err (%p2059_p2)  }
 0x798   :  { %1526 = vsyncmov [#allocation3 + $0x1c] }
 0x79b   :  { %s1527_s1 = vpop.sfrf %1526 }
 0x79c   :  { %p2060_p3 = scmp.ne.s32.totalorder %s1527_s1, 0 }
 0x79e   :  { %1531 = shalt.err (%p2060_p3)  }
 0x79f   :  { %1533 = vsyncmov [#allocation3 + $0x1d] }
 0x7a2   :  { %s1534_s16 = vpop.sfrf %1533 }
 0x7a3   :  { %p2061_p4 = scmp.ne.s32.totalorder %s1534_s16, 0 }
 0x7a5   :  { %1538 = shalt.err (%p2061_p4)  }
 0x7a6   :  { %1540 = vsyncmov [#allocation3 + $0x1e] }
 0x7a9   :  { %s1541_s14 = vpop.sfrf %1540 }
 0x7aa   :  { %p2062_p5 = scmp.ne.s32.totalorder %s1541_s14, 0 }
 0x7ac   :  { %1545 = shalt.err (%p2062_p5)  }
 0x7ad   :  { %1547 = vsyncmov [#allocation3 + $0x1f] }
 0x7b0   :  { %s1548_s19 = vpop.sfrf %1547 }
 0x7b1   :  { %p2063_p6 = scmp.ne.s32.totalorder %s1548_s19, 0 }
 0x7b3   :  { %1552 = shalt.err (%p2063_p6)  }
 0x7b4   :  { %1554 = vsyncmov [#allocation3 + $0x20] }
 0x7b7   :  { %s1555_s9 = vpop.sfrf %1554 }
 0x7b8   :  { %p2064_p7 = scmp.ne.s32.totalorder %s1555_s9, 0 }
 0x7ba   :  { %1559 = shalt.err (%p2064_p7)  }
 0x7bb   :  { %1561 = vsyncmov [#allocation3 + $0x21] }
 0x7be   :  { %s1562_s15 = vpop.sfrf %1561 }
 0x7bf   :  { %p2065_p8 = scmp.ne.s32.totalorder %s1562_s15, 0 }
 0x7c1   :  { %1566 = shalt.err (%p2065_p8)  }
 0x7c2   :  { %1568 = vsyncmov [#allocation3 + $0x22] }
 0x7c5   :  { %s1569_s20 = vpop.sfrf %1568 }
 0x7c6   :  { %p2066_p9 = scmp.ne.s32.totalorder %s1569_s20, 0 }
 0x7c8   :  { %1573 = shalt.err (%p2066_p9)  }
 0x7c9   :  { %1575 = vsyncmov [#allocation3 + $0x23] }
 0x7cc   :  { %s1576_s3 = vpop.sfrf %1575 }
 0x7cd   :  { %p2067_p10 = scmp.ne.s32.totalorder %s1576_s3, 0 }
 0x7cf   :  { %1580 = shalt.err (%p2067_p10)  }
 0x7d0   :  { %1582 = vsyncmov [#allocation3 + $0x24] }
 0x7d3   :  { %s1583_s30 = vpop.sfrf %1582 }
 0x7d4   :  { %p2068_p11 = scmp.ne.s32.totalorder %s1583_s30, 0 }
 0x7d6   :  { %1587 = shalt.err (%p2068_p11)  }
 0x7d7   :  { %1589 = vsyncmov [#allocation3 + $0x25] }
 0x7da   :  { %s1590_s21 = vpop.sfrf %1589 }
 0x7db   :  { %p2069_p12 = scmp.ne.s32.totalorder %s1590_s21, 0 }
 0x7dd   :  { %1594 = shalt.err (%p2069_p12)  }
 0x7de   :  { %1596 = vsyncmov [#allocation3 + $0x26] }
 0x7e1   :  { %s1597_s12 = vpop.sfrf %1596 }
 0x7e2   :  { %p2070_p13 = scmp.ne.s32.totalorder %s1597_s12, 0 }
 0x7e4   :  { %1601 = shalt.err (%p2070_p13)  }
 0x7e5   :  { %1603 = vsyncmov [#allocation3 + $0x27] }
 0x7e8   :  { %s1604_s23 = vpop.sfrf %1603 }
 0x7e9   :  { %p2071_p0 = scmp.ne.s32.totalorder %s1604_s23, 0 }
 0x7eb   :  { %1608 = shalt.err (%p2071_p0)  }
 0x7ec   :  { %1610 = vsyncmov [#allocation3 + $0x28] }
 0x7ef   :  { %s1611_s24 = vpop.sfrf %1610 }
 0x7f0   :  { %p2072_p1 = scmp.ne.s32.totalorder %s1611_s24, 0 }
 0x7f2   :  { %1615 = shalt.err (%p2072_p1)  }
 0x7f3   :  { %1617 = vsyncmov [#allocation3 + $0x29] }
 0x7f6   :  { %s1618_s26 = vpop.sfrf %1617 }
 0x7f7   :  { %p2073_p2 = scmp.ne.s32.totalorder %s1618_s26, 0 }
 0x7f9   :  { %1622 = shalt.err (%p2073_p2)  }
 0x7fa   :  { %1624 = vsyncmov [#allocation3 + $0x2a] }
 0x7fd   :  { %s1625_s27 = vpop.sfrf %1624 }
 0x7fe   :  { %p2074_p3 = scmp.ne.s32.totalorder %s1625_s27, 0 }
 0x800   :  { %1629 = shalt.err (%p2074_p3)  }
 0x801   :  { %1631 = vsyncmov [#allocation3 + $0x2b] }
 0x804   :  { %s1632_s17 = vpop.sfrf %1631 }
 0x805   :  { %p2075_p4 = scmp.ne.s32.totalorder %s1632_s17, 0 }
 0x807   :  { %1636 = shalt.err (%p2075_p4)  }
 0x808   :  { %1638 = vsyncmov [#allocation3 + $0x2c] }
 0x80b   :  { %s1639_s28 = vpop.sfrf %1638 }
 0x80c   :  { %p2076_p5 = scmp.ne.s32.totalorder %s1639_s28, 0 }
 0x80e   :  { %1643 = shalt.err (%p2076_p5)  }
 0x80f   :  { %1645 = vsyncmov [#allocation3 + $0x2d] }
 0x812   :  { %s1646_s6 = vpop.sfrf %1645 }
 0x813   :  { %p2077_p6 = scmp.ne.s32.totalorder %s1646_s6, 0 }
 0x815   :  { %1650 = shalt.err (%p2077_p6)  }
 0x816   :  { %1652 = vsyncmov [#allocation3 + $0x2e] }
 0x819   :  { %s1653_s18 = vpop.sfrf %1652 }
 0x81a   :  { %p2078_p7 = scmp.ne.s32.totalorder %s1653_s18, 0 }
 0x81c   :  { %1657 = shalt.err (%p2078_p7)  }
 0x81d   :  { %1659 = vsyncmov [#allocation3 + $0x2f] }
 0x820   :  { %s1660_s0 = vpop.sfrf %1659 }
 0x821   :  { %p2079_p8 = scmp.ne.s32.totalorder %s1660_s0, 0 }
 0x823   :  { %1664 = shalt.err (%p2079_p8)  }
 0x824   :  { %1666 = vsyncmov [#allocation3 + $0x30] }
 0x827   :  { %s1667_s4 = vpop.sfrf %1666 }
 0x828   :  { %p2080_p9 = scmp.ne.s32.totalorder %s1667_s4, 0 }
 0x82a   :  { %1671 = shalt.err (%p2080_p9)  }
 0x82b   :  { %1673 = vsyncmov [#allocation3 + $0x31] }
 0x82e   :  { %s1674_s7 = vpop.sfrf %1673 }
 0x82f   :  { %p2081_p10 = scmp.ne.s32.totalorder %s1674_s7, 0 }
 0x831   :  { %1678 = shalt.err (%p2081_p10)  }
 0x832   :  { %1680 = vsyncmov [#allocation3 + $0x32] }
 0x835   :  { %s1681_s2 = vpop.sfrf %1680 }
 0x836   :  { %p2082_p11 = scmp.ne.s32.totalorder %s1681_s2, 0 }
 0x838   :  { %1685 = shalt.err (%p2082_p11)  }
 0x839   :  { %1687 = vsyncmov [#allocation3 + $0x33] }
 0x83c   :  { %s1688_s8 = vpop.sfrf %1687 }
 0x83d   :  { %p2083_p12 = scmp.ne.s32.totalorder %s1688_s8, 0 }
 0x83f   :  { %1692 = shalt.err (%p2083_p12)  }
 0x840   :  { %1694 = vsyncmov [#allocation3 + $0x34] }
 0x843   :  { %s1695_s25 = vpop.sfrf %1694 }
 0x844   :  { %p2084_p13 = scmp.ne.s32.totalorder %s1695_s25, 0 }
 0x846   :  { %1699 = shalt.err (%p2084_p13)  }
 0x847   :  { %1701 = vsyncmov [#allocation3 + $0x35] }
 0x84a   :  { %s1702_s29 = vpop.sfrf %1701 }
 0x84b   :  { %p2085_p0 = scmp.ne.s32.totalorder %s1702_s29, 0 }
 0x84d   :  { %1706 = shalt.err (%p2085_p0)  }
 0x84e   :  { %1708 = vsyncmov [#allocation3 + $0x36] }
 0x851   :  { %s1709_s11 = vpop.sfrf %1708 }
 0x852   :  { %p2086_p1 = scmp.ne.s32.totalorder %s1709_s11, 0 }
 0x854   :  { %1713 = shalt.err (%p2086_p1)  }
 0x855   :  { %1715 = vsyncmov [#allocation3 + $0x37] }
 0x858   :  { %s1716_s5 = vpop.sfrf %1715 }
 0x859   :  { %p2087_p2 = scmp.ne.s32.totalorder %s1716_s5, 0 }
 0x85b   :  { %1720 = shalt.err (%p2087_p2)  }
 0x85c   :  { %1722 = vsyncmov [#allocation3 + $0x38] }
 0x85f   :  { %s1723_s10 = vpop.sfrf %1722 }
 0x860   :  { %p2088_p3 = scmp.ne.s32.totalorder %s1723_s10, 0 }
 0x862   :  { %1727 = shalt.err (%p2088_p3)  }
 0x863   :  { %1729 = vsyncmov [#allocation3 + $0x39] }
 0x866   :  { %s1730_s22 = vpop.sfrf %1729 }
 0x867   :  { %p2089_p4 = scmp.ne.s32.totalorder %s1730_s22, 0 }
 0x869   :  { %1734 = shalt.err (%p2089_p4)  }
 0x86a   :  { %1736 = vsyncmov [#allocation3 + $0x3a] }
 0x86d   :  { %s1737_s13 = vpop.sfrf %1736 }
 0x86e   :  { %p2090_p5 = scmp.ne.s32.totalorder %s1737_s13, 0 }
 0x870   :  { %1741 = shalt.err (%p2090_p5)  }
 0x871   :  { %1743 = vsyncmov [#allocation3 + $0x3b] }
 0x874   :  { %s1744_s1 = vpop.sfrf %1743 }
 0x875   :  { %p2091_p6 = scmp.ne.s32.totalorder %s1744_s1, 0 }
 0x877   :  { %1748 = shalt.err (%p2091_p6)  }
 0x878   :  { %1750 = vsyncmov [#allocation3 + $0x3c] }
 0x87b   :  { %s1751_s16 = vpop.sfrf %1750 }
 0x87c   :  { %p2092_p7 = scmp.ne.s32.totalorder %s1751_s16, 0 }
 0x87e   :  { %1755 = shalt.err (%p2092_p7)  }
 0x87f   :  { %1757 = vsyncmov [#allocation3 + $0x3d] }
 0x882   :  { %s1758_s14 = vpop.sfrf %1757 }
 0x883   :  { %p2093_p8 = scmp.ne.s32.totalorder %s1758_s14, 0 }
 0x885   :  { %1762 = shalt.err (%p2093_p8)  }
 0x886   :  { %1764 = vsyncmov [#allocation3 + $0x3e] }
 0x889   :  { %s1765_s19 = vpop.sfrf %1764 }
 0x88a   :  { %p2094_p9 = scmp.ne.s32.totalorder %s1765_s19, 0 }
 0x88c   :  { %1769 = shalt.err (%p2094_p9)  }
 0x88d   :  { %1771 = vsyncmov [#allocation3 + $0x3f] }
 0x890   :  { %s1772_s9 = vpop.sfrf %1771 }
 0x891   :  { %p2095_p10 = scmp.ne.s32.totalorder %s1772_s9, 0 }
 0x893   :  { %1776 = shalt.err (%p2095_p10)  }

</bundles_post_ra>
